<compile_context>
chip_gen: v7x
topology: tpu7x:2x2x1
jax: 0.10.0
libtpu: 0.0.40
codegen_flags: <defaults>
</compile_context>

<pallas_src>
import functools

import numpy as np
import jax
import jax.numpy as jnp
from jax.experimental import pallas as pl
from jax.experimental.pallas import tpu as pltpu

EPS = 1e-5
SEARCH_SPACE = ["none", "skip_connect", "nor_conv_3x3", "avg_pool_3x3"]


def _round_up(x, m):
    return (x + m - 1) // m * m


# --------------------------------------------------------------------------
# Kernel 1: tiled MXU matmul, bf16 operands, f32 accumulator, fused ReLU(A)
#           prologue + bias epilogue.  Used for every conv (via im2col) and
#           for the classifier Linear.
# --------------------------------------------------------------------------
def _matmul_kernel(a_ref, b_ref, bias_ref, o_ref, acc_ref, *, relu_a, nk):
    k = pl.program_id(2)

    @pl.when(k == 0)
    def _init():
        acc_ref[...] = jnp.zeros_like(acc_ref)

    a = a_ref[...]
    if relu_a:
        a = jnp.maximum(a, 0)
    acc_ref[...] += jnp.dot(a, b_ref[...], preferred_element_type=jnp.float32)

    @pl.when(k == nk - 1)
    def _finalize():
        o_ref[...] = acc_ref[...] + bias_ref[...]


def pallas_matmul(a, w, bias=None, relu_a=False):
    """(M,K) @ (K,N) + bias with optional fused ReLU on A.  f32 output."""
    M, K = a.shape
    K2, N = w.shape
    assert K == K2
    # Tile sizing: full-K / full-N blocks for the small contractions of this net
    # (avoids padding the im2col activations), K/N tiling only for large dims.
    if K <= 1024:
        K_pad, tk = K, K
    else:
        tk = 512
        K_pad = _round_up(K, tk)
    if N <= 512:
        N_pad, tn = N, N
    else:
        tn = 256
        N_pad = _round_up(N, tn)
    M_pad8 = _round_up(M, 8)
    tm = min(512, M_pad8)
    M_pad = _round_up(M, tm)
    nk = K_pad // tk

    a_p = jnp.pad(a.astype(jnp.bfloat16), ((0, M_pad - M), (0, K_pad - K)))
    w_p = jnp.pad(w.astype(jnp.bfloat16), ((0, K_pad - K), (0, N_pad - N)))
    b_vec = bias if bias is not None else jnp.zeros((N,), jnp.float32)
    b_p = jnp.pad(b_vec.astype(jnp.float32), (0, N_pad - N)).reshape(1, N_pad)

    out = pl.pallas_call(
        functools.partial(_matmul_kernel, relu_a=relu_a, nk=nk),
        out_shape=jax.ShapeDtypeStruct((M_pad, N_pad), jnp.float32),
        grid=(M_pad // tm, N_pad // tn, nk),
        in_specs=[
            pl.BlockSpec((tm, tk), lambda i, j, k: (i, k)),
            pl.BlockSpec((tk, tn), lambda i, j, k: (k, j)),
            pl.BlockSpec((1, tn), lambda i, j, k: (0, j)),
        ],
        out_specs=pl.BlockSpec((tm, tn), lambda i, j, k: (i, j)),
        scratch_shapes=[pltpu.VMEM((tm, tn), jnp.float32)],
        compiler_params=pltpu.CompilerParams(
            dimension_semantics=("parallel", "parallel", "arbitrary")),
    )(a_p, w_p, b_p)
    return out[:M, :N]


# --------------------------------------------------------------------------
# Kernel 2: BatchNorm batch statistics (sum / sumsq), row-tiled accumulation.
# --------------------------------------------------------------------------
def _bn_stats_kernel(x_ref, o_ref):
    @pl.when(pl.program_id(0) == 0)
    def _init():
        o_ref[...] = jnp.zeros_like(o_ref)

    x = x_ref[...]
    s = jnp.sum(x, axis=0, keepdims=True)
    q = jnp.sum(x * x, axis=0, keepdims=True)
    o_ref[...] += jnp.concatenate([s, q], axis=0)


def batchnorm_stats(x2d):
    M, C = x2d.shape
    tm = min(1024, _round_up(M, 8))
    M_pad = _round_up(M, tm)
    x_p = jnp.pad(x2d, ((0, M_pad - M), (0, 0)))  # zero rows do not change the sums
    return pl.pallas_call(
        _bn_stats_kernel,
        out_shape=jax.ShapeDtypeStruct((2, C), jnp.float32),
        grid=(M_pad // tm,),
        in_specs=[pl.BlockSpec((tm, C), lambda i: (i, 0))],
        out_specs=pl.BlockSpec((2, C), lambda i: (0, 0)),
        compiler_params=pltpu.CompilerParams(dimension_semantics=("arbitrary",)),
    )(x_p)


# --------------------------------------------------------------------------
# Kernel 3: BatchNorm normalize + optional ReLU + ISDarts combine epilogue:
#           out = w0 * BN(x) [relu]  +  sum_t w_t * extra_t
# --------------------------------------------------------------------------
def _bn_norm_kernel(scales_ref, stats_ref, x_ref, *rest, relu, eps, inv_count, n_extra):
    extras = rest[:n_extra]
    o_ref = rest[n_extra]
    mean = stats_ref[0:1, :] * inv_count
    var = stats_ref[1:2, :] * inv_count - mean * mean
    rstd = jax.lax.rsqrt(var + eps)
    y = (x_ref[...] - mean) * rstd
    if relu:
        y = jnp.maximum(y, 0.0)
    y = y * scales_ref[0]
    for t in range(n_extra):
        y = y + extras[t][...] * scales_ref[1 + t]
    o_ref[...] = y


def batchnorm_apply(x2d, stats, count, *, relu=False, scale=1.0,
                    extras=(), extra_scales=()):
    """PyTorch BatchNorm2d (training-mode batch stats, gamma=1/beta=0) applied to the
    flattened (rows, C) tensor, with fused ReLU / mask-weighted extra terms."""
    M, C = x2d.shape
    n_extra = len(extras)
    tm = min(1024, _round_up(M, 8))
    M_pad = _round_up(M, tm)
    pad = ((0, M_pad - M), (0, 0))
    x_p = jnp.pad(x2d, pad)
    extras_p = [jnp.pad(e, pad) for e in extras]
    scales = jnp.stack([jnp.asarray(s, jnp.float32)
                        for s in (scale,) + tuple(extra_scales)])
    row_spec = pl.BlockSpec((tm, C), lambda i: (i, 0))
    out = pl.pallas_call(
        functools.partial(_bn_norm_kernel, relu=relu, eps=EPS,
                          inv_count=1.0 / count, n_extra=n_extra),
        out_shape=jax.ShapeDtypeStruct((M_pad, C), jnp.float32),
        grid=(M_pad // tm,),
        in_specs=[pl.BlockSpec(memory_space=pltpu.MemorySpace.SMEM),
                  pl.BlockSpec((2, C), lambda i: (0, 0)),
                  row_spec] + [row_spec] * n_extra,
        out_specs=row_spec,
        compiler_params=pltpu.CompilerParams(dimension_semantics=("parallel",)),
    )(scales, stats, x_p, *extras_p)
    return out[:M]


# --------------------------------------------------------------------------
# Kernel 4: global average pool (AdaptiveAvgPool2d(1) + flatten), tiled over HW.
# --------------------------------------------------------------------------
def _gap_kernel(x_ref, o_ref, *, inv_hw):
    @pl.when(pl.program_id(0) == 0)
    def _init():
        o_ref[...] = jnp.zeros_like(o_ref)
    o_ref[...] += jnp.sum(x_ref[...], axis=1) * inv_hw


def global_avg_pool(x):
    N, H, W, C = x.shape
    HW = H * W
    t = min(512, _round_up(HW, 8))
    HW_pad = _round_up(HW, t)
    x_p = jnp.pad(x.reshape(N, HW, C), ((0, 0), (0, HW_pad - HW), (0, 0)))
    return pl.pallas_call(
        functools.partial(_gap_kernel, inv_hw=1.0 / HW),
        out_shape=jax.ShapeDtypeStruct((N, C), jnp.float32),
        grid=(HW_pad // t,),
        in_specs=[pl.BlockSpec((N, t, C), lambda i: (0, i, 0))],
        out_specs=pl.BlockSpec((N, C), lambda i: (0, 0)),
        compiler_params=pltpu.CompilerParams(dimension_semantics=("arbitrary",)),
    )(x_p)


# ----------------------------- conv / op glue -----------------------------

def conv2d(x, w, b=None, stride=1, padding=0, relu_a=False):
    """im2col (host glue, bf16) + fused Pallas matmul. x: NHWC, w: (kh,kw,Cin,Cout)."""
    # TODO(synk): in-kernel tap accumulation (direct conv with halo DMA) would avoid
    # the kh*kw activation duplication of im2col; kept as host-side glue here.
    N, H, W, Cin = x.shape
    kh, kw, _, Cout = w.shape
    xp = jnp.pad(x.astype(jnp.bfloat16),
                 ((0, 0), (padding, padding), (padding, padding), (0, 0)))
    Ho = (H + 2 * padding - kh) // stride + 1
    Wo = (W + 2 * padding - kw) // stride + 1
    cols = [xp[:, i:i + stride * Ho:stride, j:j + stride * Wo:stride, :]
            for i in range(kh) for j in range(kw)]
    a = jnp.concatenate(cols, axis=-1).reshape(N * Ho * Wo, kh * kw * Cin)
    out = pallas_matmul(a, w.reshape(kh * kw * Cin, Cout), b, relu_a=relu_a)
    return out.reshape(N, Ho, Wo, Cout)


def _bn_nhwc(y, relu=False):
    N, H, W, C = y.shape
    y2 = y.reshape(N * H * W, C)
    stats = batchnorm_stats(y2)
    return batchnorm_apply(y2, stats, N * H * W, relu=relu).reshape(N, H, W, C)


def relu_conv_bn(p, x, stride, padding):
    # xautodl ReLUConvBN: ReLU -> Conv2d(bias = not affine) -> BatchNorm2d
    return _bn_nhwc(conv2d(x, p["w"], p.get("b"), stride, padding, relu_a=True))


def factorized_reduce(p, x):
    """xautodl FactorizedReduce: relu -> two 1x1 stride-2 convs (2nd shifted) -> concat -> BN.
    The two convs are merged into ONE matmul with a block-diagonal weight matrix
    (the shifted path contributes extra K columns); ReLU is fused in the kernel."""
    N, H, W, Cin = x.shape
    xb = x.astype(jnp.bfloat16)
    x1 = xb[:, ::2, ::2, :]
    xs = jnp.pad(xb, ((0, 0), (0, 1), (0, 1), (0, 0)))[:, 1:, 1:, :]
    x2 = xs[:, ::2, ::2, :]
    Ho, Wo = x1.shape[1], x1.shape[2]
    a = jnp.concatenate([x1, x2], axis=-1).reshape(N * Ho * Wo, 2 * Cin)
    w1 = p["w1"].reshape(Cin, -1)
    w2 = p["w2"].reshape(Cin, -1)
    c1, c2 = w1.shape[1], w2.shape[1]
    wm = jnp.zeros((2 * Cin, c1 + c2), jnp.float32)
    wm = wm.at[:Cin, :c1].set(w1).at[Cin:, c1:].set(w2)
    b = jnp.concatenate([p["b1"], p["b2"]]) if "b1" in p else None
    y = pallas_matmul(a, wm, b, relu_a=True)   # relu(shift(x)) == shift(relu(x)) (zero pad)
    return _bn_nhwc(y.reshape(N, Ho, Wo, c1 + c2))


def avg_pool_3x3(x, stride):
    """nn.AvgPool2d(3, stride, padding=1, count_include_pad=False); the denominator is
    computed analytically at trace time instead of pooling a ones tensor."""
    N, H, W, C = x.shape
    Ho = (H - 1) // stride + 1
    Wo = (W - 1) // stride + 1
    xp = jnp.pad(x, ((0, 0), (1, 1), (1, 1), (0, 0)))
    s = None
    for i in range(3):
        for j in range(3):
            tap = xp[:, i:i + stride * Ho:stride, j:j + stride * Wo:stride, :]
            s = tap if s is None else s + tap
    rh = np.arange(Ho) * stride - 1
    rw = np.arange(Wo) * stride - 1
    cnt = ((np.minimum(rh + 3, H) - np.maximum(rh, 0))[:, None] *
           (np.minimum(rw + 3, W) - np.maximum(rw, 0))[None, :])
    inv_cnt = (1.0 / cnt).astype(np.float32)
    return s * jnp.asarray(inv_cnt)[None, :, :, None]


def mixed_edge(edge, h, w_edge):
    """ISDarts MixedOp edge: sum_k mask[k] * op_k(h).
    'none' contributes exactly 0 and is skipped; the skip / avg-pool terms and the
    mask weights are fused into the conv path's BN-normalize kernel epilogue."""
    stride = edge["stride"]
    w_skip, w_conv, w_pool = w_edge[1], w_edge[2], w_edge[3]  # SEARCH_SPACE order
    cp = edge["conv3"]
    y = conv2d(h, cp["w"], cp.get("b"), stride, 1, relu_a=True)
    No, Ho, Wo, Co = y.shape
    M = No * Ho * Wo
    y2 = y.reshape(M, Co)
    stats = batchnorm_stats(y2)
    skip = h if stride == 1 else factorized_reduce(edge["skip_fr"], h)
    pool = avg_pool_3x3(h, stride)
    out = batchnorm_apply(y2, stats, M, scale=w_conv,
                          extras=(skip.reshape(M, Co), pool.reshape(M, Co)),
                          extra_scales=(w_skip, w_pool))
    return out.reshape(No, Ho, Wo, Co)


# ----------------------------- parameter init -----------------------------

class KeyGen:
    def __init__(self, key):
        self.key = key

    def __call__(self):
        self.key, k = jax.random.split(self.key)
        return k


def init_conv(kg, kh, kw, cin, cout, bias):
    p = {"w": jax.random.normal(kg(), (kh, kw, cin, cout), jnp.float32) * 0.1}
    if bias:
        p["b"] = jax.random.normal(kg(), (cout,), jnp.float32) * 0.1
    return p


def init_fr(kg, cin, cout, bias):
    c1, c2 = cout // 2, cout - cout // 2
    p = {"w1": jax.random.normal(kg(), (1, 1, cin, c1), jnp.float32) * 0.1,
         "w2": jax.random.normal(kg(), (1, 1, cin, c2), jnp.float32) * 0.1}
    if bias:
        p["b1"] = jax.random.normal(kg(), (c1,), jnp.float32) * 0.1
        p["b2"] = jax.random.normal(kg(), (c2,), jnp.float32) * 0.1
    return p


def build_model(kg, C, N, steps, multiplier, stem_multiplier, num_classes, affine=False):
    bias = not affine   # xautodl: Conv2d(bias=not affine) in ReLUConvBN / FactorizedReduce
    params = {"stem": init_conv(kg, 3, 3, 3, C * stem_multiplier, bias=False)}
    layer_channels = [C] * N + [C * 2] + [C * 2] * N + [C * 4] + [C * 4] * N
    layer_reductions = [False] * N + [True] + [False] * N + [True] + [False] * N
    C_pp, C_p, reduction_prev = C * stem_multiplier, C * stem_multiplier, False
    cells, edge2index = [], None
    for C_curr, reduction in zip(layer_channels, layer_reductions):
        cell = {"reduction": reduction}
        if reduction_prev:
            cell["pre0"] = {"type": "fr", "params": init_fr(kg, C_pp, C_curr, bias)}
        else:
            cell["pre0"] = {"type": "rcb", "params": init_conv(kg, 1, 1, C_pp, C_curr, bias)}
        cell["pre1"] = {"type": "rcb", "params": init_conv(kg, 1, 1, C_p, C_curr, bias)}
        edges = {}
        for i in range(steps):
            for j in range(2 + i):
                node_str = "{:}<-{:}".format(i, j)
                stride = 2 if (reduction and j < 2) else 1
                edges[node_str] = {
                    "stride": stride,
                    # 'none' and 'avg_pool_3x3' are parameter-free; stride-1 skip is Identity.
                    "conv3": init_conv(kg, 3, 3, C_curr, C_curr, bias),
                    "skip_fr": init_fr(kg, C_curr, C_curr, bias) if stride == 2 else None,
                }
        cell["edges"] = edges
        cells.append(cell)
        if edge2index is None:
            edge2index = {k: idx for idx, k in enumerate(sorted(edges.keys()))}
        C_pp, C_p, reduction_prev = C_p, multiplier * C_curr, reduction
    params["cells"] = cells
    params["classifier"] = {
        "w": jax.random.normal(kg(), (C_p, num_classes), jnp.float32) * 0.1,
        "b": jax.random.normal(kg(), (num_classes,), jnp.float32) * 0.1,
    }
    meta = {"steps": steps, "multiplier": multiplier, "edge2index": edge2index,
            "num_edge": len(edge2index), "C_prev": C_p, "num_classes": num_classes}
    return params, meta


# ----------------------------- forward -----------------------------

def forward(params, meta, normal_masks, reduce_masks, x_nchw):
    x = jnp.transpose(x_nchw.astype(jnp.float32), (0, 2, 3, 1))      # NCHW -> NHWC
    s0 = s1 = _bn_nhwc(conv2d(x, params["stem"]["w"], None, 1, 1))   # stem: conv3x3 + BN
    steps, multiplier = meta["steps"], meta["multiplier"]
    e2i = meta["edge2index"]
    for cell in params["cells"]:
        masks = reduce_masks if cell["reduction"] else normal_masks
        if cell["pre0"]["type"] == "fr":
            h0 = factorized_reduce(cell["pre0"]["params"], s0)
        else:
            h0 = relu_conv_bn(cell["pre0"]["params"], s0, 1, 0)
        h1 = relu_conv_bn(cell["pre1"]["params"], s1, 1, 0)
        states = [h0, h1]
        for i in range(steps):
            clist = []
            for j, h in enumerate(states):
                node_str = "{:}<-{:}".format(i, j)
                clist.append(mixed_edge(cell["edges"][node_str], h, masks[e2i[node_str]]))
            states.append(sum(clist))
        s0, s1 = s1, jnp.concatenate(states[-multiplier:], axis=-1)
    out = _bn_nhwc(s1, relu=True)                                    # lastact: BN -> ReLU
    pooled = global_avg_pool(out)                                    # == out.view(N, -1)
    logits = pallas_matmul(pooled, params["classifier"]["w"], params["classifier"]["b"])
    return pooled, logits

# TODO(synk): genotype()/update_mask()/show_alphas() are host-side Python bookkeeping
# (sorting, pruning masks) with no device compute; not implemented as kernels.
# TODO(synk): BN running-statistics buffer updates (stateful) are not reproduced; only
# the training-mode forward normalization is.


if __name__ == "__main__":
    kg = KeyGen(jax.random.PRNGKey(0))
    # Small config: C=4, N=1, steps=1, multiplier=1, stem_multiplier=3, 10 classes.
    params, meta = build_model(kg, C=4, N=1, steps=1, multiplier=1,
                               stem_multiplier=3, num_classes=10, affine=False)
    normal_masks = jnp.ones((meta["num_edge"], len(SEARCH_SPACE)), jnp.float32)
    reduce_masks = jnp.ones((meta["num_edge"], len(SEARCH_SPACE)), jnp.float32)

    x = jax.random.normal(jax.random.PRNGKey(0), (2, 3, 8, 8), jnp.float32)  # NCHW input

    run = jax.jit(lambda inp: forward(params, meta, normal_masks, reduce_masks, inp))
    pooled, logits = run(x)
    pooled = jax.block_until_ready(pooled)
    logits = jax.block_until_ready(logits)
    assert pooled.shape == (2, meta["C_prev"])
    assert logits.shape == (2, meta["num_classes"])
    print("KERNEL_OK")
</pallas_src>

<mosaic_0001>
module attributes {stable_mosaic.version = 11 : i64} {
  func.func @_matmul_kernel(%arg0: i32, %arg1: i32, %arg2: i32, %arg3: memref<128x27xbf16, #tpu.memory_space<vmem>>, %arg4: memref<27x12xbf16, #tpu.memory_space<vmem>>, %arg5: memref<1x12xf32, #tpu.memory_space<vmem>>, %arg6: memref<128x12xf32, #tpu.memory_space<vmem>>, %arg7: memref<128x12xf32, #tpu.memory_space<vmem>>) attributes {dimension_semantics = [#tpu.dimension_semantics<parallel>, #tpu.dimension_semantics<parallel>, #tpu.dimension_semantics<arbitrary>], iteration_bounds = array<i64: 1, 1, 1>, scalar_prefetch = 0 : i64, scratch_operands = 1 : i64, tpu.core_type = #tpu.core_type<tc>, window_params = [{transform_indices = @transform_0, window_bounds = array<i64: 128, 27>}, {transform_indices = @transform_1, window_bounds = array<i64: 27, 12>}, {transform_indices = @transform_2, window_bounds = array<i64: 1, 12>}, {transform_indices = @transform_3, window_bounds = array<i64: 128, 12>}]} {
    %c0_i32 = arith.constant 0 : i32
    %0 = arith.cmpi eq, %arg2, %c0_i32 : i32
    %1 = arith.extui %0 : i1 to i32
    %c0_i32_0 = arith.constant 0 : i32
    %2 = arith.cmpi ne, %1, %c0_i32_0 : i32
    scf.if %2 {
      %cst_10 = arith.constant 0.000000e+00 : f32
      %12 = vector.broadcast %cst_10 : f32 to vector<128x12xf32>
      %c0_11 = arith.constant 0 : index
      %c0_12 = arith.constant 0 : index
      %13 = vector.load %arg7[%c0_11, %c0_12] : memref<128x12xf32, #tpu.memory_space<vmem>>, vector<128x12xf32>
      tpu.vector_store %arg7[%c0_11, %c0_12], %12 {strides = array<i32>} : memref<128x12xf32, #tpu.memory_space<vmem>>, vector<128x12xf32>,
    } else {
    }
    %c0 = arith.constant 0 : index
    %c0_1 = arith.constant 0 : index
    %3 = vector.load %arg3[%c0, %c0_1] : memref<128x27xbf16, #tpu.memory_space<vmem>>, vector<128x27xbf16>
    %c0_2 = arith.constant 0 : index
    %c0_3 = arith.constant 0 : index
    %4 = vector.load %arg7[%c0_2, %c0_3] : memref<128x12xf32, #tpu.memory_space<vmem>>, vector<128x12xf32>
    %c0_4 = arith.constant 0 : index
    %c0_5 = arith.constant 0 : index
    %5 = vector.load %arg4[%c0_4, %c0_5] : memref<27x12xbf16, #tpu.memory_space<vmem>>, vector<27x12xbf16>
    %cst = arith.constant dense<0.000000e+00> : vector<128x12xf32>
    %6 = tpu.matmul %3, %5, %cst {dimension_numbers = #tpu.dot_dimension_numbers<[1], [0], [0], [1], [0, 0, 1, 1], [], []>} : vector<128x27xbf16>, vector<27x12xbf16>, vector<128x12xf32> -> vector<128x12xf32>
    %7 = arith.addf %4, %6 : vector<128x12xf32>
    %c0_6 = arith.constant 0 : index
    %c0_7 = arith.constant 0 : index
    %8 = vector.load %arg7[%c0_6, %c0_7] : memref<128x12xf32, #tpu.memory_space<vmem>>, vector<128x12xf32>
    tpu.vector_store %arg7[%c0_6, %c0_7], %7 {strides = array<i32>} : memref<128x12xf32, #tpu.memory_space<vmem>>, vector<128x12xf32>,
    %c0_i32_8 = arith.constant 0 : i32
    %9 = arith.cmpi eq, %arg2, %c0_i32_8 : i32
    %10 = arith.extui %9 : i1 to i32
    %c0_i32_9 = arith.constant 0 : i32
    %11 = arith.cmpi ne, %10, %c0_i32_9 : i32
    scf.if %11 {
      %c0_10 = arith.constant 0 : index
      %c0_11 = arith.constant 0 : index
      %12 = vector.load %arg7[%c0_10, %c0_11] : memref<128x12xf32, #tpu.memory_space<vmem>>, vector<128x12xf32>
      %c0_12 = arith.constant 0 : index
      %c0_13 = arith.constant 0 : index
      %13 = vector.load %arg5[%c0_12, %c0_13] : memref<1x12xf32, #tpu.memory_space<vmem>>, vector<1x12xf32>
      %14 = vector.broadcast %13 : vector<1x12xf32> to vector<128x12xf32>
      %15 = arith.addf %12, %14 : vector<128x12xf32>
      %c0_14 = arith.constant 0 : index
      %c0_15 = arith.constant 0 : index
      %16 = vector.load %arg6[%c0_14, %c0_15] : memref<128x12xf32, #tpu.memory_space<vmem>>, vector<128x12xf32>
      tpu.vector_store %arg6[%c0_14, %c0_15], %15 {strides = array<i32>} : memref<128x12xf32, #tpu.memory_space<vmem>>, vector<128x12xf32>,
    } else {
    }
    return
  }
  func.func @transform_0(%arg0: i32, %arg1: i32, %arg2: i32) -> (i32, i32) {
    %c0_i32 = arith.constant 0 : i32
    return %arg0, %arg2 : i32, i32
  }
  func.func @transform_1(%arg0: i32, %arg1: i32, %arg2: i32) -> (i32, i32) {
    %c0_i32 = arith.constant 0 : i32
    return %arg2, %arg1 : i32, i32
  }
  func.func @transform_2(%arg0: i32, %arg1: i32, %arg2: i32) -> (i32, i32) {
    %c0_i32 = arith.constant 0 : i32
    %c0_i32_0 = arith.constant 0 : i32
    return %c0_i32, %arg1 : i32, i32
  }
  func.func @transform_3(%arg0: i32, %arg1: i32, %arg2: i32) -> (i32, i32) {
    %c0_i32 = arith.constant 0 : i32
    return %arg0, %arg1 : i32, i32
  }
}

module attributes {stable_mosaic.version = 11 : i64} {
  func.func @_bn_stats_kernel(%arg0: i32, %arg1: memref<128x12xf32, #tpu.memory_space<vmem>>, %arg2: memref<2x12xf32, #tpu.memory_space<vmem>>) attributes {dimension_semantics = [#tpu.dimension_semantics<arbitrary>], iteration_bounds = array<i64: 1>, scalar_prefetch = 0 : i64, scratch_operands = 0 : i64, tpu.core_type = #tpu.core_type<tc>, window_params = [{transform_indices = @transform_0, window_bounds = array<i64: 128, 12>}, {pipeline_mode = #tpu.pipeline_mode<synchronous>, transform_indices = @transform_1, window_bounds = array<i64: 2, 12>}]} {
    %c0_i32 = arith.constant 0 : i32
    %0 = arith.cmpi eq, %arg0, %c0_i32 : i32
    %1 = arith.extui %0 : i1 to i32
    %c0_i32_0 = arith.constant 0 : i32
    %2 = arith.cmpi ne, %1, %c0_i32_0 : i32
    scf.if %2 {
      %cst_7 = arith.constant 0.000000e+00 : f32
      %13 = vector.broadcast %cst_7 : f32 to vector<2x12xf32>
      %c0_8 = arith.constant 0 : index
      %c0_9 = arith.constant 0 : index
      %14 = vector.load %arg2[%c0_8, %c0_9] : memref<2x12xf32, #tpu.memory_space<vmem>>, vector<2x12xf32>
      tpu.vector_store %arg2[%c0_8, %c0_9], %13 {strides = array<i32>} : memref<2x12xf32, #tpu.memory_space<vmem>>, vector<2x12xf32>,
    } else {
    }
    %c0 = arith.constant 0 : index
    %c0_1 = arith.constant 0 : index
    %3 = vector.load %arg1[%c0, %c0_1] : memref<128x12xf32, #tpu.memory_space<vmem>>, vector<128x12xf32>
    %cst = arith.constant dense<0.000000e+00> : vector<12xf32>
    %4 = vector.multi_reduction <add>, %3, %cst [0] : vector<128x12xf32> to vector<12xf32>
    %5 = vector.shape_cast %4 : vector<12xf32> to vector<1x12xf32>
    %6 = arith.mulf %3, %3 : vector<128x12xf32>
    %cst_2 = arith.constant dense<0.000000e+00> : vector<12xf32>
    %7 = vector.multi_reduction <add>, %6, %cst_2 [0] : vector<128x12xf32> to vector<12xf32>
    %8 = vector.shape_cast %7 : vector<12xf32> to vector<1x12xf32>
    %c0_3 = arith.constant 0 : index
    %c0_4 = arith.constant 0 : index
    %9 = vector.load %arg2[%c0_3, %c0_4] : memref<2x12xf32, #tpu.memory_space<vmem>>, vector<2x12xf32>
    %10 = tpu.concatenate %5, %8 in 0 : vector<1x12xf32>, vector<1x12xf32> -> vector<2x12xf32>
    %11 = arith.addf %9, %10 : vector<2x12xf32>
    %c0_5 = arith.constant 0 : index
    %c0_6 = arith.constant 0 : index
    %12 = vector.load %arg2[%c0_5, %c0_6] : memref<2x12xf32, #tpu.memory_space<vmem>>, vector<2x12xf32>
    tpu.vector_store %arg2[%c0_5, %c0_6], %11 {strides = array<i32>} : memref<2x12xf32, #tpu.memory_space<vmem>>, vector<2x12xf32>,
    return
  }
  func.func @transform_0(%arg0: i32) -> (i32, i32) {
    %c0_i32 = arith.constant 0 : i32
    %c0_i32_0 = arith.constant 0 : i32
    return %arg0, %c0_i32 : i32, i32
  }
  func.func @transform_1(%arg0: i32) -> (i32, i32) {
    %c0_i32 = arith.constant 0 : i32
    %c0_i32_0 = arith.constant 0 : i32
    %c0_i32_1 = arith.constant 0 : i32
    return %c0_i32, %c0_i32_0 : i32, i32
  }
}

module attributes {stable_mosaic.version = 11 : i64} {
  func.func @_bn_norm_kernel(%arg0: i32, %arg1: memref<1xf32, #tpu.memory_space<smem>>, %arg2: memref<2x12xf32, #tpu.memory_space<vmem>>, %arg3: memref<128x12xf32, #tpu.memory_space<vmem>>, %arg4: memref<128x12xf32, #tpu.memory_space<vmem>>) attributes {dimension_semantics = [#tpu.dimension_semantics<parallel>], iteration_bounds = array<i64: 1>, scalar_prefetch = 0 : i64, scratch_operands = 0 : i64, tpu.core_type = #tpu.core_type<tc>, window_params = [{transform_indices = @transform_0, window_bounds = array<i64: 1>}, {pipeline_mode = #tpu.pipeline_mode<synchronous>, transform_indices = @transform_1, window_bounds = array<i64: 2, 12>}, {transform_indices = @transform_2, window_bounds = array<i64: 128, 12>}, {transform_indices = @transform_3, window_bounds = array<i64: 128, 12>}]} {
    %c0 = arith.constant 0 : index
    %c0_0 = arith.constant 0 : index
    %0 = vector.load %arg2[%c0, %c0_0] : memref<2x12xf32, #tpu.memory_space<vmem>>, vector<1x12xf32>
    %cst = arith.constant 7.812500e-03 : f32
    %1 = vector.broadcast %cst : f32 to vector<1x12xf32>
    %2 = arith.mulf %0, %1 : vector<1x12xf32>
    %c1 = arith.constant 1 : index
    %c0_1 = arith.constant 0 : index
    %3 = vector.load %arg2[%c1, %c0_1] : memref<2x12xf32, #tpu.memory_space<vmem>>, vector<1x12xf32>
    %cst_2 = arith.constant 7.812500e-03 : f32
    %4 = vector.broadcast %cst_2 : f32 to vector<1x12xf32>
    %5 = arith.mulf %3, %4 : vector<1x12xf32>
    %6 = arith.mulf %2, %2 : vector<1x12xf32>
    %7 = arith.subf %5, %6 : vector<1x12xf32>
    %cst_3 = arith.constant 9.99999974E-6 : f32
    %8 = vector.broadcast %cst_3 : f32 to vector<1x12xf32>
    %9 = arith.addf %7, %8 : vector<1x12xf32>
    %10 = math.rsqrt %9 : vector<1x12xf32>
    %c0_4 = arith.constant 0 : index
    %c0_5 = arith.constant 0 : index
    %11 = vector.load %arg3[%c0_4, %c0_5] : memref<128x12xf32, #tpu.memory_space<vmem>>, vector<128x12xf32>
    %12 = vector.broadcast %2 : vector<1x12xf32> to vector<128x12xf32>
    %13 = arith.subf %11, %12 : vector<128x12xf32>
    %14 = vector.broadcast %10 : vector<1x12xf32> to vector<128x12xf32>
    %15 = arith.mulf %13, %14 : vector<128x12xf32>
    %c0_6 = arith.constant 0 : index
    %16 = memref.load %arg1[%c0_6] : memref<1xf32, #tpu.memory_space<smem>>
    %17 = vector.broadcast %16 : f32 to vector<128x12xf32>
    %18 = arith.mulf %15, %17 : vector<128x12xf32>
    %c0_7 = arith.constant 0 : index
    %c0_8 = arith.constant 0 : index
    %19 = vector.load %arg4[%c0_7, %c0_8] : memref<128x12xf32, #tpu.memory_space<vmem>>, vector<128x12xf32>
    tpu.vector_store %arg4[%c0_7, %c0_8], %18 {strides = array<i32>} : memref<128x12xf32, #tpu.memory_space<vmem>>, vector<128x12xf32>,
    return
  }
  func.func @transform_0(%arg0: i32) -> i32 {
    %c0_i32 = arith.constant 0 : i32
    %c0_i32_0 = arith.constant 0 : i32
    return %c0_i32 : i32
  }
  func.func @transform_1(%arg0: i32) -> (i32, i32) {
    %c0_i32 = arith.constant 0 : i32
    %c0_i32_0 = arith.constant 0 : i32
    %c0_i32_1 = arith.constant 0 : i32
    return %c0_i32, %c0_i32_0 : i32, i32
  }
  func.func @transform_2(%arg0: i32) -> (i32, i32) {
    %c0_i32 = arith.constant 0 : i32
    %c0_i32_0 = arith.constant 0 : i32
    return %arg0, %c0_i32 : i32, i32
  }
  func.func @transform_3(%arg0: i32) -> (i32, i32) {
    %c0_i32 = arith.constant 0 : i32
    %c0_i32_0 = arith.constant 0 : i32
    return %arg0, %c0_i32 : i32, i32
  }
}

module attributes {stable_mosaic.version = 11 : i64} {
  func.func @_matmul_kernel(%arg0: i32, %arg1: i32, %arg2: i32, %arg3: memref<128x12xbf16, #tpu.memory_space<vmem>>, %arg4: memref<12x4xbf16, #tpu.memory_space<vmem>>, %arg5: memref<1x4xf32, #tpu.memory_space<vmem>>, %arg6: memref<128x4xf32, #tpu.memory_space<vmem>>, %arg7: memref<128x4xf32, #tpu.memory_space<vmem>>) attributes {dimension_semantics = [#tpu.dimension_semantics<parallel>, #tpu.dimension_semantics<parallel>, #tpu.dimension_semantics<arbitrary>], iteration_bounds = array<i64: 1, 1, 1>, scalar_prefetch = 0 : i64, scratch_operands = 1 : i64, tpu.core_type = #tpu.core_type<tc>, window_params = [{transform_indices = @transform_0, window_bounds = array<i64: 128, 12>}, {transform_indices = @transform_1, window_bounds = array<i64: 12, 4>}, {transform_indices = @transform_2, window_bounds = array<i64: 1, 4>}, {transform_indices = @transform_3, window_bounds = array<i64: 128, 4>}]} {
    %c0_i32 = arith.constant 0 : i32
    %0 = arith.cmpi eq, %arg2, %c0_i32 : i32
    %1 = arith.extui %0 : i1 to i32
    %c0_i32_0 = arith.constant 0 : i32
    %2 = arith.cmpi ne, %1, %c0_i32_0 : i32
    scf.if %2 {
      %cst_11 = arith.constant 0.000000e+00 : f32
      %14 = vector.broadcast %cst_11 : f32 to vector<128x4xf32>
      %c0_12 = arith.constant 0 : index
      %c0_13 = arith.constant 0 : index
      %15 = vector.load %arg7[%c0_12, %c0_13] : memref<128x4xf32, #tpu.memory_space<vmem>>, vector<128x4xf32>
      tpu.vector_store %arg7[%c0_12, %c0_13], %14 {strides = array<i32>} : memref<128x4xf32, #tpu.memory_space<vmem>>, vector<128x4xf32>,
    } else {
    }
    %c0 = arith.constant 0 : index
    %c0_1 = arith.constant 0 : index
    %3 = vector.load %arg3[%c0, %c0_1] : memref<128x12xbf16, #tpu.memory_space<vmem>>, vector<128x12xbf16>
    %cst = arith.constant 0.000000e+00 : bf16
    %4 = vector.broadcast %cst : bf16 to vector<128x12xbf16>
    %5 = arith.maximumf %3, %4 : vector<128x12xbf16>
    %c0_2 = arith.constant 0 : index
    %c0_3 = arith.constant 0 : index
    %6 = vector.load %arg7[%c0_2, %c0_3] : memref<128x4xf32, #tpu.memory_space<vmem>>, vector<128x4xf32>
    %c0_4 = arith.constant 0 : index
    %c0_5 = arith.constant 0 : index
    %7 = vector.load %arg4[%c0_4, %c0_5] : memref<12x4xbf16, #tpu.memory_space<vmem>>, vector<12x4xbf16>
    %cst_6 = arith.constant dense<0.000000e+00> : vector<128x4xf32>
    %8 = tpu.matmul %5, %7, %cst_6 {dimension_numbers = #tpu.dot_dimension_numbers<[1], [0], [0], [1], [0, 0, 1, 1], [], []>} : vector<128x12xbf16>, vector<12x4xbf16>, vector<128x4xf32> -> vector<128x4xf32>
    %9 = arith.addf %6, %8 : vector<128x4xf32>
    %c0_7 = arith.constant 0 : index
    %c0_8 = arith.constant 0 : index
    %10 = vector.load %arg7[%c0_7, %c0_8] : memref<128x4xf32, #tpu.memory_space<vmem>>, vector<128x4xf32>
    tpu.vector_store %arg7[%c0_7, %c0_8], %9 {strides = array<i32>} : memref<128x4xf32, #tpu.memory_space<vmem>>, vector<128x4xf32>,
    %c0_i32_9 = arith.constant 0 : i32
    %11 = arith.cmpi eq, %arg2, %c0_i32_9 : i32
    %12 = arith.extui %11 : i1 to i32
    %c0_i32_10 = arith.constant 0 : i32
    %13 = arith.cmpi ne, %12, %c0_i32_10 : i32
    scf.if %13 {
      %c0_11 = arith.constant 0 : index
      %c0_12 = arith.constant 0 : index
      %14 = vector.load %arg7[%c0_11, %c0_12] : memref<128x4xf32, #tpu.memory_space<vmem>>, vector<128x4xf32>
      %c0_13 = arith.constant 0 : index
      %c0_14 = arith.constant 0 : index
      %15 = vector.load %arg5[%c0_13, %c0_14] : memref<1x4xf32, #tpu.memory_space<vmem>>, vector<1x4xf32>
      %16 = vector.broadcast %15 : vector<1x4xf32> to vector<128x4xf32>
      %17 = arith.addf %14, %16 : vector<128x4xf32>
      %c0_15 = arith.constant 0 : index
      %c0_16 = arith.constant 0 : index
      %18 = vector.load %arg6[%c0_15, %c0_16] : memref<128x4xf32, #tpu.memory_space<vmem>>, vector<128x4xf32>
      tpu.vector_store %arg6[%c0_15, %c0_16], %17 {strides = array<i32>} : memref<128x4xf32, #tpu.memory_space<vmem>>, vector<128x4xf32>,
    } else {
    }
    return
  }
  func.func @transform_0(%arg0: i32, %arg1: i32, %arg2: i32) -> (i32, i32) {
    %c0_i32 = arith.constant 0 : i32
    return %arg0, %arg2 : i32, i32
  }
  func.func @transform_1(%arg0: i32, %arg1: i32, %arg2: i32) -> (i32, i32) {
    %c0_i32 = arith.constant 0 : i32
    return %arg2, %arg1 : i32, i32
  }
  func.func @transform_2(%arg0: i32, %arg1: i32, %arg2: i32) -> (i32, i32) {
    %c0_i32 = arith.constant 0 : i32
    %c0_i32_0 = arith.constant 0 : i32
    return %c0_i32, %arg1 : i32, i32
  }
  func.func @transform_3(%arg0: i32, %arg1: i32, %arg2: i32) -> (i32, i32) {
    %c0_i32 = arith.constant 0 : i32
    return %arg0, %arg1 : i32, i32
  }
}

module attributes {stable_mosaic.version = 11 : i64} {
  func.func @_bn_stats_kernel(%arg0: i32, %arg1: memref<128x4xf32, #tpu.memory_space<vmem>>, %arg2: memref<2x4xf32, #tpu.memory_space<vmem>>) attributes {dimension_semantics = [#tpu.dimension_semantics<arbitrary>], iteration_bounds = array<i64: 1>, scalar_prefetch = 0 : i64, scratch_operands = 0 : i64, tpu.core_type = #tpu.core_type<tc>, window_params = [{transform_indices = @transform_0, window_bounds = array<i64: 128, 4>}, {pipeline_mode = #tpu.pipeline_mode<synchronous>, transform_indices = @transform_1, window_bounds = array<i64: 2, 4>}]} {
    %c0_i32 = arith.constant 0 : i32
    %0 = arith.cmpi eq, %arg0, %c0_i32 : i32
    %1 = arith.extui %0 : i1 to i32
    %c0_i32_0 = arith.constant 0 : i32
    %2 = arith.cmpi ne, %1, %c0_i32_0 : i32
    scf.if %2 {
      %cst_7 = arith.constant 0.000000e+00 : f32
      %13 = vector.broadcast %cst_7 : f32 to vector<2x4xf32>
      %c0_8 = arith.constant 0 : index
      %c0_9 = arith.constant 0 : index
      %14 = vector.load %arg2[%c0_8, %c0_9] : memref<2x4xf32, #tpu.memory_space<vmem>>, vector<2x4xf32>
      tpu.vector_store %arg2[%c0_8, %c0_9], %13 {strides = array<i32>} : memref<2x4xf32, #tpu.memory_space<vmem>>, vector<2x4xf32>,
    } else {
    }
    %c0 = arith.constant 0 : index
    %c0_1 = arith.constant 0 : index
    %3 = vector.load %arg1[%c0, %c0_1] : memref<128x4xf32, #tpu.memory_space<vmem>>, vector<128x4xf32>
    %cst = arith.constant dense<0.000000e+00> : vector<4xf32>
    %4 = vector.multi_reduction <add>, %3, %cst [0] : vector<128x4xf32> to vector<4xf32>
    %5 = vector.shape_cast %4 : vector<4xf32> to vector<1x4xf32>
    %6 = arith.mulf %3, %3 : vector<128x4xf32>
    %cst_2 = arith.constant dense<0.000000e+00> : vector<4xf32>
    %7 = vector.multi_reduction <add>, %6, %cst_2 [0] : vector<128x4xf32> to vector<4xf32>
    %8 = vector.shape_cast %7 : vector<4xf32> to vector<1x4xf32>
    %c0_3 = arith.constant 0 : index
    %c0_4 = arith.constant 0 : index
    %9 = vector.load %arg2[%c0_3, %c0_4] : memref<2x4xf32, #tpu.memory_space<vmem>>, vector<2x4xf32>
    %10 = tpu.concatenate %5, %8 in 0 : vector<1x4xf32>, vector<1x4xf32> -> vector<2x4xf32>
    %11 = arith.addf %9, %10 : vector<2x4xf32>
    %c0_5 = arith.constant 0 : index
    %c0_6 = arith.constant 0 : index
    %12 = vector.load %arg2[%c0_5, %c0_6] : memref<2x4xf32, #tpu.memory_space<vmem>>, vector<2x4xf32>
    tpu.vector_store %arg2[%c0_5, %c0_6], %11 {strides = array<i32>} : memref<2x4xf32, #tpu.memory_space<vmem>>, vector<2x4xf32>,
    return
  }
  func.func @transform_0(%arg0: i32) -> (i32, i32) {
    %c0_i32 = arith.constant 0 : i32
    %c0_i32_0 = arith.constant 0 : i32
    return %arg0, %c0_i32 : i32, i32
  }
  func.func @transform_1(%arg0: i32) -> (i32, i32) {
    %c0_i32 = arith.constant 0 : i32
    %c0_i32_0 = arith.constant 0 : i32
    %c0_i32_1 = arith.constant 0 : i32
    return %c0_i32, %c0_i32_0 : i32, i32
  }
}

module attributes {stable_mosaic.version = 11 : i64} {
  func.func @_bn_norm_kernel(%arg0: i32, %arg1: memref<1xf32, #tpu.memory_space<smem>>, %arg2: memref<2x4xf32, #tpu.memory_space<vmem>>, %arg3: memref<128x4xf32, #tpu.memory_space<vmem>>, %arg4: memref<128x4xf32, #tpu.memory_space<vmem>>) attributes {dimension_semantics = [#tpu.dimension_semantics<parallel>], iteration_bounds = array<i64: 1>, scalar_prefetch = 0 : i64, scratch_operands = 0 : i64, tpu.core_type = #tpu.core_type<tc>, window_params = [{transform_indices = @transform_0, window_bounds = array<i64: 1>}, {pipeline_mode = #tpu.pipeline_mode<synchronous>, transform_indices = @transform_1, window_bounds = array<i64: 2, 4>}, {transform_indices = @transform_2, window_bounds = array<i64: 128, 4>}, {transform_indices = @transform_3, window_bounds = array<i64: 128, 4>}]} {
    %c0 = arith.constant 0 : index
    %c0_0 = arith.constant 0 : index
    %0 = vector.load %arg2[%c0, %c0_0] : memref<2x4xf32, #tpu.memory_space<vmem>>, vector<1x4xf32>
    %cst = arith.constant 7.812500e-03 : f32
    %1 = vector.broadcast %cst : f32 to vector<1x4xf32>
    %2 = arith.mulf %0, %1 : vector<1x4xf32>
    %c1 = arith.constant 1 : index
    %c0_1 = arith.constant 0 : index
    %3 = vector.load %arg2[%c1, %c0_1] : memref<2x4xf32, #tpu.memory_space<vmem>>, vector<1x4xf32>
    %cst_2 = arith.constant 7.812500e-03 : f32
    %4 = vector.broadcast %cst_2 : f32 to vector<1x4xf32>
    %5 = arith.mulf %3, %4 : vector<1x4xf32>
    %6 = arith.mulf %2, %2 : vector<1x4xf32>
    %7 = arith.subf %5, %6 : vector<1x4xf32>
    %cst_3 = arith.constant 9.99999974E-6 : f32
    %8 = vector.broadcast %cst_3 : f32 to vector<1x4xf32>
    %9 = arith.addf %7, %8 : vector<1x4xf32>
    %10 = math.rsqrt %9 : vector<1x4xf32>
    %c0_4 = arith.constant 0 : index
    %c0_5 = arith.constant 0 : index
    %11 = vector.load %arg3[%c0_4, %c0_5] : memref<128x4xf32, #tpu.memory_space<vmem>>, vector<128x4xf32>
    %12 = vector.broadcast %2 : vector<1x4xf32> to vector<128x4xf32>
    %13 = arith.subf %11, %12 : vector<128x4xf32>
    %14 = vector.broadcast %10 : vector<1x4xf32> to vector<128x4xf32>
    %15 = arith.mulf %13, %14 : vector<128x4xf32>
    %c0_6 = arith.constant 0 : index
    %16 = memref.load %arg1[%c0_6] : memref<1xf32, #tpu.memory_space<smem>>
    %17 = vector.broadcast %16 : f32 to vector<128x4xf32>
    %18 = arith.mulf %15, %17 : vector<128x4xf32>
    %c0_7 = arith.constant 0 : index
    %c0_8 = arith.constant 0 : index
    %19 = vector.load %arg4[%c0_7, %c0_8] : memref<128x4xf32, #tpu.memory_space<vmem>>, vector<128x4xf32>
    tpu.vector_store %arg4[%c0_7, %c0_8], %18 {strides = array<i32>} : memref<128x4xf32, #tpu.memory_space<vmem>>, vector<128x4xf32>,
    return
  }
  func.func @transform_0(%arg0: i32) -> i32 {
    %c0_i32 = arith.constant 0 : i32
    %c0_i32_0 = arith.constant 0 : i32
    return %c0_i32 : i32
  }
  func.func @transform_1(%arg0: i32) -> (i32, i32) {
    %c0_i32 = arith.constant 0 : i32
    %c0_i32_0 = arith.constant 0 : i32
    %c0_i32_1 = arith.constant 0 : i32
    return %c0_i32, %c0_i32_0 : i32, i32
  }
  func.func @transform_2(%arg0: i32) -> (i32, i32) {
    %c0_i32 = arith.constant 0 : i32
    %c0_i32_0 = arith.constant 0 : i32
    return %arg0, %c0_i32 : i32, i32
  }
  func.func @transform_3(%arg0: i32) -> (i32, i32) {
    %c0_i32 = arith.constant 0 : i32
    %c0_i32_0 = arith.constant 0 : i32
    return %arg0, %c0_i32 : i32, i32
  }
}

module attributes {stable_mosaic.version = 11 : i64} {
  func.func @_matmul_kernel(%arg0: i32, %arg1: i32, %arg2: i32, %arg3: memref<128x36xbf16, #tpu.memory_space<vmem>>, %arg4: memref<36x4xbf16, #tpu.memory_space<vmem>>, %arg5: memref<1x4xf32, #tpu.memory_space<vmem>>, %arg6: memref<128x4xf32, #tpu.memory_space<vmem>>, %arg7: memref<128x4xf32, #tpu.memory_space<vmem>>) attributes {dimension_semantics = [#tpu.dimension_semantics<parallel>, #tpu.dimension_semantics<parallel>, #tpu.dimension_semantics<arbitrary>], iteration_bounds = array<i64: 1, 1, 1>, scalar_prefetch = 0 : i64, scratch_operands = 1 : i64, tpu.core_type = #tpu.core_type<tc>, window_params = [{transform_indices = @transform_0, window_bounds = array<i64: 128, 36>}, {transform_indices = @transform_1, window_bounds = array<i64: 36, 4>}, {transform_indices = @transform_2, window_bounds = array<i64: 1, 4>}, {transform_indices = @transform_3, window_bounds = array<i64: 128, 4>}]} {
    %c0_i32 = arith.constant 0 : i32
    %0 = arith.cmpi eq, %arg2, %c0_i32 : i32
    %1 = arith.extui %0 : i1 to i32
    %c0_i32_0 = arith.constant 0 : i32
    %2 = arith.cmpi ne, %1, %c0_i32_0 : i32
    scf.if %2 {
      %cst_11 = arith.constant 0.000000e+00 : f32
      %14 = vector.broadcast %cst_11 : f32 to vector<128x4xf32>
      %c0_12 = arith.constant 0 : index
      %c0_13 = arith.constant 0 : index
      %15 = vector.load %arg7[%c0_12, %c0_13] : memref<128x4xf32, #tpu.memory_space<vmem>>, vector<128x4xf32>
      tpu.vector_store %arg7[%c0_12, %c0_13], %14 {strides = array<i32>} : memref<128x4xf32, #tpu.memory_space<vmem>>, vector<128x4xf32>,
    } else {
    }
    %c0 = arith.constant 0 : index
    %c0_1 = arith.constant 0 : index
    %3 = vector.load %arg3[%c0, %c0_1] : memref<128x36xbf16, #tpu.memory_space<vmem>>, vector<128x36xbf16>
    %cst = arith.constant 0.000000e+00 : bf16
    %4 = vector.broadcast %cst : bf16 to vector<128x36xbf16>
    %5 = arith.maximumf %3, %4 : vector<128x36xbf16>
    %c0_2 = arith.constant 0 : index
    %c0_3 = arith.constant 0 : index
    %6 = vector.load %arg7[%c0_2, %c0_3] : memref<128x4xf32, #tpu.memory_space<vmem>>, vector<128x4xf32>
    %c0_4 = arith.constant 0 : index
    %c0_5 = arith.constant 0 : index
    %7 = vector.load %arg4[%c0_4, %c0_5] : memref<36x4xbf16, #tpu.memory_space<vmem>>, vector<36x4xbf16>
    %cst_6 = arith.constant dense<0.000000e+00> : vector<128x4xf32>
    %8 = tpu.matmul %5, %7, %cst_6 {dimension_numbers = #tpu.dot_dimension_numbers<[1], [0], [0], [1], [0, 0, 1, 1], [], []>} : vector<128x36xbf16>, vector<36x4xbf16>, vector<128x4xf32> -> vector<128x4xf32>
    %9 = arith.addf %6, %8 : vector<128x4xf32>
    %c0_7 = arith.constant 0 : index
    %c0_8 = arith.constant 0 : index
    %10 = vector.load %arg7[%c0_7, %c0_8] : memref<128x4xf32, #tpu.memory_space<vmem>>, vector<128x4xf32>
    tpu.vector_store %arg7[%c0_7, %c0_8], %9 {strides = array<i32>} : memref<128x4xf32, #tpu.memory_space<vmem>>, vector<128x4xf32>,
    %c0_i32_9 = arith.constant 0 : i32
    %11 = arith.cmpi eq, %arg2, %c0_i32_9 : i32
    %12 = arith.extui %11 : i1 to i32
    %c0_i32_10 = arith.constant 0 : i32
    %13 = arith.cmpi ne, %12, %c0_i32_10 : i32
    scf.if %13 {
      %c0_11 = arith.constant 0 : index
      %c0_12 = arith.constant 0 : index
      %14 = vector.load %arg7[%c0_11, %c0_12] : memref<128x4xf32, #tpu.memory_space<vmem>>, vector<128x4xf32>
      %c0_13 = arith.constant 0 : index
      %c0_14 = arith.constant 0 : index
      %15 = vector.load %arg5[%c0_13, %c0_14] : memref<1x4xf32, #tpu.memory_space<vmem>>, vector<1x4xf32>
      %16 = vector.broadcast %15 : vector<1x4xf32> to vector<128x4xf32>
      %17 = arith.addf %14, %16 : vector<128x4xf32>
      %c0_15 = arith.constant 0 : index
      %c0_16 = arith.constant 0 : index
      %18 = vector.load %arg6[%c0_15, %c0_16] : memref<128x4xf32, #tpu.memory_space<vmem>>, vector<128x4xf32>
      tpu.vector_store %arg6[%c0_15, %c0_16], %17 {strides = array<i32>} : memref<128x4xf32, #tpu.memory_space<vmem>>, vector<128x4xf32>,
    } else {
    }
    return
  }
  func.func @transform_0(%arg0: i32, %arg1: i32, %arg2: i32) -> (i32, i32) {
    %c0_i32 = arith.constant 0 : i32
    return %arg0, %arg2 : i32, i32
  }
  func.func @transform_1(%arg0: i32, %arg1: i32, %arg2: i32) -> (i32, i32) {
    %c0_i32 = arith.constant 0 : i32
    return %arg2, %arg1 : i32, i32
  }
  func.func @transform_2(%arg0: i32, %arg1: i32, %arg2: i32) -> (i32, i32) {
    %c0_i32 = arith.constant 0 : i32
    %c0_i32_0 = arith.constant 0 : i32
    return %c0_i32, %arg1 : i32, i32
  }
  func.func @transform_3(%arg0: i32, %arg1: i32, %arg2: i32) -> (i32, i32) {
    %c0_i32 = arith.constant 0 : i32
    return %arg0, %arg1 : i32, i32
  }
}

module attributes {stable_mosaic.version = 11 : i64} {
  func.func @_bn_norm_kernel(%arg0: i32, %arg1: memref<3xf32, #tpu.memory_space<smem>>, %arg2: memref<2x4xf32, #tpu.memory_space<vmem>>, %arg3: memref<128x4xf32, #tpu.memory_space<vmem>>, %arg4: memref<128x4xf32, #tpu.memory_space<vmem>>, %arg5: memref<128x4xf32, #tpu.memory_space<vmem>>, %arg6: memref<128x4xf32, #tpu.memory_space<vmem>>) attributes {dimension_semantics = [#tpu.dimension_semantics<parallel>], iteration_bounds = array<i64: 1>, scalar_prefetch = 0 : i64, scratch_operands = 0 : i64, tpu.core_type = #tpu.core_type<tc>, window_params = [{transform_indices = @transform_0, window_bounds = array<i64: 3>}, {pipeline_mode = #tpu.pipeline_mode<synchronous>, transform_indices = @transform_1, window_bounds = array<i64: 2, 4>}, {transform_indices = @transform_2, window_bounds = array<i64: 128, 4>}, {transform_indices = @transform_3, window_bounds = array<i64: 128, 4>}, {transform_indices = @transform_4, window_bounds = array<i64: 128, 4>}, {transform_indices = @transform_5, window_bounds = array<i64: 128, 4>}]} {
    %c0 = arith.constant 0 : index
    %c0_0 = arith.constant 0 : index
    %0 = vector.load %arg2[%c0, %c0_0] : memref<2x4xf32, #tpu.memory_space<vmem>>, vector<1x4xf32>
    %cst = arith.constant 7.812500e-03 : f32
    %1 = vector.broadcast %cst : f32 to vector<1x4xf32>
    %2 = arith.mulf %0, %1 : vector<1x4xf32>
    %c1 = arith.constant 1 : index
    %c0_1 = arith.constant 0 : index
    %3 = vector.load %arg2[%c1, %c0_1] : memref<2x4xf32, #tpu.memory_space<vmem>>, vector<1x4xf32>
    %cst_2 = arith.constant 7.812500e-03 : f32
    %4 = vector.broadcast %cst_2 : f32 to vector<1x4xf32>
    %5 = arith.mulf %3, %4 : vector<1x4xf32>
    %6 = arith.mulf %2, %2 : vector<1x4xf32>
    %7 = arith.subf %5, %6 : vector<1x4xf32>
    %cst_3 = arith.constant 9.99999974E-6 : f32
    %8 = vector.broadcast %cst_3 : f32 to vector<1x4xf32>
    %9 = arith.addf %7, %8 : vector<1x4xf32>
    %10 = math.rsqrt %9 : vector<1x4xf32>
    %c0_4 = arith.constant 0 : index
    %c0_5 = arith.constant 0 : index
    %11 = vector.load %arg3[%c0_4, %c0_5] : memref<128x4xf32, #tpu.memory_space<vmem>>, vector<128x4xf32>
    %12 = vector.broadcast %2 : vector<1x4xf32> to vector<128x4xf32>
    %13 = arith.subf %11, %12 : vector<128x4xf32>
    %14 = vector.broadcast %10 : vector<1x4xf32> to vector<128x4xf32>
    %15 = arith.mulf %13, %14 : vector<128x4xf32>
    %c0_6 = arith.constant 0 : index
    %16 = memref.load %arg1[%c0_6] : memref<3xf32, #tpu.memory_space<smem>>
    %17 = vector.broadcast %16 : f32 to vector<128x4xf32>
    %18 = arith.mulf %15, %17 : vector<128x4xf32>
    %c0_7 = arith.constant 0 : index
    %c0_8 = arith.constant 0 : index
    %19 = vector.load %arg4[%c0_7, %c0_8] : memref<128x4xf32, #tpu.memory_space<vmem>>, vector<128x4xf32>
    %c1_9 = arith.constant 1 : index
    %20 = memref.load %arg1[%c1_9] : memref<3xf32, #tpu.memory_space<smem>>
    %21 = vector.broadcast %20 : f32 to vector<128x4xf32>
    %22 = arith.mulf %19, %21 : vector<128x4xf32>
    %23 = arith.addf %18, %22 : vector<128x4xf32>
    %c0_10 = arith.constant 0 : index
    %c0_11 = arith.constant 0 : index
    %24 = vector.load %arg5[%c0_10, %c0_11] : memref<128x4xf32, #tpu.memory_space<vmem>>, vector<128x4xf32>
    %c2 = arith.constant 2 : index
    %25 = memref.load %arg1[%c2] : memref<3xf32, #tpu.memory_space<smem>>
    %26 = vector.broadcast %25 : f32 to vector<128x4xf32>
    %27 = arith.mulf %24, %26 : vector<128x4xf32>
    %28 = arith.addf %23, %27 : vector<128x4xf32>
    %c0_12 = arith.constant 0 : index
    %c0_13 = arith.constant 0 : index
    %29 = vector.load %arg6[%c0_12, %c0_13] : memref<128x4xf32, #tpu.memory_space<vmem>>, vector<128x4xf32>
    tpu.vector_store %arg6[%c0_12, %c0_13], %28 {strides = array<i32>} : memref<128x4xf32, #tpu.memory_space<vmem>>, vector<128x4xf32>,
    return
  }
  func.func @transform_0(%arg0: i32) -> i32 {
    %c0_i32 = arith.constant 0 : i32
    %c0_i32_0 = arith.constant 0 : i32
    return %c0_i32 : i32
  }
  func.func @transform_1(%arg0: i32) -> (i32, i32) {
    %c0_i32 = arith.constant 0 : i32
    %c0_i32_0 = arith.constant 0 : i32
    %c0_i32_1 = arith.constant 0 : i32
    return %c0_i32, %c0_i32_0 : i32, i32
  }
  func.func @transform_2(%arg0: i32) -> (i32, i32) {
    %c0_i32 = arith.constant 0 : i32
    %c0_i32_0 = arith.constant 0 : i32
    return %arg0, %c0_i32 : i32, i32
  }
  func.func @transform_3(%arg0: i32) -> (i32, i32) {
    %c0_i32 = arith.constant 0 : i32
    %c0_i32_0 = arith.constant 0 : i32
    return %arg0, %c0_i32 : i32, i32
  }
  func.func @transform_4(%arg0: i32) -> (i32, i32) {
    %c0_i32 = arith.constant 0 : i32
    %c0_i32_0 = arith.constant 0 : i32
    return %arg0, %c0_i32 : i32, i32
  }
  func.func @transform_5(%arg0: i32) -> (i32, i32) {
    %c0_i32 = arith.constant 0 : i32
    %c0_i32_0 = arith.constant 0 : i32
    return %arg0, %c0_i32 : i32, i32
  }
}

module attributes {stable_mosaic.version = 11 : i64} {
  func.func @_bn_stats_kernel(%arg0: i32, %arg1: memref<128x8xf32, #tpu.memory_space<vmem>>, %arg2: memref<2x8xf32, #tpu.memory_space<vmem>>) attributes {dimension_semantics = [#tpu.dimension_semantics<arbitrary>], iteration_bounds = array<i64: 1>, scalar_prefetch = 0 : i64, scratch_operands = 0 : i64, tpu.core_type = #tpu.core_type<tc>, window_params = [{transform_indices = @transform_0, window_bounds = array<i64: 128, 8>}, {pipeline_mode = #tpu.pipeline_mode<synchronous>, transform_indices = @transform_1, window_bounds = array<i64: 2, 8>}]} {
    %c0_i32 = arith.constant 0 : i32
    %0 = arith.cmpi eq, %arg0, %c0_i32 : i32
    %1 = arith.extui %0 : i1 to i32
    %c0_i32_0 = arith.constant 0 : i32
    %2 = arith.cmpi ne, %1, %c0_i32_0 : i32
    scf.if %2 {
      %cst_7 = arith.constant 0.000000e+00 : f32
      %13 = vector.broadcast %cst_7 : f32 to vector<2x8xf32>
      %c0_8 = arith.constant 0 : index
      %c0_9 = arith.constant 0 : index
      %14 = vector.load %arg2[%c0_8, %c0_9] : memref<2x8xf32, #tpu.memory_space<vmem>>, vector<2x8xf32>
      tpu.vector_store %arg2[%c0_8, %c0_9], %13 {strides = array<i32>} : memref<2x8xf32, #tpu.memory_space<vmem>>, vector<2x8xf32>,
    } else {
    }
    %c0 = arith.constant 0 : index
    %c0_1 = arith.constant 0 : index
    %3 = vector.load %arg1[%c0, %c0_1] : memref<128x8xf32, #tpu.memory_space<vmem>>, vector<128x8xf32>
    %cst = arith.constant dense<0.000000e+00> : vector<8xf32>
    %4 = vector.multi_reduction <add>, %3, %cst [0] : vector<128x8xf32> to vector<8xf32>
    %5 = vector.shape_cast %4 : vector<8xf32> to vector<1x8xf32>
    %6 = arith.mulf %3, %3 : vector<128x8xf32>
    %cst_2 = arith.constant dense<0.000000e+00> : vector<8xf32>
    %7 = vector.multi_reduction <add>, %6, %cst_2 [0] : vector<128x8xf32> to vector<8xf32>
    %8 = vector.shape_cast %7 : vector<8xf32> to vector<1x8xf32>
    %c0_3 = arith.constant 0 : index
    %c0_4 = arith.constant 0 : index
    %9 = vector.load %arg2[%c0_3, %c0_4] : memref<2x8xf32, #tpu.memory_space<vmem>>, vector<2x8xf32>
    %10 = tpu.concatenate %5, %8 in 0 : vector<1x8xf32>, vector<1x8xf32> -> vector<2x8xf32>
    %11 = arith.addf %9, %10 : vector<2x8xf32>
    %c0_5 = arith.constant 0 : index
    %c0_6 = arith.constant 0 : index
    %12 = vector.load %arg2[%c0_5, %c0_6] : memref<2x8xf32, #tpu.memory_space<vmem>>, vector<2x8xf32>
    tpu.vector_store %arg2[%c0_5, %c0_6], %11 {strides = array<i32>} : memref<2x8xf32, #tpu.memory_space<vmem>>, vector<2x8xf32>,
    return
  }
  func.func @transform_0(%arg0: i32) -> (i32, i32) {
    %c0_i32 = arith.constant 0 : i32
    %c0_i32_0 = arith.constant 0 : i32
    return %arg0, %c0_i32 : i32, i32
  }
  func.func @transform_1(%arg0: i32) -> (i32, i32) {
    %c0_i32 = arith.constant 0 : i32
    %c0_i32_0 = arith.constant 0 : i32
    %c0_i32_1 = arith.constant 0 : i32
    return %c0_i32, %c0_i32_0 : i32, i32
  }
}

module attributes {stable_mosaic.version = 11 : i64} {
  func.func @_matmul_kernel(%arg0: i32, %arg1: i32, %arg2: i32, %arg3: memref<128x4xbf16, #tpu.memory_space<vmem>>, %arg4: memref<4x8xbf16, #tpu.memory_space<vmem>>, %arg5: memref<1x8xf32, #tpu.memory_space<vmem>>, %arg6: memref<128x8xf32, #tpu.memory_space<vmem>>, %arg7: memref<128x8xf32, #tpu.memory_space<vmem>>) attributes {dimension_semantics = [#tpu.dimension_semantics<parallel>, #tpu.dimension_semantics<parallel>, #tpu.dimension_semantics<arbitrary>], iteration_bounds = array<i64: 1, 1, 1>, scalar_prefetch = 0 : i64, scratch_operands = 1 : i64, tpu.core_type = #tpu.core_type<tc>, window_params = [{transform_indices = @transform_0, window_bounds = array<i64: 128, 4>}, {transform_indices = @transform_1, window_bounds = array<i64: 4, 8>}, {transform_indices = @transform_2, window_bounds = array<i64: 1, 8>}, {transform_indices = @transform_3, window_bounds = array<i64: 128, 8>}]} {
    %c0_i32 = arith.constant 0 : i32
    %0 = arith.cmpi eq, %arg2, %c0_i32 : i32
    %1 = arith.extui %0 : i1 to i32
    %c0_i32_0 = arith.constant 0 : i32
    %2 = arith.cmpi ne, %1, %c0_i32_0 : i32
    scf.if %2 {
      %cst_11 = arith.constant 0.000000e+00 : f32
      %14 = vector.broadcast %cst_11 : f32 to vector<128x8xf32>
      %c0_12 = arith.constant 0 : index
      %c0_13 = arith.constant 0 : index
      %15 = vector.load %arg7[%c0_12, %c0_13] : memref<128x8xf32, #tpu.memory_space<vmem>>, vector<128x8xf32>
      tpu.vector_store %arg7[%c0_12, %c0_13], %14 {strides = array<i32>} : memref<128x8xf32, #tpu.memory_space<vmem>>, vector<128x8xf32>,
    } else {
    }
    %c0 = arith.constant 0 : index
    %c0_1 = arith.constant 0 : index
    %3 = vector.load %arg3[%c0, %c0_1] : memref<128x4xbf16, #tpu.memory_space<vmem>>, vector<128x4xbf16>
    %cst = arith.constant 0.000000e+00 : bf16
    %4 = vector.broadcast %cst : bf16 to vector<128x4xbf16>
    %5 = arith.maximumf %3, %4 : vector<128x4xbf16>
    %c0_2 = arith.constant 0 : index
    %c0_3 = arith.constant 0 : index
    %6 = vector.load %arg7[%c0_2, %c0_3] : memref<128x8xf32, #tpu.memory_space<vmem>>, vector<128x8xf32>
    %c0_4 = arith.constant 0 : index
    %c0_5 = arith.constant 0 : index
    %7 = vector.load %arg4[%c0_4, %c0_5] : memref<4x8xbf16, #tpu.memory_space<vmem>>, vector<4x8xbf16>
    %cst_6 = arith.constant dense<0.000000e+00> : vector<128x8xf32>
    %8 = tpu.matmul %5, %7, %cst_6 {dimension_numbers = #tpu.dot_dimension_numbers<[1], [0], [0], [1], [0, 0, 1, 1], [], []>} : vector<128x4xbf16>, vector<4x8xbf16>, vector<128x8xf32> -> vector<128x8xf32>
    %9 = arith.addf %6, %8 : vector<128x8xf32>
    %c0_7 = arith.constant 0 : index
    %c0_8 = arith.constant 0 : index
    %10 = vector.load %arg7[%c0_7, %c0_8] : memref<128x8xf32, #tpu.memory_space<vmem>>, vector<128x8xf32>
    tpu.vector_store %arg7[%c0_7, %c0_8], %9 {strides = array<i32>} : memref<128x8xf32, #tpu.memory_space<vmem>>, vector<128x8xf32>,
    %c0_i32_9 = arith.constant 0 : i32
    %11 = arith.cmpi eq, %arg2, %c0_i32_9 : i32
    %12 = arith.extui %11 : i1 to i32
    %c0_i32_10 = arith.constant 0 : i32
    %13 = arith.cmpi ne, %12, %c0_i32_10 : i32
    scf.if %13 {
      %c0_11 = arith.constant 0 : index
      %c0_12 = arith.constant 0 : index
      %14 = vector.load %arg7[%c0_11, %c0_12] : memref<128x8xf32, #tpu.memory_space<vmem>>, vector<128x8xf32>
      %c0_13 = arith.constant 0 : index
      %c0_14 = arith.constant 0 : index
      %15 = vector.load %arg5[%c0_13, %c0_14] : memref<1x8xf32, #tpu.memory_space<vmem>>, vector<1x8xf32>
      %16 = vector.broadcast %15 : vector<1x8xf32> to vector<128x8xf32>
      %17 = arith.addf %14, %16 : vector<128x8xf32>
      %c0_15 = arith.constant 0 : index
      %c0_16 = arith.constant 0 : index
      %18 = vector.load %arg6[%c0_15, %c0_16] : memref<128x8xf32, #tpu.memory_space<vmem>>, vector<128x8xf32>
      tpu.vector_store %arg6[%c0_15, %c0_16], %17 {strides = array<i32>} : memref<128x8xf32, #tpu.memory_space<vmem>>, vector<128x8xf32>,
    } else {
    }
    return
  }
  func.func @transform_0(%arg0: i32, %arg1: i32, %arg2: i32) -> (i32, i32) {
    %c0_i32 = arith.constant 0 : i32
    return %arg0, %arg2 : i32, i32
  }
  func.func @transform_1(%arg0: i32, %arg1: i32, %arg2: i32) -> (i32, i32) {
    %c0_i32 = arith.constant 0 : i32
    return %arg2, %arg1 : i32, i32
  }
  func.func @transform_2(%arg0: i32, %arg1: i32, %arg2: i32) -> (i32, i32) {
    %c0_i32 = arith.constant 0 : i32
    %c0_i32_0 = arith.constant 0 : i32
    return %c0_i32, %arg1 : i32, i32
  }
  func.func @transform_3(%arg0: i32, %arg1: i32, %arg2: i32) -> (i32, i32) {
    %c0_i32 = arith.constant 0 : i32
    return %arg0, %arg1 : i32, i32
  }
}

module attributes {stable_mosaic.version = 11 : i64} {
  func.func @_bn_norm_kernel(%arg0: i32, %arg1: memref<1xf32, #tpu.memory_space<smem>>, %arg2: memref<2x8xf32, #tpu.memory_space<vmem>>, %arg3: memref<128x8xf32, #tpu.memory_space<vmem>>, %arg4: memref<128x8xf32, #tpu.memory_space<vmem>>) attributes {dimension_semantics = [#tpu.dimension_semantics<parallel>], iteration_bounds = array<i64: 1>, scalar_prefetch = 0 : i64, scratch_operands = 0 : i64, tpu.core_type = #tpu.core_type<tc>, window_params = [{transform_indices = @transform_0, window_bounds = array<i64: 1>}, {pipeline_mode = #tpu.pipeline_mode<synchronous>, transform_indices = @transform_1, window_bounds = array<i64: 2, 8>}, {transform_indices = @transform_2, window_bounds = array<i64: 128, 8>}, {transform_indices = @transform_3, window_bounds = array<i64: 128, 8>}]} {
    %c0 = arith.constant 0 : index
    %c0_0 = arith.constant 0 : index
    %0 = vector.load %arg2[%c0, %c0_0] : memref<2x8xf32, #tpu.memory_space<vmem>>, vector<1x8xf32>
    %cst = arith.constant 7.812500e-03 : f32
    %1 = vector.broadcast %cst : f32 to vector<1x8xf32>
    %2 = arith.mulf %0, %1 : vector<1x8xf32>
    %c1 = arith.constant 1 : index
    %c0_1 = arith.constant 0 : index
    %3 = vector.load %arg2[%c1, %c0_1] : memref<2x8xf32, #tpu.memory_space<vmem>>, vector<1x8xf32>
    %cst_2 = arith.constant 7.812500e-03 : f32
    %4 = vector.broadcast %cst_2 : f32 to vector<1x8xf32>
    %5 = arith.mulf %3, %4 : vector<1x8xf32>
    %6 = arith.mulf %2, %2 : vector<1x8xf32>
    %7 = arith.subf %5, %6 : vector<1x8xf32>
    %cst_3 = arith.constant 9.99999974E-6 : f32
    %8 = vector.broadcast %cst_3 : f32 to vector<1x8xf32>
    %9 = arith.addf %7, %8 : vector<1x8xf32>
    %10 = math.rsqrt %9 : vector<1x8xf32>
    %c0_4 = arith.constant 0 : index
    %c0_5 = arith.constant 0 : index
    %11 = vector.load %arg3[%c0_4, %c0_5] : memref<128x8xf32, #tpu.memory_space<vmem>>, vector<128x8xf32>
    %12 = vector.broadcast %2 : vector<1x8xf32> to vector<128x8xf32>
    %13 = arith.subf %11, %12 : vector<128x8xf32>
    %14 = vector.broadcast %10 : vector<1x8xf32> to vector<128x8xf32>
    %15 = arith.mulf %13, %14 : vector<128x8xf32>
    %c0_6 = arith.constant 0 : index
    %16 = memref.load %arg1[%c0_6] : memref<1xf32, #tpu.memory_space<smem>>
    %17 = vector.broadcast %16 : f32 to vector<128x8xf32>
    %18 = arith.mulf %15, %17 : vector<128x8xf32>
    %c0_7 = arith.constant 0 : index
    %c0_8 = arith.constant 0 : index
    %19 = vector.load %arg4[%c0_7, %c0_8] : memref<128x8xf32, #tpu.memory_space<vmem>>, vector<128x8xf32>
    tpu.vector_store %arg4[%c0_7, %c0_8], %18 {strides = array<i32>} : memref<128x8xf32, #tpu.memory_space<vmem>>, vector<128x8xf32>,
    return
  }
  func.func @transform_0(%arg0: i32) -> i32 {
    %c0_i32 = arith.constant 0 : i32
    %c0_i32_0 = arith.constant 0 : i32
    return %c0_i32 : i32
  }
  func.func @transform_1(%arg0: i32) -> (i32, i32) {
    %c0_i32 = arith.constant 0 : i32
    %c0_i32_0 = arith.constant 0 : i32
    %c0_i32_1 = arith.constant 0 : i32
    return %c0_i32, %c0_i32_0 : i32, i32
  }
  func.func @transform_2(%arg0: i32) -> (i32, i32) {
    %c0_i32 = arith.constant 0 : i32
    %c0_i32_0 = arith.constant 0 : i32
    return %arg0, %c0_i32 : i32, i32
  }
  func.func @transform_3(%arg0: i32) -> (i32, i32) {
    %c0_i32 = arith.constant 0 : i32
    %c0_i32_0 = arith.constant 0 : i32
    return %arg0, %c0_i32 : i32, i32
  }
}

module attributes {stable_mosaic.version = 11 : i64} {
  func.func @_matmul_kernel(%arg0: i32, %arg1: i32, %arg2: i32, %arg3: memref<32x16xbf16, #tpu.memory_space<vmem>>, %arg4: memref<16x8xbf16, #tpu.memory_space<vmem>>, %arg5: memref<1x8xf32, #tpu.memory_space<vmem>>, %arg6: memref<32x8xf32, #tpu.memory_space<vmem>>, %arg7: memref<32x8xf32, #tpu.memory_space<vmem>>) attributes {dimension_semantics = [#tpu.dimension_semantics<parallel>, #tpu.dimension_semantics<parallel>, #tpu.dimension_semantics<arbitrary>], iteration_bounds = array<i64: 1, 1, 1>, scalar_prefetch = 0 : i64, scratch_operands = 1 : i64, tpu.core_type = #tpu.core_type<tc>, window_params = [{transform_indices = @transform_0, window_bounds = array<i64: 32, 16>}, {transform_indices = @transform_1, window_bounds = array<i64: 16, 8>}, {transform_indices = @transform_2, window_bounds = array<i64: 1, 8>}, {transform_indices = @transform_3, window_bounds = array<i64: 32, 8>}]} {
    %c0_i32 = arith.constant 0 : i32
    %0 = arith.cmpi eq, %arg2, %c0_i32 : i32
    %1 = arith.extui %0 : i1 to i32
    %c0_i32_0 = arith.constant 0 : i32
    %2 = arith.cmpi ne, %1, %c0_i32_0 : i32
    scf.if %2 {
      %cst_11 = arith.constant 0.000000e+00 : f32
      %14 = vector.broadcast %cst_11 : f32 to vector<32x8xf32>
      %c0_12 = arith.constant 0 : index
      %c0_13 = arith.constant 0 : index
      %15 = vector.load %arg7[%c0_12, %c0_13] : memref<32x8xf32, #tpu.memory_space<vmem>>, vector<32x8xf32>
      tpu.vector_store %arg7[%c0_12, %c0_13], %14 {strides = array<i32>} : memref<32x8xf32, #tpu.memory_space<vmem>>, vector<32x8xf32>,
    } else {
    }
    %c0 = arith.constant 0 : index
    %c0_1 = arith.constant 0 : index
    %3 = vector.load %arg3[%c0, %c0_1] : memref<32x16xbf16, #tpu.memory_space<vmem>>, vector<32x16xbf16>
    %cst = arith.constant 0.000000e+00 : bf16
    %4 = vector.broadcast %cst : bf16 to vector<32x16xbf16>
    %5 = arith.maximumf %3, %4 : vector<32x16xbf16>
    %c0_2 = arith.constant 0 : index
    %c0_3 = arith.constant 0 : index
    %6 = vector.load %arg7[%c0_2, %c0_3] : memref<32x8xf32, #tpu.memory_space<vmem>>, vector<32x8xf32>
    %c0_4 = arith.constant 0 : index
    %c0_5 = arith.constant 0 : index
    %7 = vector.load %arg4[%c0_4, %c0_5] : memref<16x8xbf16, #tpu.memory_space<vmem>>, vector<16x8xbf16>
    %cst_6 = arith.constant dense<0.000000e+00> : vector<32x8xf32>
    %8 = tpu.matmul %5, %7, %cst_6 {dimension_numbers = #tpu.dot_dimension_numbers<[1], [0], [0], [1], [0, 0, 1, 1], [], []>} : vector<32x16xbf16>, vector<16x8xbf16>, vector<32x8xf32> -> vector<32x8xf32>
    %9 = arith.addf %6, %8 : vector<32x8xf32>
    %c0_7 = arith.constant 0 : index
    %c0_8 = arith.constant 0 : index
    %10 = vector.load %arg7[%c0_7, %c0_8] : memref<32x8xf32, #tpu.memory_space<vmem>>, vector<32x8xf32>
    tpu.vector_store %arg7[%c0_7, %c0_8], %9 {strides = array<i32>} : memref<32x8xf32, #tpu.memory_space<vmem>>, vector<32x8xf32>,
    %c0_i32_9 = arith.constant 0 : i32
    %11 = arith.cmpi eq, %arg2, %c0_i32_9 : i32
    %12 = arith.extui %11 : i1 to i32
    %c0_i32_10 = arith.constant 0 : i32
    %13 = arith.cmpi ne, %12, %c0_i32_10 : i32
    scf.if %13 {
      %c0_11 = arith.constant 0 : index
      %c0_12 = arith.constant 0 : index
      %14 = vector.load %arg7[%c0_11, %c0_12] : memref<32x8xf32, #tpu.memory_space<vmem>>, vector<32x8xf32>
      %c0_13 = arith.constant 0 : index
      %c0_14 = arith.constant 0 : index
      %15 = vector.load %arg5[%c0_13, %c0_14] : memref<1x8xf32, #tpu.memory_space<vmem>>, vector<1x8xf32>
      %16 = vector.broadcast %15 : vector<1x8xf32> to vector<32x8xf32>
      %17 = arith.addf %14, %16 : vector<32x8xf32>
      %c0_15 = arith.constant 0 : index
      %c0_16 = arith.constant 0 : index
      %18 = vector.load %arg6[%c0_15, %c0_16] : memref<32x8xf32, #tpu.memory_space<vmem>>, vector<32x8xf32>
      tpu.vector_store %arg6[%c0_15, %c0_16], %17 {strides = array<i32>} : memref<32x8xf32, #tpu.memory_space<vmem>>, vector<32x8xf32>,
    } else {
    }
    return
  }
  func.func @transform_0(%arg0: i32, %arg1: i32, %arg2: i32) -> (i32, i32) {
    %c0_i32 = arith.constant 0 : i32
    return %arg0, %arg2 : i32, i32
  }
  func.func @transform_1(%arg0: i32, %arg1: i32, %arg2: i32) -> (i32, i32) {
    %c0_i32 = arith.constant 0 : i32
    return %arg2, %arg1 : i32, i32
  }
  func.func @transform_2(%arg0: i32, %arg1: i32, %arg2: i32) -> (i32, i32) {
    %c0_i32 = arith.constant 0 : i32
    %c0_i32_0 = arith.constant 0 : i32
    return %c0_i32, %arg1 : i32, i32
  }
  func.func @transform_3(%arg0: i32, %arg1: i32, %arg2: i32) -> (i32, i32) {
    %c0_i32 = arith.constant 0 : i32
    return %arg0, %arg1 : i32, i32
  }
}

module attributes {stable_mosaic.version = 11 : i64} {
  func.func @_bn_stats_kernel(%arg0: i32, %arg1: memref<32x8xf32, #tpu.memory_space<vmem>>, %arg2: memref<2x8xf32, #tpu.memory_space<vmem>>) attributes {dimension_semantics = [#tpu.dimension_semantics<arbitrary>], iteration_bounds = array<i64: 1>, scalar_prefetch = 0 : i64, scratch_operands = 0 : i64, tpu.core_type = #tpu.core_type<tc>, window_params = [{transform_indices = @transform_0, window_bounds = array<i64: 32, 8>}, {pipeline_mode = #tpu.pipeline_mode<synchronous>, transform_indices = @transform_1, window_bounds = array<i64: 2, 8>}]} {
    %c0_i32 = arith.constant 0 : i32
    %0 = arith.cmpi eq, %arg0, %c0_i32 : i32
    %1 = arith.extui %0 : i1 to i32
    %c0_i32_0 = arith.constant 0 : i32
    %2 = arith.cmpi ne, %1, %c0_i32_0 : i32
    scf.if %2 {
      %cst_7 = arith.constant 0.000000e+00 : f32
      %13 = vector.broadcast %cst_7 : f32 to vector<2x8xf32>
      %c0_8 = arith.constant 0 : index
      %c0_9 = arith.constant 0 : index
      %14 = vector.load %arg2[%c0_8, %c0_9] : memref<2x8xf32, #tpu.memory_space<vmem>>, vector<2x8xf32>
      tpu.vector_store %arg2[%c0_8, %c0_9], %13 {strides = array<i32>} : memref<2x8xf32, #tpu.memory_space<vmem>>, vector<2x8xf32>,
    } else {
    }
    %c0 = arith.constant 0 : index
    %c0_1 = arith.constant 0 : index
    %3 = vector.load %arg1[%c0, %c0_1] : memref<32x8xf32, #tpu.memory_space<vmem>>, vector<32x8xf32>
    %cst = arith.constant dense<0.000000e+00> : vector<8xf32>
    %4 = vector.multi_reduction <add>, %3, %cst [0] : vector<32x8xf32> to vector<8xf32>
    %5 = vector.shape_cast %4 : vector<8xf32> to vector<1x8xf32>
    %6 = arith.mulf %3, %3 : vector<32x8xf32>
    %cst_2 = arith.constant dense<0.000000e+00> : vector<8xf32>
    %7 = vector.multi_reduction <add>, %6, %cst_2 [0] : vector<32x8xf32> to vector<8xf32>
    %8 = vector.shape_cast %7 : vector<8xf32> to vector<1x8xf32>
    %c0_3 = arith.constant 0 : index
    %c0_4 = arith.constant 0 : index
    %9 = vector.load %arg2[%c0_3, %c0_4] : memref<2x8xf32, #tpu.memory_space<vmem>>, vector<2x8xf32>
    %10 = tpu.concatenate %5, %8 in 0 : vector<1x8xf32>, vector<1x8xf32> -> vector<2x8xf32>
    %11 = arith.addf %9, %10 : vector<2x8xf32>
    %c0_5 = arith.constant 0 : index
    %c0_6 = arith.constant 0 : index
    %12 = vector.load %arg2[%c0_5, %c0_6] : memref<2x8xf32, #tpu.memory_space<vmem>>, vector<2x8xf32>
    tpu.vector_store %arg2[%c0_5, %c0_6], %11 {strides = array<i32>} : memref<2x8xf32, #tpu.memory_space<vmem>>, vector<2x8xf32>,
    return
  }
  func.func @transform_0(%arg0: i32) -> (i32, i32) {
    %c0_i32 = arith.constant 0 : i32
    %c0_i32_0 = arith.constant 0 : i32
    return %arg0, %c0_i32 : i32, i32
  }
  func.func @transform_1(%arg0: i32) -> (i32, i32) {
    %c0_i32 = arith.constant 0 : i32
    %c0_i32_0 = arith.constant 0 : i32
    %c0_i32_1 = arith.constant 0 : i32
    return %c0_i32, %c0_i32_0 : i32, i32
  }
}

module attributes {stable_mosaic.version = 11 : i64} {
  func.func @_bn_norm_kernel(%arg0: i32, %arg1: memref<1xf32, #tpu.memory_space<smem>>, %arg2: memref<2x8xf32, #tpu.memory_space<vmem>>, %arg3: memref<32x8xf32, #tpu.memory_space<vmem>>, %arg4: memref<32x8xf32, #tpu.memory_space<vmem>>) attributes {dimension_semantics = [#tpu.dimension_semantics<parallel>], iteration_bounds = array<i64: 1>, scalar_prefetch = 0 : i64, scratch_operands = 0 : i64, tpu.core_type = #tpu.core_type<tc>, window_params = [{transform_indices = @transform_0, window_bounds = array<i64: 1>}, {pipeline_mode = #tpu.pipeline_mode<synchronous>, transform_indices = @transform_1, window_bounds = array<i64: 2, 8>}, {transform_indices = @transform_2, window_bounds = array<i64: 32, 8>}, {transform_indices = @transform_3, window_bounds = array<i64: 32, 8>}]} {
    %c0 = arith.constant 0 : index
    %c0_0 = arith.constant 0 : index
    %0 = vector.load %arg2[%c0, %c0_0] : memref<2x8xf32, #tpu.memory_space<vmem>>, vector<1x8xf32>
    %cst = arith.constant 3.125000e-02 : f32
    %1 = vector.broadcast %cst : f32 to vector<1x8xf32>
    %2 = arith.mulf %0, %1 : vector<1x8xf32>
    %c1 = arith.constant 1 : index
    %c0_1 = arith.constant 0 : index
    %3 = vector.load %arg2[%c1, %c0_1] : memref<2x8xf32, #tpu.memory_space<vmem>>, vector<1x8xf32>
    %cst_2 = arith.constant 3.125000e-02 : f32
    %4 = vector.broadcast %cst_2 : f32 to vector<1x8xf32>
    %5 = arith.mulf %3, %4 : vector<1x8xf32>
    %6 = arith.mulf %2, %2 : vector<1x8xf32>
    %7 = arith.subf %5, %6 : vector<1x8xf32>
    %cst_3 = arith.constant 9.99999974E-6 : f32
    %8 = vector.broadcast %cst_3 : f32 to vector<1x8xf32>
    %9 = arith.addf %7, %8 : vector<1x8xf32>
    %10 = math.rsqrt %9 : vector<1x8xf32>
    %c0_4 = arith.constant 0 : index
    %c0_5 = arith.constant 0 : index
    %11 = vector.load %arg3[%c0_4, %c0_5] : memref<32x8xf32, #tpu.memory_space<vmem>>, vector<32x8xf32>
    %12 = vector.broadcast %2 : vector<1x8xf32> to vector<32x8xf32>
    %13 = arith.subf %11, %12 : vector<32x8xf32>
    %14 = vector.broadcast %10 : vector<1x8xf32> to vector<32x8xf32>
    %15 = arith.mulf %13, %14 : vector<32x8xf32>
    %c0_6 = arith.constant 0 : index
    %16 = memref.load %arg1[%c0_6] : memref<1xf32, #tpu.memory_space<smem>>
    %17 = vector.broadcast %16 : f32 to vector<32x8xf32>
    %18 = arith.mulf %15, %17 : vector<32x8xf32>
    %c0_7 = arith.constant 0 : index
    %c0_8 = arith.constant 0 : index
    %19 = vector.load %arg4[%c0_7, %c0_8] : memref<32x8xf32, #tpu.memory_space<vmem>>, vector<32x8xf32>
    tpu.vector_store %arg4[%c0_7, %c0_8], %18 {strides = array<i32>} : memref<32x8xf32, #tpu.memory_space<vmem>>, vector<32x8xf32>,
    return
  }
  func.func @transform_0(%arg0: i32) -> i32 {
    %c0_i32 = arith.constant 0 : i32
    %c0_i32_0 = arith.constant 0 : i32
    return %c0_i32 : i32
  }
  func.func @transform_1(%arg0: i32) -> (i32, i32) {
    %c0_i32 = arith.constant 0 : i32
    %c0_i32_0 = arith.constant 0 : i32
    %c0_i32_1 = arith.constant 0 : i32
    return %c0_i32, %c0_i32_0 : i32, i32
  }
  func.func @transform_2(%arg0: i32) -> (i32, i32) {
    %c0_i32 = arith.constant 0 : i32
    %c0_i32_0 = arith.constant 0 : i32
    return %arg0, %c0_i32 : i32, i32
  }
  func.func @transform_3(%arg0: i32) -> (i32, i32) {
    %c0_i32 = arith.constant 0 : i32
    %c0_i32_0 = arith.constant 0 : i32
    return %arg0, %c0_i32 : i32, i32
  }
}

module attributes {stable_mosaic.version = 11 : i64} {
  func.func @_matmul_kernel(%arg0: i32, %arg1: i32, %arg2: i32, %arg3: memref<32x72xbf16, #tpu.memory_space<vmem>>, %arg4: memref<72x8xbf16, #tpu.memory_space<vmem>>, %arg5: memref<1x8xf32, #tpu.memory_space<vmem>>, %arg6: memref<32x8xf32, #tpu.memory_space<vmem>>, %arg7: memref<32x8xf32, #tpu.memory_space<vmem>>) attributes {dimension_semantics = [#tpu.dimension_semantics<parallel>, #tpu.dimension_semantics<parallel>, #tpu.dimension_semantics<arbitrary>], iteration_bounds = array<i64: 1, 1, 1>, scalar_prefetch = 0 : i64, scratch_operands = 1 : i64, tpu.core_type = #tpu.core_type<tc>, window_params = [{transform_indices = @transform_0, window_bounds = array<i64: 32, 72>}, {transform_indices = @transform_1, window_bounds = array<i64: 72, 8>}, {transform_indices = @transform_2, window_bounds = array<i64: 1, 8>}, {transform_indices = @transform_3, window_bounds = array<i64: 32, 8>}]} {
    %c0_i32 = arith.constant 0 : i32
    %0 = arith.cmpi eq, %arg2, %c0_i32 : i32
    %1 = arith.extui %0 : i1 to i32
    %c0_i32_0 = arith.constant 0 : i32
    %2 = arith.cmpi ne, %1, %c0_i32_0 : i32
    scf.if %2 {
      %cst_11 = arith.constant 0.000000e+00 : f32
      %14 = vector.broadcast %cst_11 : f32 to vector<32x8xf32>
      %c0_12 = arith.constant 0 : index
      %c0_13 = arith.constant 0 : index
      %15 = vector.load %arg7[%c0_12, %c0_13] : memref<32x8xf32, #tpu.memory_space<vmem>>, vector<32x8xf32>
      tpu.vector_store %arg7[%c0_12, %c0_13], %14 {strides = array<i32>} : memref<32x8xf32, #tpu.memory_space<vmem>>, vector<32x8xf32>,
    } else {
    }
    %c0 = arith.constant 0 : index
    %c0_1 = arith.constant 0 : index
    %3 = vector.load %arg3[%c0, %c0_1] : memref<32x72xbf16, #tpu.memory_space<vmem>>, vector<32x72xbf16>
    %cst = arith.constant 0.000000e+00 : bf16
    %4 = vector.broadcast %cst : bf16 to vector<32x72xbf16>
    %5 = arith.maximumf %3, %4 : vector<32x72xbf16>
    %c0_2 = arith.constant 0 : index
    %c0_3 = arith.constant 0 : index
    %6 = vector.load %arg7[%c0_2, %c0_3] : memref<32x8xf32, #tpu.memory_space<vmem>>, vector<32x8xf32>
    %c0_4 = arith.constant 0 : index
    %c0_5 = arith.constant 0 : index
    %7 = vector.load %arg4[%c0_4, %c0_5] : memref<72x8xbf16, #tpu.memory_space<vmem>>, vector<72x8xbf16>
    %cst_6 = arith.constant dense<0.000000e+00> : vector<32x8xf32>
    %8 = tpu.matmul %5, %7, %cst_6 {dimension_numbers = #tpu.dot_dimension_numbers<[1], [0], [0], [1], [0, 0, 1, 1], [], []>} : vector<32x72xbf16>, vector<72x8xbf16>, vector<32x8xf32> -> vector<32x8xf32>
    %9 = arith.addf %6, %8 : vector<32x8xf32>
    %c0_7 = arith.constant 0 : index
    %c0_8 = arith.constant 0 : index
    %10 = vector.load %arg7[%c0_7, %c0_8] : memref<32x8xf32, #tpu.memory_space<vmem>>, vector<32x8xf32>
    tpu.vector_store %arg7[%c0_7, %c0_8], %9 {strides = array<i32>} : memref<32x8xf32, #tpu.memory_space<vmem>>, vector<32x8xf32>,
    %c0_i32_9 = arith.constant 0 : i32
    %11 = arith.cmpi eq, %arg2, %c0_i32_9 : i32
    %12 = arith.extui %11 : i1 to i32
    %c0_i32_10 = arith.constant 0 : i32
    %13 = arith.cmpi ne, %12, %c0_i32_10 : i32
    scf.if %13 {
      %c0_11 = arith.constant 0 : index
      %c0_12 = arith.constant 0 : index
      %14 = vector.load %arg7[%c0_11, %c0_12] : memref<32x8xf32, #tpu.memory_space<vmem>>, vector<32x8xf32>
      %c0_13 = arith.constant 0 : index
      %c0_14 = arith.constant 0 : index
      %15 = vector.load %arg5[%c0_13, %c0_14] : memref<1x8xf32, #tpu.memory_space<vmem>>, vector<1x8xf32>
      %16 = vector.broadcast %15 : vector<1x8xf32> to vector<32x8xf32>
      %17 = arith.addf %14, %16 : vector<32x8xf32>
      %c0_15 = arith.constant 0 : index
      %c0_16 = arith.constant 0 : index
      %18 = vector.load %arg6[%c0_15, %c0_16] : memref<32x8xf32, #tpu.memory_space<vmem>>, vector<32x8xf32>
      tpu.vector_store %arg6[%c0_15, %c0_16], %17 {strides = array<i32>} : memref<32x8xf32, #tpu.memory_space<vmem>>, vector<32x8xf32>,
    } else {
    }
    return
  }
  func.func @transform_0(%arg0: i32, %arg1: i32, %arg2: i32) -> (i32, i32) {
    %c0_i32 = arith.constant 0 : i32
    return %arg0, %arg2 : i32, i32
  }
  func.func @transform_1(%arg0: i32, %arg1: i32, %arg2: i32) -> (i32, i32) {
    %c0_i32 = arith.constant 0 : i32
    return %arg2, %arg1 : i32, i32
  }
  func.func @transform_2(%arg0: i32, %arg1: i32, %arg2: i32) -> (i32, i32) {
    %c0_i32 = arith.constant 0 : i32
    %c0_i32_0 = arith.constant 0 : i32
    return %c0_i32, %arg1 : i32, i32
  }
  func.func @transform_3(%arg0: i32, %arg1: i32, %arg2: i32) -> (i32, i32) {
    %c0_i32 = arith.constant 0 : i32
    return %arg0, %arg1 : i32, i32
  }
}

module attributes {stable_mosaic.version = 11 : i64} {
  func.func @_matmul_kernel(%arg0: i32, %arg1: i32, %arg2: i32, %arg3: memref<128x12xbf16, #tpu.memory_space<vmem>>, %arg4: memref<12x8xbf16, #tpu.memory_space<vmem>>, %arg5: memref<1x8xf32, #tpu.memory_space<vmem>>, %arg6: memref<128x8xf32, #tpu.memory_space<vmem>>, %arg7: memref<128x8xf32, #tpu.memory_space<vmem>>) attributes {dimension_semantics = [#tpu.dimension_semantics<parallel>, #tpu.dimension_semantics<parallel>, #tpu.dimension_semantics<arbitrary>], iteration_bounds = array<i64: 1, 1, 1>, scalar_prefetch = 0 : i64, scratch_operands = 1 : i64, tpu.core_type = #tpu.core_type<tc>, window_params = [{transform_indices = @transform_0, window_bounds = array<i64: 128, 12>}, {transform_indices = @transform_1, window_bounds = array<i64: 12, 8>}, {transform_indices = @transform_2, window_bounds = array<i64: 1, 8>}, {transform_indices = @transform_3, window_bounds = array<i64: 128, 8>}]} {
    %c0_i32 = arith.constant 0 : i32
    %0 = arith.cmpi eq, %arg2, %c0_i32 : i32
    %1 = arith.extui %0 : i1 to i32
    %c0_i32_0 = arith.constant 0 : i32
    %2 = arith.cmpi ne, %1, %c0_i32_0 : i32
    scf.if %2 {
      %cst_11 = arith.constant 0.000000e+00 : f32
      %14 = vector.broadcast %cst_11 : f32 to vector<128x8xf32>
      %c0_12 = arith.constant 0 : index
      %c0_13 = arith.constant 0 : index
      %15 = vector.load %arg7[%c0_12, %c0_13] : memref<128x8xf32, #tpu.memory_space<vmem>>, vector<128x8xf32>
      tpu.vector_store %arg7[%c0_12, %c0_13], %14 {strides = array<i32>} : memref<128x8xf32, #tpu.memory_space<vmem>>, vector<128x8xf32>,
    } else {
    }
    %c0 = arith.constant 0 : index
    %c0_1 = arith.constant 0 : index
    %3 = vector.load %arg3[%c0, %c0_1] : memref<128x12xbf16, #tpu.memory_space<vmem>>, vector<128x12xbf16>
    %cst = arith.constant 0.000000e+00 : bf16
    %4 = vector.broadcast %cst : bf16 to vector<128x12xbf16>
    %5 = arith.maximumf %3, %4 : vector<128x12xbf16>
    %c0_2 = arith.constant 0 : index
    %c0_3 = arith.constant 0 : index
    %6 = vector.load %arg7[%c0_2, %c0_3] : memref<128x8xf32, #tpu.memory_space<vmem>>, vector<128x8xf32>
    %c0_4 = arith.constant 0 : index
    %c0_5 = arith.constant 0 : index
    %7 = vector.load %arg4[%c0_4, %c0_5] : memref<12x8xbf16, #tpu.memory_space<vmem>>, vector<12x8xbf16>
    %cst_6 = arith.constant dense<0.000000e+00> : vector<128x8xf32>
    %8 = tpu.matmul %5, %7, %cst_6 {dimension_numbers = #tpu.dot_dimension_numbers<[1], [0], [0], [1], [0, 0, 1, 1], [], []>} : vector<128x12xbf16>, vector<12x8xbf16>, vector<128x8xf32> -> vector<128x8xf32>
    %9 = arith.addf %6, %8 : vector<128x8xf32>
    %c0_7 = arith.constant 0 : index
    %c0_8 = arith.constant 0 : index
    %10 = vector.load %arg7[%c0_7, %c0_8] : memref<128x8xf32, #tpu.memory_space<vmem>>, vector<128x8xf32>
    tpu.vector_store %arg7[%c0_7, %c0_8], %9 {strides = array<i32>} : memref<128x8xf32, #tpu.memory_space<vmem>>, vector<128x8xf32>,
    %c0_i32_9 = arith.constant 0 : i32
    %11 = arith.cmpi eq, %arg2, %c0_i32_9 : i32
    %12 = arith.extui %11 : i1 to i32
    %c0_i32_10 = arith.constant 0 : i32
    %13 = arith.cmpi ne, %12, %c0_i32_10 : i32
    scf.if %13 {
      %c0_11 = arith.constant 0 : index
      %c0_12 = arith.constant 0 : index
      %14 = vector.load %arg7[%c0_11, %c0_12] : memref<128x8xf32, #tpu.memory_space<vmem>>, vector<128x8xf32>
      %c0_13 = arith.constant 0 : index
      %c0_14 = arith.constant 0 : index
      %15 = vector.load %arg5[%c0_13, %c0_14] : memref<1x8xf32, #tpu.memory_space<vmem>>, vector<1x8xf32>
      %16 = vector.broadcast %15 : vector<1x8xf32> to vector<128x8xf32>
      %17 = arith.addf %14, %16 : vector<128x8xf32>
      %c0_15 = arith.constant 0 : index
      %c0_16 = arith.constant 0 : index
      %18 = vector.load %arg6[%c0_15, %c0_16] : memref<128x8xf32, #tpu.memory_space<vmem>>, vector<128x8xf32>
      tpu.vector_store %arg6[%c0_15, %c0_16], %17 {strides = array<i32>} : memref<128x8xf32, #tpu.memory_space<vmem>>, vector<128x8xf32>,
    } else {
    }
    return
  }
  func.func @transform_0(%arg0: i32, %arg1: i32, %arg2: i32) -> (i32, i32) {
    %c0_i32 = arith.constant 0 : i32
    return %arg0, %arg2 : i32, i32
  }
  func.func @transform_1(%arg0: i32, %arg1: i32, %arg2: i32) -> (i32, i32) {
    %c0_i32 = arith.constant 0 : i32
    return %arg2, %arg1 : i32, i32
  }
  func.func @transform_2(%arg0: i32, %arg1: i32, %arg2: i32) -> (i32, i32) {
    %c0_i32 = arith.constant 0 : i32
    %c0_i32_0 = arith.constant 0 : i32
    return %c0_i32, %arg1 : i32, i32
  }
  func.func @transform_3(%arg0: i32, %arg1: i32, %arg2: i32) -> (i32, i32) {
    %c0_i32 = arith.constant 0 : i32
    return %arg0, %arg1 : i32, i32
  }
}

module attributes {stable_mosaic.version = 11 : i64} {
  func.func @_bn_norm_kernel(%arg0: i32, %arg1: memref<3xf32, #tpu.memory_space<smem>>, %arg2: memref<2x8xf32, #tpu.memory_space<vmem>>, %arg3: memref<32x8xf32, #tpu.memory_space<vmem>>, %arg4: memref<32x8xf32, #tpu.memory_space<vmem>>, %arg5: memref<32x8xf32, #tpu.memory_space<vmem>>, %arg6: memref<32x8xf32, #tpu.memory_space<vmem>>) attributes {dimension_semantics = [#tpu.dimension_semantics<parallel>], iteration_bounds = array<i64: 1>, scalar_prefetch = 0 : i64, scratch_operands = 0 : i64, tpu.core_type = #tpu.core_type<tc>, window_params = [{transform_indices = @transform_0, window_bounds = array<i64: 3>}, {pipeline_mode = #tpu.pipeline_mode<synchronous>, transform_indices = @transform_1, window_bounds = array<i64: 2, 8>}, {transform_indices = @transform_2, window_bounds = array<i64: 32, 8>}, {transform_indices = @transform_3, window_bounds = array<i64: 32, 8>}, {transform_indices = @transform_4, window_bounds = array<i64: 32, 8>}, {transform_indices = @transform_5, window_bounds = array<i64: 32, 8>}]} {
    %c0 = arith.constant 0 : index
    %c0_0 = arith.constant 0 : index
    %0 = vector.load %arg2[%c0, %c0_0] : memref<2x8xf32, #tpu.memory_space<vmem>>, vector<1x8xf32>
    %cst = arith.constant 3.125000e-02 : f32
    %1 = vector.broadcast %cst : f32 to vector<1x8xf32>
    %2 = arith.mulf %0, %1 : vector<1x8xf32>
    %c1 = arith.constant 1 : index
    %c0_1 = arith.constant 0 : index
    %3 = vector.load %arg2[%c1, %c0_1] : memref<2x8xf32, #tpu.memory_space<vmem>>, vector<1x8xf32>
    %cst_2 = arith.constant 3.125000e-02 : f32
    %4 = vector.broadcast %cst_2 : f32 to vector<1x8xf32>
    %5 = arith.mulf %3, %4 : vector<1x8xf32>
    %6 = arith.mulf %2, %2 : vector<1x8xf32>
    %7 = arith.subf %5, %6 : vector<1x8xf32>
    %cst_3 = arith.constant 9.99999974E-6 : f32
    %8 = vector.broadcast %cst_3 : f32 to vector<1x8xf32>
    %9 = arith.addf %7, %8 : vector<1x8xf32>
    %10 = math.rsqrt %9 : vector<1x8xf32>
    %c0_4 = arith.constant 0 : index
    %c0_5 = arith.constant 0 : index
    %11 = vector.load %arg3[%c0_4, %c0_5] : memref<32x8xf32, #tpu.memory_space<vmem>>, vector<32x8xf32>
    %12 = vector.broadcast %2 : vector<1x8xf32> to vector<32x8xf32>
    %13 = arith.subf %11, %12 : vector<32x8xf32>
    %14 = vector.broadcast %10 : vector<1x8xf32> to vector<32x8xf32>
    %15 = arith.mulf %13, %14 : vector<32x8xf32>
    %c0_6 = arith.constant 0 : index
    %16 = memref.load %arg1[%c0_6] : memref<3xf32, #tpu.memory_space<smem>>
    %17 = vector.broadcast %16 : f32 to vector<32x8xf32>
    %18 = arith.mulf %15, %17 : vector<32x8xf32>
    %c0_7 = arith.constant 0 : index
    %c0_8 = arith.constant 0 : index
    %19 = vector.load %arg4[%c0_7, %c0_8] : memref<32x8xf32, #tpu.memory_space<vmem>>, vector<32x8xf32>
    %c1_9 = arith.constant 1 : index
    %20 = memref.load %arg1[%c1_9] : memref<3xf32, #tpu.memory_space<smem>>
    %21 = vector.broadcast %20 : f32 to vector<32x8xf32>
    %22 = arith.mulf %19, %21 : vector<32x8xf32>
    %23 = arith.addf %18, %22 : vector<32x8xf32>
    %c0_10 = arith.constant 0 : index
    %c0_11 = arith.constant 0 : index
    %24 = vector.load %arg5[%c0_10, %c0_11] : memref<32x8xf32, #tpu.memory_space<vmem>>, vector<32x8xf32>
    %c2 = arith.constant 2 : index
    %25 = memref.load %arg1[%c2] : memref<3xf32, #tpu.memory_space<smem>>
    %26 = vector.broadcast %25 : f32 to vector<32x8xf32>
    %27 = arith.mulf %24, %26 : vector<32x8xf32>
    %28 = arith.addf %23, %27 : vector<32x8xf32>
    %c0_12 = arith.constant 0 : index
    %c0_13 = arith.constant 0 : index
    %29 = vector.load %arg6[%c0_12, %c0_13] : memref<32x8xf32, #tpu.memory_space<vmem>>, vector<32x8xf32>
    tpu.vector_store %arg6[%c0_12, %c0_13], %28 {strides = array<i32>} : memref<32x8xf32, #tpu.memory_space<vmem>>, vector<32x8xf32>,
    return
  }
  func.func @transform_0(%arg0: i32) -> i32 {
    %c0_i32 = arith.constant 0 : i32
    %c0_i32_0 = arith.constant 0 : i32
    return %c0_i32 : i32
  }
  func.func @transform_1(%arg0: i32) -> (i32, i32) {
    %c0_i32 = arith.constant 0 : i32
    %c0_i32_0 = arith.constant 0 : i32
    %c0_i32_1 = arith.constant 0 : i32
    return %c0_i32, %c0_i32_0 : i32, i32
  }
  func.func @transform_2(%arg0: i32) -> (i32, i32) {
    %c0_i32 = arith.constant 0 : i32
    %c0_i32_0 = arith.constant 0 : i32
    return %arg0, %c0_i32 : i32, i32
  }
  func.func @transform_3(%arg0: i32) -> (i32, i32) {
    %c0_i32 = arith.constant 0 : i32
    %c0_i32_0 = arith.constant 0 : i32
    return %arg0, %c0_i32 : i32, i32
  }
  func.func @transform_4(%arg0: i32) -> (i32, i32) {
    %c0_i32 = arith.constant 0 : i32
    %c0_i32_0 = arith.constant 0 : i32
    return %arg0, %c0_i32 : i32, i32
  }
  func.func @transform_5(%arg0: i32) -> (i32, i32) {
    %c0_i32 = arith.constant 0 : i32
    %c0_i32_0 = arith.constant 0 : i32
    return %arg0, %c0_i32 : i32, i32
  }
}

module attributes {stable_mosaic.version = 11 : i64} {
  func.func @_matmul_kernel(%arg0: i32, %arg1: i32, %arg2: i32, %arg3: memref<32x8xbf16, #tpu.memory_space<vmem>>, %arg4: memref<8x8xbf16, #tpu.memory_space<vmem>>, %arg5: memref<1x8xf32, #tpu.memory_space<vmem>>, %arg6: memref<32x8xf32, #tpu.memory_space<vmem>>, %arg7: memref<32x8xf32, #tpu.memory_space<vmem>>) attributes {dimension_semantics = [#tpu.dimension_semantics<parallel>, #tpu.dimension_semantics<parallel>, #tpu.dimension_semantics<arbitrary>], iteration_bounds = array<i64: 1, 1, 1>, scalar_prefetch = 0 : i64, scratch_operands = 1 : i64, tpu.core_type = #tpu.core_type<tc>, window_params = [{transform_indices = @transform_0, window_bounds = array<i64: 32, 8>}, {transform_indices = @transform_1, window_bounds = array<i64: 8, 8>}, {transform_indices = @transform_2, window_bounds = array<i64: 1, 8>}, {transform_indices = @transform_3, window_bounds = array<i64: 32, 8>}]} {
    %c0_i32 = arith.constant 0 : i32
    %0 = arith.cmpi eq, %arg2, %c0_i32 : i32
    %1 = arith.extui %0 : i1 to i32
    %c0_i32_0 = arith.constant 0 : i32
    %2 = arith.cmpi ne, %1, %c0_i32_0 : i32
    scf.if %2 {
      %cst_11 = arith.constant 0.000000e+00 : f32
      %14 = vector.broadcast %cst_11 : f32 to vector<32x8xf32>
      %c0_12 = arith.constant 0 : index
      %c0_13 = arith.constant 0 : index
      %15 = vector.load %arg7[%c0_12, %c0_13] : memref<32x8xf32, #tpu.memory_space<vmem>>, vector<32x8xf32>
      tpu.vector_store %arg7[%c0_12, %c0_13], %14 {strides = array<i32>} : memref<32x8xf32, #tpu.memory_space<vmem>>, vector<32x8xf32>,
    } else {
    }
    %c0 = arith.constant 0 : index
    %c0_1 = arith.constant 0 : index
    %3 = vector.load %arg3[%c0, %c0_1] : memref<32x8xbf16, #tpu.memory_space<vmem>>, vector<32x8xbf16>
    %cst = arith.constant 0.000000e+00 : bf16
    %4 = vector.broadcast %cst : bf16 to vector<32x8xbf16>
    %5 = arith.maximumf %3, %4 : vector<32x8xbf16>
    %c0_2 = arith.constant 0 : index
    %c0_3 = arith.constant 0 : index
    %6 = vector.load %arg7[%c0_2, %c0_3] : memref<32x8xf32, #tpu.memory_space<vmem>>, vector<32x8xf32>
    %c0_4 = arith.constant 0 : index
    %c0_5 = arith.constant 0 : index
    %7 = vector.load %arg4[%c0_4, %c0_5] : memref<8x8xbf16, #tpu.memory_space<vmem>>, vector<8x8xbf16>
    %cst_6 = arith.constant dense<0.000000e+00> : vector<32x8xf32>
    %8 = tpu.matmul %5, %7, %cst_6 {dimension_numbers = #tpu.dot_dimension_numbers<[1], [0], [0], [1], [0, 0, 1, 1], [], []>} : vector<32x8xbf16>, vector<8x8xbf16>, vector<32x8xf32> -> vector<32x8xf32>
    %9 = arith.addf %6, %8 : vector<32x8xf32>
    %c0_7 = arith.constant 0 : index
    %c0_8 = arith.constant 0 : index
    %10 = vector.load %arg7[%c0_7, %c0_8] : memref<32x8xf32, #tpu.memory_space<vmem>>, vector<32x8xf32>
    tpu.vector_store %arg7[%c0_7, %c0_8], %9 {strides = array<i32>} : memref<32x8xf32, #tpu.memory_space<vmem>>, vector<32x8xf32>,
    %c0_i32_9 = arith.constant 0 : i32
    %11 = arith.cmpi eq, %arg2, %c0_i32_9 : i32
    %12 = arith.extui %11 : i1 to i32
    %c0_i32_10 = arith.constant 0 : i32
    %13 = arith.cmpi ne, %12, %c0_i32_10 : i32
    scf.if %13 {
      %c0_11 = arith.constant 0 : index
      %c0_12 = arith.constant 0 : index
      %14 = vector.load %arg7[%c0_11, %c0_12] : memref<32x8xf32, #tpu.memory_space<vmem>>, vector<32x8xf32>
      %c0_13 = arith.constant 0 : index
      %c0_14 = arith.constant 0 : index
      %15 = vector.load %arg5[%c0_13, %c0_14] : memref<1x8xf32, #tpu.memory_space<vmem>>, vector<1x8xf32>
      %16 = vector.broadcast %15 : vector<1x8xf32> to vector<32x8xf32>
      %17 = arith.addf %14, %16 : vector<32x8xf32>
      %c0_15 = arith.constant 0 : index
      %c0_16 = arith.constant 0 : index
      %18 = vector.load %arg6[%c0_15, %c0_16] : memref<32x8xf32, #tpu.memory_space<vmem>>, vector<32x8xf32>
      tpu.vector_store %arg6[%c0_15, %c0_16], %17 {strides = array<i32>} : memref<32x8xf32, #tpu.memory_space<vmem>>, vector<32x8xf32>,
    } else {
    }
    return
  }
  func.func @transform_0(%arg0: i32, %arg1: i32, %arg2: i32) -> (i32, i32) {
    %c0_i32 = arith.constant 0 : i32
    return %arg0, %arg2 : i32, i32
  }
  func.func @transform_1(%arg0: i32, %arg1: i32, %arg2: i32) -> (i32, i32) {
    %c0_i32 = arith.constant 0 : i32
    return %arg2, %arg1 : i32, i32
  }
  func.func @transform_2(%arg0: i32, %arg1: i32, %arg2: i32) -> (i32, i32) {
    %c0_i32 = arith.constant 0 : i32
    %c0_i32_0 = arith.constant 0 : i32
    return %c0_i32, %arg1 : i32, i32
  }
  func.func @transform_3(%arg0: i32, %arg1: i32, %arg2: i32) -> (i32, i32) {
    %c0_i32 = arith.constant 0 : i32
    return %arg0, %arg1 : i32, i32
  }
}

module attributes {stable_mosaic.version = 11 : i64} {
  func.func @_matmul_kernel(%arg0: i32, %arg1: i32, %arg2: i32, %arg3: memref<32x8xbf16, #tpu.memory_space<vmem>>, %arg4: memref<8x16xbf16, #tpu.memory_space<vmem>>, %arg5: memref<1x16xf32, #tpu.memory_space<vmem>>, %arg6: memref<32x16xf32, #tpu.memory_space<vmem>>, %arg7: memref<32x16xf32, #tpu.memory_space<vmem>>) attributes {dimension_semantics = [#tpu.dimension_semantics<parallel>, #tpu.dimension_semantics<parallel>, #tpu.dimension_semantics<arbitrary>], iteration_bounds = array<i64: 1, 1, 1>, scalar_prefetch = 0 : i64, scratch_operands = 1 : i64, tpu.core_type = #tpu.core_type<tc>, window_params = [{transform_indices = @transform_0, window_bounds = array<i64: 32, 8>}, {transform_indices = @transform_1, window_bounds = array<i64: 8, 16>}, {transform_indices = @transform_2, window_bounds = array<i64: 1, 16>}, {transform_indices = @transform_3, window_bounds = array<i64: 32, 16>}]} {
    %c0_i32 = arith.constant 0 : i32
    %0 = arith.cmpi eq, %arg2, %c0_i32 : i32
    %1 = arith.extui %0 : i1 to i32
    %c0_i32_0 = arith.constant 0 : i32
    %2 = arith.cmpi ne, %1, %c0_i32_0 : i32
    scf.if %2 {
      %cst_11 = arith.constant 0.000000e+00 : f32
      %14 = vector.broadcast %cst_11 : f32 to vector<32x16xf32>
      %c0_12 = arith.constant 0 : index
      %c0_13 = arith.constant 0 : index
      %15 = vector.load %arg7[%c0_12, %c0_13] : memref<32x16xf32, #tpu.memory_space<vmem>>, vector<32x16xf32>
      tpu.vector_store %arg7[%c0_12, %c0_13], %14 {strides = array<i32>} : memref<32x16xf32, #tpu.memory_space<vmem>>, vector<32x16xf32>,
    } else {
    }
    %c0 = arith.constant 0 : index
    %c0_1 = arith.constant 0 : index
    %3 = vector.load %arg3[%c0, %c0_1] : memref<32x8xbf16, #tpu.memory_space<vmem>>, vector<32x8xbf16>
    %cst = arith.constant 0.000000e+00 : bf16
    %4 = vector.broadcast %cst : bf16 to vector<32x8xbf16>
    %5 = arith.maximumf %3, %4 : vector<32x8xbf16>
    %c0_2 = arith.constant 0 : index
    %c0_3 = arith.constant 0 : index
    %6 = vector.load %arg7[%c0_2, %c0_3] : memref<32x16xf32, #tpu.memory_space<vmem>>, vector<32x16xf32>
    %c0_4 = arith.constant 0 : index
    %c0_5 = arith.constant 0 : index
    %7 = vector.load %arg4[%c0_4, %c0_5] : memref<8x16xbf16, #tpu.memory_space<vmem>>, vector<8x16xbf16>
    %cst_6 = arith.constant dense<0.000000e+00> : vector<32x16xf32>
    %8 = tpu.matmul %5, %7, %cst_6 {dimension_numbers = #tpu.dot_dimension_numbers<[1], [0], [0], [1], [0, 0, 1, 1], [], []>} : vector<32x8xbf16>, vector<8x16xbf16>, vector<32x16xf32> -> vector<32x16xf32>
    %9 = arith.addf %6, %8 : vector<32x16xf32>
    %c0_7 = arith.constant 0 : index
    %c0_8 = arith.constant 0 : index
    %10 = vector.load %arg7[%c0_7, %c0_8] : memref<32x16xf32, #tpu.memory_space<vmem>>, vector<32x16xf32>
    tpu.vector_store %arg7[%c0_7, %c0_8], %9 {strides = array<i32>} : memref<32x16xf32, #tpu.memory_space<vmem>>, vector<32x16xf32>,
    %c0_i32_9 = arith.constant 0 : i32
    %11 = arith.cmpi eq, %arg2, %c0_i32_9 : i32
    %12 = arith.extui %11 : i1 to i32
    %c0_i32_10 = arith.constant 0 : i32
    %13 = arith.cmpi ne, %12, %c0_i32_10 : i32
    scf.if %13 {
      %c0_11 = arith.constant 0 : index
      %c0_12 = arith.constant 0 : index
      %14 = vector.load %arg7[%c0_11, %c0_12] : memref<32x16xf32, #tpu.memory_space<vmem>>, vector<32x16xf32>
      %c0_13 = arith.constant 0 : index
      %c0_14 = arith.constant 0 : index
      %15 = vector.load %arg5[%c0_13, %c0_14] : memref<1x16xf32, #tpu.memory_space<vmem>>, vector<1x16xf32>
      %16 = vector.broadcast %15 : vector<1x16xf32> to vector<32x16xf32>
      %17 = arith.addf %14, %16 : vector<32x16xf32>
      %c0_15 = arith.constant 0 : index
      %c0_16 = arith.constant 0 : index
      %18 = vector.load %arg6[%c0_15, %c0_16] : memref<32x16xf32, #tpu.memory_space<vmem>>, vector<32x16xf32>
      tpu.vector_store %arg6[%c0_15, %c0_16], %17 {strides = array<i32>} : memref<32x16xf32, #tpu.memory_space<vmem>>, vector<32x16xf32>,
    } else {
    }
    return
  }
  func.func @transform_0(%arg0: i32, %arg1: i32, %arg2: i32) -> (i32, i32) {
    %c0_i32 = arith.constant 0 : i32
    return %arg0, %arg2 : i32, i32
  }
  func.func @transform_1(%arg0: i32, %arg1: i32, %arg2: i32) -> (i32, i32) {
    %c0_i32 = arith.constant 0 : i32
    return %arg2, %arg1 : i32, i32
  }
  func.func @transform_2(%arg0: i32, %arg1: i32, %arg2: i32) -> (i32, i32) {
    %c0_i32 = arith.constant 0 : i32
    %c0_i32_0 = arith.constant 0 : i32
    return %c0_i32, %arg1 : i32, i32
  }
  func.func @transform_3(%arg0: i32, %arg1: i32, %arg2: i32) -> (i32, i32) {
    %c0_i32 = arith.constant 0 : i32
    return %arg0, %arg1 : i32, i32
  }
}

module attributes {stable_mosaic.version = 11 : i64} {
  func.func @_bn_stats_kernel(%arg0: i32, %arg1: memref<32x16xf32, #tpu.memory_space<vmem>>, %arg2: memref<2x16xf32, #tpu.memory_space<vmem>>) attributes {dimension_semantics = [#tpu.dimension_semantics<arbitrary>], iteration_bounds = array<i64: 1>, scalar_prefetch = 0 : i64, scratch_operands = 0 : i64, tpu.core_type = #tpu.core_type<tc>, window_params = [{transform_indices = @transform_0, window_bounds = array<i64: 32, 16>}, {pipeline_mode = #tpu.pipeline_mode<synchronous>, transform_indices = @transform_1, window_bounds = array<i64: 2, 16>}]} {
    %c0_i32 = arith.constant 0 : i32
    %0 = arith.cmpi eq, %arg0, %c0_i32 : i32
    %1 = arith.extui %0 : i1 to i32
    %c0_i32_0 = arith.constant 0 : i32
    %2 = arith.cmpi ne, %1, %c0_i32_0 : i32
    scf.if %2 {
      %cst_7 = arith.constant 0.000000e+00 : f32
      %13 = vector.broadcast %cst_7 : f32 to vector<2x16xf32>
      %c0_8 = arith.constant 0 : index
      %c0_9 = arith.constant 0 : index
      %14 = vector.load %arg2[%c0_8, %c0_9] : memref<2x16xf32, #tpu.memory_space<vmem>>, vector<2x16xf32>
      tpu.vector_store %arg2[%c0_8, %c0_9], %13 {strides = array<i32>} : memref<2x16xf32, #tpu.memory_space<vmem>>, vector<2x16xf32>,
    } else {
    }
    %c0 = arith.constant 0 : index
    %c0_1 = arith.constant 0 : index
    %3 = vector.load %arg1[%c0, %c0_1] : memref<32x16xf32, #tpu.memory_space<vmem>>, vector<32x16xf32>
    %cst = arith.constant dense<0.000000e+00> : vector<16xf32>
    %4 = vector.multi_reduction <add>, %3, %cst [0] : vector<32x16xf32> to vector<16xf32>
    %5 = vector.shape_cast %4 : vector<16xf32> to vector<1x16xf32>
    %6 = arith.mulf %3, %3 : vector<32x16xf32>
    %cst_2 = arith.constant dense<0.000000e+00> : vector<16xf32>
    %7 = vector.multi_reduction <add>, %6, %cst_2 [0] : vector<32x16xf32> to vector<16xf32>
    %8 = vector.shape_cast %7 : vector<16xf32> to vector<1x16xf32>
    %c0_3 = arith.constant 0 : index
    %c0_4 = arith.constant 0 : index
    %9 = vector.load %arg2[%c0_3, %c0_4] : memref<2x16xf32, #tpu.memory_space<vmem>>, vector<2x16xf32>
    %10 = tpu.concatenate %5, %8 in 0 : vector<1x16xf32>, vector<1x16xf32> -> vector<2x16xf32>
    %11 = arith.addf %9, %10 : vector<2x16xf32>
    %c0_5 = arith.constant 0 : index
    %c0_6 = arith.constant 0 : index
    %12 = vector.load %arg2[%c0_5, %c0_6] : memref<2x16xf32, #tpu.memory_space<vmem>>, vector<2x16xf32>
    tpu.vector_store %arg2[%c0_5, %c0_6], %11 {strides = array<i32>} : memref<2x16xf32, #tpu.memory_space<vmem>>, vector<2x16xf32>,
    return
  }
  func.func @transform_0(%arg0: i32) -> (i32, i32) {
    %c0_i32 = arith.constant 0 : i32
    %c0_i32_0 = arith.constant 0 : i32
    return %arg0, %c0_i32 : i32, i32
  }
  func.func @transform_1(%arg0: i32) -> (i32, i32) {
    %c0_i32 = arith.constant 0 : i32
    %c0_i32_0 = arith.constant 0 : i32
    %c0_i32_1 = arith.constant 0 : i32
    return %c0_i32, %c0_i32_0 : i32, i32
  }
}

module attributes {stable_mosaic.version = 11 : i64} {
  func.func @_bn_norm_kernel(%arg0: i32, %arg1: memref<1xf32, #tpu.memory_space<smem>>, %arg2: memref<2x16xf32, #tpu.memory_space<vmem>>, %arg3: memref<32x16xf32, #tpu.memory_space<vmem>>, %arg4: memref<32x16xf32, #tpu.memory_space<vmem>>) attributes {dimension_semantics = [#tpu.dimension_semantics<parallel>], iteration_bounds = array<i64: 1>, scalar_prefetch = 0 : i64, scratch_operands = 0 : i64, tpu.core_type = #tpu.core_type<tc>, window_params = [{transform_indices = @transform_0, window_bounds = array<i64: 1>}, {pipeline_mode = #tpu.pipeline_mode<synchronous>, transform_indices = @transform_1, window_bounds = array<i64: 2, 16>}, {transform_indices = @transform_2, window_bounds = array<i64: 32, 16>}, {transform_indices = @transform_3, window_bounds = array<i64: 32, 16>}]} {
    %c0 = arith.constant 0 : index
    %c0_0 = arith.constant 0 : index
    %0 = vector.load %arg2[%c0, %c0_0] : memref<2x16xf32, #tpu.memory_space<vmem>>, vector<1x16xf32>
    %cst = arith.constant 3.125000e-02 : f32
    %1 = vector.broadcast %cst : f32 to vector<1x16xf32>
    %2 = arith.mulf %0, %1 : vector<1x16xf32>
    %c1 = arith.constant 1 : index
    %c0_1 = arith.constant 0 : index
    %3 = vector.load %arg2[%c1, %c0_1] : memref<2x16xf32, #tpu.memory_space<vmem>>, vector<1x16xf32>
    %cst_2 = arith.constant 3.125000e-02 : f32
    %4 = vector.broadcast %cst_2 : f32 to vector<1x16xf32>
    %5 = arith.mulf %3, %4 : vector<1x16xf32>
    %6 = arith.mulf %2, %2 : vector<1x16xf32>
    %7 = arith.subf %5, %6 : vector<1x16xf32>
    %cst_3 = arith.constant 9.99999974E-6 : f32
    %8 = vector.broadcast %cst_3 : f32 to vector<1x16xf32>
    %9 = arith.addf %7, %8 : vector<1x16xf32>
    %10 = math.rsqrt %9 : vector<1x16xf32>
    %c0_4 = arith.constant 0 : index
    %c0_5 = arith.constant 0 : index
    %11 = vector.load %arg3[%c0_4, %c0_5] : memref<32x16xf32, #tpu.memory_space<vmem>>, vector<32x16xf32>
    %12 = vector.broadcast %2 : vector<1x16xf32> to vector<32x16xf32>
    %13 = arith.subf %11, %12 : vector<32x16xf32>
    %14 = vector.broadcast %10 : vector<1x16xf32> to vector<32x16xf32>
    %15 = arith.mulf %13, %14 : vector<32x16xf32>
    %c0_6 = arith.constant 0 : index
    %16 = memref.load %arg1[%c0_6] : memref<1xf32, #tpu.memory_space<smem>>
    %17 = vector.broadcast %16 : f32 to vector<32x16xf32>
    %18 = arith.mulf %15, %17 : vector<32x16xf32>
    %c0_7 = arith.constant 0 : index
    %c0_8 = arith.constant 0 : index
    %19 = vector.load %arg4[%c0_7, %c0_8] : memref<32x16xf32, #tpu.memory_space<vmem>>, vector<32x16xf32>
    tpu.vector_store %arg4[%c0_7, %c0_8], %18 {strides = array<i32>} : memref<32x16xf32, #tpu.memory_space<vmem>>, vector<32x16xf32>,
    return
  }
  func.func @transform_0(%arg0: i32) -> i32 {
    %c0_i32 = arith.constant 0 : i32
    %c0_i32_0 = arith.constant 0 : i32
    return %c0_i32 : i32
  }
  func.func @transform_1(%arg0: i32) -> (i32, i32) {
    %c0_i32 = arith.constant 0 : i32
    %c0_i32_0 = arith.constant 0 : i32
    %c0_i32_1 = arith.constant 0 : i32
    return %c0_i32, %c0_i32_0 : i32, i32
  }
  func.func @transform_2(%arg0: i32) -> (i32, i32) {
    %c0_i32 = arith.constant 0 : i32
    %c0_i32_0 = arith.constant 0 : i32
    return %arg0, %c0_i32 : i32, i32
  }
  func.func @transform_3(%arg0: i32) -> (i32, i32) {
    %c0_i32 = arith.constant 0 : i32
    %c0_i32_0 = arith.constant 0 : i32
    return %arg0, %c0_i32 : i32, i32
  }
}

module attributes {stable_mosaic.version = 11 : i64} {
  func.func @_matmul_kernel(%arg0: i32, %arg1: i32, %arg2: i32, %arg3: memref<8x32xbf16, #tpu.memory_space<vmem>>, %arg4: memref<32x16xbf16, #tpu.memory_space<vmem>>, %arg5: memref<1x16xf32, #tpu.memory_space<vmem>>, %arg6: memref<8x16xf32, #tpu.memory_space<vmem>>, %arg7: memref<8x16xf32, #tpu.memory_space<vmem>>) attributes {dimension_semantics = [#tpu.dimension_semantics<parallel>, #tpu.dimension_semantics<parallel>, #tpu.dimension_semantics<arbitrary>], iteration_bounds = array<i64: 1, 1, 1>, scalar_prefetch = 0 : i64, scratch_operands = 1 : i64, tpu.core_type = #tpu.core_type<tc>, window_params = [{transform_indices = @transform_0, window_bounds = array<i64: 8, 32>}, {transform_indices = @transform_1, window_bounds = array<i64: 32, 16>}, {transform_indices = @transform_2, window_bounds = array<i64: 1, 16>}, {transform_indices = @transform_3, window_bounds = array<i64: 8, 16>}]} {
    %c0_i32 = arith.constant 0 : i32
    %0 = arith.cmpi eq, %arg2, %c0_i32 : i32
    %1 = arith.extui %0 : i1 to i32
    %c0_i32_0 = arith.constant 0 : i32
    %2 = arith.cmpi ne, %1, %c0_i32_0 : i32
    scf.if %2 {
      %cst_11 = arith.constant 0.000000e+00 : f32
      %14 = vector.broadcast %cst_11 : f32 to vector<8x16xf32>
      %c0_12 = arith.constant 0 : index
      %c0_13 = arith.constant 0 : index
      %15 = vector.load %arg7[%c0_12, %c0_13] : memref<8x16xf32, #tpu.memory_space<vmem>>, vector<8x16xf32>
      tpu.vector_store %arg7[%c0_12, %c0_13], %14 {strides = array<i32>} : memref<8x16xf32, #tpu.memory_space<vmem>>, vector<8x16xf32>,
    } else {
    }
    %c0 = arith.constant 0 : index
    %c0_1 = arith.constant 0 : index
    %3 = vector.load %arg3[%c0, %c0_1] : memref<8x32xbf16, #tpu.memory_space<vmem>>, vector<8x32xbf16>
    %cst = arith.constant 0.000000e+00 : bf16
    %4 = vector.broadcast %cst : bf16 to vector<8x32xbf16>
    %5 = arith.maximumf %3, %4 : vector<8x32xbf16>
    %c0_2 = arith.constant 0 : index
    %c0_3 = arith.constant 0 : index
    %6 = vector.load %arg7[%c0_2, %c0_3] : memref<8x16xf32, #tpu.memory_space<vmem>>, vector<8x16xf32>
    %c0_4 = arith.constant 0 : index
    %c0_5 = arith.constant 0 : index
    %7 = vector.load %arg4[%c0_4, %c0_5] : memref<32x16xbf16, #tpu.memory_space<vmem>>, vector<32x16xbf16>
    %cst_6 = arith.constant dense<0.000000e+00> : vector<8x16xf32>
    %8 = tpu.matmul %5, %7, %cst_6 {dimension_numbers = #tpu.dot_dimension_numbers<[1], [0], [0], [1], [0, 0, 1, 1], [], []>} : vector<8x32xbf16>, vector<32x16xbf16>, vector<8x16xf32> -> vector<8x16xf32>
    %9 = arith.addf %6, %8 : vector<8x16xf32>
    %c0_7 = arith.constant 0 : index
    %c0_8 = arith.constant 0 : index
    %10 = vector.load %arg7[%c0_7, %c0_8] : memref<8x16xf32, #tpu.memory_space<vmem>>, vector<8x16xf32>
    tpu.vector_store %arg7[%c0_7, %c0_8], %9 {strides = array<i32>} : memref<8x16xf32, #tpu.memory_space<vmem>>, vector<8x16xf32>,
    %c0_i32_9 = arith.constant 0 : i32
    %11 = arith.cmpi eq, %arg2, %c0_i32_9 : i32
    %12 = arith.extui %11 : i1 to i32
    %c0_i32_10 = arith.constant 0 : i32
    %13 = arith.cmpi ne, %12, %c0_i32_10 : i32
    scf.if %13 {
      %c0_11 = arith.constant 0 : index
      %c0_12 = arith.constant 0 : index
      %14 = vector.load %arg7[%c0_11, %c0_12] : memref<8x16xf32, #tpu.memory_space<vmem>>, vector<8x16xf32>
      %c0_13 = arith.constant 0 : index
      %c0_14 = arith.constant 0 : index
      %15 = vector.load %arg5[%c0_13, %c0_14] : memref<1x16xf32, #tpu.memory_space<vmem>>, vector<1x16xf32>
      %16 = vector.broadcast %15 : vector<1x16xf32> to vector<8x16xf32>
      %17 = arith.addf %14, %16 : vector<8x16xf32>
      %c0_15 = arith.constant 0 : index
      %c0_16 = arith.constant 0 : index
      %18 = vector.load %arg6[%c0_15, %c0_16] : memref<8x16xf32, #tpu.memory_space<vmem>>, vector<8x16xf32>
      tpu.vector_store %arg6[%c0_15, %c0_16], %17 {strides = array<i32>} : memref<8x16xf32, #tpu.memory_space<vmem>>, vector<8x16xf32>,
    } else {
    }
    return
  }
  func.func @transform_0(%arg0: i32, %arg1: i32, %arg2: i32) -> (i32, i32) {
    %c0_i32 = arith.constant 0 : i32
    return %arg0, %arg2 : i32, i32
  }
  func.func @transform_1(%arg0: i32, %arg1: i32, %arg2: i32) -> (i32, i32) {
    %c0_i32 = arith.constant 0 : i32
    return %arg2, %arg1 : i32, i32
  }
  func.func @transform_2(%arg0: i32, %arg1: i32, %arg2: i32) -> (i32, i32) {
    %c0_i32 = arith.constant 0 : i32
    %c0_i32_0 = arith.constant 0 : i32
    return %c0_i32, %arg1 : i32, i32
  }
  func.func @transform_3(%arg0: i32, %arg1: i32, %arg2: i32) -> (i32, i32) {
    %c0_i32 = arith.constant 0 : i32
    return %arg0, %arg1 : i32, i32
  }
}

module attributes {stable_mosaic.version = 11 : i64} {
  func.func @_bn_norm_kernel(%arg0: i32, %arg1: memref<1xf32, #tpu.memory_space<smem>>, %arg2: memref<2x16xf32, #tpu.memory_space<vmem>>, %arg3: memref<8x16xf32, #tpu.memory_space<vmem>>, %arg4: memref<8x16xf32, #tpu.memory_space<vmem>>) attributes {dimension_semantics = [#tpu.dimension_semantics<parallel>], iteration_bounds = array<i64: 1>, scalar_prefetch = 0 : i64, scratch_operands = 0 : i64, tpu.core_type = #tpu.core_type<tc>, window_params = [{transform_indices = @transform_0, window_bounds = array<i64: 1>}, {pipeline_mode = #tpu.pipeline_mode<synchronous>, transform_indices = @transform_1, window_bounds = array<i64: 2, 16>}, {transform_indices = @transform_2, window_bounds = array<i64: 8, 16>}, {transform_indices = @transform_3, window_bounds = array<i64: 8, 16>}]} {
    %c0 = arith.constant 0 : index
    %c0_0 = arith.constant 0 : index
    %0 = vector.load %arg2[%c0, %c0_0] : memref<2x16xf32, #tpu.memory_space<vmem>>, vector<1x16xf32>
    %cst = arith.constant 1.250000e-01 : f32
    %1 = vector.broadcast %cst : f32 to vector<1x16xf32>
    %2 = arith.mulf %0, %1 : vector<1x16xf32>
    %c1 = arith.constant 1 : index
    %c0_1 = arith.constant 0 : index
    %3 = vector.load %arg2[%c1, %c0_1] : memref<2x16xf32, #tpu.memory_space<vmem>>, vector<1x16xf32>
    %cst_2 = arith.constant 1.250000e-01 : f32
    %4 = vector.broadcast %cst_2 : f32 to vector<1x16xf32>
    %5 = arith.mulf %3, %4 : vector<1x16xf32>
    %6 = arith.mulf %2, %2 : vector<1x16xf32>
    %7 = arith.subf %5, %6 : vector<1x16xf32>
    %cst_3 = arith.constant 9.99999974E-6 : f32
    %8 = vector.broadcast %cst_3 : f32 to vector<1x16xf32>
    %9 = arith.addf %7, %8 : vector<1x16xf32>
    %10 = math.rsqrt %9 : vector<1x16xf32>
    %c0_4 = arith.constant 0 : index
    %c0_5 = arith.constant 0 : index
    %11 = vector.load %arg3[%c0_4, %c0_5] : memref<8x16xf32, #tpu.memory_space<vmem>>, vector<8x16xf32>
    %12 = vector.broadcast %2 : vector<1x16xf32> to vector<8x16xf32>
    %13 = arith.subf %11, %12 : vector<8x16xf32>
    %14 = vector.broadcast %10 : vector<1x16xf32> to vector<8x16xf32>
    %15 = arith.mulf %13, %14 : vector<8x16xf32>
    %c0_6 = arith.constant 0 : index
    %16 = memref.load %arg1[%c0_6] : memref<1xf32, #tpu.memory_space<smem>>
    %17 = vector.broadcast %16 : f32 to vector<8x16xf32>
    %18 = arith.mulf %15, %17 : vector<8x16xf32>
    %c0_7 = arith.constant 0 : index
    %c0_8 = arith.constant 0 : index
    %19 = vector.load %arg4[%c0_7, %c0_8] : memref<8x16xf32, #tpu.memory_space<vmem>>, vector<8x16xf32>
    tpu.vector_store %arg4[%c0_7, %c0_8], %18 {strides = array<i32>} : memref<8x16xf32, #tpu.memory_space<vmem>>, vector<8x16xf32>,
    return
  }
  func.func @transform_0(%arg0: i32) -> i32 {
    %c0_i32 = arith.constant 0 : i32
    %c0_i32_0 = arith.constant 0 : i32
    return %c0_i32 : i32
  }
  func.func @transform_1(%arg0: i32) -> (i32, i32) {
    %c0_i32 = arith.constant 0 : i32
    %c0_i32_0 = arith.constant 0 : i32
    %c0_i32_1 = arith.constant 0 : i32
    return %c0_i32, %c0_i32_0 : i32, i32
  }
  func.func @transform_2(%arg0: i32) -> (i32, i32) {
    %c0_i32 = arith.constant 0 : i32
    %c0_i32_0 = arith.constant 0 : i32
    return %arg0, %c0_i32 : i32, i32
  }
  func.func @transform_3(%arg0: i32) -> (i32, i32) {
    %c0_i32 = arith.constant 0 : i32
    %c0_i32_0 = arith.constant 0 : i32
    return %arg0, %c0_i32 : i32, i32
  }
}

module attributes {stable_mosaic.version = 11 : i64} {
  func.func @_bn_stats_kernel(%arg0: i32, %arg1: memref<8x16xf32, #tpu.memory_space<vmem>>, %arg2: memref<2x16xf32, #tpu.memory_space<vmem>>) attributes {dimension_semantics = [#tpu.dimension_semantics<arbitrary>], iteration_bounds = array<i64: 1>, scalar_prefetch = 0 : i64, scratch_operands = 0 : i64, tpu.core_type = #tpu.core_type<tc>, window_params = [{transform_indices = @transform_0, window_bounds = array<i64: 8, 16>}, {pipeline_mode = #tpu.pipeline_mode<synchronous>, transform_indices = @transform_1, window_bounds = array<i64: 2, 16>}]} {
    %c0_i32 = arith.constant 0 : i32
    %0 = arith.cmpi eq, %arg0, %c0_i32 : i32
    %1 = arith.extui %0 : i1 to i32
    %c0_i32_0 = arith.constant 0 : i32
    %2 = arith.cmpi ne, %1, %c0_i32_0 : i32
    scf.if %2 {
      %cst_7 = arith.constant 0.000000e+00 : f32
      %13 = vector.broadcast %cst_7 : f32 to vector<2x16xf32>
      %c0_8 = arith.constant 0 : index
      %c0_9 = arith.constant 0 : index
      %14 = vector.load %arg2[%c0_8, %c0_9] : memref<2x16xf32, #tpu.memory_space<vmem>>, vector<2x16xf32>
      tpu.vector_store %arg2[%c0_8, %c0_9], %13 {strides = array<i32>} : memref<2x16xf32, #tpu.memory_space<vmem>>, vector<2x16xf32>,
    } else {
    }
    %c0 = arith.constant 0 : index
    %c0_1 = arith.constant 0 : index
    %3 = vector.load %arg1[%c0, %c0_1] : memref<8x16xf32, #tpu.memory_space<vmem>>, vector<8x16xf32>
    %cst = arith.constant dense<0.000000e+00> : vector<16xf32>
    %4 = vector.multi_reduction <add>, %3, %cst [0] : vector<8x16xf32> to vector<16xf32>
    %5 = vector.shape_cast %4 : vector<16xf32> to vector<1x16xf32>
    %6 = arith.mulf %3, %3 : vector<8x16xf32>
    %cst_2 = arith.constant dense<0.000000e+00> : vector<16xf32>
    %7 = vector.multi_reduction <add>, %6, %cst_2 [0] : vector<8x16xf32> to vector<16xf32>
    %8 = vector.shape_cast %7 : vector<16xf32> to vector<1x16xf32>
    %c0_3 = arith.constant 0 : index
    %c0_4 = arith.constant 0 : index
    %9 = vector.load %arg2[%c0_3, %c0_4] : memref<2x16xf32, #tpu.memory_space<vmem>>, vector<2x16xf32>
    %10 = tpu.concatenate %5, %8 in 0 : vector<1x16xf32>, vector<1x16xf32> -> vector<2x16xf32>
    %11 = arith.addf %9, %10 : vector<2x16xf32>
    %c0_5 = arith.constant 0 : index
    %c0_6 = arith.constant 0 : index
    %12 = vector.load %arg2[%c0_5, %c0_6] : memref<2x16xf32, #tpu.memory_space<vmem>>, vector<2x16xf32>
    tpu.vector_store %arg2[%c0_5, %c0_6], %11 {strides = array<i32>} : memref<2x16xf32, #tpu.memory_space<vmem>>, vector<2x16xf32>,
    return
  }
  func.func @transform_0(%arg0: i32) -> (i32, i32) {
    %c0_i32 = arith.constant 0 : i32
    %c0_i32_0 = arith.constant 0 : i32
    return %arg0, %c0_i32 : i32, i32
  }
  func.func @transform_1(%arg0: i32) -> (i32, i32) {
    %c0_i32 = arith.constant 0 : i32
    %c0_i32_0 = arith.constant 0 : i32
    %c0_i32_1 = arith.constant 0 : i32
    return %c0_i32, %c0_i32_0 : i32, i32
  }
}

module attributes {stable_mosaic.version = 11 : i64} {
  func.func @_matmul_kernel(%arg0: i32, %arg1: i32, %arg2: i32, %arg3: memref<8x144xbf16, #tpu.memory_space<vmem>>, %arg4: memref<144x16xbf16, #tpu.memory_space<vmem>>, %arg5: memref<1x16xf32, #tpu.memory_space<vmem>>, %arg6: memref<8x16xf32, #tpu.memory_space<vmem>>, %arg7: memref<8x16xf32, #tpu.memory_space<vmem>>) attributes {dimension_semantics = [#tpu.dimension_semantics<parallel>, #tpu.dimension_semantics<parallel>, #tpu.dimension_semantics<arbitrary>], iteration_bounds = array<i64: 1, 1, 1>, scalar_prefetch = 0 : i64, scratch_operands = 1 : i64, tpu.core_type = #tpu.core_type<tc>, window_params = [{transform_indices = @transform_0, window_bounds = array<i64: 8, 144>}, {transform_indices = @transform_1, window_bounds = array<i64: 144, 16>}, {transform_indices = @transform_2, window_bounds = array<i64: 1, 16>}, {transform_indices = @transform_3, window_bounds = array<i64: 8, 16>}]} {
    %c0_i32 = arith.constant 0 : i32
    %0 = arith.cmpi eq, %arg2, %c0_i32 : i32
    %1 = arith.extui %0 : i1 to i32
    %c0_i32_0 = arith.constant 0 : i32
    %2 = arith.cmpi ne, %1, %c0_i32_0 : i32
    scf.if %2 {
      %cst_11 = arith.constant 0.000000e+00 : f32
      %14 = vector.broadcast %cst_11 : f32 to vector<8x16xf32>
      %c0_12 = arith.constant 0 : index
      %c0_13 = arith.constant 0 : index
      %15 = vector.load %arg7[%c0_12, %c0_13] : memref<8x16xf32, #tpu.memory_space<vmem>>, vector<8x16xf32>
      tpu.vector_store %arg7[%c0_12, %c0_13], %14 {strides = array<i32>} : memref<8x16xf32, #tpu.memory_space<vmem>>, vector<8x16xf32>,
    } else {
    }
    %c0 = arith.constant 0 : index
    %c0_1 = arith.constant 0 : index
    %3 = vector.load %arg3[%c0, %c0_1] : memref<8x144xbf16, #tpu.memory_space<vmem>>, vector<8x144xbf16>
    %cst = arith.constant 0.000000e+00 : bf16
    %4 = vector.broadcast %cst : bf16 to vector<8x144xbf16>
    %5 = arith.maximumf %3, %4 : vector<8x144xbf16>
    %c0_2 = arith.constant 0 : index
    %c0_3 = arith.constant 0 : index
    %6 = vector.load %arg7[%c0_2, %c0_3] : memref<8x16xf32, #tpu.memory_space<vmem>>, vector<8x16xf32>
    %c0_4 = arith.constant 0 : index
    %c0_5 = arith.constant 0 : index
    %7 = vector.load %arg4[%c0_4, %c0_5] : memref<144x16xbf16, #tpu.memory_space<vmem>>, vector<144x16xbf16>
    %cst_6 = arith.constant dense<0.000000e+00> : vector<8x16xf32>
    %8 = tpu.matmul %5, %7, %cst_6 {dimension_numbers = #tpu.dot_dimension_numbers<[1], [0], [0], [1], [0, 0, 1, 1], [], []>} : vector<8x144xbf16>, vector<144x16xbf16>, vector<8x16xf32> -> vector<8x16xf32>
    %9 = arith.addf %6, %8 : vector<8x16xf32>
    %c0_7 = arith.constant 0 : index
    %c0_8 = arith.constant 0 : index
    %10 = vector.load %arg7[%c0_7, %c0_8] : memref<8x16xf32, #tpu.memory_space<vmem>>, vector<8x16xf32>
    tpu.vector_store %arg7[%c0_7, %c0_8], %9 {strides = array<i32>} : memref<8x16xf32, #tpu.memory_space<vmem>>, vector<8x16xf32>,
    %c0_i32_9 = arith.constant 0 : i32
    %11 = arith.cmpi eq, %arg2, %c0_i32_9 : i32
    %12 = arith.extui %11 : i1 to i32
    %c0_i32_10 = arith.constant 0 : i32
    %13 = arith.cmpi ne, %12, %c0_i32_10 : i32
    scf.if %13 {
      %c0_11 = arith.constant 0 : index
      %c0_12 = arith.constant 0 : index
      %14 = vector.load %arg7[%c0_11, %c0_12] : memref<8x16xf32, #tpu.memory_space<vmem>>, vector<8x16xf32>
      %c0_13 = arith.constant 0 : index
      %c0_14 = arith.constant 0 : index
      %15 = vector.load %arg5[%c0_13, %c0_14] : memref<1x16xf32, #tpu.memory_space<vmem>>, vector<1x16xf32>
      %16 = vector.broadcast %15 : vector<1x16xf32> to vector<8x16xf32>
      %17 = arith.addf %14, %16 : vector<8x16xf32>
      %c0_15 = arith.constant 0 : index
      %c0_16 = arith.constant 0 : index
      %18 = vector.load %arg6[%c0_15, %c0_16] : memref<8x16xf32, #tpu.memory_space<vmem>>, vector<8x16xf32>
      tpu.vector_store %arg6[%c0_15, %c0_16], %17 {strides = array<i32>} : memref<8x16xf32, #tpu.memory_space<vmem>>, vector<8x16xf32>,
    } else {
    }
    return
  }
  func.func @transform_0(%arg0: i32, %arg1: i32, %arg2: i32) -> (i32, i32) {
    %c0_i32 = arith.constant 0 : i32
    return %arg0, %arg2 : i32, i32
  }
  func.func @transform_1(%arg0: i32, %arg1: i32, %arg2: i32) -> (i32, i32) {
    %c0_i32 = arith.constant 0 : i32
    return %arg2, %arg1 : i32, i32
  }
  func.func @transform_2(%arg0: i32, %arg1: i32, %arg2: i32) -> (i32, i32) {
    %c0_i32 = arith.constant 0 : i32
    %c0_i32_0 = arith.constant 0 : i32
    return %c0_i32, %arg1 : i32, i32
  }
  func.func @transform_3(%arg0: i32, %arg1: i32, %arg2: i32) -> (i32, i32) {
    %c0_i32 = arith.constant 0 : i32
    return %arg0, %arg1 : i32, i32
  }
}

module attributes {stable_mosaic.version = 11 : i64} {
  func.func @_bn_norm_kernel(%arg0: i32, %arg1: memref<3xf32, #tpu.memory_space<smem>>, %arg2: memref<2x16xf32, #tpu.memory_space<vmem>>, %arg3: memref<8x16xf32, #tpu.memory_space<vmem>>, %arg4: memref<8x16xf32, #tpu.memory_space<vmem>>, %arg5: memref<8x16xf32, #tpu.memory_space<vmem>>, %arg6: memref<8x16xf32, #tpu.memory_space<vmem>>) attributes {dimension_semantics = [#tpu.dimension_semantics<parallel>], iteration_bounds = array<i64: 1>, scalar_prefetch = 0 : i64, scratch_operands = 0 : i64, tpu.core_type = #tpu.core_type<tc>, window_params = [{transform_indices = @transform_0, window_bounds = array<i64: 3>}, {pipeline_mode = #tpu.pipeline_mode<synchronous>, transform_indices = @transform_1, window_bounds = array<i64: 2, 16>}, {transform_indices = @transform_2, window_bounds = array<i64: 8, 16>}, {transform_indices = @transform_3, window_bounds = array<i64: 8, 16>}, {transform_indices = @transform_4, window_bounds = array<i64: 8, 16>}, {transform_indices = @transform_5, window_bounds = array<i64: 8, 16>}]} {
    %c0 = arith.constant 0 : index
    %c0_0 = arith.constant 0 : index
    %0 = vector.load %arg2[%c0, %c0_0] : memref<2x16xf32, #tpu.memory_space<vmem>>, vector<1x16xf32>
    %cst = arith.constant 1.250000e-01 : f32
    %1 = vector.broadcast %cst : f32 to vector<1x16xf32>
    %2 = arith.mulf %0, %1 : vector<1x16xf32>
    %c1 = arith.constant 1 : index
    %c0_1 = arith.constant 0 : index
    %3 = vector.load %arg2[%c1, %c0_1] : memref<2x16xf32, #tpu.memory_space<vmem>>, vector<1x16xf32>
    %cst_2 = arith.constant 1.250000e-01 : f32
    %4 = vector.broadcast %cst_2 : f32 to vector<1x16xf32>
    %5 = arith.mulf %3, %4 : vector<1x16xf32>
    %6 = arith.mulf %2, %2 : vector<1x16xf32>
    %7 = arith.subf %5, %6 : vector<1x16xf32>
    %cst_3 = arith.constant 9.99999974E-6 : f32
    %8 = vector.broadcast %cst_3 : f32 to vector<1x16xf32>
    %9 = arith.addf %7, %8 : vector<1x16xf32>
    %10 = math.rsqrt %9 : vector<1x16xf32>
    %c0_4 = arith.constant 0 : index
    %c0_5 = arith.constant 0 : index
    %11 = vector.load %arg3[%c0_4, %c0_5] : memref<8x16xf32, #tpu.memory_space<vmem>>, vector<8x16xf32>
    %12 = vector.broadcast %2 : vector<1x16xf32> to vector<8x16xf32>
    %13 = arith.subf %11, %12 : vector<8x16xf32>
    %14 = vector.broadcast %10 : vector<1x16xf32> to vector<8x16xf32>
    %15 = arith.mulf %13, %14 : vector<8x16xf32>
    %c0_6 = arith.constant 0 : index
    %16 = memref.load %arg1[%c0_6] : memref<3xf32, #tpu.memory_space<smem>>
    %17 = vector.broadcast %16 : f32 to vector<8x16xf32>
    %18 = arith.mulf %15, %17 : vector<8x16xf32>
    %c0_7 = arith.constant 0 : index
    %c0_8 = arith.constant 0 : index
    %19 = vector.load %arg4[%c0_7, %c0_8] : memref<8x16xf32, #tpu.memory_space<vmem>>, vector<8x16xf32>
    %c1_9 = arith.constant 1 : index
    %20 = memref.load %arg1[%c1_9] : memref<3xf32, #tpu.memory_space<smem>>
    %21 = vector.broadcast %20 : f32 to vector<8x16xf32>
    %22 = arith.mulf %19, %21 : vector<8x16xf32>
    %23 = arith.addf %18, %22 : vector<8x16xf32>
    %c0_10 = arith.constant 0 : index
    %c0_11 = arith.constant 0 : index
    %24 = vector.load %arg5[%c0_10, %c0_11] : memref<8x16xf32, #tpu.memory_space<vmem>>, vector<8x16xf32>
    %c2 = arith.constant 2 : index
    %25 = memref.load %arg1[%c2] : memref<3xf32, #tpu.memory_space<smem>>
    %26 = vector.broadcast %25 : f32 to vector<8x16xf32>
    %27 = arith.mulf %24, %26 : vector<8x16xf32>
    %28 = arith.addf %23, %27 : vector<8x16xf32>
    %c0_12 = arith.constant 0 : index
    %c0_13 = arith.constant 0 : index
    %29 = vector.load %arg6[%c0_12, %c0_13] : memref<8x16xf32, #tpu.memory_space<vmem>>, vector<8x16xf32>
    tpu.vector_store %arg6[%c0_12, %c0_13], %28 {strides = array<i32>} : memref<8x16xf32, #tpu.memory_space<vmem>>, vector<8x16xf32>,
    return
  }
  func.func @transform_0(%arg0: i32) -> i32 {
    %c0_i32 = arith.constant 0 : i32
    %c0_i32_0 = arith.constant 0 : i32
    return %c0_i32 : i32
  }
  func.func @transform_1(%arg0: i32) -> (i32, i32) {
    %c0_i32 = arith.constant 0 : i32
    %c0_i32_0 = arith.constant 0 : i32
    %c0_i32_1 = arith.constant 0 : i32
    return %c0_i32, %c0_i32_0 : i32, i32
  }
  func.func @transform_2(%arg0: i32) -> (i32, i32) {
    %c0_i32 = arith.constant 0 : i32
    %c0_i32_0 = arith.constant 0 : i32
    return %arg0, %c0_i32 : i32, i32
  }
  func.func @transform_3(%arg0: i32) -> (i32, i32) {
    %c0_i32 = arith.constant 0 : i32
    %c0_i32_0 = arith.constant 0 : i32
    return %arg0, %c0_i32 : i32, i32
  }
  func.func @transform_4(%arg0: i32) -> (i32, i32) {
    %c0_i32 = arith.constant 0 : i32
    %c0_i32_0 = arith.constant 0 : i32
    return %arg0, %c0_i32 : i32, i32
  }
  func.func @transform_5(%arg0: i32) -> (i32, i32) {
    %c0_i32 = arith.constant 0 : i32
    %c0_i32_0 = arith.constant 0 : i32
    return %arg0, %c0_i32 : i32, i32
  }
}

module attributes {stable_mosaic.version = 11 : i64} {
  func.func @_matmul_kernel(%arg0: i32, %arg1: i32, %arg2: i32, %arg3: memref<8x16xbf16, #tpu.memory_space<vmem>>, %arg4: memref<16x16xbf16, #tpu.memory_space<vmem>>, %arg5: memref<1x16xf32, #tpu.memory_space<vmem>>, %arg6: memref<8x16xf32, #tpu.memory_space<vmem>>, %arg7: memref<8x16xf32, #tpu.memory_space<vmem>>) attributes {dimension_semantics = [#tpu.dimension_semantics<parallel>, #tpu.dimension_semantics<parallel>, #tpu.dimension_semantics<arbitrary>], iteration_bounds = array<i64: 1, 1, 1>, scalar_prefetch = 0 : i64, scratch_operands = 1 : i64, tpu.core_type = #tpu.core_type<tc>, window_params = [{transform_indices = @transform_0, window_bounds = array<i64: 8, 16>}, {transform_indices = @transform_1, window_bounds = array<i64: 16, 16>}, {transform_indices = @transform_2, window_bounds = array<i64: 1, 16>}, {transform_indices = @transform_3, window_bounds = array<i64: 8, 16>}]} {
    %c0_i32 = arith.constant 0 : i32
    %0 = arith.cmpi eq, %arg2, %c0_i32 : i32
    %1 = arith.extui %0 : i1 to i32
    %c0_i32_0 = arith.constant 0 : i32
    %2 = arith.cmpi ne, %1, %c0_i32_0 : i32
    scf.if %2 {
      %cst_11 = arith.constant 0.000000e+00 : f32
      %14 = vector.broadcast %cst_11 : f32 to vector<8x16xf32>
      %c0_12 = arith.constant 0 : index
      %c0_13 = arith.constant 0 : index
      %15 = vector.load %arg7[%c0_12, %c0_13] : memref<8x16xf32, #tpu.memory_space<vmem>>, vector<8x16xf32>
      tpu.vector_store %arg7[%c0_12, %c0_13], %14 {strides = array<i32>} : memref<8x16xf32, #tpu.memory_space<vmem>>, vector<8x16xf32>,
    } else {
    }
    %c0 = arith.constant 0 : index
    %c0_1 = arith.constant 0 : index
    %3 = vector.load %arg3[%c0, %c0_1] : memref<8x16xbf16, #tpu.memory_space<vmem>>, vector<8x16xbf16>
    %cst = arith.constant 0.000000e+00 : bf16
    %4 = vector.broadcast %cst : bf16 to vector<8x16xbf16>
    %5 = arith.maximumf %3, %4 : vector<8x16xbf16>
    %c0_2 = arith.constant 0 : index
    %c0_3 = arith.constant 0 : index
    %6 = vector.load %arg7[%c0_2, %c0_3] : memref<8x16xf32, #tpu.memory_space<vmem>>, vector<8x16xf32>
    %c0_4 = arith.constant 0 : index
    %c0_5 = arith.constant 0 : index
    %7 = vector.load %arg4[%c0_4, %c0_5] : memref<16x16xbf16, #tpu.memory_space<vmem>>, vector<16x16xbf16>
    %cst_6 = arith.constant dense<0.000000e+00> : vector<8x16xf32>
    %8 = tpu.matmul %5, %7, %cst_6 {dimension_numbers = #tpu.dot_dimension_numbers<[1], [0], [0], [1], [0, 0, 1, 1], [], []>} : vector<8x16xbf16>, vector<16x16xbf16>, vector<8x16xf32> -> vector<8x16xf32>
    %9 = arith.addf %6, %8 : vector<8x16xf32>
    %c0_7 = arith.constant 0 : index
    %c0_8 = arith.constant 0 : index
    %10 = vector.load %arg7[%c0_7, %c0_8] : memref<8x16xf32, #tpu.memory_space<vmem>>, vector<8x16xf32>
    tpu.vector_store %arg7[%c0_7, %c0_8], %9 {strides = array<i32>} : memref<8x16xf32, #tpu.memory_space<vmem>>, vector<8x16xf32>,
    %c0_i32_9 = arith.constant 0 : i32
    %11 = arith.cmpi eq, %arg2, %c0_i32_9 : i32
    %12 = arith.extui %11 : i1 to i32
    %c0_i32_10 = arith.constant 0 : i32
    %13 = arith.cmpi ne, %12, %c0_i32_10 : i32
    scf.if %13 {
      %c0_11 = arith.constant 0 : index
      %c0_12 = arith.constant 0 : index
      %14 = vector.load %arg7[%c0_11, %c0_12] : memref<8x16xf32, #tpu.memory_space<vmem>>, vector<8x16xf32>
      %c0_13 = arith.constant 0 : index
      %c0_14 = arith.constant 0 : index
      %15 = vector.load %arg5[%c0_13, %c0_14] : memref<1x16xf32, #tpu.memory_space<vmem>>, vector<1x16xf32>
      %16 = vector.broadcast %15 : vector<1x16xf32> to vector<8x16xf32>
      %17 = arith.addf %14, %16 : vector<8x16xf32>
      %c0_15 = arith.constant 0 : index
      %c0_16 = arith.constant 0 : index
      %18 = vector.load %arg6[%c0_15, %c0_16] : memref<8x16xf32, #tpu.memory_space<vmem>>, vector<8x16xf32>
      tpu.vector_store %arg6[%c0_15, %c0_16], %17 {strides = array<i32>} : memref<8x16xf32, #tpu.memory_space<vmem>>, vector<8x16xf32>,
    } else {
    }
    return
  }
  func.func @transform_0(%arg0: i32, %arg1: i32, %arg2: i32) -> (i32, i32) {
    %c0_i32 = arith.constant 0 : i32
    return %arg0, %arg2 : i32, i32
  }
  func.func @transform_1(%arg0: i32, %arg1: i32, %arg2: i32) -> (i32, i32) {
    %c0_i32 = arith.constant 0 : i32
    return %arg2, %arg1 : i32, i32
  }
  func.func @transform_2(%arg0: i32, %arg1: i32, %arg2: i32) -> (i32, i32) {
    %c0_i32 = arith.constant 0 : i32
    %c0_i32_0 = arith.constant 0 : i32
    return %c0_i32, %arg1 : i32, i32
  }
  func.func @transform_3(%arg0: i32, %arg1: i32, %arg2: i32) -> (i32, i32) {
    %c0_i32 = arith.constant 0 : i32
    return %arg0, %arg1 : i32, i32
  }
}

module attributes {stable_mosaic.version = 11 : i64} {
  func.func @_bn_norm_kernel(%arg0: i32, %arg1: memref<1xf32, #tpu.memory_space<smem>>, %arg2: memref<2x16xf32, #tpu.memory_space<vmem>>, %arg3: memref<8x16xf32, #tpu.memory_space<vmem>>, %arg4: memref<8x16xf32, #tpu.memory_space<vmem>>) attributes {dimension_semantics = [#tpu.dimension_semantics<parallel>], iteration_bounds = array<i64: 1>, scalar_prefetch = 0 : i64, scratch_operands = 0 : i64, tpu.core_type = #tpu.core_type<tc>, window_params = [{transform_indices = @transform_0, window_bounds = array<i64: 1>}, {pipeline_mode = #tpu.pipeline_mode<synchronous>, transform_indices = @transform_1, window_bounds = array<i64: 2, 16>}, {transform_indices = @transform_2, window_bounds = array<i64: 8, 16>}, {transform_indices = @transform_3, window_bounds = array<i64: 8, 16>}]} {
    %c0 = arith.constant 0 : index
    %c0_0 = arith.constant 0 : index
    %0 = vector.load %arg2[%c0, %c0_0] : memref<2x16xf32, #tpu.memory_space<vmem>>, vector<1x16xf32>
    %cst = arith.constant 1.250000e-01 : f32
    %1 = vector.broadcast %cst : f32 to vector<1x16xf32>
    %2 = arith.mulf %0, %1 : vector<1x16xf32>
    %c1 = arith.constant 1 : index
    %c0_1 = arith.constant 0 : index
    %3 = vector.load %arg2[%c1, %c0_1] : memref<2x16xf32, #tpu.memory_space<vmem>>, vector<1x16xf32>
    %cst_2 = arith.constant 1.250000e-01 : f32
    %4 = vector.broadcast %cst_2 : f32 to vector<1x16xf32>
    %5 = arith.mulf %3, %4 : vector<1x16xf32>
    %6 = arith.mulf %2, %2 : vector<1x16xf32>
    %7 = arith.subf %5, %6 : vector<1x16xf32>
    %cst_3 = arith.constant 9.99999974E-6 : f32
    %8 = vector.broadcast %cst_3 : f32 to vector<1x16xf32>
    %9 = arith.addf %7, %8 : vector<1x16xf32>
    %10 = math.rsqrt %9 : vector<1x16xf32>
    %c0_4 = arith.constant 0 : index
    %c0_5 = arith.constant 0 : index
    %11 = vector.load %arg3[%c0_4, %c0_5] : memref<8x16xf32, #tpu.memory_space<vmem>>, vector<8x16xf32>
    %12 = vector.broadcast %2 : vector<1x16xf32> to vector<8x16xf32>
    %13 = arith.subf %11, %12 : vector<8x16xf32>
    %14 = vector.broadcast %10 : vector<1x16xf32> to vector<8x16xf32>
    %15 = arith.mulf %13, %14 : vector<8x16xf32>
    %cst_6 = arith.constant 0.000000e+00 : f32
    %16 = vector.broadcast %cst_6 : f32 to vector<8x16xf32>
    %17 = arith.maximumf %15, %16 : vector<8x16xf32>
    %c0_7 = arith.constant 0 : index
    %18 = memref.load %arg1[%c0_7] : memref<1xf32, #tpu.memory_space<smem>>
    %19 = vector.broadcast %18 : f32 to vector<8x16xf32>
    %20 = arith.mulf %17, %19 : vector<8x16xf32>
    %c0_8 = arith.constant 0 : index
    %c0_9 = arith.constant 0 : index
    %21 = vector.load %arg4[%c0_8, %c0_9] : memref<8x16xf32, #tpu.memory_space<vmem>>, vector<8x16xf32>
    tpu.vector_store %arg4[%c0_8, %c0_9], %20 {strides = array<i32>} : memref<8x16xf32, #tpu.memory_space<vmem>>, vector<8x16xf32>,
    return
  }
  func.func @transform_0(%arg0: i32) -> i32 {
    %c0_i32 = arith.constant 0 : i32
    %c0_i32_0 = arith.constant 0 : i32
    return %c0_i32 : i32
  }
  func.func @transform_1(%arg0: i32) -> (i32, i32) {
    %c0_i32 = arith.constant 0 : i32
    %c0_i32_0 = arith.constant 0 : i32
    %c0_i32_1 = arith.constant 0 : i32
    return %c0_i32, %c0_i32_0 : i32, i32
  }
  func.func @transform_2(%arg0: i32) -> (i32, i32) {
    %c0_i32 = arith.constant 0 : i32
    %c0_i32_0 = arith.constant 0 : i32
    return %arg0, %c0_i32 : i32, i32
  }
  func.func @transform_3(%arg0: i32) -> (i32, i32) {
    %c0_i32 = arith.constant 0 : i32
    %c0_i32_0 = arith.constant 0 : i32
    return %arg0, %c0_i32 : i32, i32
  }
}

module attributes {stable_mosaic.version = 11 : i64} {
  func.func @_gap_kernel(%arg0: i32, %arg1: memref<2x8x16xf32, #tpu.memory_space<vmem>>, %arg2: memref<2x16xf32, #tpu.memory_space<vmem>>) attributes {dimension_semantics = [#tpu.dimension_semantics<arbitrary>], iteration_bounds = array<i64: 1>, scalar_prefetch = 0 : i64, scratch_operands = 0 : i64, tpu.core_type = #tpu.core_type<tc>, window_params = [{transform_indices = @transform_0, window_bounds = array<i64: 2, 8, 16>}, {pipeline_mode = #tpu.pipeline_mode<synchronous>, transform_indices = @transform_1, window_bounds = array<i64: 2, 16>}]} {
    %c0_i32 = arith.constant 0 : i32
    %0 = arith.cmpi eq, %arg0, %c0_i32 : i32
    %1 = arith.extui %0 : i1 to i32
    %c0_i32_0 = arith.constant 0 : i32
    %2 = arith.cmpi ne, %1, %c0_i32_0 : i32
    scf.if %2 {
      %cst_8 = arith.constant 0.000000e+00 : f32
      %10 = vector.broadcast %cst_8 : f32 to vector<2x16xf32>
      %c0_9 = arith.constant 0 : index
      %c0_10 = arith.constant 0 : index
      %11 = vector.load %arg2[%c0_9, %c0_10] : memref<2x16xf32, #tpu.memory_space<vmem>>, vector<2x16xf32>
      tpu.vector_store %arg2[%c0_9, %c0_10], %10 {strides = array<i32>} : memref<2x16xf32, #tpu.memory_space<vmem>>, vector<2x16xf32>,
    } else {
    }
    %c0 = arith.constant 0 : index
    %c0_1 = arith.constant 0 : index
    %3 = vector.load %arg2[%c0, %c0_1] : memref<2x16xf32, #tpu.memory_space<vmem>>, vector<2x16xf32>
    %c0_2 = arith.constant 0 : index
    %c0_3 = arith.constant 0 : index
    %c0_4 = arith.constant 0 : index
    %4 = vector.load %arg1[%c0_2, %c0_3, %c0_4] : memref<2x8x16xf32, #tpu.memory_space<vmem>>, vector<2x8x16xf32>
    %cst = arith.constant dense<0.000000e+00> : vector<2x16xf32>
    %5 = vector.multi_reduction <add>, %4, %cst [1] : vector<2x8x16xf32> to vector<2x16xf32>
    %cst_5 = arith.constant 2.500000e-01 : f32
    %6 = vector.broadcast %cst_5 : f32 to vector<2x16xf32>
    %7 = arith.mulf %5, %6 : vector<2x16xf32>
    %8 = arith.addf %3, %7 : vector<2x16xf32>
    %c0_6 = arith.constant 0 : index
    %c0_7 = arith.constant 0 : index
    %9 = vector.load %arg2[%c0_6, %c0_7] : memref<2x16xf32, #tpu.memory_space<vmem>>, vector<2x16xf32>
    tpu.vector_store %arg2[%c0_6, %c0_7], %8 {strides = array<i32>} : memref<2x16xf32, #tpu.memory_space<vmem>>, vector<2x16xf32>,
    return
  }
  func.func @transform_0(%arg0: i32) -> (i32, i32, i32) {
    %c0_i32 = arith.constant 0 : i32
    %c0_i32_0 = arith.constant 0 : i32
    %c0_i32_1 = arith.constant 0 : i32
    return %c0_i32, %arg0, %c0_i32_0 : i32, i32, i32
  }
  func.func @transform_1(%arg0: i32) -> (i32, i32) {
    %c0_i32 = arith.constant 0 : i32
    %c0_i32_0 = arith.constant 0 : i32
    %c0_i32_1 = arith.constant 0 : i32
    return %c0_i32, %c0_i32_0 : i32, i32
  }
}

module attributes {stable_mosaic.version = 11 : i64} {
  func.func @_matmul_kernel(%arg0: i32, %arg1: i32, %arg2: i32, %arg3: memref<8x16xbf16, #tpu.memory_space<vmem>>, %arg4: memref<16x10xbf16, #tpu.memory_space<vmem>>, %arg5: memref<1x10xf32, #tpu.memory_space<vmem>>, %arg6: memref<8x10xf32, #tpu.memory_space<vmem>>, %arg7: memref<8x10xf32, #tpu.memory_space<vmem>>) attributes {dimension_semantics = [#tpu.dimension_semantics<parallel>, #tpu.dimension_semantics<parallel>, #tpu.dimension_semantics<arbitrary>], iteration_bounds = array<i64: 1, 1, 1>, scalar_prefetch = 0 : i64, scratch_operands = 1 : i64, tpu.core_type = #tpu.core_type<tc>, window_params = [{transform_indices = @transform_0, window_bounds = array<i64: 8, 16>}, {transform_indices = @transform_1, window_bounds = array<i64: 16, 10>}, {transform_indices = @transform_2, window_bounds = array<i64: 1, 10>}, {transform_indices = @transform_3, window_bounds = array<i64: 8, 10>}]} {
    %c0_i32 = arith.constant 0 : i32
    %0 = arith.cmpi eq, %arg2, %c0_i32 : i32
    %1 = arith.extui %0 : i1 to i32
    %c0_i32_0 = arith.constant 0 : i32
    %2 = arith.cmpi ne, %1, %c0_i32_0 : i32
    scf.if %2 {
      %cst_10 = arith.constant 0.000000e+00 : f32
      %12 = vector.broadcast %cst_10 : f32 to vector<8x10xf32>
      %c0_11 = arith.constant 0 : index
      %c0_12 = arith.constant 0 : index
      %13 = vector.load %arg7[%c0_11, %c0_12] : memref<8x10xf32, #tpu.memory_space<vmem>>, vector<8x10xf32>
      tpu.vector_store %arg7[%c0_11, %c0_12], %12 {strides = array<i32>} : memref<8x10xf32, #tpu.memory_space<vmem>>, vector<8x10xf32>,
    } else {
    }
    %c0 = arith.constant 0 : index
    %c0_1 = arith.constant 0 : index
    %3 = vector.load %arg3[%c0, %c0_1] : memref<8x16xbf16, #tpu.memory_space<vmem>>, vector<8x16xbf16>
    %c0_2 = arith.constant 0 : index
    %c0_3 = arith.constant 0 : index
    %4 = vector.load %arg7[%c0_2, %c0_3] : memref<8x10xf32, #tpu.memory_space<vmem>>, vector<8x10xf32>
    %c0_4 = arith.constant 0 : index
    %c0_5 = arith.constant 0 : index
    %5 = vector.load %arg4[%c0_4, %c0_5] : memref<16x10xbf16, #tpu.memory_space<vmem>>, vector<16x10xbf16>
    %cst = arith.constant dense<0.000000e+00> : vector<8x10xf32>
    %6 = tpu.matmul %3, %5, %cst {dimension_numbers = #tpu.dot_dimension_numbers<[1], [0], [0], [1], [0, 0, 1, 1], [], []>} : vector<8x16xbf16>, vector<16x10xbf16>, vector<8x10xf32> -> vector<8x10xf32>
    %7 = arith.addf %4, %6 : vector<8x10xf32>
    %c0_6 = arith.constant 0 : index
    %c0_7 = arith.constant 0 : index
    %8 = vector.load %arg7[%c0_6, %c0_7] : memref<8x10xf32, #tpu.memory_space<vmem>>, vector<8x10xf32>
    tpu.vector_store %arg7[%c0_6, %c0_7], %7 {strides = array<i32>} : memref<8x10xf32, #tpu.memory_space<vmem>>, vector<8x10xf32>,
    %c0_i32_8 = arith.constant 0 : i32
    %9 = arith.cmpi eq, %arg2, %c0_i32_8 : i32
    %10 = arith.extui %9 : i1 to i32
    %c0_i32_9 = arith.constant 0 : i32
    %11 = arith.cmpi ne, %10, %c0_i32_9 : i32
    scf.if %11 {
      %c0_10 = arith.constant 0 : index
      %c0_11 = arith.constant 0 : index
      %12 = vector.load %arg7[%c0_10, %c0_11] : memref<8x10xf32, #tpu.memory_space<vmem>>, vector<8x10xf32>
      %c0_12 = arith.constant 0 : index
      %c0_13 = arith.constant 0 : index
      %13 = vector.load %arg5[%c0_12, %c0_13] : memref<1x10xf32, #tpu.memory_space<vmem>>, vector<1x10xf32>
      %14 = vector.broadcast %13 : vector<1x10xf32> to vector<8x10xf32>
      %15 = arith.addf %12, %14 : vector<8x10xf32>
      %c0_14 = arith.constant 0 : index
      %c0_15 = arith.constant 0 : index
      %16 = vector.load %arg6[%c0_14, %c0_15] : memref<8x10xf32, #tpu.memory_space<vmem>>, vector<8x10xf32>
      tpu.vector_store %arg6[%c0_14, %c0_15], %15 {strides = array<i32>} : memref<8x10xf32, #tpu.memory_space<vmem>>, vector<8x10xf32>,
    } else {
    }
    return
  }
  func.func @transform_0(%arg0: i32, %arg1: i32, %arg2: i32) -> (i32, i32) {
    %c0_i32 = arith.constant 0 : i32
    return %arg0, %arg2 : i32, i32
  }
  func.func @transform_1(%arg0: i32, %arg1: i32, %arg2: i32) -> (i32, i32) {
    %c0_i32 = arith.constant 0 : i32
    return %arg2, %arg1 : i32, i32
  }
  func.func @transform_2(%arg0: i32, %arg1: i32, %arg2: i32) -> (i32, i32) {
    %c0_i32 = arith.constant 0 : i32
    %c0_i32_0 = arith.constant 0 : i32
    return %c0_i32, %arg1 : i32, i32
  }
  func.func @transform_3(%arg0: i32, %arg1: i32, %arg2: i32) -> (i32, i32) {
    %c0_i32 = arith.constant 0 : i32
    return %arg0, %arg1 : i32, i32
  }
}

</mosaic_0001>

<bundles_post_ra>
// kernel: _lambda_.81
= control target key start
LH: loop header
LB: loop body
LE: loop exit
PB: predicated region body
PF: predicated region fallthrough
CT: control target
= control target key end

     0   :  { %v39_v4 = vlaneseq  ;;  %vm97_vm0 = vcmask 97280   ;;  %s297_s1 = inlined_call_operand.vmem [shape: f32[2,12], index: 1, kind: input, shape index: {}]   ;;  %s298_s2 = inlined_call_operand.vmem [shape: f32[128,12], index: 2, kind: input, shape index: {}]   ;;  %s299_s0 = inlined_call_operand.<no memory space> [shape: f32[1], index: 0, kind: input, shape index: {}]   ;;  %s300_s3 = inlined_call_operand.vmem [shape: f32[128,12], index: 3, kind: output, shape index: {}]  }
   0x1   :  { %v15_v0 = vld [vmem:[%s297_s1] sm:$0x1]  ;;  %v17_v1 = vld [vmem:[%s297_s1 + $0x1] sm:$0x1]  ;;  %v24_v12 = vld [vmem:[%s298_s2 + $0x8] sm:$0xff]  ;;  %v182_v22 = vstv %s299_s0 }
   0x2   :  { %v16_v2 = vmul.f32 0.0078125, %v15_v0  ;;  %v18_v3 = vmul.f32 0.0078125, %v17_v1  ;;  %v40_v7 = vshrl.u32 %v39_v4, 7  ;;  %v23_v10 = vld [vmem:[%s298_s2] sm:$0xff]  ;;  %v25_v13 = vld [vmem:[%s298_s2 + $0x10] sm:$0xff]  ;;  %v26_v14 = vld [vmem:[%s298_s2 + $0x18] sm:$0xff] }
   0x3   :  { %v27_v15 = vld [vmem:[%s298_s2 + $0x20] sm:$0xff]  ;;  %v28_v16 = vld [vmem:[%s298_s2 + $0x28] sm:$0xff]  ;;  %v29_v17 = vld [vmem:[%s298_s2 + $0x30] sm:$0xff] }
   0x4   :  { %v19_v5 = vmul.f32 %v16_v2, %v16_v2  ;;  %v41_v9 = vsub.s32 0, %v40_v7  ;;  %v30_v18 = vld [vmem:[%s298_s2 + $0x38] sm:$0xff]  ;;  %v31_v19 = vld [vmem:[%s298_s2 + $0x40] sm:$0xff]  ;;  %v32_v20 = vld [vmem:[%s298_s2 + $0x48] sm:$0xff] }
   0x5   :  { %v33_v23 = vld [vmem:[%s298_s2 + $0x50] sm:$0xff]  ;;  %v34_v24 = vld [vmem:[%s298_s2 + $0x58] sm:$0xff]  ;;  %v35_v25 = vld [vmem:[%s298_s2 + $0x60] sm:$0xff] }
   0x6   :  { %v20_v6 = vsub.f32 %v18_v3, %v19_v5  ;;  %v149_v11 = vrot.slane %v16_v2, %v41_v9  ;;  %v36_v30 = vld [vmem:[%s298_s2 + $0x68] sm:$0xff]  ;;  %v37_v31 = vld [vmem:[%s298_s2 + $0x70] sm:$0xff]  ;;  %v38_v32 = vld [vmem:[%s298_s2 + $0x78] sm:$0xff] }
   0x8   :  { %v21_v8 = vadd.f32 1e-05, %v20_v6  ;;  %v43_v21 = vsub.f32 %v23_v10, %v149_v11  ;;  %v44_v26 = vsub.f32 %v24_v12, %v149_v11  ;;  %v45_v27 = vsub.f32 %v25_v13, %v149_v11 }
   0x9   :  { %v46_v28 = vsub.f32 %v26_v14, %v149_v11  ;;  %v47_v29 = vsub.f32 %v27_v15, %v149_v11  ;;  %v48_v34 = vsub.f32 %v28_v16, %v149_v11  ;;  %v49_v35 = vsub.f32 %v29_v17, %v149_v11 }
   0xa   :  { %118 = vrsqrt.f32 %v21_v8  ;;  %v50_v36 = vsub.f32 %v30_v18, %v149_v11  ;;  %v51_v37 = vsub.f32 %v31_v19, %v149_v11  ;;  %v52_v39 = vsub.f32 %v32_v20, %v149_v11 }
   0xb   :  { %v53_v40 = vsub.f32 %v33_v23, %v149_v11  ;;  %v54_v41 = vsub.f32 %v34_v24, %v149_v11  ;;  %v55_v42 = vsub.f32 %v35_v25, %v149_v11  ;;  %v56_v43 = vsub.f32 %v36_v30, %v149_v11 }
   0xc   :  { %v57_v44 = vsub.f32 %v37_v31, %v149_v11  ;;  %v58_v45 = vsub.f32 %v38_v32, %v149_v11 }
  0x14   :  { %v119_v33 = vpop.eup %118 }
  0x15   :  { %v62_v38 = vrot.slane %v119_v33, %v41_v9 }
  0x17   :  { %v63_v46 = vmul.f32 %v62_v38, %v43_v21  ;;  %v64_v47 = vmul.f32 %v62_v38, %v44_v26  ;;  %v65_v48 = vmul.f32 %v62_v38, %v45_v27  ;;  %v66_v49 = vmul.f32 %v62_v38, %v46_v28 }
  0x18   :  { %v67_v50 = vmul.f32 %v62_v38, %v47_v29  ;;  %v68_v51 = vmul.f32 %v62_v38, %v48_v34  ;;  %v69_v52 = vmul.f32 %v62_v38, %v49_v35  ;;  %v70_v53 = vmul.f32 %v62_v38, %v50_v36 }
  0x19   :  { %v81_v54 = vmul.f32 %v182_v22, %v63_v46  ;;  %v82_v55 = vmul.f32 %v182_v22, %v64_v47  ;;  %v83_v56 = vmul.f32 %v182_v22, %v65_v48  ;;  %v84_v57 = vmul.f32 %v182_v22, %v66_v49 }
  0x1a   :  { %v85_v58 = vmul.f32 %v182_v22, %v67_v50  ;;  %v86_v59 = vmul.f32 %v182_v22, %v68_v51  ;;  %v87_v60 = vmul.f32 %v182_v22, %v69_v52  ;;  %v88_v61 = vmul.f32 %v182_v22, %v70_v53 }
  0x1b   :  { %98 = vst.msk [vmem:[%s300_s3] sm:$0xff] %vm97_vm0, %v81_v54  ;;  %99 = vst.msk [vmem:[%s300_s3 + $0x8] sm:$0xff] %vm97_vm0, %v82_v55  ;;  %v71_v62 = vmul.f32 %v62_v38, %v51_v37  ;;  %v72_v63 = vmul.f32 %v62_v38, %v52_v39  ;;  %v73_v0 = vmul.f32 %v62_v38, %v53_v40 }
  0x1c   :  { %100 = vst.msk [vmem:[%s300_s3 + $0x10] sm:$0xff] %vm97_vm0, %v83_v56  ;;  %101 = vst.msk [vmem:[%s300_s3 + $0x18] sm:$0xff] %vm97_vm0, %v84_v57  ;;  %v74_v1 = vmul.f32 %v62_v38, %v54_v41  ;;  %v75_v2 = vmul.f32 %v62_v38, %v55_v42  ;;  %v76_v3 = vmul.f32 %v62_v38, %v56_v43 }
  0x1d   :  { %102 = vst.msk [vmem:[%s300_s3 + $0x20] sm:$0xff] %vm97_vm0, %v85_v58  ;;  %103 = vst.msk [vmem:[%s300_s3 + $0x28] sm:$0xff] %vm97_vm0, %v86_v59  ;;  %v77_v4 = vmul.f32 %v62_v38, %v57_v44  ;;  %v78_v5 = vmul.f32 %v62_v38, %v58_v45  ;;  %v89_v6 = vmul.f32 %v182_v22, %v71_v62 }
  0x1e   :  { %104 = vst.msk [vmem:[%s300_s3 + $0x30] sm:$0xff] %vm97_vm0, %v87_v60  ;;  %105 = vst.msk [vmem:[%s300_s3 + $0x38] sm:$0xff] %vm97_vm0, %v88_v61  ;;  %v90_v7 = vmul.f32 %v182_v22, %v72_v63  ;;  %v91_v8 = vmul.f32 %v182_v22, %v73_v0  ;;  %v92_v9 = vmul.f32 %v182_v22, %v74_v1 }
  0x1f   :  { %v93_v10 = vmul.f32 %v182_v22, %v75_v2  ;;  %v94_v11 = vmul.f32 %v182_v22, %v76_v3  ;;  %v95_v12 = vmul.f32 %v182_v22, %v77_v4  ;;  %v96_v13 = vmul.f32 %v182_v22, %v78_v5  ;;  %106 = vst.msk [vmem:[%s300_s3 + $0x40] sm:$0xff] %vm97_vm0, %v89_v6 }
  0x20   :  { %107 = vst.msk [vmem:[%s300_s3 + $0x48] sm:$0xff] %vm97_vm0, %v90_v7  ;;  %108 = vst.msk [vmem:[%s300_s3 + $0x50] sm:$0xff] %vm97_vm0, %v91_v8 }
  0x21   :  { %109 = vst.msk [vmem:[%s300_s3 + $0x58] sm:$0xff] %vm97_vm0, %v92_v9  ;;  %110 = vst.msk [vmem:[%s300_s3 + $0x60] sm:$0xff] %vm97_vm0, %v93_v10 }
  0x22   :  { %111 = vst.msk [vmem:[%s300_s3 + $0x68] sm:$0xff] %vm97_vm0, %v94_v11  ;;  %112 = vst.msk [vmem:[%s300_s3 + $0x70] sm:$0xff] %vm97_vm0, %v95_v12 }
  0x23   :  { %113 = vst.msk [vmem:[%s300_s3 + $0x78] sm:$0xff] %vm97_vm0, %v96_v13 }

// kernel: _lambda_.80
= control target key start
LH: loop header
LB: loop body
LE: loop exit
PB: predicated region body
PF: predicated region fallthrough
CT: control target
= control target key end

     0   :  { %vm12_vm0 = vcmask 91136   ;;  %vm30_vm1 = vcmask 97280   ;;  %v132_v0 = vmov 0.0   ;;  %vm122_vm2 = vcmask 1040384   ;;  %s234_s0 = inlined_call_operand.vmem [shape: f32[128,12], index: 0, kind: input, shape index: {}]   ;;  %s235_s1 = inlined_call_operand.vmem [shape: f32[2,12], index: 1, kind: output, shape index: {}]  }
   0x1   :  { %13 = vst.msk [vmem:[%s235_s1] sm:$0x3] %vm12_vm0, %v132_v0  ;;  %v14_v1 = vld [vmem:[%s234_s0] sm:$0xff]  ;;  %v15_v2 = vld [vmem:[%s234_s0 + $0x8] sm:$0xff]  ;;  %v16_v3 = vld [vmem:[%s234_s0 + $0x10] sm:$0xff] }
   0x2   :  { %v31_v4 = vsel %vm30_vm1, %v14_v1, 0.0  ;;  %v32_v5 = vsel %vm30_vm1, %v15_v2, 0.0  ;;  %v34_v6 = vsel %vm30_vm1, %v16_v3, 0.0  ;;  %v17_v7 = vld [vmem:[%s234_s0 + $0x18] sm:$0xff]  ;;  %v18_v10 = vld [vmem:[%s234_s0 + $0x20] sm:$0xff]  ;;  %v19_v13 = vld [vmem:[%s234_s0 + $0x28] sm:$0xff]  ;;  %v68_v15 = vmul.f32 %v14_v1, %v14_v1 }
   0x3   :  { %v33_v8 = vadd.f32 %v32_v5, %v31_v4  ;;  %v36_v9 = vsel %vm30_vm1, %v17_v7, 0.0  ;;  %v38_v12 = vsel %vm30_vm1, %v18_v10, 0.0  ;;  %v69_v16 = vmul.f32 %v15_v2, %v15_v2  ;;  %v20_v19 = vld [vmem:[%s234_s0 + $0x30] sm:$0xff]  ;;  %v21_v24 = vld [vmem:[%s234_s0 + $0x38] sm:$0xff]  ;;  %v22_v31 = vld [vmem:[%s234_s0 + $0x40] sm:$0xff] }
   0x4   :  { %v70_v17 = vmul.f32 %v16_v3, %v16_v3  ;;  %v40_v18 = vsel %vm30_vm1, %v19_v13, 0.0  ;;  %v71_v21 = vmul.f32 %v17_v7, %v17_v7  ;;  %v42_v22 = vsel %vm30_vm1, %v20_v19, 0.0  ;;  %v23_v37 = vld [vmem:[%s234_s0 + $0x48] sm:$0xff]  ;;  %v24_v43 = vld [vmem:[%s234_s0 + $0x50] sm:$0xff]  ;;  %v25_v49 = vld [vmem:[%s234_s0 + $0x58] sm:$0xff] }
   0x5   :  { %v35_v11 = vadd.f32 %v34_v6, %v33_v8  ;;  %v72_v23 = vmul.f32 %v18_v10, %v18_v10  ;;  %v84_v26 = vsel %vm30_vm1, %v68_v15, 0.0  ;;  %v85_v27 = vsel %vm30_vm1, %v69_v16, 0.0  ;;  %v26_v55 = vld [vmem:[%s234_s0 + $0x60] sm:$0xff]  ;;  %v27_v61 = vld [vmem:[%s234_s0 + $0x68] sm:$0xff]  ;;  %v28_v3 = vld [vmem:[%s234_s0 + $0x70] sm:$0xff] }
   0x6   :  { %v87_v28 = vsel %vm30_vm1, %v70_v17, 0.0  ;;  %v44_v29 = vsel %vm30_vm1, %v21_v24, 0.0  ;;  %v86_v30 = vadd.f32 %v85_v27, %v84_v26  ;;  %v73_v33 = vmul.f32 %v19_v13, %v19_v13 }
   0x7   :  { %v37_v14 = vadd.f32 %v36_v9, %v35_v11  ;;  %v89_v34 = vsel %vm30_vm1, %v71_v21, 0.0  ;;  %v46_v35 = vsel %vm30_vm1, %v22_v31, 0.0  ;;  %v74_v39 = vmul.f32 %v20_v19, %v20_v19  ;;  %v29_v9 = vld [vmem:[%s234_s0 + $0x78] sm:$0xff] }
   0x8   :  { %v88_v36 = vadd.f32 %v87_v28, %v86_v30  ;;  %v91_v40 = vsel %vm30_vm1, %v72_v23, 0.0  ;;  %v48_v41 = vsel %vm30_vm1, %v23_v37, 0.0  ;;  %v75_v45 = vmul.f32 %v21_v24, %v21_v24 }
   0x9   :  { %v39_v20 = vadd.f32 %v38_v12, %v37_v14  ;;  %v93_v46 = vsel %vm30_vm1, %v73_v33, 0.0  ;;  %v50_v47 = vsel %vm30_vm1, %v24_v43, 0.0  ;;  %v76_v51 = vmul.f32 %v22_v31, %v22_v31 }
   0xa   :  { %v90_v42 = vadd.f32 %v89_v34, %v88_v36  ;;  %v95_v52 = vsel %vm30_vm1, %v74_v39, 0.0  ;;  %v52_v53 = vsel %vm30_vm1, %v25_v49, 0.0  ;;  %v77_v57 = vmul.f32 %v23_v37, %v23_v37 }
   0xb   :  { %v41_v25 = vadd.f32 %v40_v18, %v39_v20  ;;  %v97_v58 = vsel %vm30_vm1, %v75_v45, 0.0  ;;  %v54_v59 = vsel %vm30_vm1, %v26_v55, 0.0  ;;  %v78_v63 = vmul.f32 %v24_v43, %v24_v43  ;;  %v121_v43 = vld [vmem:[%s235_s1] sm:$0x3] }
   0xc   :  { %v92_v48 = vadd.f32 %v91_v40, %v90_v42  ;;  %v99_v0 = vsel %vm30_vm1, %v76_v51, 0.0  ;;  %v56_v1 = vsel %vm30_vm1, %v27_v61, 0.0  ;;  %v79_v5 = vmul.f32 %v25_v49, %v25_v49 }
   0xd   :  { %v43_v32 = vadd.f32 %v42_v22, %v41_v25  ;;  %v101_v6 = vsel %vm30_vm1, %v77_v57, 0.0  ;;  %v58_v7 = vsel %vm30_vm1, %v28_v3, 0.0  ;;  %v80_v11 = vmul.f32 %v26_v55, %v26_v55 }
   0xe   :  { %v94_v54 = vadd.f32 %v93_v46, %v92_v48  ;;  %v103_v12 = vsel %vm30_vm1, %v78_v63, 0.0  ;;  %v60_v13 = vsel %vm30_vm1, %v29_v9, 0.0  ;;  %v81_v16 = vmul.f32 %v27_v61, %v27_v61 }
   0xf   :  { %v45_v38 = vadd.f32 %v44_v29, %v43_v32  ;;  %v105_v17 = vsel %vm30_vm1, %v79_v5, 0.0  ;;  %v82_v20 = vmul.f32 %v28_v3, %v28_v3  ;;  %v107_v21 = vsel %vm30_vm1, %v80_v11, 0.0 }
  0x10   :  { %v96_v60 = vadd.f32 %v95_v52, %v94_v54  ;;  %v83_v24 = vmul.f32 %v29_v9, %v29_v9  ;;  %v109_v25 = vsel %vm30_vm1, %v81_v16, 0.0 }
  0x11   :  { %v47_v44 = vadd.f32 %v46_v35, %v45_v38  ;;  %v111_v28 = vsel %vm30_vm1, %v82_v20, 0.0 }
  0x12   :  { %v98_v2 = vadd.f32 %v97_v58, %v96_v60  ;;  %v113_v30 = vsel %vm30_vm1, %v83_v24, 0.0 }
  0x13   :  { %v49_v50 = vadd.f32 %v48_v41, %v47_v44 }
  0x14   :  { %v100_v8 = vadd.f32 %v99_v0, %v98_v2 }
  0x15   :  { %v51_v56 = vadd.f32 %v50_v47, %v49_v50 }
  0x16   :  { %v102_v14 = vadd.f32 %v101_v6, %v100_v8 }
  0x17   :  { %v53_v62 = vadd.f32 %v52_v53, %v51_v56 }
  0x18   :  { %v104_v18 = vadd.f32 %v103_v12, %v102_v14 }
  0x19   :  { %v55_v4 = vadd.f32 %v54_v59, %v53_v62 }
  0x1a   :  { %v106_v22 = vadd.f32 %v105_v17, %v104_v18 }
  0x1b   :  { %v57_v10 = vadd.f32 %v56_v1, %v55_v4 }
  0x1c   :  { %v108_v26 = vadd.f32 %v107_v21, %v106_v22 }
  0x1d   :  { %v59_v15 = vadd.f32 %v58_v7, %v57_v10 }
  0x1e   :  { %v110_v29 = vadd.f32 %v109_v25, %v108_v26 }
  0x1f   :  { %v61_v19 = vadd.f32 %v60_v13, %v59_v15 }
  0x20   :  { %v112_v32 = vadd.f32 %v111_v28, %v110_v29 }
  0x21   :  { %v62_v23 = vrot.slane %v61_v19, 4 }
  0x22   :  { %v114_v33 = vadd.f32 %v113_v30, %v112_v32 }
  0x23   :  { %v63_v27 = vadd.f32 %v62_v23, %v61_v19 }
  0x24   :  { %v115_v35 = vrot.slane %v114_v33, 4 }
  0x25   :  { %v64_v31 = vrot.slane %v63_v27, 2 }
  0x26   :  { %v116_v36 = vadd.f32 %v115_v35, %v114_v33 }
  0x27   :  { %v65_v34 = vadd.f32 %v64_v31, %v63_v27 }
  0x28   :  { %v117_v38 = vrot.slane %v116_v36, 2 }
  0x29   :  { %v66_v37 = vrot.slane %v65_v34, 1 }
  0x2a   :  { %v118_v39 = vadd.f32 %v117_v38, %v116_v36 }
  0x2b   :  { %v67_v40 = vadd.f32 %v66_v37, %v65_v34 }
  0x2c   :  { %v119_v41 = vrot.slane %v118_v39, 1 }
  0x2e   :  { %v120_v42 = vadd.f32 %v119_v41, %v118_v39 }
  0x30   :  { %v123_v44 = vsel %vm122_vm2, %v67_v40, %v120_v42 }
  0x31   :  { %v124_v45 = vadd.f32 %v123_v44, %v121_v43 }
  0x33   :  { %126 = vst.msk [vmem:[%s235_s1] sm:$0x3] %vm12_vm0, %v124_v45 }

// kernel: _lambda_.85
= control target key start
LH: loop header
LB: loop body
LE: loop exit
PB: predicated region body
PF: predicated region fallthrough
CT: control target
= control target key end

     0   :  { %vm156_vm0 = vcmask 1045504   ;;  %vm131_vm1 = vcmask 97280   ;;  %v404_v5 = vmov 0   ;;  %vm19_vm2 = vcmask 31744   ;;  %s602_s1 = inlined_call_operand.vmem [shape: bf16[12,4], index: 1, kind: input, shape index: {}]   ;;  %s603_s0 = inlined_call_operand.vmem [shape: bf16[128,12], index: 0, kind: input, shape index: {}]   ;;  %s604_s2 = inlined_call_operand.vmem [shape: f32[1,4], index: 2, kind: input, shape index: {}]   ;;  %s605_s3 = inlined_call_operand.vmem [shape: f32[128,4], index: 3, kind: output, shape index: {}]  }
   0x1   :  { %v403_v0 = vld [vmem:[%s602_s1] sm:$0x3f]   ;;  %v38_v10 = vld [vmem:[%s603_s0 + $0x8] sm:$0xf]  ;;  %v39_v12 = vld [vmem:[%s603_s0 + $0xc] sm:$0xf] }
   0x2   :  { %v36_v1 = vld [vmem:[%s603_s0] sm:$0xf]  ;;  %v37_v2 = vld [vmem:[%s603_s0 + $0x4] sm:$0xf]  ;;  %399 = vmatprep.subr.msk.bf16.mxu0 %vm156_vm0, %v403_v0  ;;  %400 = vmatprep.subr.msk.bf16.mxu1 %vm156_vm0, %v403_v0  ;;  %v158_v4 = vsel %vm156_vm0, %v403_v0, 0  ;;  %v54_v13 = vmax.bf16 %v404_v5, %v38_v10  ;;  %v55_v17 = vmax.bf16 %v404_v5, %v39_v12  ;;  %v405_v41 = vmov 0.0  }
   0x3   :  { %v44_v3 = vld [vmem:[%s603_s0 + $0x20] sm:$0xf]  ;;  %v52_v6 = vmax.bf16 %v404_v5, %v36_v1  ;;  %v53_v7 = vmax.bf16 %v404_v5, %v37_v2  ;;  %v45_v8 = vld [vmem:[%s603_s0 + $0x24] sm:$0xf]  ;;  %380 = vmatpush3.bf16.msra.mxu0 %v158_v4  ;;  %398 = vmatpush3.bf16.msra.mxu1 %v158_v4  ;;  %v46_v14 = vld [vmem:[%s603_s0 + $0x28] sm:$0xf] }
   0x4   :  { %v60_v9 = vmax.bf16 %v404_v5, %v44_v3  ;;  %v61_v11 = vmax.bf16 %v404_v5, %v45_v8  ;;  %v47_v15 = vld [vmem:[%s603_s0 + $0x2c] sm:$0xf]  ;;  %v62_v18 = vmax.bf16 %v404_v5, %v46_v14  ;;  %v40_v20 = vld [vmem:[%s603_s0 + $0x10] sm:$0xf]  ;;  %v41_v21 = vld [vmem:[%s603_s0 + $0x14] sm:$0xf]  ;;  %v353_v30 = vcombine.low %v54_v13, %v55_v17 }
   0x5   :  { %v352_v16 = vcombine.low %v52_v6, %v53_v7  ;;  %v63_v19 = vmax.bf16 %v404_v5, %v47_v15  ;;  %v48_v22 = vld [vmem:[%s603_s0 + $0x30] sm:$0xf]  ;;  %v56_v24 = vmax.bf16 %v404_v5, %v40_v20  ;;  %v57_v25 = vmax.bf16 %v404_v5, %v41_v21  ;;  %v49_v26 = vld [vmem:[%s603_s0 + $0x34] sm:$0xf]  ;;  %v42_v28 = vld [vmem:[%s603_s0 + $0x18] sm:$0xf] }
   0x6   :  { %v356_v23 = vcombine.low %v60_v9, %v61_v11  ;;  %v64_v27 = vmax.bf16 %v404_v5, %v48_v22  ;;  %v43_v29 = vld [vmem:[%s603_s0 + $0x1c] sm:$0xf]  ;;  %v65_v32 = vmax.bf16 %v404_v5, %v49_v26  ;;  %v50_v33 = vld [vmem:[%s603_s0 + $0x38] sm:$0xf]  ;;  %v58_v36 = vmax.bf16 %v404_v5, %v42_v28  ;;  %22 = vst.msk [vmem:[#allocation2 + $0x10] sm:$0xff] %vm19_vm2, %v405_v41 }
   0x7   :  { %381 = vmatprep.mubr.msk.bf16.mxu0 %vm131_vm1, %v352_v16  ;;  %v357_v31 = vcombine.low %v62_v18, %v63_v19  ;;  %v51_v34 = vld [vmem:[%s603_s0 + $0x3c] sm:$0xf]  ;;  %v354_v35 = vcombine.low %v56_v24, %v57_v25  ;;  %v59_v37 = vmax.bf16 %v404_v5, %v43_v29  ;;  %v66_v39 = vmax.bf16 %v404_v5, %v50_v33  ;;  %v512_v8 = vld [vmem:[%s604_s2] ss:$0 sm:$0xff] }
   0x8   :  { %389 = vmatprep.mubr.msk.bf16.mxu1 %vm131_vm1, %v356_v23  ;;  %382 = vmatmul.mubr.msk.bf16.vlgmr.msra.gmra.mrb[0].mxu0 %vm131_vm1, %v353_v30  ;;  %v358_v38 = vcombine.low %v64_v27, %v65_v32  ;;  %v67_v40 = vmax.bf16 %v404_v5, %v51_v34  ;;  %20 = vst.msk [vmem:[#allocation2] sm:$0xff] %vm19_vm2, %v405_v41  ;;  %21 = vst.msk [vmem:[#allocation2 + $0x8] sm:$0xff] %vm19_vm2, %v405_v41 }
   0x9   :  { %390 = vmatmul.mubr.msk.bf16.vlgmr.msra.gmra.mrb[0].mxu1 %vm131_vm1, %v357_v31  ;;  %385 = vmatprep.mubr.msk.bf16.mxu0 %vm131_vm1, %v354_v35  ;;  %23 = vst.msk [vmem:[#allocation2 + $0x18] sm:$0xff] %vm19_vm2, %v405_v41  ;;  %24 = vst.msk [vmem:[#allocation2 + $0x20] sm:$0xff] %vm19_vm2, %v405_v41  ;;  %v355_v42 = vcombine.low %v58_v36, %v59_v37 }
   0xa   :  { %25 = vst.msk [vmem:[#allocation2 + $0x28] sm:$0xff] %vm19_vm2, %v405_v41  ;;  %26 = vst.msk [vmem:[#allocation2 + $0x30] sm:$0xff] %vm19_vm2, %v405_v41  ;;  %393 = vmatprep.mubr.msk.bf16.mxu1 %vm131_vm1, %v358_v38  ;;  %v359_v43 = vcombine.low %v66_v39, %v67_v40 }
   0xb   :  { %27 = vst.msk [vmem:[#allocation2 + $0x38] sm:$0xff] %vm19_vm2, %v405_v41  ;;  %28 = vst.msk [vmem:[#allocation2 + $0x40] sm:$0xff] %vm19_vm2, %v405_v41 }
   0xc   :  { %29 = vst.msk [vmem:[#allocation2 + $0x48] sm:$0xff] %vm19_vm2, %v405_v41  ;;  %30 = vst.msk [vmem:[#allocation2 + $0x50] sm:$0xff] %vm19_vm2, %v405_v41 }
   0xd   :  { %31 = vst.msk [vmem:[#allocation2 + $0x58] sm:$0xff] %vm19_vm2, %v405_v41  ;;  %32 = vst.msk [vmem:[#allocation2 + $0x60] sm:$0xff] %vm19_vm2, %v405_v41  ;;  %v70_v44 = vld [vmem:[#allocation2 + $0x10] sm:$0xff] }
   0xe   :  { %33 = vst.msk [vmem:[#allocation2 + $0x68] sm:$0xff] %vm19_vm2, %v405_v41  ;;  %34 = vst.msk [vmem:[#allocation2 + $0x70] sm:$0xff] %vm19_vm2, %v405_v41 }
   0xf   :  { %35 = vst.msk [vmem:[#allocation2 + $0x78] sm:$0xff] %vm19_vm2, %v405_v41  ;;  %v68_v46 = vld [vmem:[#allocation2] sm:$0xff]  ;;  %v69_v56 = vld [vmem:[#allocation2 + $0x8] sm:$0xff] }
  0x10   :  { %386 = vmatmul.mubr.msk.bf16.gmra.mrb[4].mxu0 %vm131_vm1, %v355_v42  ;;  %v71_v50 = vld [vmem:[#allocation2 + $0x18] sm:$0xff]  ;;  %v72_v6 = vld [vmem:[#allocation2 + $0x20] sm:$0xff] }
  0x11   :  { %394 = vmatmul.mubr.msk.bf16.gmra.mrb[4].mxu1 %vm131_vm1, %v359_v43  ;;  %v74_v4 = vld [vmem:[#allocation2 + $0x30] sm:$0xff]  ;;  %v73_v17 = vld [vmem:[#allocation2 + $0x28] sm:$0xff] }
  0x12   :  { %v76_v47 = vld [vmem:[#allocation2 + $0x40] sm:$0xff]  ;;  %v75_v11 = vld [vmem:[#allocation2 + $0x38] sm:$0xff] }
  0x13   :  { %v78_v45 = vld [vmem:[#allocation2 + $0x50] sm:$0xff]  ;;  %v77_v57 = vld [vmem:[#allocation2 + $0x48] sm:$0xff] }
  0x14   :  { %v79_v51 = vld [vmem:[#allocation2 + $0x58] sm:$0xff]  ;;  %v80_v7 = vld [vmem:[#allocation2 + $0x60] sm:$0xff] }
  0x15   :  { %v82_v5 = vld [vmem:[#allocation2 + $0x70] sm:$0xff]  ;;  %v81_v18 = vld [vmem:[#allocation2 + $0x68] sm:$0xff] }
  0x16   :  { %v83_v12 = vld [vmem:[#allocation2 + $0x78] sm:$0xff] }
  0xdb   :  { %v383_v48 = vpop.f32.mrb[0].mxu0 }
  0xdc   :  { %v391_v49 = vpop.f32.mrb[0].mxu1  ;;  %v259_v52 = vadd.f32 %v383_v48, %v70_v44  ;;  %v194_v54 = vpop.f32.mrb[1].mxu0 }
  0xdd   :  { %v267_v53 = vadd.f32 %v391_v49, %v78_v45  ;;  %v226_v55 = vpop.f32.mrb[1].mxu1  ;;  %v257_v58 = vadd.f32 %v194_v54, %v68_v46  ;;  %v384_v60 = vpop.f32.mrb[2].mxu0 }
  0xde   :  { %v265_v59 = vadd.f32 %v226_v55, %v76_v47  ;;  %v392_v61 = vpop.f32.mrb[2].mxu1  ;;  %276 = vst.msk [vmem:[#allocation2 + $0x10] sm:$0xff] %vm19_vm2, %v259_v52  ;;  %v260_v62 = vadd.f32 %v384_v60, %v71_v50  ;;  %v197_v0 = vpop.f32.mrb[3].mxu0 }
  0xdf   :  { %284 = vst.msk [vmem:[#allocation2 + $0x50] sm:$0xff] %vm19_vm2, %v267_v53  ;;  %v268_v63 = vadd.f32 %v392_v61, %v79_v51  ;;  %v229_v1 = vpop.f32.mrb[3].mxu1  ;;  %274 = vst.msk [vmem:[#allocation2] sm:$0xff] %vm19_vm2, %v257_v58  ;;  %v258_v2 = vadd.f32 %v197_v0, %v69_v56 }
  0xe0   :  { %282 = vst.msk [vmem:[#allocation2 + $0x40] sm:$0xff] %vm19_vm2, %v265_v59  ;;  %v266_v3 = vadd.f32 %v229_v1, %v77_v57  ;;  %277 = vst.msk [vmem:[#allocation2 + $0x18] sm:$0xff] %vm19_vm2, %v260_v62 }
  0xe1   :  { %285 = vst.msk [vmem:[#allocation2 + $0x58] sm:$0xff] %vm19_vm2, %v268_v63  ;;  %275 = vst.msk [vmem:[#allocation2 + $0x8] sm:$0xff] %vm19_vm2, %v258_v2 }
  0xe2   :  { %283 = vst.msk [vmem:[#allocation2 + $0x48] sm:$0xff] %vm19_vm2, %v266_v3 }
  0xe3   :  { %v387_v9 = vpop.f32.mrb[4].mxu0 }
  0xe4   :  { %v395_v10 = vpop.f32.mrb[4].mxu1  ;;  %v263_v13 = vadd.f32 %v387_v9, %v74_v4  ;;  %v210_v15 = vpop.f32.mrb[5].mxu0 }
  0xe5   :  { %v271_v14 = vadd.f32 %v395_v10, %v82_v5  ;;  %v242_v16 = vpop.f32.mrb[5].mxu1  ;;  %v295_v19 = vld [vmem:[#allocation2 + $0x10] sm:$0xff]  ;;  %v261_v21 = vadd.f32 %v210_v15, %v72_v6  ;;  %v388_v23 = vpop.f32.mrb[6].mxu0 }
  0xe6   :  { %v303_v20 = vld [vmem:[#allocation2 + $0x50] sm:$0xff]  ;;  %v269_v22 = vadd.f32 %v242_v16, %v80_v7  ;;  %v396_v24 = vpop.f32.mrb[6].mxu1  ;;  %v318_v25 = vadd.f32 %v512_v8, %v295_v19  ;;  %v293_v27 = vld [vmem:[#allocation2] sm:$0xff]  ;;  %280 = vst.msk [vmem:[#allocation2 + $0x30] sm:$0xff] %vm19_vm2, %v263_v13  ;;  %v264_v29 = vadd.f32 %v388_v23, %v75_v11  ;;  %v213_v31 = vpop.f32.mrb[7].mxu0 }
  0xe7   :  { %v326_v26 = vadd.f32 %v512_v8, %v303_v20  ;;  %v301_v28 = vld [vmem:[#allocation2 + $0x40] sm:$0xff]  ;;  %288 = vst.msk [vmem:[#allocation2 + $0x70] sm:$0xff] %vm19_vm2, %v271_v14  ;;  %v272_v30 = vadd.f32 %v396_v24, %v83_v12  ;;  %v245_v32 = vpop.f32.mrb[7].mxu1  ;;  %v316_v33 = vadd.f32 %v512_v8, %v293_v27  ;;  %v296_v35 = vld [vmem:[#allocation2 + $0x18] sm:$0xff]  ;;  %278 = vst.msk [vmem:[#allocation2 + $0x20] sm:$0xff] %vm19_vm2, %v261_v21 }
  0xe8   :  { %v324_v34 = vadd.f32 %v512_v8, %v301_v28  ;;  %v304_v36 = vld [vmem:[#allocation2 + $0x58] sm:$0xff]  ;;  %286 = vst.msk [vmem:[#allocation2 + $0x60] sm:$0xff] %vm19_vm2, %v269_v22  ;;  %v262_v37 = vadd.f32 %v213_v31, %v73_v17  ;;  %v270_v38 = vadd.f32 %v245_v32, %v81_v18  ;;  %334 = vst.msk [vmem:[%s605_s3 + $0x10] sm:$0xff] %vm19_vm2, %v318_v25  ;;  %v294_v41 = vld [vmem:[#allocation2 + $0x8] sm:$0xff] }
  0xe9   :  { %342 = vst.msk [vmem:[%s605_s3 + $0x50] sm:$0xff] %vm19_vm2, %v326_v26  ;;  %v319_v39 = vadd.f32 %v512_v8, %v296_v35  ;;  %v327_v40 = vadd.f32 %v512_v8, %v304_v36  ;;  %v302_v42 = vld [vmem:[#allocation2 + $0x48] sm:$0xff]  ;;  %281 = vst.msk [vmem:[#allocation2 + $0x38] sm:$0xff] %vm19_vm2, %v264_v29  ;;  %v317_v43 = vadd.f32 %v512_v8, %v294_v41 }
  0xea   :  { %289 = vst.msk [vmem:[#allocation2 + $0x78] sm:$0xff] %vm19_vm2, %v272_v30  ;;  %332 = vst.msk [vmem:[%s605_s3] sm:$0xff] %vm19_vm2, %v316_v33  ;;  %v325_v44 = vadd.f32 %v512_v8, %v302_v42 }
  0xeb   :  { %340 = vst.msk [vmem:[%s605_s3 + $0x40] sm:$0xff] %vm19_vm2, %v324_v34  ;;  %279 = vst.msk [vmem:[#allocation2 + $0x28] sm:$0xff] %vm19_vm2, %v262_v37 }
  0xec   :  { %287 = vst.msk [vmem:[#allocation2 + $0x68] sm:$0xff] %vm19_vm2, %v270_v38  ;;  %335 = vst.msk [vmem:[%s605_s3 + $0x18] sm:$0xff] %vm19_vm2, %v319_v39 }
  0xed   :  { %343 = vst.msk [vmem:[%s605_s3 + $0x58] sm:$0xff] %vm19_vm2, %v327_v40  ;;  %333 = vst.msk [vmem:[%s605_s3 + $0x8] sm:$0xff] %vm19_vm2, %v317_v43  ;;  %v299_v45 = vld [vmem:[#allocation2 + $0x30] sm:$0xff] }
  0xee   :  { %341 = vst.msk [vmem:[%s605_s3 + $0x48] sm:$0xff] %vm19_vm2, %v325_v44  ;;  %v307_v46 = vld [vmem:[#allocation2 + $0x70] sm:$0xff]  ;;  %v322_v47 = vadd.f32 %v512_v8, %v299_v45  ;;  %v297_v49 = vld [vmem:[#allocation2 + $0x20] sm:$0xff] }
  0xef   :  { %v330_v48 = vadd.f32 %v512_v8, %v307_v46  ;;  %v305_v50 = vld [vmem:[#allocation2 + $0x60] sm:$0xff]  ;;  %v320_v51 = vadd.f32 %v512_v8, %v297_v49 }
  0xf0   :  { %v328_v52 = vadd.f32 %v512_v8, %v305_v50  ;;  %v300_v53 = vld [vmem:[#allocation2 + $0x38] sm:$0xff]  ;;  %338 = vst.msk [vmem:[%s605_s3 + $0x30] sm:$0xff] %vm19_vm2, %v322_v47 }
  0xf1   :  { %v308_v54 = vld [vmem:[#allocation2 + $0x78] sm:$0xff]  ;;  %346 = vst.msk [vmem:[%s605_s3 + $0x70] sm:$0xff] %vm19_vm2, %v330_v48  ;;  %v323_v55 = vadd.f32 %v512_v8, %v300_v53  ;;  %336 = vst.msk [vmem:[%s605_s3 + $0x20] sm:$0xff] %vm19_vm2, %v320_v51 }
  0xf2   :  { %v331_v56 = vadd.f32 %v512_v8, %v308_v54  ;;  %v298_v57 = vld [vmem:[#allocation2 + $0x28] sm:$0xff]  ;;  %344 = vst.msk [vmem:[%s605_s3 + $0x60] sm:$0xff] %vm19_vm2, %v328_v52 }
  0xf3   :  { %v306_v58 = vld [vmem:[#allocation2 + $0x68] sm:$0xff]  ;;  %v321_v59 = vadd.f32 %v512_v8, %v298_v57  ;;  %339 = vst.msk [vmem:[%s605_s3 + $0x38] sm:$0xff] %vm19_vm2, %v323_v55 }
  0xf4   :  { %v329_v60 = vadd.f32 %v512_v8, %v306_v58  ;;  %347 = vst.msk [vmem:[%s605_s3 + $0x78] sm:$0xff] %vm19_vm2, %v331_v56 }
  0xf5   :  { %337 = vst.msk [vmem:[%s605_s3 + $0x28] sm:$0xff] %vm19_vm2, %v321_v59 }
  0xf6   :  { %345 = vst.msk [vmem:[%s605_s3 + $0x68] sm:$0xff] %vm19_vm2, %v329_v60 }

// kernel: _lambda_.79
= control target key start
LH: loop header
LB: loop body
LE: loop exit
PB: predicated region body
PF: predicated region fallthrough
CT: control target
= control target key end

     0   :  { %vm148_vm0 = vcmask 1044480   ;;  %vm149_vm1 = vcmask 1045504   ;;  %vm123_vm2 = vcmask 220160   ;;  %v412_v1 = vmov 65535   ;;  %s589_s1 = inlined_call_operand.vmem [shape: bf16[27,12], index: 1, kind: input, shape index: {}]   ;;  %s590_s0 = inlined_call_operand.vmem [shape: bf16[128,27], index: 0, kind: input, shape index: {}]   ;;  %s591_s2 = inlined_call_operand.vmem [shape: f32[1,12], index: 2, kind: input, shape index: {}]   ;;  %s592_s3 = inlined_call_operand.vmem [shape: f32[128,12], index: 3, kind: output, shape index: {}]  }
   0x1   :  { %v402_v0 = vld [vmem:[%s589_s1] sm:$0xff]   ;;  %v150_v2 = vsel %vm148_vm0, 4294967295, %v412_v1  ;;  %v403_v3 = vld [vmem:[%s589_s1 + $0x8] sm:$0x3f]   ;;  %vm19_vm3 = vcmask 97280   ;;  %v413_v10 = vmov 0.0  }
   0x2   :  { %376 = vmatprep.subr.bf16.mxu0 %v402_v0  ;;  %396 = vmatprep.subr.bf16.mxu1 %v402_v0  ;;  %v151_v4 = vsel %vm149_vm1, %v150_v2, 0  ;;  %v404_v5 = vld [vmem:[%s590_s0] sm:$0xff]   ;;  %v406_v8 = vld [vmem:[%s590_s0 + $0x8] sm:$0xff]   ;;  %22 = vst.msk [vmem:[#allocation2 + $0x10] sm:$0xff] %vm19_vm3, %v413_v10  ;;  %20 = vst.msk [vmem:[#allocation2] sm:$0xff] %vm19_vm3, %v413_v10 }
   0x3   :  { %377 = vmatpush3.bf16.msra.mxu0 %v402_v0  ;;  %398 = vmatpush3.bf16.msra.mxu1 %v402_v0  ;;  %v153_v6 = vand.u32 %v403_v3, %v151_v4  ;;  %v405_v7 = vld [vmem:[%s590_s0 + $0x20] sm:$0xff]   ;;  %v407_v9 = vld [vmem:[%s590_s0 + $0x28] sm:$0xff]   ;;  %21 = vst.msk [vmem:[#allocation2 + $0x8] sm:$0xff] %vm19_vm3, %v413_v10  ;;  %23 = vst.msk [vmem:[#allocation2 + $0x18] sm:$0xff] %vm19_vm3, %v413_v10 }
   0x4   :  { %380 = vmatprep.mubr.msk.bf16.mxu0 %vm123_vm2, %v404_v5  ;;  %24 = vst.msk [vmem:[#allocation2 + $0x20] sm:$0xff] %vm19_vm3, %v413_v10  ;;  %25 = vst.msk [vmem:[#allocation2 + $0x28] sm:$0xff] %vm19_vm3, %v413_v10  ;;  %388 = vmatprep.mubr.msk.bf16.mxu1 %vm123_vm2, %v405_v7  ;;  %v408_v11 = vld [vmem:[%s590_s0 + $0x10] sm:$0xff]   ;;  %v410_v13 = vld [vmem:[%s590_s0 + $0x18] sm:$0xff]  }
   0x5   :  { %378 = vmatprep.subr.bf16.mxu0 %v153_v6  ;;  %397 = vmatprep.subr.bf16.mxu1 %v153_v6  ;;  %26 = vst.msk [vmem:[#allocation2 + $0x30] sm:$0xff] %vm19_vm3, %v413_v10  ;;  %27 = vst.msk [vmem:[#allocation2 + $0x38] sm:$0xff] %vm19_vm3, %v413_v10  ;;  %v409_v12 = vld [vmem:[%s590_s0 + $0x30] sm:$0xff]   ;;  %v411_v14 = vld [vmem:[%s590_s0 + $0x38] sm:$0xff]  }
   0x6   :  { %28 = vst.msk [vmem:[#allocation2 + $0x40] sm:$0xff] %vm19_vm3, %v413_v10  ;;  %29 = vst.msk [vmem:[#allocation2 + $0x48] sm:$0xff] %vm19_vm3, %v413_v10  ;;  %v499_v43 = vld [vmem:[%s591_s2] ss:$0 sm:$0xff] }
   0x7   :  { %30 = vst.msk [vmem:[#allocation2 + $0x50] sm:$0xff] %vm19_vm3, %v413_v10  ;;  %31 = vst.msk [vmem:[#allocation2 + $0x58] sm:$0xff] %vm19_vm3, %v413_v10  ;;  %379 = vmatpush3.bf16.msra.mxu0 %v153_v6  ;;  %399 = vmatpush3.bf16.msra.mxu1 %v153_v6 }
   0x8   :  { %32 = vst.msk [vmem:[#allocation2 + $0x60] sm:$0xff] %vm19_vm3, %v413_v10  ;;  %33 = vst.msk [vmem:[#allocation2 + $0x68] sm:$0xff] %vm19_vm3, %v413_v10 }
   0x9   :  { %34 = vst.msk [vmem:[#allocation2 + $0x70] sm:$0xff] %vm19_vm3, %v413_v10  ;;  %35 = vst.msk [vmem:[#allocation2 + $0x78] sm:$0xff] %vm19_vm3, %v413_v10  ;;  %v54_v15 = vld [vmem:[#allocation2 + $0x10] sm:$0xff]  ;;  %v52_v17 = vld [vmem:[#allocation2] sm:$0xff] }
   0xa   :  { %381 = vmatmul.mubr.msk.bf16.vlgmr.msra.gmra.mrb[0].mxu0 %vm123_vm2, %v406_v8  ;;  %389 = vmatmul.mubr.msk.bf16.vlgmr.msra.gmra.mrb[0].mxu1 %vm123_vm2, %v407_v9  ;;  %v55_v21 = vld [vmem:[#allocation2 + $0x18] sm:$0xff]  ;;  %v53_v27 = vld [vmem:[#allocation2 + $0x8] sm:$0xff] }
   0xb   :  { %384 = vmatprep.mubr.msk.bf16.mxu0 %vm123_vm2, %v408_v11  ;;  %392 = vmatprep.mubr.msk.bf16.mxu1 %vm123_vm2, %v409_v12  ;;  %v56_v41 = vld [vmem:[#allocation2 + $0x20] sm:$0xff]  ;;  %v57_v52 = vld [vmem:[#allocation2 + $0x28] sm:$0xff] }
   0xc   :  { %v58_v39 = vld [vmem:[#allocation2 + $0x30] sm:$0xff]  ;;  %v59_v46 = vld [vmem:[#allocation2 + $0x38] sm:$0xff] }
   0xd   :  { %v60_v18 = vld [vmem:[#allocation2 + $0x40] sm:$0xff]  ;;  %v61_v28 = vld [vmem:[#allocation2 + $0x48] sm:$0xff] }
   0xe   :  { %v62_v16 = vld [vmem:[#allocation2 + $0x50] sm:$0xff]  ;;  %v63_v22 = vld [vmem:[#allocation2 + $0x58] sm:$0xff] }
   0xf   :  { %v64_v42 = vld [vmem:[#allocation2 + $0x60] sm:$0xff]  ;;  %v65_v53 = vld [vmem:[#allocation2 + $0x68] sm:$0xff] }
  0x10   :  { %v66_v40 = vld [vmem:[#allocation2 + $0x70] sm:$0xff]  ;;  %v67_v47 = vld [vmem:[#allocation2 + $0x78] sm:$0xff] }
  0x12   :  { %385 = vmatmul.mubr.msk.bf16.gmra.mrb[4].mxu0 %vm123_vm2, %v410_v13  ;;  %393 = vmatmul.mubr.msk.bf16.gmra.mrb[4].mxu1 %vm123_vm2, %v411_v14 }
  0xdd   :  { %v382_v19 = vpop.f32.mrb[0].mxu0  ;;  %v390_v20 = vpop.f32.mrb[0].mxu1 }
  0xde   :  { %v254_v23 = vadd.f32 %v382_v19, %v54_v15  ;;  %v262_v24 = vadd.f32 %v390_v20, %v62_v16  ;;  %v189_v25 = vpop.f32.mrb[1].mxu0  ;;  %v221_v26 = vpop.f32.mrb[1].mxu1 }
  0xdf   :  { %v252_v29 = vadd.f32 %v189_v25, %v52_v17  ;;  %v260_v30 = vadd.f32 %v221_v26, %v60_v18  ;;  %v383_v31 = vpop.f32.mrb[2].mxu0  ;;  %v391_v32 = vpop.f32.mrb[2].mxu1 }
  0xe0   :  { %271 = vst.msk [vmem:[#allocation2 + $0x10] sm:$0xff] %vm19_vm3, %v254_v23  ;;  %279 = vst.msk [vmem:[#allocation2 + $0x50] sm:$0xff] %vm19_vm3, %v262_v24  ;;  %v255_v33 = vadd.f32 %v383_v31, %v55_v21  ;;  %v263_v34 = vadd.f32 %v391_v32, %v63_v22  ;;  %v192_v35 = vpop.f32.mrb[3].mxu0  ;;  %v224_v36 = vpop.f32.mrb[3].mxu1 }
  0xe1   :  { %269 = vst.msk [vmem:[#allocation2] sm:$0xff] %vm19_vm3, %v252_v29  ;;  %277 = vst.msk [vmem:[#allocation2 + $0x40] sm:$0xff] %vm19_vm3, %v260_v30  ;;  %v253_v37 = vadd.f32 %v192_v35, %v53_v27  ;;  %v261_v38 = vadd.f32 %v224_v36, %v61_v28 }
  0xe2   :  { %272 = vst.msk [vmem:[#allocation2 + $0x18] sm:$0xff] %vm19_vm3, %v255_v33  ;;  %280 = vst.msk [vmem:[#allocation2 + $0x58] sm:$0xff] %vm19_vm3, %v263_v34 }
  0xe3   :  { %270 = vst.msk [vmem:[#allocation2 + $0x8] sm:$0xff] %vm19_vm3, %v253_v37  ;;  %278 = vst.msk [vmem:[#allocation2 + $0x48] sm:$0xff] %vm19_vm3, %v261_v38 }
  0xe5   :  { %v386_v44 = vpop.f32.mrb[4].mxu0  ;;  %v394_v45 = vpop.f32.mrb[4].mxu1 }
  0xe6   :  { %v258_v48 = vadd.f32 %v386_v44, %v58_v39  ;;  %v266_v49 = vadd.f32 %v394_v45, %v66_v40  ;;  %v205_v50 = vpop.f32.mrb[5].mxu0  ;;  %v237_v51 = vpop.f32.mrb[5].mxu1 }
  0xe7   :  { %v290_v54 = vld [vmem:[#allocation2 + $0x10] sm:$0xff]  ;;  %v256_v56 = vadd.f32 %v205_v50, %v56_v41  ;;  %v264_v57 = vadd.f32 %v237_v51, %v64_v42  ;;  %v387_v58 = vpop.f32.mrb[6].mxu0  ;;  %v395_v59 = vpop.f32.mrb[6].mxu1 }
  0xe8   :  { %v298_v55 = vld [vmem:[#allocation2 + $0x50] sm:$0xff]  ;;  %v313_v60 = vadd.f32 %v499_v43, %v290_v54  ;;  %v288_v62 = vld [vmem:[#allocation2] sm:$0xff]  ;;  %275 = vst.msk [vmem:[#allocation2 + $0x30] sm:$0xff] %vm19_vm3, %v258_v48  ;;  %283 = vst.msk [vmem:[#allocation2 + $0x70] sm:$0xff] %vm19_vm3, %v266_v49  ;;  %v259_v0 = vadd.f32 %v387_v58, %v59_v46  ;;  %v267_v1 = vadd.f32 %v395_v59, %v67_v47  ;;  %v208_v2 = vpop.f32.mrb[7].mxu0  ;;  %v240_v3 = vpop.f32.mrb[7].mxu1 }
  0xe9   :  { %v321_v61 = vadd.f32 %v499_v43, %v298_v55  ;;  %v296_v63 = vld [vmem:[#allocation2 + $0x40] sm:$0xff]  ;;  %v311_v4 = vadd.f32 %v499_v43, %v288_v62  ;;  %v291_v6 = vld [vmem:[#allocation2 + $0x18] sm:$0xff]  ;;  %273 = vst.msk [vmem:[#allocation2 + $0x20] sm:$0xff] %vm19_vm3, %v256_v56  ;;  %281 = vst.msk [vmem:[#allocation2 + $0x60] sm:$0xff] %vm19_vm3, %v264_v57  ;;  %v257_v8 = vadd.f32 %v208_v2, %v57_v52 }
  0xea   :  { %v319_v5 = vadd.f32 %v499_v43, %v296_v63  ;;  %v299_v7 = vld [vmem:[#allocation2 + $0x58] sm:$0xff]  ;;  %v265_v9 = vadd.f32 %v240_v3, %v65_v53  ;;  %329 = vst.msk [vmem:[%s592_s3 + $0x10] sm:$0xff] %vm19_vm3, %v313_v60  ;;  %v314_v10 = vadd.f32 %v499_v43, %v291_v6  ;;  %v289_v12 = vld [vmem:[#allocation2 + $0x8] sm:$0xff]  ;;  %276 = vst.msk [vmem:[#allocation2 + $0x38] sm:$0xff] %vm19_vm3, %v259_v0 }
  0xeb   :  { %337 = vst.msk [vmem:[%s592_s3 + $0x50] sm:$0xff] %vm19_vm3, %v321_v61  ;;  %v322_v11 = vadd.f32 %v499_v43, %v299_v7  ;;  %v297_v13 = vld [vmem:[#allocation2 + $0x48] sm:$0xff]  ;;  %284 = vst.msk [vmem:[#allocation2 + $0x78] sm:$0xff] %vm19_vm3, %v267_v1  ;;  %v312_v14 = vadd.f32 %v499_v43, %v289_v12 }
  0xec   :  { %327 = vst.msk [vmem:[%s592_s3] sm:$0xff] %vm19_vm3, %v311_v4  ;;  %335 = vst.msk [vmem:[%s592_s3 + $0x40] sm:$0xff] %vm19_vm3, %v319_v5  ;;  %v320_v15 = vadd.f32 %v499_v43, %v297_v13 }
  0xed   :  { %274 = vst.msk [vmem:[#allocation2 + $0x28] sm:$0xff] %vm19_vm3, %v257_v8  ;;  %282 = vst.msk [vmem:[#allocation2 + $0x68] sm:$0xff] %vm19_vm3, %v265_v9 }
  0xee   :  { %330 = vst.msk [vmem:[%s592_s3 + $0x18] sm:$0xff] %vm19_vm3, %v314_v10  ;;  %338 = vst.msk [vmem:[%s592_s3 + $0x58] sm:$0xff] %vm19_vm3, %v322_v11 }
  0xef   :  { %328 = vst.msk [vmem:[%s592_s3 + $0x8] sm:$0xff] %vm19_vm3, %v312_v14  ;;  %336 = vst.msk [vmem:[%s592_s3 + $0x48] sm:$0xff] %vm19_vm3, %v320_v15  ;;  %v294_v16 = vld [vmem:[#allocation2 + $0x30] sm:$0xff] }
  0xf0   :  { %v302_v17 = vld [vmem:[#allocation2 + $0x70] sm:$0xff]  ;;  %v317_v18 = vadd.f32 %v499_v43, %v294_v16  ;;  %v292_v20 = vld [vmem:[#allocation2 + $0x20] sm:$0xff] }
  0xf1   :  { %v325_v19 = vadd.f32 %v499_v43, %v302_v17  ;;  %v300_v21 = vld [vmem:[#allocation2 + $0x60] sm:$0xff]  ;;  %v315_v22 = vadd.f32 %v499_v43, %v292_v20  ;;  %v295_v24 = vld [vmem:[#allocation2 + $0x38] sm:$0xff] }
  0xf2   :  { %v323_v23 = vadd.f32 %v499_v43, %v300_v21  ;;  %v303_v25 = vld [vmem:[#allocation2 + $0x78] sm:$0xff]  ;;  %333 = vst.msk [vmem:[%s592_s3 + $0x30] sm:$0xff] %vm19_vm3, %v317_v18  ;;  %v318_v26 = vadd.f32 %v499_v43, %v295_v24 }
  0xf3   :  { %341 = vst.msk [vmem:[%s592_s3 + $0x70] sm:$0xff] %vm19_vm3, %v325_v19  ;;  %v326_v27 = vadd.f32 %v499_v43, %v303_v25  ;;  %331 = vst.msk [vmem:[%s592_s3 + $0x20] sm:$0xff] %vm19_vm3, %v315_v22 }
  0xf4   :  { %v293_v28 = vld [vmem:[#allocation2 + $0x28] sm:$0xff]  ;;  %339 = vst.msk [vmem:[%s592_s3 + $0x60] sm:$0xff] %vm19_vm3, %v323_v23  ;;  %334 = vst.msk [vmem:[%s592_s3 + $0x38] sm:$0xff] %vm19_vm3, %v318_v26 }
  0xf5   :  { %v301_v29 = vld [vmem:[#allocation2 + $0x68] sm:$0xff]  ;;  %v316_v30 = vadd.f32 %v499_v43, %v293_v28  ;;  %342 = vst.msk [vmem:[%s592_s3 + $0x78] sm:$0xff] %vm19_vm3, %v326_v27 }
  0xf6   :  { %v324_v31 = vadd.f32 %v499_v43, %v301_v29 }
  0xf7   :  { %332 = vst.msk [vmem:[%s592_s3 + $0x28] sm:$0xff] %vm19_vm3, %v316_v30 }
  0xf8   :  { %340 = vst.msk [vmem:[%s592_s3 + $0x68] sm:$0xff] %vm19_vm3, %v324_v31 }

// kernel: _lambda_.87
= control target key start
LH: loop header
LB: loop body
LE: loop exit
PB: predicated region body
PF: predicated region fallthrough
CT: control target
= control target key end

     0   :  { %v39_v4 = vlaneseq  ;;  %vm97_vm0 = vcmask 31744   ;;  %s297_s1 = inlined_call_operand.vmem [shape: f32[2,4], index: 1, kind: input, shape index: {}]   ;;  %s298_s2 = inlined_call_operand.vmem [shape: f32[128,4], index: 2, kind: input, shape index: {}]   ;;  %s299_s0 = inlined_call_operand.<no memory space> [shape: f32[1], index: 0, kind: input, shape index: {}]   ;;  %s300_s3 = inlined_call_operand.vmem [shape: f32[128,4], index: 3, kind: output, shape index: {}]  }
   0x1   :  { %v15_v0 = vld [vmem:[%s297_s1] sm:$0x1]  ;;  %v17_v1 = vld [vmem:[%s297_s1 + $0x1] sm:$0x1]  ;;  %v24_v12 = vld [vmem:[%s298_s2 + $0x8] sm:$0xff]  ;;  %v182_v22 = vstv %s299_s0 }
   0x2   :  { %v16_v2 = vmul.f32 0.0078125, %v15_v0  ;;  %v18_v3 = vmul.f32 0.0078125, %v17_v1  ;;  %v40_v7 = vshrl.u32 %v39_v4, 7  ;;  %v23_v10 = vld [vmem:[%s298_s2] sm:$0xff]  ;;  %v25_v13 = vld [vmem:[%s298_s2 + $0x10] sm:$0xff]  ;;  %v26_v14 = vld [vmem:[%s298_s2 + $0x18] sm:$0xff] }
   0x3   :  { %v27_v15 = vld [vmem:[%s298_s2 + $0x20] sm:$0xff]  ;;  %v28_v16 = vld [vmem:[%s298_s2 + $0x28] sm:$0xff]  ;;  %v29_v17 = vld [vmem:[%s298_s2 + $0x30] sm:$0xff] }
   0x4   :  { %v19_v5 = vmul.f32 %v16_v2, %v16_v2  ;;  %v41_v9 = vsub.s32 0, %v40_v7  ;;  %v30_v18 = vld [vmem:[%s298_s2 + $0x38] sm:$0xff]  ;;  %v31_v19 = vld [vmem:[%s298_s2 + $0x40] sm:$0xff]  ;;  %v32_v20 = vld [vmem:[%s298_s2 + $0x48] sm:$0xff] }
   0x5   :  { %v33_v23 = vld [vmem:[%s298_s2 + $0x50] sm:$0xff]  ;;  %v34_v24 = vld [vmem:[%s298_s2 + $0x58] sm:$0xff]  ;;  %v35_v25 = vld [vmem:[%s298_s2 + $0x60] sm:$0xff] }
   0x6   :  { %v20_v6 = vsub.f32 %v18_v3, %v19_v5  ;;  %v149_v11 = vrot.slane %v16_v2, %v41_v9  ;;  %v36_v30 = vld [vmem:[%s298_s2 + $0x68] sm:$0xff]  ;;  %v37_v31 = vld [vmem:[%s298_s2 + $0x70] sm:$0xff]  ;;  %v38_v32 = vld [vmem:[%s298_s2 + $0x78] sm:$0xff] }
   0x8   :  { %v21_v8 = vadd.f32 1e-05, %v20_v6  ;;  %v43_v21 = vsub.f32 %v23_v10, %v149_v11  ;;  %v44_v26 = vsub.f32 %v24_v12, %v149_v11  ;;  %v45_v27 = vsub.f32 %v25_v13, %v149_v11 }
   0x9   :  { %v46_v28 = vsub.f32 %v26_v14, %v149_v11  ;;  %v47_v29 = vsub.f32 %v27_v15, %v149_v11  ;;  %v48_v34 = vsub.f32 %v28_v16, %v149_v11  ;;  %v49_v35 = vsub.f32 %v29_v17, %v149_v11 }
   0xa   :  { %118 = vrsqrt.f32 %v21_v8  ;;  %v50_v36 = vsub.f32 %v30_v18, %v149_v11  ;;  %v51_v37 = vsub.f32 %v31_v19, %v149_v11  ;;  %v52_v39 = vsub.f32 %v32_v20, %v149_v11 }
   0xb   :  { %v53_v40 = vsub.f32 %v33_v23, %v149_v11  ;;  %v54_v41 = vsub.f32 %v34_v24, %v149_v11  ;;  %v55_v42 = vsub.f32 %v35_v25, %v149_v11  ;;  %v56_v43 = vsub.f32 %v36_v30, %v149_v11 }
   0xc   :  { %v57_v44 = vsub.f32 %v37_v31, %v149_v11  ;;  %v58_v45 = vsub.f32 %v38_v32, %v149_v11 }
  0x14   :  { %v119_v33 = vpop.eup %118 }
  0x15   :  { %v62_v38 = vrot.slane %v119_v33, %v41_v9 }
  0x17   :  { %v63_v46 = vmul.f32 %v62_v38, %v43_v21  ;;  %v64_v47 = vmul.f32 %v62_v38, %v44_v26  ;;  %v65_v48 = vmul.f32 %v62_v38, %v45_v27  ;;  %v66_v49 = vmul.f32 %v62_v38, %v46_v28 }
  0x18   :  { %v67_v50 = vmul.f32 %v62_v38, %v47_v29  ;;  %v68_v51 = vmul.f32 %v62_v38, %v48_v34  ;;  %v69_v52 = vmul.f32 %v62_v38, %v49_v35  ;;  %v70_v53 = vmul.f32 %v62_v38, %v50_v36 }
  0x19   :  { %v81_v54 = vmul.f32 %v182_v22, %v63_v46  ;;  %v82_v55 = vmul.f32 %v182_v22, %v64_v47  ;;  %v83_v56 = vmul.f32 %v182_v22, %v65_v48  ;;  %v84_v57 = vmul.f32 %v182_v22, %v66_v49 }
  0x1a   :  { %v85_v58 = vmul.f32 %v182_v22, %v67_v50  ;;  %v86_v59 = vmul.f32 %v182_v22, %v68_v51  ;;  %v87_v60 = vmul.f32 %v182_v22, %v69_v52  ;;  %v88_v61 = vmul.f32 %v182_v22, %v70_v53 }
  0x1b   :  { %98 = vst.msk [vmem:[%s300_s3] sm:$0xff] %vm97_vm0, %v81_v54  ;;  %99 = vst.msk [vmem:[%s300_s3 + $0x8] sm:$0xff] %vm97_vm0, %v82_v55  ;;  %v71_v62 = vmul.f32 %v62_v38, %v51_v37  ;;  %v72_v63 = vmul.f32 %v62_v38, %v52_v39  ;;  %v73_v0 = vmul.f32 %v62_v38, %v53_v40 }
  0x1c   :  { %100 = vst.msk [vmem:[%s300_s3 + $0x10] sm:$0xff] %vm97_vm0, %v83_v56  ;;  %101 = vst.msk [vmem:[%s300_s3 + $0x18] sm:$0xff] %vm97_vm0, %v84_v57  ;;  %v74_v1 = vmul.f32 %v62_v38, %v54_v41  ;;  %v75_v2 = vmul.f32 %v62_v38, %v55_v42  ;;  %v76_v3 = vmul.f32 %v62_v38, %v56_v43 }
  0x1d   :  { %102 = vst.msk [vmem:[%s300_s3 + $0x20] sm:$0xff] %vm97_vm0, %v85_v58  ;;  %103 = vst.msk [vmem:[%s300_s3 + $0x28] sm:$0xff] %vm97_vm0, %v86_v59  ;;  %v77_v4 = vmul.f32 %v62_v38, %v57_v44  ;;  %v78_v5 = vmul.f32 %v62_v38, %v58_v45  ;;  %v89_v6 = vmul.f32 %v182_v22, %v71_v62 }
  0x1e   :  { %104 = vst.msk [vmem:[%s300_s3 + $0x30] sm:$0xff] %vm97_vm0, %v87_v60  ;;  %105 = vst.msk [vmem:[%s300_s3 + $0x38] sm:$0xff] %vm97_vm0, %v88_v61  ;;  %v90_v7 = vmul.f32 %v182_v22, %v72_v63  ;;  %v91_v8 = vmul.f32 %v182_v22, %v73_v0  ;;  %v92_v9 = vmul.f32 %v182_v22, %v74_v1 }
  0x1f   :  { %v93_v10 = vmul.f32 %v182_v22, %v75_v2  ;;  %v94_v11 = vmul.f32 %v182_v22, %v76_v3  ;;  %v95_v12 = vmul.f32 %v182_v22, %v77_v4  ;;  %v96_v13 = vmul.f32 %v182_v22, %v78_v5  ;;  %106 = vst.msk [vmem:[%s300_s3 + $0x40] sm:$0xff] %vm97_vm0, %v89_v6 }
  0x20   :  { %107 = vst.msk [vmem:[%s300_s3 + $0x48] sm:$0xff] %vm97_vm0, %v90_v7  ;;  %108 = vst.msk [vmem:[%s300_s3 + $0x50] sm:$0xff] %vm97_vm0, %v91_v8 }
  0x21   :  { %109 = vst.msk [vmem:[%s300_s3 + $0x58] sm:$0xff] %vm97_vm0, %v92_v9  ;;  %110 = vst.msk [vmem:[%s300_s3 + $0x60] sm:$0xff] %vm97_vm0, %v93_v10 }
  0x22   :  { %111 = vst.msk [vmem:[%s300_s3 + $0x68] sm:$0xff] %vm97_vm0, %v94_v11  ;;  %112 = vst.msk [vmem:[%s300_s3 + $0x70] sm:$0xff] %vm97_vm0, %v95_v12 }
  0x23   :  { %113 = vst.msk [vmem:[%s300_s3 + $0x78] sm:$0xff] %vm97_vm0, %v96_v13 }

// kernel: _lambda_.86
= control target key start
LH: loop header
LB: loop body
LE: loop exit
PB: predicated region body
PF: predicated region fallthrough
CT: control target
= control target key end

     0   :  { %vm12_vm0 = vcmask 25600   ;;  %vm30_vm1 = vcmask 31744   ;;  %v132_v0 = vmov 0.0   ;;  %vm122_vm2 = vcmask 1040384   ;;  %s234_s0 = inlined_call_operand.vmem [shape: f32[128,4], index: 0, kind: input, shape index: {}]   ;;  %s235_s1 = inlined_call_operand.vmem [shape: f32[2,4], index: 1, kind: output, shape index: {}]  }
   0x1   :  { %13 = vst.msk [vmem:[%s235_s1] sm:$0x3] %vm12_vm0, %v132_v0  ;;  %v14_v1 = vld [vmem:[%s234_s0] sm:$0xff]  ;;  %v15_v2 = vld [vmem:[%s234_s0 + $0x8] sm:$0xff]  ;;  %v16_v3 = vld [vmem:[%s234_s0 + $0x10] sm:$0xff] }
   0x2   :  { %v31_v4 = vsel %vm30_vm1, %v14_v1, 0.0  ;;  %v32_v5 = vsel %vm30_vm1, %v15_v2, 0.0  ;;  %v34_v6 = vsel %vm30_vm1, %v16_v3, 0.0  ;;  %v17_v7 = vld [vmem:[%s234_s0 + $0x18] sm:$0xff]  ;;  %v18_v10 = vld [vmem:[%s234_s0 + $0x20] sm:$0xff]  ;;  %v19_v13 = vld [vmem:[%s234_s0 + $0x28] sm:$0xff]  ;;  %v68_v15 = vmul.f32 %v14_v1, %v14_v1 }
   0x3   :  { %v33_v8 = vadd.f32 %v32_v5, %v31_v4  ;;  %v36_v9 = vsel %vm30_vm1, %v17_v7, 0.0  ;;  %v38_v12 = vsel %vm30_vm1, %v18_v10, 0.0  ;;  %v69_v16 = vmul.f32 %v15_v2, %v15_v2  ;;  %v20_v19 = vld [vmem:[%s234_s0 + $0x30] sm:$0xff]  ;;  %v21_v24 = vld [vmem:[%s234_s0 + $0x38] sm:$0xff]  ;;  %v22_v31 = vld [vmem:[%s234_s0 + $0x40] sm:$0xff] }
   0x4   :  { %v70_v17 = vmul.f32 %v16_v3, %v16_v3  ;;  %v40_v18 = vsel %vm30_vm1, %v19_v13, 0.0  ;;  %v71_v21 = vmul.f32 %v17_v7, %v17_v7  ;;  %v42_v22 = vsel %vm30_vm1, %v20_v19, 0.0  ;;  %v23_v37 = vld [vmem:[%s234_s0 + $0x48] sm:$0xff]  ;;  %v24_v43 = vld [vmem:[%s234_s0 + $0x50] sm:$0xff]  ;;  %v25_v49 = vld [vmem:[%s234_s0 + $0x58] sm:$0xff] }
   0x5   :  { %v35_v11 = vadd.f32 %v34_v6, %v33_v8  ;;  %v72_v23 = vmul.f32 %v18_v10, %v18_v10  ;;  %v84_v26 = vsel %vm30_vm1, %v68_v15, 0.0  ;;  %v85_v27 = vsel %vm30_vm1, %v69_v16, 0.0  ;;  %v26_v55 = vld [vmem:[%s234_s0 + $0x60] sm:$0xff]  ;;  %v27_v61 = vld [vmem:[%s234_s0 + $0x68] sm:$0xff]  ;;  %v28_v3 = vld [vmem:[%s234_s0 + $0x70] sm:$0xff] }
   0x6   :  { %v87_v28 = vsel %vm30_vm1, %v70_v17, 0.0  ;;  %v44_v29 = vsel %vm30_vm1, %v21_v24, 0.0  ;;  %v86_v30 = vadd.f32 %v85_v27, %v84_v26  ;;  %v73_v33 = vmul.f32 %v19_v13, %v19_v13 }
   0x7   :  { %v37_v14 = vadd.f32 %v36_v9, %v35_v11  ;;  %v89_v34 = vsel %vm30_vm1, %v71_v21, 0.0  ;;  %v46_v35 = vsel %vm30_vm1, %v22_v31, 0.0  ;;  %v74_v39 = vmul.f32 %v20_v19, %v20_v19  ;;  %v29_v9 = vld [vmem:[%s234_s0 + $0x78] sm:$0xff] }
   0x8   :  { %v88_v36 = vadd.f32 %v87_v28, %v86_v30  ;;  %v91_v40 = vsel %vm30_vm1, %v72_v23, 0.0  ;;  %v48_v41 = vsel %vm30_vm1, %v23_v37, 0.0  ;;  %v75_v45 = vmul.f32 %v21_v24, %v21_v24 }
   0x9   :  { %v39_v20 = vadd.f32 %v38_v12, %v37_v14  ;;  %v93_v46 = vsel %vm30_vm1, %v73_v33, 0.0  ;;  %v50_v47 = vsel %vm30_vm1, %v24_v43, 0.0  ;;  %v76_v51 = vmul.f32 %v22_v31, %v22_v31 }
   0xa   :  { %v90_v42 = vadd.f32 %v89_v34, %v88_v36  ;;  %v95_v52 = vsel %vm30_vm1, %v74_v39, 0.0  ;;  %v52_v53 = vsel %vm30_vm1, %v25_v49, 0.0  ;;  %v77_v57 = vmul.f32 %v23_v37, %v23_v37 }
   0xb   :  { %v41_v25 = vadd.f32 %v40_v18, %v39_v20  ;;  %v97_v58 = vsel %vm30_vm1, %v75_v45, 0.0  ;;  %v54_v59 = vsel %vm30_vm1, %v26_v55, 0.0  ;;  %v78_v63 = vmul.f32 %v24_v43, %v24_v43  ;;  %v121_v43 = vld [vmem:[%s235_s1] sm:$0x3] }
   0xc   :  { %v92_v48 = vadd.f32 %v91_v40, %v90_v42  ;;  %v99_v0 = vsel %vm30_vm1, %v76_v51, 0.0  ;;  %v56_v1 = vsel %vm30_vm1, %v27_v61, 0.0  ;;  %v79_v5 = vmul.f32 %v25_v49, %v25_v49 }
   0xd   :  { %v43_v32 = vadd.f32 %v42_v22, %v41_v25  ;;  %v101_v6 = vsel %vm30_vm1, %v77_v57, 0.0  ;;  %v58_v7 = vsel %vm30_vm1, %v28_v3, 0.0  ;;  %v80_v11 = vmul.f32 %v26_v55, %v26_v55 }
   0xe   :  { %v94_v54 = vadd.f32 %v93_v46, %v92_v48  ;;  %v103_v12 = vsel %vm30_vm1, %v78_v63, 0.0  ;;  %v60_v13 = vsel %vm30_vm1, %v29_v9, 0.0  ;;  %v81_v16 = vmul.f32 %v27_v61, %v27_v61 }
   0xf   :  { %v45_v38 = vadd.f32 %v44_v29, %v43_v32  ;;  %v105_v17 = vsel %vm30_vm1, %v79_v5, 0.0  ;;  %v82_v20 = vmul.f32 %v28_v3, %v28_v3  ;;  %v107_v21 = vsel %vm30_vm1, %v80_v11, 0.0 }
  0x10   :  { %v96_v60 = vadd.f32 %v95_v52, %v94_v54  ;;  %v83_v24 = vmul.f32 %v29_v9, %v29_v9  ;;  %v109_v25 = vsel %vm30_vm1, %v81_v16, 0.0 }
  0x11   :  { %v47_v44 = vadd.f32 %v46_v35, %v45_v38  ;;  %v111_v28 = vsel %vm30_vm1, %v82_v20, 0.0 }
  0x12   :  { %v98_v2 = vadd.f32 %v97_v58, %v96_v60  ;;  %v113_v30 = vsel %vm30_vm1, %v83_v24, 0.0 }
  0x13   :  { %v49_v50 = vadd.f32 %v48_v41, %v47_v44 }
  0x14   :  { %v100_v8 = vadd.f32 %v99_v0, %v98_v2 }
  0x15   :  { %v51_v56 = vadd.f32 %v50_v47, %v49_v50 }
  0x16   :  { %v102_v14 = vadd.f32 %v101_v6, %v100_v8 }
  0x17   :  { %v53_v62 = vadd.f32 %v52_v53, %v51_v56 }
  0x18   :  { %v104_v18 = vadd.f32 %v103_v12, %v102_v14 }
  0x19   :  { %v55_v4 = vadd.f32 %v54_v59, %v53_v62 }
  0x1a   :  { %v106_v22 = vadd.f32 %v105_v17, %v104_v18 }
  0x1b   :  { %v57_v10 = vadd.f32 %v56_v1, %v55_v4 }
  0x1c   :  { %v108_v26 = vadd.f32 %v107_v21, %v106_v22 }
  0x1d   :  { %v59_v15 = vadd.f32 %v58_v7, %v57_v10 }
  0x1e   :  { %v110_v29 = vadd.f32 %v109_v25, %v108_v26 }
  0x1f   :  { %v61_v19 = vadd.f32 %v60_v13, %v59_v15 }
  0x20   :  { %v112_v32 = vadd.f32 %v111_v28, %v110_v29 }
  0x21   :  { %v62_v23 = vrot.slane %v61_v19, 4 }
  0x22   :  { %v114_v33 = vadd.f32 %v113_v30, %v112_v32 }
  0x23   :  { %v63_v27 = vadd.f32 %v62_v23, %v61_v19 }
  0x24   :  { %v115_v35 = vrot.slane %v114_v33, 4 }
  0x25   :  { %v64_v31 = vrot.slane %v63_v27, 2 }
  0x26   :  { %v116_v36 = vadd.f32 %v115_v35, %v114_v33 }
  0x27   :  { %v65_v34 = vadd.f32 %v64_v31, %v63_v27 }
  0x28   :  { %v117_v38 = vrot.slane %v116_v36, 2 }
  0x29   :  { %v66_v37 = vrot.slane %v65_v34, 1 }
  0x2a   :  { %v118_v39 = vadd.f32 %v117_v38, %v116_v36 }
  0x2b   :  { %v67_v40 = vadd.f32 %v66_v37, %v65_v34 }
  0x2c   :  { %v119_v41 = vrot.slane %v118_v39, 1 }
  0x2e   :  { %v120_v42 = vadd.f32 %v119_v41, %v118_v39 }
  0x30   :  { %v123_v44 = vsel %vm122_vm2, %v67_v40, %v120_v42 }
  0x31   :  { %v124_v45 = vadd.f32 %v123_v44, %v121_v43 }
  0x33   :  { %126 = vst.msk [vmem:[%s235_s1] sm:$0x3] %vm12_vm0, %v124_v45 }

// kernel: _lambda_.91
= control target key start
LH: loop header
LB: loop body
LE: loop exit
PB: predicated region body
PF: predicated region fallthrough
CT: control target
= control target key end

     0   :  { %vm19_vm0 = vcmask 31744   ;;  %v431_v2 = vmov 0.0   ;;  %vm169_vm1 = vcmask 1041408   ;;  %v432_v7 = vmov 0   ;;  %s638_s1 = inlined_call_operand.vmem [shape: bf16[36,4], index: 1, kind: input, shape index: {}]   ;;  %s639_s0 = inlined_call_operand.vmem [shape: bf16[128,36], index: 0, kind: input, shape index: {}]   ;;  %s640_s2 = inlined_call_operand.vmem [shape: f32[1,4], index: 2, kind: input, shape index: {}]   ;;  %s641_s3 = inlined_call_operand.vmem [shape: f32[128,4], index: 3, kind: output, shape index: {}]  }
   0x1   :  { %v428_v0 = vld [vmem:[%s638_s1] sm:$0xff]   ;;  %v429_v1 = vld [vmem:[%s638_s1 + $0x8] sm:$0xff]   ;;  %22 = vst.msk [vmem:[#allocation2 + $0x10] sm:$0xff] %vm19_vm0, %v431_v2  ;;  %20 = vst.msk [vmem:[#allocation2] sm:$0xff] %vm19_vm0, %v431_v2  ;;  %vm144_vm2 = vcmask 293888  }
   0x2   :  { %21 = vst.msk [vmem:[#allocation2 + $0x8] sm:$0xff] %vm19_vm0, %v431_v2  ;;  %23 = vst.msk [vmem:[#allocation2 + $0x18] sm:$0xff] %vm19_vm0, %v431_v2  ;;  %396 = vmatprep.subr.bf16.mxu0 %v428_v0  ;;  %418 = vmatprep.subr.bf16.mxu1 %v428_v0  ;;  %v430_v3 = vld [vmem:[%s638_s1 + $0x10] ss:$0 sps:$4 sm:$0x33]  }
   0x3   :  { %24 = vst.msk [vmem:[#allocation2 + $0x20] sm:$0xff] %vm19_vm0, %v431_v2  ;;  %25 = vst.msk [vmem:[#allocation2 + $0x28] sm:$0xff] %vm19_vm0, %v431_v2  ;;  %397 = vmatpush3.bf16.msra.mxu0 %v428_v0  ;;  %421 = vmatpush3.bf16.msra.mxu1 %v428_v0  ;;  %v36_v4 = vld [vmem:[%s639_s0] sm:$0xf]  ;;  %v37_v5 = vld [vmem:[%s639_s0 + $0x4] sm:$0xf] }
   0x4   :  { %26 = vst.msk [vmem:[#allocation2 + $0x30] sm:$0xff] %vm19_vm0, %v431_v2  ;;  %27 = vst.msk [vmem:[#allocation2 + $0x38] sm:$0xff] %vm19_vm0, %v431_v2  ;;  %v44_v6 = vld [vmem:[%s639_s0 + $0x20] sm:$0xf]  ;;  %398 = vmatprep.subr.bf16.mxu0 %v429_v1  ;;  %419 = vmatprep.subr.bf16.mxu1 %v429_v1  ;;  %v52_v8 = vmax.bf16 %v432_v7, %v36_v4  ;;  %v53_v9 = vmax.bf16 %v432_v7, %v37_v5  ;;  %v45_v10 = vld [vmem:[%s639_s0 + $0x24] sm:$0xf] }
   0x5   :  { %28 = vst.msk [vmem:[#allocation2 + $0x40] sm:$0xff] %vm19_vm0, %v431_v2  ;;  %29 = vst.msk [vmem:[#allocation2 + $0x48] sm:$0xff] %vm19_vm0, %v431_v2  ;;  %v60_v11 = vmax.bf16 %v432_v7, %v44_v6  ;;  %v38_v12 = vld [vmem:[%s639_s0 + $0x8] sm:$0xf]  ;;  %v61_v13 = vmax.bf16 %v432_v7, %v45_v10  ;;  %v39_v14 = vld [vmem:[%s639_s0 + $0xc] sm:$0xf] }
   0x6   :  { %30 = vst.msk [vmem:[#allocation2 + $0x50] sm:$0xff] %vm19_vm0, %v431_v2  ;;  %31 = vst.msk [vmem:[#allocation2 + $0x58] sm:$0xff] %vm19_vm0, %v431_v2  ;;  %v54_v15 = vmax.bf16 %v432_v7, %v38_v12  ;;  %v46_v16 = vld [vmem:[%s639_s0 + $0x28] sm:$0xf]  ;;  %v47_v17 = vld [vmem:[%s639_s0 + $0x2c] sm:$0xf]  ;;  %v365_v18 = vcombine.low %v52_v8, %v53_v9  ;;  %v55_v19 = vmax.bf16 %v432_v7, %v39_v14 }
   0x7   :  { %32 = vst.msk [vmem:[#allocation2 + $0x60] sm:$0xff] %vm19_vm0, %v431_v2  ;;  %33 = vst.msk [vmem:[#allocation2 + $0x68] sm:$0xff] %vm19_vm0, %v431_v2  ;;  %v62_v20 = vmax.bf16 %v432_v7, %v46_v16  ;;  %v63_v21 = vmax.bf16 %v432_v7, %v47_v17  ;;  %v40_v22 = vld [vmem:[%s639_s0 + $0x10] sm:$0xf]  ;;  %v41_v23 = vld [vmem:[%s639_s0 + $0x14] sm:$0xf]  ;;  %399 = vmatpush3.bf16.msra.mxu0 %v429_v1  ;;  %422 = vmatpush3.bf16.msra.mxu1 %v429_v1 }
   0x8   :  { %34 = vst.msk [vmem:[#allocation2 + $0x70] sm:$0xff] %vm19_vm0, %v431_v2  ;;  %35 = vst.msk [vmem:[#allocation2 + $0x78] sm:$0xff] %vm19_vm0, %v431_v2  ;;  %v48_v24 = vld [vmem:[%s639_s0 + $0x30] sm:$0xf]  ;;  %v369_v25 = vcombine.low %v60_v11, %v61_v13  ;;  %v56_v26 = vmax.bf16 %v432_v7, %v40_v22  ;;  %v57_v27 = vmax.bf16 %v432_v7, %v41_v23  ;;  %v49_v28 = vld [vmem:[%s639_s0 + $0x34] sm:$0xf]  ;;  %424 = vmatprep.subr.msk.bf16.mxu0 %vm169_vm1, %v430_v3 }
   0x9   :  { %425 = vmatprep.subr.msk.bf16.mxu1 %vm169_vm1, %v430_v3  ;;  %v171_v29 = vsel %vm169_vm1, %v430_v3, 0  ;;  %v64_v30 = vmax.bf16 %v432_v7, %v48_v24  ;;  %402 = vmatprep.mubr.msk.bf16.mxu0 %vm144_vm2, %v365_v18  ;;  %v65_v31 = vmax.bf16 %v432_v7, %v49_v28  ;;  %v366_v32 = vcombine.low %v54_v15, %v55_v19  ;;  %v42_v34 = vld [vmem:[%s639_s0 + $0x18] sm:$0xf]  ;;  %v43_v37 = vld [vmem:[%s639_s0 + $0x1c] sm:$0xf]  ;;  %v68_v48 = vld [vmem:[#allocation2] sm:$0xff] }
   0xa   :  { %410 = vmatprep.mubr.msk.bf16.mxu1 %vm144_vm2, %v369_v25  ;;  %v370_v33 = vcombine.low %v62_v20, %v63_v21  ;;  %v367_v35 = vcombine.low %v56_v26, %v57_v27  ;;  %v50_v38 = vld [vmem:[%s639_s0 + $0x38] sm:$0xf]  ;;  %v51_v39 = vld [vmem:[%s639_s0 + $0x3c] sm:$0xf]  ;;  %v58_v40 = vmax.bf16 %v432_v7, %v42_v34  ;;  %v59_v41 = vmax.bf16 %v432_v7, %v43_v37  ;;  %v71_v52 = vld [vmem:[#allocation2 + $0x18] sm:$0xff] }
   0xb   :  { %401 = vmatpush3.bf16.msra.mxu0 %v171_v29  ;;  %423 = vmatpush3.bf16.msra.mxu1 %v171_v29  ;;  %v371_v36 = vcombine.low %v64_v30, %v65_v31  ;;  %v66_v42 = vmax.bf16 %v432_v7, %v50_v38  ;;  %v67_v43 = vmax.bf16 %v432_v7, %v51_v39  ;;  %v70_v46 = vld [vmem:[#allocation2 + $0x10] sm:$0xff]  ;;  %v69_v58 = vld [vmem:[#allocation2 + $0x8] sm:$0xff]  ;;  %v72_v8 = vld [vmem:[#allocation2 + $0x20] sm:$0xff] }
   0xc   :  { %v368_v44 = vcombine.low %v58_v40, %v59_v41  ;;  %v76_v49 = vld [vmem:[#allocation2 + $0x40] sm:$0xff]  ;;  %v77_v59 = vld [vmem:[#allocation2 + $0x48] sm:$0xff]  ;;  %v74_v6 = vld [vmem:[#allocation2 + $0x30] sm:$0xff] }
   0xd   :  { %v372_v45 = vcombine.low %v66_v42, %v67_v43  ;;  %v78_v47 = vld [vmem:[#allocation2 + $0x50] sm:$0xff]  ;;  %v79_v53 = vld [vmem:[#allocation2 + $0x58] sm:$0xff]  ;;  %v73_v19 = vld [vmem:[#allocation2 + $0x28] sm:$0xff] }
   0xe   :  { %403 = vmatmul.mubr.msk.bf16.vlgmr.msra.gmra.mrb[0].mxu0 %vm144_vm2, %v366_v32  ;;  %411 = vmatmul.mubr.msk.bf16.vlgmr.msra.gmra.mrb[0].mxu1 %vm144_vm2, %v370_v33  ;;  %v80_v9 = vld [vmem:[#allocation2 + $0x60] sm:$0xff]  ;;  %v548_v10 = vld [vmem:[%s640_s2] ss:$0 sm:$0xff]  ;;  %v81_v20 = vld [vmem:[#allocation2 + $0x68] sm:$0xff] }
   0xf   :  { %406 = vmatprep.mubr.msk.bf16.mxu0 %vm144_vm2, %v367_v35  ;;  %414 = vmatprep.mubr.msk.bf16.mxu1 %vm144_vm2, %v371_v36  ;;  %v82_v7 = vld [vmem:[#allocation2 + $0x70] sm:$0xff]  ;;  %v75_v13 = vld [vmem:[#allocation2 + $0x38] sm:$0xff] }
  0x10   :  { %v83_v14 = vld [vmem:[#allocation2 + $0x78] sm:$0xff] }
  0x16   :  { %407 = vmatmul.mubr.msk.bf16.gmra.mrb[4].mxu0 %vm144_vm2, %v368_v44  ;;  %415 = vmatmul.mubr.msk.bf16.gmra.mrb[4].mxu1 %vm144_vm2, %v372_v45 }
  0xe1   :  { %v404_v50 = vpop.f32.mrb[0].mxu0  ;;  %v412_v51 = vpop.f32.mrb[0].mxu1 }
  0xe2   :  { %v272_v54 = vadd.f32 %v404_v50, %v70_v46  ;;  %v280_v55 = vadd.f32 %v412_v51, %v78_v47  ;;  %v207_v56 = vpop.f32.mrb[1].mxu0  ;;  %v239_v57 = vpop.f32.mrb[1].mxu1 }
  0xe3   :  { %v270_v60 = vadd.f32 %v207_v56, %v68_v48  ;;  %v278_v61 = vadd.f32 %v239_v57, %v76_v49  ;;  %v405_v62 = vpop.f32.mrb[2].mxu0  ;;  %v413_v63 = vpop.f32.mrb[2].mxu1 }
  0xe4   :  { %289 = vst.msk [vmem:[#allocation2 + $0x10] sm:$0xff] %vm19_vm0, %v272_v54  ;;  %297 = vst.msk [vmem:[#allocation2 + $0x50] sm:$0xff] %vm19_vm0, %v280_v55  ;;  %v273_v0 = vadd.f32 %v405_v62, %v71_v52  ;;  %v281_v1 = vadd.f32 %v413_v63, %v79_v53  ;;  %v210_v2 = vpop.f32.mrb[3].mxu0  ;;  %v242_v3 = vpop.f32.mrb[3].mxu1 }
  0xe5   :  { %287 = vst.msk [vmem:[#allocation2] sm:$0xff] %vm19_vm0, %v270_v60  ;;  %295 = vst.msk [vmem:[#allocation2 + $0x40] sm:$0xff] %vm19_vm0, %v278_v61  ;;  %v271_v4 = vadd.f32 %v210_v2, %v69_v58  ;;  %v279_v5 = vadd.f32 %v242_v3, %v77_v59 }
  0xe6   :  { %290 = vst.msk [vmem:[#allocation2 + $0x18] sm:$0xff] %vm19_vm0, %v273_v0  ;;  %298 = vst.msk [vmem:[#allocation2 + $0x58] sm:$0xff] %vm19_vm0, %v281_v1 }
  0xe7   :  { %288 = vst.msk [vmem:[#allocation2 + $0x8] sm:$0xff] %vm19_vm0, %v271_v4  ;;  %296 = vst.msk [vmem:[#allocation2 + $0x48] sm:$0xff] %vm19_vm0, %v279_v5 }
  0xe9   :  { %v408_v11 = vpop.f32.mrb[4].mxu0  ;;  %v416_v12 = vpop.f32.mrb[4].mxu1 }
  0xea   :  { %v276_v15 = vadd.f32 %v408_v11, %v74_v6  ;;  %v284_v16 = vadd.f32 %v416_v12, %v82_v7  ;;  %v223_v17 = vpop.f32.mrb[5].mxu0  ;;  %v255_v18 = vpop.f32.mrb[5].mxu1 }
  0xeb   :  { %v308_v21 = vld [vmem:[#allocation2 + $0x10] sm:$0xff]  ;;  %v274_v23 = vadd.f32 %v223_v17, %v72_v8  ;;  %v282_v24 = vadd.f32 %v255_v18, %v80_v9  ;;  %v409_v25 = vpop.f32.mrb[6].mxu0  ;;  %v417_v26 = vpop.f32.mrb[6].mxu1 }
  0xec   :  { %v316_v22 = vld [vmem:[#allocation2 + $0x50] sm:$0xff]  ;;  %v331_v27 = vadd.f32 %v548_v10, %v308_v21  ;;  %v306_v29 = vld [vmem:[#allocation2] sm:$0xff]  ;;  %293 = vst.msk [vmem:[#allocation2 + $0x30] sm:$0xff] %vm19_vm0, %v276_v15  ;;  %301 = vst.msk [vmem:[#allocation2 + $0x70] sm:$0xff] %vm19_vm0, %v284_v16  ;;  %v277_v31 = vadd.f32 %v409_v25, %v75_v13  ;;  %v285_v32 = vadd.f32 %v417_v26, %v83_v14  ;;  %v226_v33 = vpop.f32.mrb[7].mxu0  ;;  %v258_v34 = vpop.f32.mrb[7].mxu1 }
  0xed   :  { %v339_v28 = vadd.f32 %v548_v10, %v316_v22  ;;  %v314_v30 = vld [vmem:[#allocation2 + $0x40] sm:$0xff]  ;;  %v329_v35 = vadd.f32 %v548_v10, %v306_v29  ;;  %v309_v37 = vld [vmem:[#allocation2 + $0x18] sm:$0xff]  ;;  %291 = vst.msk [vmem:[#allocation2 + $0x20] sm:$0xff] %vm19_vm0, %v274_v23  ;;  %299 = vst.msk [vmem:[#allocation2 + $0x60] sm:$0xff] %vm19_vm0, %v282_v24  ;;  %v275_v39 = vadd.f32 %v226_v33, %v73_v19 }
  0xee   :  { %v337_v36 = vadd.f32 %v548_v10, %v314_v30  ;;  %v317_v38 = vld [vmem:[#allocation2 + $0x58] sm:$0xff]  ;;  %v283_v40 = vadd.f32 %v258_v34, %v81_v20  ;;  %347 = vst.msk [vmem:[%s641_s3 + $0x10] sm:$0xff] %vm19_vm0, %v331_v27  ;;  %v332_v41 = vadd.f32 %v548_v10, %v309_v37  ;;  %v307_v43 = vld [vmem:[#allocation2 + $0x8] sm:$0xff]  ;;  %294 = vst.msk [vmem:[#allocation2 + $0x38] sm:$0xff] %vm19_vm0, %v277_v31 }
  0xef   :  { %355 = vst.msk [vmem:[%s641_s3 + $0x50] sm:$0xff] %vm19_vm0, %v339_v28  ;;  %v340_v42 = vadd.f32 %v548_v10, %v317_v38  ;;  %v315_v44 = vld [vmem:[#allocation2 + $0x48] sm:$0xff]  ;;  %302 = vst.msk [vmem:[#allocation2 + $0x78] sm:$0xff] %vm19_vm0, %v285_v32  ;;  %v330_v45 = vadd.f32 %v548_v10, %v307_v43 }
  0xf0   :  { %345 = vst.msk [vmem:[%s641_s3] sm:$0xff] %vm19_vm0, %v329_v35  ;;  %353 = vst.msk [vmem:[%s641_s3 + $0x40] sm:$0xff] %vm19_vm0, %v337_v36  ;;  %v338_v46 = vadd.f32 %v548_v10, %v315_v44 }
  0xf1   :  { %292 = vst.msk [vmem:[#allocation2 + $0x28] sm:$0xff] %vm19_vm0, %v275_v39  ;;  %300 = vst.msk [vmem:[#allocation2 + $0x68] sm:$0xff] %vm19_vm0, %v283_v40 }
  0xf2   :  { %348 = vst.msk [vmem:[%s641_s3 + $0x18] sm:$0xff] %vm19_vm0, %v332_v41  ;;  %356 = vst.msk [vmem:[%s641_s3 + $0x58] sm:$0xff] %vm19_vm0, %v340_v42 }
  0xf3   :  { %346 = vst.msk [vmem:[%s641_s3 + $0x8] sm:$0xff] %vm19_vm0, %v330_v45  ;;  %354 = vst.msk [vmem:[%s641_s3 + $0x48] sm:$0xff] %vm19_vm0, %v338_v46  ;;  %v312_v47 = vld [vmem:[#allocation2 + $0x30] sm:$0xff] }
  0xf4   :  { %v320_v48 = vld [vmem:[#allocation2 + $0x70] sm:$0xff]  ;;  %v335_v49 = vadd.f32 %v548_v10, %v312_v47  ;;  %v310_v51 = vld [vmem:[#allocation2 + $0x20] sm:$0xff] }
  0xf5   :  { %v343_v50 = vadd.f32 %v548_v10, %v320_v48  ;;  %v318_v52 = vld [vmem:[#allocation2 + $0x60] sm:$0xff]  ;;  %v333_v53 = vadd.f32 %v548_v10, %v310_v51  ;;  %v313_v55 = vld [vmem:[#allocation2 + $0x38] sm:$0xff] }
  0xf6   :  { %v341_v54 = vadd.f32 %v548_v10, %v318_v52  ;;  %v321_v56 = vld [vmem:[#allocation2 + $0x78] sm:$0xff]  ;;  %351 = vst.msk [vmem:[%s641_s3 + $0x30] sm:$0xff] %vm19_vm0, %v335_v49  ;;  %v336_v57 = vadd.f32 %v548_v10, %v313_v55 }
  0xf7   :  { %359 = vst.msk [vmem:[%s641_s3 + $0x70] sm:$0xff] %vm19_vm0, %v343_v50  ;;  %v344_v58 = vadd.f32 %v548_v10, %v321_v56  ;;  %349 = vst.msk [vmem:[%s641_s3 + $0x20] sm:$0xff] %vm19_vm0, %v333_v53 }
  0xf8   :  { %v311_v59 = vld [vmem:[#allocation2 + $0x28] sm:$0xff]  ;;  %357 = vst.msk [vmem:[%s641_s3 + $0x60] sm:$0xff] %vm19_vm0, %v341_v54  ;;  %352 = vst.msk [vmem:[%s641_s3 + $0x38] sm:$0xff] %vm19_vm0, %v336_v57 }
  0xf9   :  { %v319_v60 = vld [vmem:[#allocation2 + $0x68] sm:$0xff]  ;;  %v334_v61 = vadd.f32 %v548_v10, %v311_v59  ;;  %360 = vst.msk [vmem:[%s641_s3 + $0x78] sm:$0xff] %vm19_vm0, %v344_v58 }
  0xfa   :  { %v342_v62 = vadd.f32 %v548_v10, %v319_v60 }
  0xfb   :  { %350 = vst.msk [vmem:[%s641_s3 + $0x28] sm:$0xff] %vm19_vm0, %v334_v61 }
  0xfc   :  { %358 = vst.msk [vmem:[%s641_s3 + $0x68] sm:$0xff] %vm19_vm0, %v342_v62 }

// kernel: _lambda_.93
= control target key start
LH: loop header
LB: loop body
LE: loop exit
PB: predicated region body
PF: predicated region fallthrough
CT: control target
= control target key end

     0   :  { %10 = vsyncpa [#allocation3], 0  ;;  %s751_s0 = inlined_call_operand.vmem [shape: f32[3], index: 0, kind: input, shape index: {}]   ;;  %s752_s1 = inlined_call_operand.vmem [shape: f32[2,4], index: 1, kind: input, shape index: {}]   ;;  %s753_s2 = inlined_call_operand.vmem [shape: f32[128,4], index: 2, kind: input, shape index: {}]   ;;  %s754_s3 = inlined_call_operand.vmem [shape: f32[128,4], index: 3, kind: input, shape index: {}]   ;;  %s755_s4 = inlined_call_operand.vmem [shape: f32[128,4], index: 4, kind: input, shape index: {}]   ;;  %s756_s5 = inlined_call_operand.vmem [shape: f32[128,4], index: 5, kind: output, shape index: {}]  }
   0x1   :  { %s17_s20 = sshll.u32 %s751_s0, 4  ;;  %s18_s20 = int_to_ptr.vmem [resolvable:$true] %s17_s20 }
   0x2   :  { %s242_s21 = scalar_lea.vmem %s18_s20, 16  ;;  %p247_p1 = scmp.lt.s32.totalorder %s18_s20, %s18_s20 }
   0x3   :  { %p243_p0 = scmp.ne.s32.totalorder %s18_s20, %s242_s21  ;;  %p248_p2 = scmp.lt.s32.totalorder %s242_s21, %s242_s21 }
   0x5   :  { %p249_p3 = por %p248_p2, %p247_p1 }
   0x7   :  { %p250_p4 = pnand %p249_p3, %p243_p0 }
   0x9   :  { %253 = shalt.err (!%p250_p4)
}
   0xa   :  { %s256_s22 = smov [#allocation2]  }
   0xb   :  { %20 = dma.vmem_to_smem %s18_s20, 16, %s256_s22, [#allocation3]  }
   0xc   :  { %254 = dma.done.wait [#allocation3], 16  }
   0xd   :  { %255 = vsyncadd [#allocation3], 4294967280 }
   0xe   :  { %32 = sfence }
   0xf   :  { %v33_v0 = vld [vmem:[%s752_s1] sm:$0x1]  ;;  %v35_v1 = vld [vmem:[%s752_s1 + $0x1] sm:$0x1]  ;;  %v57_v2 = vlaneseq  ;;  %s97_s0 = sld [smem:[#allocation2]]  ;;  %s237_s27 = sld [smem:[#allocation2 + $0x1]] }
  0x10   :  { %v34_v3 = vmul.f32 0.0078125, %v33_v0  ;;  %v36_v4 = vmul.f32 0.0078125, %v35_v1  ;;  %s238_s28 = sld [smem:[#allocation2 + $0x2]]  ;;  %v301_v7 = vld [vmem:[%s753_s2] sm:$0xff]  ;;  %v313_v12 = vld [vmem:[%s753_s2 + $0x8] sm:$0xff]  ;;  %v328_v16 = vld [vmem:[%s753_s2 + $0x10] sm:$0xff] }
  0x11   :  { %v296_v5 = vshrl.u32 %v57_v2, 7  ;;  %v115_v10 = vld [vmem:[%s754_s3] sm:$0xff]  ;;  %v116_v13 = vld [vmem:[%s754_s3 + $0x8] sm:$0xff]  ;;  %v117_v17 = vld [vmem:[%s754_s3 + $0x10] sm:$0xff]  ;;  %vm215_vm0 = vcmask 31744  }
  0x12   :  { %v37_v6 = vmul.f32 %v34_v3, %v34_v3  ;;  %v165_v11 = vld [vmem:[%s755_s4] sm:$0xff]  ;;  %v166_v15 = vld [vmem:[%s755_s4 + $0x8] sm:$0xff]  ;;  %v167_v18 = vld [vmem:[%s755_s4 + $0x10] sm:$0xff] }
  0x13   :  { %v59_v8 = vsub.s32 0, %v296_v5  ;;  %v339_v20 = vld [vmem:[%s753_s2 + $0x18] sm:$0xff]  ;;  %v350_v23 = vld [vmem:[%s753_s2 + $0x20] sm:$0xff]  ;;  %v365_v28 = vld [vmem:[%s753_s2 + $0x28] sm:$0xff] }
  0x14   :  { %v38_v9 = vsub.f32 %v36_v4, %v37_v6  ;;  %v118_v21 = vld [vmem:[%s754_s3 + $0x18] sm:$0xff]  ;;  %v119_v26 = vld [vmem:[%s754_s3 + $0x20] sm:$0xff]  ;;  %v120_v29 = vld [vmem:[%s754_s3 + $0x28] sm:$0xff] }
  0x15   :  { %v320_v14 = vrot.slane %v34_v3, %v59_v8  ;;  %v168_v22 = vld [vmem:[%s755_s4 + $0x18] sm:$0xff]  ;;  %v352_v24 = vstv %s237_s27  ;;  %v169_v27 = vld [vmem:[%s755_s4 + $0x20] sm:$0xff]  ;;  %v372_v31 = vstv %s97_s0 }
  0x16   :  { %v39_v19 = vadd.f32 1e-05, %v38_v9  ;;  %v354_v25 = vstv %s238_s28  ;;  %v170_v32 = vld [vmem:[%s755_s4 + $0x28] sm:$0xff]  ;;  %v380_v33 = vld [vmem:[%s753_s2 + $0x30] sm:$0xff]  ;;  %v389_v36 = vmul.f32 %v352_v24, %v115_v10  ;;  %v397_v39 = vmul.f32 %v352_v24, %v116_v13  ;;  %v402_v40 = vld [vmem:[%s753_s2 + $0x38] sm:$0xff] }
  0x17   :  { %v61_v30 = vsub.f32 %v301_v7, %v320_v14  ;;  %v121_v34 = vld [vmem:[%s754_s3 + $0x30] sm:$0xff]  ;;  %v392_v37 = vmul.f32 %v354_v25, %v165_v11  ;;  %v62_v38 = vsub.f32 %v313_v12, %v320_v14  ;;  %v122_v41 = vld [vmem:[%s754_s3 + $0x38] sm:$0xff]  ;;  %v411_v43 = vmul.f32 %v354_v25, %v166_v15  ;;  %v424_v47 = vld [vmem:[%s753_s2 + $0x40] sm:$0xff] }
  0x18   :  { %240 = vrsqrt.f32 %v39_v19  ;;  %v171_v35 = vld [vmem:[%s755_s4 + $0x30] sm:$0xff]  ;;  %v172_v42 = vld [vmem:[%s755_s4 + $0x38] sm:$0xff]  ;;  %v416_v45 = vmul.f32 %v352_v24, %v117_v17  ;;  %v419_v46 = vmul.f32 %v354_v25, %v167_v18  ;;  %v123_v48 = vld [vmem:[%s754_s3 + $0x40] sm:$0xff]  ;;  %v435_v51 = vmul.f32 %v352_v24, %v118_v21 }
  0x19   :  { %v173_v49 = vld [vmem:[%s755_s4 + $0x40] sm:$0xff]  ;;  %v438_v52 = vmul.f32 %v354_v25, %v168_v22  ;;  %v445_v54 = vld [vmem:[%s753_s2 + $0x48] sm:$0xff]  ;;  %v454_v57 = vmul.f32 %v352_v24, %v119_v26  ;;  %v457_v58 = vmul.f32 %v354_v25, %v169_v27  ;;  %v66_v59 = vsub.f32 %v365_v28, %v320_v14  ;;  %v467_v61 = vld [vmem:[%s753_s2 + $0x50] sm:$0xff] }
  0x1a   :  { %v124_v55 = vld [vmem:[%s754_s3 + $0x48] sm:$0xff]  ;;  %v462_v60 = vmul.f32 %v352_v24, %v120_v29  ;;  %v125_v62 = vld [vmem:[%s754_s3 + $0x50] sm:$0xff]  ;;  %v476_v0 = vmul.f32 %v354_v25, %v170_v32  ;;  %v67_v1 = vsub.f32 %v380_v33, %v320_v14  ;;  %v481_v2 = vmul.f32 %v352_v24, %v121_v34  ;;  %v489_v4 = vld [vmem:[%s753_s2 + $0x58] sm:$0xff] }
  0x1b   :  { %v174_v56 = vld [vmem:[%s755_s4 + $0x48] sm:$0xff]  ;;  %v175_v63 = vld [vmem:[%s755_s4 + $0x50] sm:$0xff]  ;;  %v484_v3 = vmul.f32 %v354_v25, %v171_v35  ;;  %v126_v6 = vld [vmem:[%s754_s3 + $0x58] sm:$0xff]  ;;  %v68_v10 = vsub.f32 %v402_v40, %v320_v14  ;;  %v500_v11 = vmul.f32 %v352_v24, %v122_v41  ;;  %v503_v13 = vmul.f32 %v354_v25, %v172_v42 }
  0x1c   :  { %v176_v9 = vld [vmem:[%s755_s4 + $0x58] sm:$0xff]  ;;  %v510_v17 = vld [vmem:[%s753_s2 + $0x60] sm:$0xff]  ;;  %v519_v21 = vmul.f32 %v352_v24, %v123_v48  ;;  %v522_v22 = vmul.f32 %v354_v25, %v173_v49  ;;  %v527_v27 = vmul.f32 %v352_v24, %v124_v55  ;;  %v532_v28 = vld [vmem:[%s753_s2 + $0x68] sm:$0xff]  ;;  %v541_v33 = vmul.f32 %v354_v25, %v174_v56 }
  0x1d   :  { %v127_v18 = vld [vmem:[%s754_s3 + $0x60] sm:$0xff]  ;;  %v128_v29 = vld [vmem:[%s754_s3 + $0x68] sm:$0xff]  ;;  %v546_v35 = vmul.f32 %v352_v24, %v125_v62  ;;  %v549_v40 = vmul.f32 %v354_v25, %v175_v63  ;;  %v554_v41 = vld [vmem:[%s753_s2 + $0x70] sm:$0xff]  ;;  %v72_v49 = vsub.f32 %v489_v4, %v320_v14  ;;  %v565_v55 = vmul.f32 %v352_v24, %v126_v6 }
  0x1e   :  { %v177_v19 = vld [vmem:[%s755_s4 + $0x60] sm:$0xff]  ;;  %v178_v32 = vld [vmem:[%s755_s4 + $0x68] sm:$0xff]  ;;  %v129_v42 = vld [vmem:[%s754_s3 + $0x70] sm:$0xff]  ;;  %v568_v56 = vmul.f32 %v354_v25, %v176_v9  ;;  %v73_v62 = vsub.f32 %v510_v17, %v320_v14  ;;  %v584_v9 = vmul.f32 %v352_v24, %v127_v18  ;;  %v74_v26 = vsub.f32 %v532_v28, %v320_v14 }
  0x1f   :  { %v179_v48 = vld [vmem:[%s755_s4 + $0x70] sm:$0xff]  ;;  %v575_v63 = vld [vmem:[%s753_s2 + $0x78] sm:$0xff]  ;;  %v587_v17 = vmul.f32 %v354_v25, %v177_v19  ;;  %v592_v15 = vmul.f32 %v352_v24, %v128_v29  ;;  %v597_v50 = vmul.f32 %v354_v25, %v178_v32  ;;  %v75_v44 = vsub.f32 %v554_v41, %v320_v14 }
  0x20   :  { %v130_v34 = vld [vmem:[%s754_s3 + $0x78] sm:$0xff]  ;;  %v602_v18 = vmul.f32 %v352_v24, %v129_v42  ;;  %v605_v19 = vmul.f32 %v354_v25, %v179_v48  ;;  %v76_v28 = vsub.f32 %v575_v63, %v320_v14  ;;  %v757_v41 = vsub.f32 %v328_v16, %v320_v14 }
  0x21   :  { %v180_v4 = vld [vmem:[%s755_s4 + $0x78] sm:$0xff]  ;;  %v610_v29 = vmul.f32 %v352_v24, %v130_v34  ;;  %v758_v48 = vsub.f32 %v339_v20, %v320_v14 }
  0x22   :  { %v241_v6 = vpop.eup %240  ;;  %v613_v5 = vmul.f32 %v354_v25, %v180_v4  ;;  %v759_v25 = vsub.f32 %v350_v23, %v320_v14 }
  0x23   :  { %v80_v53 = vrot.slane %v241_v6, %v59_v8 }
  0x25   :  { %v81_v8 = vmul.f32 %v80_v53, %v61_v30  ;;  %v82_v32 = vmul.f32 %v80_v53, %v62_v38  ;;  %v83_v42 = vmul.f32 %v80_v53, %v757_v41  ;;  %v84_v24 = vmul.f32 %v80_v53, %v758_v48 }
  0x26   :  { %v85_v34 = vmul.f32 %v80_v53, %v759_v25  ;;  %v86_v63 = vmul.f32 %v80_v53, %v66_v59  ;;  %v87_v4 = vmul.f32 %v80_v53, %v67_v1  ;;  %v88_v7 = vmul.f32 %v80_v53, %v68_v10 }
  0x27   :  { %v99_v30 = vmul.f32 %v372_v31, %v81_v8  ;;  %v100_v12 = vmul.f32 %v372_v31, %v82_v32  ;;  %v101_v38 = vmul.f32 %v372_v31, %v83_v42  ;;  %v102_v16 = vmul.f32 %v372_v31, %v84_v24 }
  0x28   :  { %v103_v6 = vmul.f32 %v372_v31, %v85_v34  ;;  %v104_v20 = vmul.f32 %v372_v31, %v86_v63  ;;  %v105_v41 = vmul.f32 %v372_v31, %v87_v4  ;;  %v106_v23 = vmul.f32 %v372_v31, %v88_v7 }
  0x29   :  { %v149_v59 = vadd.f32 %v389_v36, %v99_v30  ;;  %v150_v1 = vadd.f32 %v397_v39, %v100_v12  ;;  %v151_v10 = vadd.f32 %v416_v45, %v101_v38  ;;  %v152_v8 = vadd.f32 %v435_v51, %v102_v16 }
  0x2a   :  { %v153_v32 = vadd.f32 %v454_v57, %v103_v6  ;;  %v154_v42 = vadd.f32 %v462_v60, %v104_v20  ;;  %v155_v48 = vadd.f32 %v481_v2, %v105_v41  ;;  %v156_v24 = vadd.f32 %v500_v11, %v106_v23 }
  0x2b   :  { %v199_v25 = vadd.f32 %v392_v37, %v149_v59  ;;  %v200_v34 = vadd.f32 %v411_v43, %v150_v1  ;;  %v201_v36 = vadd.f32 %v419_v46, %v151_v10  ;;  %v202_v39 = vadd.f32 %v438_v52, %v152_v8 }
  0x2c   :  { %v203_v45 = vadd.f32 %v457_v58, %v153_v32  ;;  %v204_v51 = vadd.f32 %v476_v0, %v154_v42  ;;  %v205_v57 = vadd.f32 %v484_v3, %v155_v48  ;;  %v206_v60 = vadd.f32 %v503_v13, %v156_v24 }
  0x2d   :  { %216 = vst.msk [vmem:[%s756_s5] sm:$0xff] %vm215_vm0, %v199_v25  ;;  %217 = vst.msk [vmem:[%s756_s5 + $0x8] sm:$0xff] %vm215_vm0, %v200_v34  ;;  %v760_v37 = vsub.f32 %v424_v47, %v320_v14  ;;  %v761_v46 = vsub.f32 %v445_v54, %v320_v14  ;;  %v762_v58 = vsub.f32 %v467_v61, %v320_v14 }
  0x2e   :  { %218 = vst.msk [vmem:[%s756_s5 + $0x10] sm:$0xff] %vm215_vm0, %v201_v36  ;;  %219 = vst.msk [vmem:[%s756_s5 + $0x18] sm:$0xff] %vm215_vm0, %v202_v39  ;;  %v92_v2 = vmul.f32 %v80_v53, %v72_v49  ;;  %v93_v14 = vmul.f32 %v80_v53, %v73_v62  ;;  %v94_v47 = vmul.f32 %v80_v53, %v74_v26 }
  0x2f   :  { %v89_v43 = vmul.f32 %v80_v53, %v760_v37  ;;  %v90_v52 = vmul.f32 %v80_v53, %v761_v46  ;;  %v91_v0 = vmul.f32 %v80_v53, %v762_v58  ;;  %220 = vst.msk [vmem:[%s756_s5 + $0x20] sm:$0xff] %vm215_vm0, %v203_v45  ;;  %221 = vst.msk [vmem:[%s756_s5 + $0x28] sm:$0xff] %vm215_vm0, %v204_v51 }
  0x30   :  { %222 = vst.msk [vmem:[%s756_s5 + $0x30] sm:$0xff] %vm215_vm0, %v205_v57  ;;  %223 = vst.msk [vmem:[%s756_s5 + $0x38] sm:$0xff] %vm215_vm0, %v206_v60  ;;  %v95_v54 = vmul.f32 %v80_v53, %v75_v44  ;;  %v96_v61 = vmul.f32 %v80_v53, %v76_v28  ;;  %v110_v49 = vmul.f32 %v372_v31, %v92_v2 }
  0x31   :  { %v107_v3 = vmul.f32 %v372_v31, %v89_v43  ;;  %v108_v11 = vmul.f32 %v372_v31, %v90_v52  ;;  %v109_v13 = vmul.f32 %v372_v31, %v91_v0  ;;  %v111_v63 = vmul.f32 %v372_v31, %v93_v14 }
  0x32   :  { %v112_v4 = vmul.f32 %v372_v31, %v94_v47  ;;  %v113_v7 = vmul.f32 %v372_v31, %v95_v54  ;;  %v114_v30 = vmul.f32 %v372_v31, %v96_v61  ;;  %v160_v62 = vadd.f32 %v565_v55, %v110_v49 }
  0x33   :  { %v157_v26 = vadd.f32 %v519_v21, %v107_v3  ;;  %v158_v44 = vadd.f32 %v527_v27, %v108_v11  ;;  %v159_v53 = vadd.f32 %v546_v35, %v109_v13  ;;  %v161_v28 = vadd.f32 %v584_v9, %v111_v63 }
  0x34   :  { %v162_v12 = vadd.f32 %v592_v15, %v112_v4  ;;  %v163_v38 = vadd.f32 %v602_v18, %v113_v7  ;;  %v164_v16 = vadd.f32 %v610_v29, %v114_v30  ;;  %v210_v27 = vadd.f32 %v568_v56, %v160_v62 }
  0x35   :  { %v207_v6 = vadd.f32 %v522_v22, %v157_v26  ;;  %v208_v31 = vadd.f32 %v541_v33, %v158_v44  ;;  %v209_v21 = vadd.f32 %v549_v40, %v159_v53  ;;  %v211_v35 = vadd.f32 %v587_v17, %v161_v28 }
  0x36   :  { %v212_v55 = vadd.f32 %v597_v50, %v162_v12  ;;  %v213_v9 = vadd.f32 %v605_v19, %v163_v38  ;;  %v214_v15 = vadd.f32 %v613_v5, %v164_v16  ;;  %227 = vst.msk [vmem:[%s756_s5 + $0x58] sm:$0xff] %vm215_vm0, %v210_v27 }
  0x37   :  { %224 = vst.msk [vmem:[%s756_s5 + $0x40] sm:$0xff] %vm215_vm0, %v207_v6  ;;  %225 = vst.msk [vmem:[%s756_s5 + $0x48] sm:$0xff] %vm215_vm0, %v208_v31 }
  0x38   :  { %226 = vst.msk [vmem:[%s756_s5 + $0x50] sm:$0xff] %vm215_vm0, %v209_v21  ;;  %228 = vst.msk [vmem:[%s756_s5 + $0x60] sm:$0xff] %vm215_vm0, %v211_v35 }
  0x39   :  { %229 = vst.msk [vmem:[%s756_s5 + $0x68] sm:$0xff] %vm215_vm0, %v212_v55  ;;  %230 = vst.msk [vmem:[%s756_s5 + $0x70] sm:$0xff] %vm215_vm0, %v213_v9 }
  0x3a   :  { %231 = vst.msk [vmem:[%s756_s5 + $0x78] sm:$0xff] %vm215_vm0, %v214_v15 }
  0x3b   :  { %236 = vsyncpa [#allocation3], 1 }

// kernel: _lambda_.98
= control target key start
LH: loop header
LB: loop body
LE: loop exit
PB: predicated region body
PF: predicated region fallthrough
CT: control target
= control target key end

     0   :  { %vm12_vm0 = vcmask 58368   ;;  %vm30_vm1 = vcmask 64512   ;;  %v132_v0 = vmov 0.0   ;;  %vm122_vm2 = vcmask 1040384   ;;  %s234_s0 = inlined_call_operand.vmem [shape: f32[128,8], index: 0, kind: input, shape index: {}]   ;;  %s235_s1 = inlined_call_operand.vmem [shape: f32[2,8], index: 1, kind: output, shape index: {}]  }
   0x1   :  { %13 = vst.msk [vmem:[%s235_s1] sm:$0x3] %vm12_vm0, %v132_v0  ;;  %v14_v1 = vld [vmem:[%s234_s0] sm:$0xff]  ;;  %v15_v2 = vld [vmem:[%s234_s0 + $0x8] sm:$0xff]  ;;  %v16_v3 = vld [vmem:[%s234_s0 + $0x10] sm:$0xff] }
   0x2   :  { %v31_v4 = vsel %vm30_vm1, %v14_v1, 0.0  ;;  %v32_v5 = vsel %vm30_vm1, %v15_v2, 0.0  ;;  %v34_v6 = vsel %vm30_vm1, %v16_v3, 0.0  ;;  %v17_v7 = vld [vmem:[%s234_s0 + $0x18] sm:$0xff]  ;;  %v18_v10 = vld [vmem:[%s234_s0 + $0x20] sm:$0xff]  ;;  %v19_v13 = vld [vmem:[%s234_s0 + $0x28] sm:$0xff]  ;;  %v68_v15 = vmul.f32 %v14_v1, %v14_v1 }
   0x3   :  { %v33_v8 = vadd.f32 %v32_v5, %v31_v4  ;;  %v36_v9 = vsel %vm30_vm1, %v17_v7, 0.0  ;;  %v38_v12 = vsel %vm30_vm1, %v18_v10, 0.0  ;;  %v69_v16 = vmul.f32 %v15_v2, %v15_v2  ;;  %v20_v19 = vld [vmem:[%s234_s0 + $0x30] sm:$0xff]  ;;  %v21_v24 = vld [vmem:[%s234_s0 + $0x38] sm:$0xff]  ;;  %v22_v31 = vld [vmem:[%s234_s0 + $0x40] sm:$0xff] }
   0x4   :  { %v70_v17 = vmul.f32 %v16_v3, %v16_v3  ;;  %v40_v18 = vsel %vm30_vm1, %v19_v13, 0.0  ;;  %v71_v21 = vmul.f32 %v17_v7, %v17_v7  ;;  %v42_v22 = vsel %vm30_vm1, %v20_v19, 0.0  ;;  %v23_v37 = vld [vmem:[%s234_s0 + $0x48] sm:$0xff]  ;;  %v24_v43 = vld [vmem:[%s234_s0 + $0x50] sm:$0xff]  ;;  %v25_v49 = vld [vmem:[%s234_s0 + $0x58] sm:$0xff] }
   0x5   :  { %v35_v11 = vadd.f32 %v34_v6, %v33_v8  ;;  %v72_v23 = vmul.f32 %v18_v10, %v18_v10  ;;  %v84_v26 = vsel %vm30_vm1, %v68_v15, 0.0  ;;  %v85_v27 = vsel %vm30_vm1, %v69_v16, 0.0  ;;  %v26_v55 = vld [vmem:[%s234_s0 + $0x60] sm:$0xff]  ;;  %v27_v61 = vld [vmem:[%s234_s0 + $0x68] sm:$0xff]  ;;  %v28_v3 = vld [vmem:[%s234_s0 + $0x70] sm:$0xff] }
   0x6   :  { %v87_v28 = vsel %vm30_vm1, %v70_v17, 0.0  ;;  %v44_v29 = vsel %vm30_vm1, %v21_v24, 0.0  ;;  %v86_v30 = vadd.f32 %v85_v27, %v84_v26  ;;  %v73_v33 = vmul.f32 %v19_v13, %v19_v13 }
   0x7   :  { %v37_v14 = vadd.f32 %v36_v9, %v35_v11  ;;  %v89_v34 = vsel %vm30_vm1, %v71_v21, 0.0  ;;  %v46_v35 = vsel %vm30_vm1, %v22_v31, 0.0  ;;  %v74_v39 = vmul.f32 %v20_v19, %v20_v19  ;;  %v29_v9 = vld [vmem:[%s234_s0 + $0x78] sm:$0xff] }
   0x8   :  { %v88_v36 = vadd.f32 %v87_v28, %v86_v30  ;;  %v91_v40 = vsel %vm30_vm1, %v72_v23, 0.0  ;;  %v48_v41 = vsel %vm30_vm1, %v23_v37, 0.0  ;;  %v75_v45 = vmul.f32 %v21_v24, %v21_v24 }
   0x9   :  { %v39_v20 = vadd.f32 %v38_v12, %v37_v14  ;;  %v93_v46 = vsel %vm30_vm1, %v73_v33, 0.0  ;;  %v50_v47 = vsel %vm30_vm1, %v24_v43, 0.0  ;;  %v76_v51 = vmul.f32 %v22_v31, %v22_v31 }
   0xa   :  { %v90_v42 = vadd.f32 %v89_v34, %v88_v36  ;;  %v95_v52 = vsel %vm30_vm1, %v74_v39, 0.0  ;;  %v52_v53 = vsel %vm30_vm1, %v25_v49, 0.0  ;;  %v77_v57 = vmul.f32 %v23_v37, %v23_v37 }
   0xb   :  { %v41_v25 = vadd.f32 %v40_v18, %v39_v20  ;;  %v97_v58 = vsel %vm30_vm1, %v75_v45, 0.0  ;;  %v54_v59 = vsel %vm30_vm1, %v26_v55, 0.0  ;;  %v78_v63 = vmul.f32 %v24_v43, %v24_v43  ;;  %v121_v43 = vld [vmem:[%s235_s1] sm:$0x3] }
   0xc   :  { %v92_v48 = vadd.f32 %v91_v40, %v90_v42  ;;  %v99_v0 = vsel %vm30_vm1, %v76_v51, 0.0  ;;  %v56_v1 = vsel %vm30_vm1, %v27_v61, 0.0  ;;  %v79_v5 = vmul.f32 %v25_v49, %v25_v49 }
   0xd   :  { %v43_v32 = vadd.f32 %v42_v22, %v41_v25  ;;  %v101_v6 = vsel %vm30_vm1, %v77_v57, 0.0  ;;  %v58_v7 = vsel %vm30_vm1, %v28_v3, 0.0  ;;  %v80_v11 = vmul.f32 %v26_v55, %v26_v55 }
   0xe   :  { %v94_v54 = vadd.f32 %v93_v46, %v92_v48  ;;  %v103_v12 = vsel %vm30_vm1, %v78_v63, 0.0  ;;  %v60_v13 = vsel %vm30_vm1, %v29_v9, 0.0  ;;  %v81_v16 = vmul.f32 %v27_v61, %v27_v61 }
   0xf   :  { %v45_v38 = vadd.f32 %v44_v29, %v43_v32  ;;  %v105_v17 = vsel %vm30_vm1, %v79_v5, 0.0  ;;  %v82_v20 = vmul.f32 %v28_v3, %v28_v3  ;;  %v107_v21 = vsel %vm30_vm1, %v80_v11, 0.0 }
  0x10   :  { %v96_v60 = vadd.f32 %v95_v52, %v94_v54  ;;  %v83_v24 = vmul.f32 %v29_v9, %v29_v9  ;;  %v109_v25 = vsel %vm30_vm1, %v81_v16, 0.0 }
  0x11   :  { %v47_v44 = vadd.f32 %v46_v35, %v45_v38  ;;  %v111_v28 = vsel %vm30_vm1, %v82_v20, 0.0 }
  0x12   :  { %v98_v2 = vadd.f32 %v97_v58, %v96_v60  ;;  %v113_v30 = vsel %vm30_vm1, %v83_v24, 0.0 }
  0x13   :  { %v49_v50 = vadd.f32 %v48_v41, %v47_v44 }
  0x14   :  { %v100_v8 = vadd.f32 %v99_v0, %v98_v2 }
  0x15   :  { %v51_v56 = vadd.f32 %v50_v47, %v49_v50 }
  0x16   :  { %v102_v14 = vadd.f32 %v101_v6, %v100_v8 }
  0x17   :  { %v53_v62 = vadd.f32 %v52_v53, %v51_v56 }
  0x18   :  { %v104_v18 = vadd.f32 %v103_v12, %v102_v14 }
  0x19   :  { %v55_v4 = vadd.f32 %v54_v59, %v53_v62 }
  0x1a   :  { %v106_v22 = vadd.f32 %v105_v17, %v104_v18 }
  0x1b   :  { %v57_v10 = vadd.f32 %v56_v1, %v55_v4 }
  0x1c   :  { %v108_v26 = vadd.f32 %v107_v21, %v106_v22 }
  0x1d   :  { %v59_v15 = vadd.f32 %v58_v7, %v57_v10 }
  0x1e   :  { %v110_v29 = vadd.f32 %v109_v25, %v108_v26 }
  0x1f   :  { %v61_v19 = vadd.f32 %v60_v13, %v59_v15 }
  0x20   :  { %v112_v32 = vadd.f32 %v111_v28, %v110_v29 }
  0x21   :  { %v62_v23 = vrot.slane %v61_v19, 4 }
  0x22   :  { %v114_v33 = vadd.f32 %v113_v30, %v112_v32 }
  0x23   :  { %v63_v27 = vadd.f32 %v62_v23, %v61_v19 }
  0x24   :  { %v115_v35 = vrot.slane %v114_v33, 4 }
  0x25   :  { %v64_v31 = vrot.slane %v63_v27, 2 }
  0x26   :  { %v116_v36 = vadd.f32 %v115_v35, %v114_v33 }
  0x27   :  { %v65_v34 = vadd.f32 %v64_v31, %v63_v27 }
  0x28   :  { %v117_v38 = vrot.slane %v116_v36, 2 }
  0x29   :  { %v66_v37 = vrot.slane %v65_v34, 1 }
  0x2a   :  { %v118_v39 = vadd.f32 %v117_v38, %v116_v36 }
  0x2b   :  { %v67_v40 = vadd.f32 %v66_v37, %v65_v34 }
  0x2c   :  { %v119_v41 = vrot.slane %v118_v39, 1 }
  0x2e   :  { %v120_v42 = vadd.f32 %v119_v41, %v118_v39 }
  0x30   :  { %v123_v44 = vsel %vm122_vm2, %v67_v40, %v120_v42 }
  0x31   :  { %v124_v45 = vadd.f32 %v123_v44, %v121_v43 }
  0x33   :  { %126 = vst.msk [vmem:[%s235_s1] sm:$0x3] %vm12_vm0, %v124_v45 }

// kernel: _lambda_.99
= control target key start
LH: loop header
LB: loop body
LE: loop exit
PB: predicated region body
PF: predicated region fallthrough
CT: control target
= control target key end

     0   :  { %v39_v4 = vlaneseq  ;;  %vm97_vm0 = vcmask 64512   ;;  %s297_s1 = inlined_call_operand.vmem [shape: f32[2,8], index: 1, kind: input, shape index: {}]   ;;  %s298_s2 = inlined_call_operand.vmem [shape: f32[128,8], index: 2, kind: input, shape index: {}]   ;;  %s299_s0 = inlined_call_operand.<no memory space> [shape: f32[1], index: 0, kind: input, shape index: {}]   ;;  %s300_s3 = inlined_call_operand.vmem [shape: f32[128,8], index: 3, kind: output, shape index: {}]  }
   0x1   :  { %v15_v0 = vld [vmem:[%s297_s1] sm:$0x1]  ;;  %v17_v1 = vld [vmem:[%s297_s1 + $0x1] sm:$0x1]  ;;  %v24_v12 = vld [vmem:[%s298_s2 + $0x8] sm:$0xff]  ;;  %v182_v22 = vstv %s299_s0 }
   0x2   :  { %v16_v2 = vmul.f32 0.0078125, %v15_v0  ;;  %v18_v3 = vmul.f32 0.0078125, %v17_v1  ;;  %v40_v7 = vshrl.u32 %v39_v4, 7  ;;  %v23_v10 = vld [vmem:[%s298_s2] sm:$0xff]  ;;  %v25_v13 = vld [vmem:[%s298_s2 + $0x10] sm:$0xff]  ;;  %v26_v14 = vld [vmem:[%s298_s2 + $0x18] sm:$0xff] }
   0x3   :  { %v27_v15 = vld [vmem:[%s298_s2 + $0x20] sm:$0xff]  ;;  %v28_v16 = vld [vmem:[%s298_s2 + $0x28] sm:$0xff]  ;;  %v29_v17 = vld [vmem:[%s298_s2 + $0x30] sm:$0xff] }
   0x4   :  { %v19_v5 = vmul.f32 %v16_v2, %v16_v2  ;;  %v41_v9 = vsub.s32 0, %v40_v7  ;;  %v30_v18 = vld [vmem:[%s298_s2 + $0x38] sm:$0xff]  ;;  %v31_v19 = vld [vmem:[%s298_s2 + $0x40] sm:$0xff]  ;;  %v32_v20 = vld [vmem:[%s298_s2 + $0x48] sm:$0xff] }
   0x5   :  { %v33_v23 = vld [vmem:[%s298_s2 + $0x50] sm:$0xff]  ;;  %v34_v24 = vld [vmem:[%s298_s2 + $0x58] sm:$0xff]  ;;  %v35_v25 = vld [vmem:[%s298_s2 + $0x60] sm:$0xff] }
   0x6   :  { %v20_v6 = vsub.f32 %v18_v3, %v19_v5  ;;  %v149_v11 = vrot.slane %v16_v2, %v41_v9  ;;  %v36_v30 = vld [vmem:[%s298_s2 + $0x68] sm:$0xff]  ;;  %v37_v31 = vld [vmem:[%s298_s2 + $0x70] sm:$0xff]  ;;  %v38_v32 = vld [vmem:[%s298_s2 + $0x78] sm:$0xff] }
   0x8   :  { %v21_v8 = vadd.f32 1e-05, %v20_v6  ;;  %v43_v21 = vsub.f32 %v23_v10, %v149_v11  ;;  %v44_v26 = vsub.f32 %v24_v12, %v149_v11  ;;  %v45_v27 = vsub.f32 %v25_v13, %v149_v11 }
   0x9   :  { %v46_v28 = vsub.f32 %v26_v14, %v149_v11  ;;  %v47_v29 = vsub.f32 %v27_v15, %v149_v11  ;;  %v48_v34 = vsub.f32 %v28_v16, %v149_v11  ;;  %v49_v35 = vsub.f32 %v29_v17, %v149_v11 }
   0xa   :  { %118 = vrsqrt.f32 %v21_v8  ;;  %v50_v36 = vsub.f32 %v30_v18, %v149_v11  ;;  %v51_v37 = vsub.f32 %v31_v19, %v149_v11  ;;  %v52_v39 = vsub.f32 %v32_v20, %v149_v11 }
   0xb   :  { %v53_v40 = vsub.f32 %v33_v23, %v149_v11  ;;  %v54_v41 = vsub.f32 %v34_v24, %v149_v11  ;;  %v55_v42 = vsub.f32 %v35_v25, %v149_v11  ;;  %v56_v43 = vsub.f32 %v36_v30, %v149_v11 }
   0xc   :  { %v57_v44 = vsub.f32 %v37_v31, %v149_v11  ;;  %v58_v45 = vsub.f32 %v38_v32, %v149_v11 }
  0x14   :  { %v119_v33 = vpop.eup %118 }
  0x15   :  { %v62_v38 = vrot.slane %v119_v33, %v41_v9 }
  0x17   :  { %v63_v46 = vmul.f32 %v62_v38, %v43_v21  ;;  %v64_v47 = vmul.f32 %v62_v38, %v44_v26  ;;  %v65_v48 = vmul.f32 %v62_v38, %v45_v27  ;;  %v66_v49 = vmul.f32 %v62_v38, %v46_v28 }
  0x18   :  { %v67_v50 = vmul.f32 %v62_v38, %v47_v29  ;;  %v68_v51 = vmul.f32 %v62_v38, %v48_v34  ;;  %v69_v52 = vmul.f32 %v62_v38, %v49_v35  ;;  %v70_v53 = vmul.f32 %v62_v38, %v50_v36 }
  0x19   :  { %v81_v54 = vmul.f32 %v182_v22, %v63_v46  ;;  %v82_v55 = vmul.f32 %v182_v22, %v64_v47  ;;  %v83_v56 = vmul.f32 %v182_v22, %v65_v48  ;;  %v84_v57 = vmul.f32 %v182_v22, %v66_v49 }
  0x1a   :  { %v85_v58 = vmul.f32 %v182_v22, %v67_v50  ;;  %v86_v59 = vmul.f32 %v182_v22, %v68_v51  ;;  %v87_v60 = vmul.f32 %v182_v22, %v69_v52  ;;  %v88_v61 = vmul.f32 %v182_v22, %v70_v53 }
  0x1b   :  { %98 = vst.msk [vmem:[%s300_s3] sm:$0xff] %vm97_vm0, %v81_v54  ;;  %99 = vst.msk [vmem:[%s300_s3 + $0x8] sm:$0xff] %vm97_vm0, %v82_v55  ;;  %v71_v62 = vmul.f32 %v62_v38, %v51_v37  ;;  %v72_v63 = vmul.f32 %v62_v38, %v52_v39  ;;  %v73_v0 = vmul.f32 %v62_v38, %v53_v40 }
  0x1c   :  { %100 = vst.msk [vmem:[%s300_s3 + $0x10] sm:$0xff] %vm97_vm0, %v83_v56  ;;  %101 = vst.msk [vmem:[%s300_s3 + $0x18] sm:$0xff] %vm97_vm0, %v84_v57  ;;  %v74_v1 = vmul.f32 %v62_v38, %v54_v41  ;;  %v75_v2 = vmul.f32 %v62_v38, %v55_v42  ;;  %v76_v3 = vmul.f32 %v62_v38, %v56_v43 }
  0x1d   :  { %102 = vst.msk [vmem:[%s300_s3 + $0x20] sm:$0xff] %vm97_vm0, %v85_v58  ;;  %103 = vst.msk [vmem:[%s300_s3 + $0x28] sm:$0xff] %vm97_vm0, %v86_v59  ;;  %v77_v4 = vmul.f32 %v62_v38, %v57_v44  ;;  %v78_v5 = vmul.f32 %v62_v38, %v58_v45  ;;  %v89_v6 = vmul.f32 %v182_v22, %v71_v62 }
  0x1e   :  { %104 = vst.msk [vmem:[%s300_s3 + $0x30] sm:$0xff] %vm97_vm0, %v87_v60  ;;  %105 = vst.msk [vmem:[%s300_s3 + $0x38] sm:$0xff] %vm97_vm0, %v88_v61  ;;  %v90_v7 = vmul.f32 %v182_v22, %v72_v63  ;;  %v91_v8 = vmul.f32 %v182_v22, %v73_v0  ;;  %v92_v9 = vmul.f32 %v182_v22, %v74_v1 }
  0x1f   :  { %v93_v10 = vmul.f32 %v182_v22, %v75_v2  ;;  %v94_v11 = vmul.f32 %v182_v22, %v76_v3  ;;  %v95_v12 = vmul.f32 %v182_v22, %v77_v4  ;;  %v96_v13 = vmul.f32 %v182_v22, %v78_v5  ;;  %106 = vst.msk [vmem:[%s300_s3 + $0x40] sm:$0xff] %vm97_vm0, %v89_v6 }
  0x20   :  { %107 = vst.msk [vmem:[%s300_s3 + $0x48] sm:$0xff] %vm97_vm0, %v90_v7  ;;  %108 = vst.msk [vmem:[%s300_s3 + $0x50] sm:$0xff] %vm97_vm0, %v91_v8 }
  0x21   :  { %109 = vst.msk [vmem:[%s300_s3 + $0x58] sm:$0xff] %vm97_vm0, %v92_v9  ;;  %110 = vst.msk [vmem:[%s300_s3 + $0x60] sm:$0xff] %vm97_vm0, %v93_v10 }
  0x22   :  { %111 = vst.msk [vmem:[%s300_s3 + $0x68] sm:$0xff] %vm97_vm0, %v94_v11  ;;  %112 = vst.msk [vmem:[%s300_s3 + $0x70] sm:$0xff] %vm97_vm0, %v95_v12 }
  0x23   :  { %113 = vst.msk [vmem:[%s300_s3 + $0x78] sm:$0xff] %vm97_vm0, %v96_v13 }

// kernel: _lambda_.97
= control target key start
LH: loop header
LB: loop body
LE: loop exit
PB: predicated region body
PF: predicated region fallthrough
CT: control target
= control target key end

     0   :  { %vm150_vm0 = vcmask 1041408   ;;  %vm125_vm1 = vcmask 31744   ;;  %vm19_vm2 = vcmask 64512   ;;  %v396_v4 = vmov 0   ;;  %s594_s1 = inlined_call_operand.vmem [shape: bf16[4,8], index: 1, kind: input, shape index: {}]   ;;  %s595_s0 = inlined_call_operand.vmem [shape: bf16[128,4], index: 0, kind: input, shape index: {}]   ;;  %s596_s2 = inlined_call_operand.vmem [shape: f32[1,8], index: 2, kind: input, shape index: {}]   ;;  %s597_s3 = inlined_call_operand.vmem [shape: f32[128,8], index: 3, kind: output, shape index: {}]  }
   0x1   :  { %v84_v0 = vld [vmem:[%s594_s1] sm:$0x3]  ;;  %v37_v2 = vld [vmem:[%s595_s0 + $0x4] sm:$0xf]  ;;  %v38_v11 = vld [vmem:[%s595_s0 + $0x8] sm:$0xf] }
   0x2   :  { %v36_v1 = vld [vmem:[%s595_s0] sm:$0xf]  ;;  %392 = vmatprep.subr.msk.bf16.mxu0 %vm150_vm0, %v84_v0  ;;  %393 = vmatprep.subr.msk.bf16.mxu1 %vm150_vm0, %v84_v0  ;;  %v152_v3 = vsel %vm150_vm0, %v84_v0, 0  ;;  %v53_v6 = vmax.bf16 %v396_v4, %v37_v2  ;;  %v45_v8 = vld [vmem:[%s595_s0 + $0x24] sm:$0xf]  ;;  %v397_v14 = vmov 0.0   ;;  %v54_v16 = vmax.bf16 %v396_v4, %v38_v11 }
   0x3   :  { %v52_v5 = vmax.bf16 %v396_v4, %v36_v1  ;;  %v44_v7 = vld [vmem:[%s595_s0 + $0x20] sm:$0xf]  ;;  %373 = vmatpush3.bf16.msra.mxu0 %v152_v3  ;;  %391 = vmatpush3.bf16.msra.mxu1 %v152_v3  ;;  %v61_v10 = vmax.bf16 %v396_v4, %v45_v8  ;;  %v39_v12 = vld [vmem:[%s595_s0 + $0xc] sm:$0xf]  ;;  %v46_v13 = vld [vmem:[%s595_s0 + $0x28] sm:$0xf] }
   0x4   :  { %v60_v9 = vmax.bf16 %v396_v4, %v44_v7  ;;  %22 = vst.msk [vmem:[#allocation2 + $0x10] sm:$0xff] %vm19_vm2, %v397_v14  ;;  %20 = vst.msk [vmem:[#allocation2] sm:$0xff] %vm19_vm2, %v397_v14  ;;  %v55_v17 = vmax.bf16 %v396_v4, %v39_v12  ;;  %v47_v18 = vld [vmem:[%s595_s0 + $0x2c] sm:$0xf]  ;;  %v62_v19 = vmax.bf16 %v396_v4, %v46_v13  ;;  %v40_v20 = vld [vmem:[%s595_s0 + $0x10] sm:$0xf] }
   0x5   :  { %21 = vst.msk [vmem:[#allocation2 + $0x8] sm:$0xff] %vm19_vm2, %v397_v14  ;;  %23 = vst.msk [vmem:[#allocation2 + $0x18] sm:$0xff] %vm19_vm2, %v397_v14  ;;  %v346_v15 = vcombine.low %v52_v5, %v53_v6  ;;  %v41_v21 = vld [vmem:[%s595_s0 + $0x14] sm:$0xf]  ;;  %v63_v23 = vmax.bf16 %v396_v4, %v47_v18  ;;  %v56_v24 = vmax.bf16 %v396_v4, %v40_v20  ;;  %v48_v26 = vld [vmem:[%s595_s0 + $0x30] sm:$0xf] }
   0x6   :  { %24 = vst.msk [vmem:[#allocation2 + $0x20] sm:$0xff] %vm19_vm2, %v397_v14  ;;  %25 = vst.msk [vmem:[#allocation2 + $0x28] sm:$0xff] %vm19_vm2, %v397_v14  ;;  %v350_v22 = vcombine.low %v60_v9, %v61_v10  ;;  %v57_v25 = vmax.bf16 %v396_v4, %v41_v21  ;;  %v49_v27 = vld [vmem:[%s595_s0 + $0x34] sm:$0xf]  ;;  %v42_v28 = vld [vmem:[%s595_s0 + $0x18] sm:$0xf]  ;;  %v347_v29 = vcombine.low %v54_v16, %v55_v17 }
   0x7   :  { %26 = vst.msk [vmem:[#allocation2 + $0x30] sm:$0xff] %vm19_vm2, %v397_v14  ;;  %27 = vst.msk [vmem:[#allocation2 + $0x38] sm:$0xff] %vm19_vm2, %v397_v14  ;;  %374 = vmatprep.mubr.msk.bf16.mxu0 %vm125_vm1, %v346_v15  ;;  %v64_v30 = vmax.bf16 %v396_v4, %v48_v26  ;;  %v65_v31 = vmax.bf16 %v396_v4, %v49_v27  ;;  %v43_v32 = vld [vmem:[%s595_s0 + $0x1c] sm:$0xf]  ;;  %v50_v33 = vld [vmem:[%s595_s0 + $0x38] sm:$0xf]  ;;  %v351_v35 = vcombine.low %v62_v19, %v63_v23 }
   0x8   :  { %28 = vst.msk [vmem:[#allocation2 + $0x40] sm:$0xff] %vm19_vm2, %v397_v14  ;;  %29 = vst.msk [vmem:[#allocation2 + $0x48] sm:$0xff] %vm19_vm2, %v397_v14  ;;  %v51_v34 = vld [vmem:[%s595_s0 + $0x3c] sm:$0xf]  ;;  %382 = vmatprep.mubr.msk.bf16.mxu1 %vm125_vm1, %v350_v22  ;;  %v348_v36 = vcombine.low %v56_v24, %v57_v25  ;;  %375 = vmatmul.mubr.msk.bf16.vlgmr.msra.gmra.mrb[0].mxu0 %vm125_vm1, %v347_v29  ;;  %v58_v38 = vmax.bf16 %v396_v4, %v42_v28  ;;  %v504_v7 = vld [vmem:[%s596_s2] ss:$0 sm:$0xff] }
   0x9   :  { %30 = vst.msk [vmem:[#allocation2 + $0x50] sm:$0xff] %vm19_vm2, %v397_v14  ;;  %31 = vst.msk [vmem:[#allocation2 + $0x58] sm:$0xff] %vm19_vm2, %v397_v14  ;;  %v352_v37 = vcombine.low %v64_v30, %v65_v31  ;;  %v59_v39 = vmax.bf16 %v396_v4, %v43_v32  ;;  %383 = vmatmul.mubr.msk.bf16.vlgmr.msra.gmra.mrb[0].mxu1 %vm125_vm1, %v351_v35  ;;  %v66_v40 = vmax.bf16 %v396_v4, %v50_v33 }
   0xa   :  { %32 = vst.msk [vmem:[#allocation2 + $0x60] sm:$0xff] %vm19_vm2, %v397_v14  ;;  %33 = vst.msk [vmem:[#allocation2 + $0x68] sm:$0xff] %vm19_vm2, %v397_v14  ;;  %378 = vmatprep.mubr.msk.bf16.mxu0 %vm125_vm1, %v348_v36  ;;  %v67_v41 = vmax.bf16 %v396_v4, %v51_v34 }
   0xb   :  { %34 = vst.msk [vmem:[#allocation2 + $0x70] sm:$0xff] %vm19_vm2, %v397_v14  ;;  %35 = vst.msk [vmem:[#allocation2 + $0x78] sm:$0xff] %vm19_vm2, %v397_v14  ;;  %386 = vmatprep.mubr.msk.bf16.mxu1 %vm125_vm1, %v352_v37  ;;  %v349_v42 = vcombine.low %v58_v38, %v59_v39  ;;  %v70_v44 = vld [vmem:[#allocation2 + $0x10] sm:$0xff]  ;;  %v68_v46 = vld [vmem:[#allocation2] sm:$0xff] }
   0xc   :  { %v353_v43 = vcombine.low %v66_v40, %v67_v41  ;;  %v71_v49 = vld [vmem:[#allocation2 + $0x18] sm:$0xff]  ;;  %v69_v54 = vld [vmem:[#allocation2 + $0x8] sm:$0xff] }
   0xd   :  { %v72_v6 = vld [vmem:[#allocation2 + $0x20] sm:$0xff]  ;;  %v73_v15 = vld [vmem:[#allocation2 + $0x28] sm:$0xff] }
   0xe   :  { %v74_v4 = vld [vmem:[#allocation2 + $0x30] sm:$0xff]  ;;  %v75_v10 = vld [vmem:[#allocation2 + $0x38] sm:$0xff] }
   0xf   :  { %v76_v48 = vld [vmem:[#allocation2 + $0x40] sm:$0xff]  ;;  %v77_v59 = vld [vmem:[#allocation2 + $0x48] sm:$0xff] }
  0x10   :  { %379 = vmatmul.mubr.msk.bf16.gmra.mrb[4].mxu0 %vm125_vm1, %v349_v42  ;;  %v78_v45 = vld [vmem:[#allocation2 + $0x50] sm:$0xff]  ;;  %v79_v53 = vld [vmem:[#allocation2 + $0x58] sm:$0xff] }
  0x11   :  { %387 = vmatmul.mubr.msk.bf16.gmra.mrb[4].mxu1 %vm125_vm1, %v353_v43  ;;  %v80_v9 = vld [vmem:[#allocation2 + $0x60] sm:$0xff]  ;;  %v81_v21 = vld [vmem:[#allocation2 + $0x68] sm:$0xff] }
  0x12   :  { %v82_v5 = vld [vmem:[#allocation2 + $0x70] sm:$0xff]  ;;  %v83_v14 = vld [vmem:[#allocation2 + $0x78] sm:$0xff] }
  0xdb   :  { %v376_v47 = vpop.f32.mrb[0].mxu0 }
  0xdc   :  { %v253_v50 = vadd.f32 %v376_v47, %v70_v44  ;;  %v384_v51 = vpop.f32.mrb[0].mxu1  ;;  %v188_v52 = vpop.f32.mrb[1].mxu0 }
  0xdd   :  { %v261_v55 = vadd.f32 %v384_v51, %v78_v45  ;;  %v251_v56 = vadd.f32 %v188_v52, %v68_v46  ;;  %v220_v57 = vpop.f32.mrb[1].mxu1  ;;  %v377_v58 = vpop.f32.mrb[2].mxu0 }
  0xde   :  { %270 = vst.msk [vmem:[#allocation2 + $0x10] sm:$0xff] %vm19_vm2, %v253_v50  ;;  %v259_v60 = vadd.f32 %v220_v57, %v76_v48  ;;  %v254_v61 = vadd.f32 %v377_v58, %v71_v49  ;;  %v385_v62 = vpop.f32.mrb[2].mxu1  ;;  %v191_v63 = vpop.f32.mrb[3].mxu0 }
  0xdf   :  { %278 = vst.msk [vmem:[#allocation2 + $0x50] sm:$0xff] %vm19_vm2, %v261_v55  ;;  %268 = vst.msk [vmem:[#allocation2] sm:$0xff] %vm19_vm2, %v251_v56  ;;  %v262_v0 = vadd.f32 %v385_v62, %v79_v53  ;;  %v252_v1 = vadd.f32 %v191_v63, %v69_v54  ;;  %v223_v2 = vpop.f32.mrb[3].mxu1 }
  0xe0   :  { %276 = vst.msk [vmem:[#allocation2 + $0x40] sm:$0xff] %vm19_vm2, %v259_v60  ;;  %271 = vst.msk [vmem:[#allocation2 + $0x18] sm:$0xff] %vm19_vm2, %v254_v61  ;;  %v260_v3 = vadd.f32 %v223_v2, %v77_v59 }
  0xe1   :  { %279 = vst.msk [vmem:[#allocation2 + $0x58] sm:$0xff] %vm19_vm2, %v262_v0  ;;  %269 = vst.msk [vmem:[#allocation2 + $0x8] sm:$0xff] %vm19_vm2, %v252_v1 }
  0xe2   :  { %277 = vst.msk [vmem:[#allocation2 + $0x48] sm:$0xff] %vm19_vm2, %v260_v3 }
  0xe3   :  { %v380_v8 = vpop.f32.mrb[4].mxu0 }
  0xe4   :  { %v257_v11 = vadd.f32 %v380_v8, %v74_v4  ;;  %v388_v12 = vpop.f32.mrb[4].mxu1  ;;  %v204_v13 = vpop.f32.mrb[5].mxu0 }
  0xe5   :  { %v289_v16 = vld [vmem:[#allocation2 + $0x10] sm:$0xff]  ;;  %v265_v17 = vadd.f32 %v388_v12, %v82_v5  ;;  %v255_v18 = vadd.f32 %v204_v13, %v72_v6  ;;  %v236_v19 = vpop.f32.mrb[5].mxu1  ;;  %v381_v20 = vpop.f32.mrb[6].mxu0 }
  0xe6   :  { %v312_v22 = vadd.f32 %v504_v7, %v289_v16  ;;  %v297_v23 = vld [vmem:[#allocation2 + $0x50] sm:$0xff]  ;;  %v287_v24 = vld [vmem:[#allocation2] sm:$0xff]  ;;  %274 = vst.msk [vmem:[#allocation2 + $0x30] sm:$0xff] %vm19_vm2, %v257_v11  ;;  %v263_v25 = vadd.f32 %v236_v19, %v80_v9  ;;  %v258_v26 = vadd.f32 %v381_v20, %v75_v10  ;;  %v389_v27 = vpop.f32.mrb[6].mxu1  ;;  %v207_v28 = vpop.f32.mrb[7].mxu0 }
  0xe7   :  { %v320_v29 = vadd.f32 %v504_v7, %v297_v23  ;;  %v310_v30 = vadd.f32 %v504_v7, %v287_v24  ;;  %v295_v31 = vld [vmem:[#allocation2 + $0x40] sm:$0xff]  ;;  %v290_v32 = vld [vmem:[#allocation2 + $0x18] sm:$0xff]  ;;  %282 = vst.msk [vmem:[#allocation2 + $0x70] sm:$0xff] %vm19_vm2, %v265_v17  ;;  %272 = vst.msk [vmem:[#allocation2 + $0x20] sm:$0xff] %vm19_vm2, %v255_v18  ;;  %v266_v33 = vadd.f32 %v389_v27, %v83_v14  ;;  %v239_v35 = vpop.f32.mrb[7].mxu1 }
  0xe8   :  { %v256_v34 = vadd.f32 %v207_v28, %v73_v15  ;;  %328 = vst.msk [vmem:[%s597_s3 + $0x10] sm:$0xff] %vm19_vm2, %v312_v22  ;;  %v318_v36 = vadd.f32 %v504_v7, %v295_v31  ;;  %v313_v37 = vadd.f32 %v504_v7, %v290_v32  ;;  %v298_v38 = vld [vmem:[#allocation2 + $0x58] sm:$0xff]  ;;  %v288_v39 = vld [vmem:[#allocation2 + $0x8] sm:$0xff]  ;;  %280 = vst.msk [vmem:[#allocation2 + $0x60] sm:$0xff] %vm19_vm2, %v263_v25 }
  0xe9   :  { %275 = vst.msk [vmem:[#allocation2 + $0x38] sm:$0xff] %vm19_vm2, %v258_v26  ;;  %v264_v40 = vadd.f32 %v239_v35, %v81_v21  ;;  %336 = vst.msk [vmem:[%s597_s3 + $0x50] sm:$0xff] %vm19_vm2, %v320_v29  ;;  %v321_v41 = vadd.f32 %v504_v7, %v298_v38  ;;  %v311_v42 = vadd.f32 %v504_v7, %v288_v39  ;;  %v296_v43 = vld [vmem:[#allocation2 + $0x48] sm:$0xff] }
  0xea   :  { %326 = vst.msk [vmem:[%s597_s3] sm:$0xff] %vm19_vm2, %v310_v30  ;;  %283 = vst.msk [vmem:[#allocation2 + $0x78] sm:$0xff] %vm19_vm2, %v266_v33  ;;  %v319_v44 = vadd.f32 %v504_v7, %v296_v43 }
  0xeb   :  { %273 = vst.msk [vmem:[#allocation2 + $0x28] sm:$0xff] %vm19_vm2, %v256_v34  ;;  %334 = vst.msk [vmem:[%s597_s3 + $0x40] sm:$0xff] %vm19_vm2, %v318_v36 }
  0xec   :  { %329 = vst.msk [vmem:[%s597_s3 + $0x18] sm:$0xff] %vm19_vm2, %v313_v37  ;;  %281 = vst.msk [vmem:[#allocation2 + $0x68] sm:$0xff] %vm19_vm2, %v264_v40 }
  0xed   :  { %337 = vst.msk [vmem:[%s597_s3 + $0x58] sm:$0xff] %vm19_vm2, %v321_v41  ;;  %327 = vst.msk [vmem:[%s597_s3 + $0x8] sm:$0xff] %vm19_vm2, %v311_v42  ;;  %v293_v45 = vld [vmem:[#allocation2 + $0x30] sm:$0xff] }
  0xee   :  { %335 = vst.msk [vmem:[%s597_s3 + $0x48] sm:$0xff] %vm19_vm2, %v319_v44  ;;  %v316_v46 = vadd.f32 %v504_v7, %v293_v45  ;;  %v301_v47 = vld [vmem:[#allocation2 + $0x70] sm:$0xff]  ;;  %v291_v48 = vld [vmem:[#allocation2 + $0x20] sm:$0xff] }
  0xef   :  { %v324_v49 = vadd.f32 %v504_v7, %v301_v47  ;;  %v314_v50 = vadd.f32 %v504_v7, %v291_v48  ;;  %v299_v51 = vld [vmem:[#allocation2 + $0x60] sm:$0xff] }
  0xf0   :  { %v294_v52 = vld [vmem:[#allocation2 + $0x38] sm:$0xff]  ;;  %332 = vst.msk [vmem:[%s597_s3 + $0x30] sm:$0xff] %vm19_vm2, %v316_v46  ;;  %v322_v53 = vadd.f32 %v504_v7, %v299_v51 }
  0xf1   :  { %v317_v54 = vadd.f32 %v504_v7, %v294_v52  ;;  %v302_v55 = vld [vmem:[#allocation2 + $0x78] sm:$0xff]  ;;  %340 = vst.msk [vmem:[%s597_s3 + $0x70] sm:$0xff] %vm19_vm2, %v324_v49  ;;  %330 = vst.msk [vmem:[%s597_s3 + $0x20] sm:$0xff] %vm19_vm2, %v314_v50 }
  0xf2   :  { %v292_v56 = vld [vmem:[#allocation2 + $0x28] sm:$0xff]  ;;  %v325_v57 = vadd.f32 %v504_v7, %v302_v55  ;;  %338 = vst.msk [vmem:[%s597_s3 + $0x60] sm:$0xff] %vm19_vm2, %v322_v53 }
  0xf3   :  { %v315_v58 = vadd.f32 %v504_v7, %v292_v56  ;;  %v300_v59 = vld [vmem:[#allocation2 + $0x68] sm:$0xff]  ;;  %333 = vst.msk [vmem:[%s597_s3 + $0x38] sm:$0xff] %vm19_vm2, %v317_v54 }
  0xf4   :  { %v323_v60 = vadd.f32 %v504_v7, %v300_v59  ;;  %341 = vst.msk [vmem:[%s597_s3 + $0x78] sm:$0xff] %vm19_vm2, %v325_v57 }
  0xf5   :  { %331 = vst.msk [vmem:[%s597_s3 + $0x28] sm:$0xff] %vm19_vm2, %v315_v58 }
  0xf6   :  { %339 = vst.msk [vmem:[%s597_s3 + $0x68] sm:$0xff] %vm19_vm2, %v323_v60 }

// kernel: _lambda_.108
= control target key start
LH: loop header
LB: loop body
LE: loop exit
PB: predicated region body
PF: predicated region fallthrough
CT: control target
= control target key end

     0   :  { %vm19_vm0 = vcmask 64512   ;;  %v163_v1 = vmov 0.0   ;;  %v164_v5 = vmov 0   ;;  %vm54_vm1 = vcmask 130048   ;;  %s227_s1 = inlined_call_operand.vmem [shape: bf16[16,8], index: 1, kind: input, shape index: {}]   ;;  %s228_s0 = inlined_call_operand.vmem [shape: bf16[32,16], index: 0, kind: input, shape index: {}]   ;;  %s229_s2 = inlined_call_operand.vmem [shape: f32[1,8], index: 2, kind: input, shape index: {}]   ;;  %s230_s3 = inlined_call_operand.vmem [shape: f32[32,8], index: 3, kind: output, shape index: {}]  }
   0x1   :  { %v162_v0 = vld [vmem:[%s227_s1] sm:$0xff]   ;;  %22 = vst.msk [vmem:[#allocation2 + $0x10] sm:$0xff] %vm19_vm0, %v163_v1  ;;  %20 = vst.msk [vmem:[#allocation2] sm:$0xff] %vm19_vm0, %v163_v1  ;;  %v26_v4 = vld [vmem:[%s228_s0 + $0x8] sm:$0xf] }
   0x2   :  { %21 = vst.msk [vmem:[#allocation2 + $0x8] sm:$0xff] %vm19_vm0, %v163_v1  ;;  %23 = vst.msk [vmem:[#allocation2 + $0x18] sm:$0xff] %vm19_vm0, %v163_v1  ;;  %v24_v2 = vld [vmem:[%s228_s0] sm:$0xf]  ;;  %v25_v3 = vld [vmem:[%s228_s0 + $0x4] sm:$0xf]  ;;  %154 = vmatprep.subr.bf16.mxu0 %v162_v0  ;;  %v30_v9 = vmax.bf16 %v164_v5, %v26_v4 }
   0x3   :  { %v28_v6 = vmax.bf16 %v164_v5, %v24_v2  ;;  %v29_v7 = vmax.bf16 %v164_v5, %v25_v3  ;;  %v27_v8 = vld [vmem:[%s228_s0 + $0xc] sm:$0xf]  ;;  %155 = vmatpush3.bf16.msra.mxu0 %v162_v0  ;;  %v150_v25 = vld [vmem:[%s229_s2] ss:$0 sm:$0xff] }
   0x4   :  { %v31_v10 = vmax.bf16 %v164_v5, %v27_v8 }
   0x5   :  { %v145_v11 = vcombine.low %v28_v6, %v29_v7 }
   0x6   :  { %v146_v12 = vcombine.low %v30_v9, %v31_v10 }
   0x7   :  { %156 = vmatprep.mubr.msk.bf16.mxu0 %vm54_vm1, %v145_v11 }
   0x8   :  { %157 = vmatmul.mubr.msk.bf16.vlgmr.msra.gmra.mrb[0].mxu0 %vm54_vm1, %v146_v12  ;;  %v34_v13 = vld [vmem:[#allocation2 + $0x10] sm:$0xff]  ;;  %v32_v14 = vld [vmem:[#allocation2] sm:$0xff] }
   0x9   :  { %v35_v16 = vld [vmem:[#allocation2 + $0x18] sm:$0xff]  ;;  %v33_v19 = vld [vmem:[#allocation2 + $0x8] sm:$0xff] }
  0xdb   :  { %v158_v15 = vpop.f32.mrb[0].mxu0 }
  0xdc   :  { %v112_v17 = vadd.f32 %v158_v15, %v34_v13  ;;  %v95_v18 = vpop.f32.mrb[1].mxu0 }
  0xdd   :  { %v110_v20 = vadd.f32 %v95_v18, %v32_v14  ;;  %v159_v21 = vpop.f32.mrb[2].mxu0 }
  0xde   :  { %117 = vst.msk [vmem:[#allocation2 + $0x10] sm:$0xff] %vm19_vm0, %v112_v17  ;;  %v113_v22 = vadd.f32 %v159_v21, %v35_v16  ;;  %v98_v23 = vpop.f32.mrb[3].mxu0 }
  0xdf   :  { %115 = vst.msk [vmem:[#allocation2] sm:$0xff] %vm19_vm0, %v110_v20  ;;  %v111_v24 = vadd.f32 %v98_v23, %v33_v19 }
  0xe0   :  { %118 = vst.msk [vmem:[#allocation2 + $0x18] sm:$0xff] %vm19_vm0, %v113_v22 }
  0xe1   :  { %116 = vst.msk [vmem:[#allocation2 + $0x8] sm:$0xff] %vm19_vm0, %v111_v24 }
  0xe5   :  { %v124_v26 = vld [vmem:[#allocation2 + $0x10] sm:$0xff] }
  0xe6   :  { %v135_v27 = vadd.f32 %v150_v25, %v124_v26  ;;  %v122_v28 = vld [vmem:[#allocation2] sm:$0xff] }
  0xe7   :  { %v133_v29 = vadd.f32 %v150_v25, %v122_v28  ;;  %v125_v30 = vld [vmem:[#allocation2 + $0x18] sm:$0xff] }
  0xe8   :  { %139 = vst.msk [vmem:[%s230_s3 + $0x10] sm:$0xff] %vm19_vm0, %v135_v27  ;;  %v136_v31 = vadd.f32 %v150_v25, %v125_v30  ;;  %v123_v32 = vld [vmem:[#allocation2 + $0x8] sm:$0xff] }
  0xe9   :  { %137 = vst.msk [vmem:[%s230_s3] sm:$0xff] %vm19_vm0, %v133_v29  ;;  %v134_v33 = vadd.f32 %v150_v25, %v123_v32 }
  0xea   :  { %140 = vst.msk [vmem:[%s230_s3 + $0x18] sm:$0xff] %vm19_vm0, %v136_v31 }
  0xeb   :  { %138 = vst.msk [vmem:[%s230_s3 + $0x8] sm:$0xff] %vm19_vm0, %v134_v33 }

// kernel: _lambda_.109
= control target key start
LH: loop header
LB: loop body
LE: loop exit
PB: predicated region body
PF: predicated region fallthrough
CT: control target
= control target key end

     0   :  { %vm12_vm0 = vcmask 58368   ;;  %vm18_vm1 = vcmask 64512   ;;  %v60_v0 = vmov 0.0   ;;  %vm50_vm2 = vcmask 1040384   ;;  %s102_s0 = inlined_call_operand.vmem [shape: f32[32,8], index: 0, kind: input, shape index: {}]   ;;  %s103_s1 = inlined_call_operand.vmem [shape: f32[2,8], index: 1, kind: output, shape index: {}]  }
   0x1   :  { %13 = vst.msk [vmem:[%s103_s1] sm:$0x3] %vm12_vm0, %v60_v0  ;;  %v14_v1 = vld [vmem:[%s102_s0] sm:$0xff]  ;;  %v15_v2 = vld [vmem:[%s102_s0 + $0x8] sm:$0xff]  ;;  %v16_v3 = vld [vmem:[%s102_s0 + $0x10] sm:$0xff] }
   0x2   :  { %v17_v4 = vld [vmem:[%s102_s0 + $0x18] sm:$0xff]  ;;  %v19_v5 = vsel %vm18_vm1, %v14_v1, 0.0  ;;  %v20_v6 = vsel %vm18_vm1, %v15_v2, 0.0  ;;  %v22_v7 = vsel %vm18_vm1, %v16_v3, 0.0  ;;  %v32_v8 = vmul.f32 %v14_v1, %v14_v1 }
   0x3   :  { %v21_v9 = vadd.f32 %v20_v6, %v19_v5  ;;  %v33_v10 = vmul.f32 %v15_v2, %v15_v2  ;;  %v34_v11 = vmul.f32 %v16_v3, %v16_v3  ;;  %v24_v12 = vsel %vm18_vm1, %v17_v4, 0.0 }
   0x4   :  { %v35_v13 = vmul.f32 %v17_v4, %v17_v4  ;;  %v36_v14 = vsel %vm18_vm1, %v32_v8, 0.0 }
   0x5   :  { %v23_v15 = vadd.f32 %v22_v7, %v21_v9  ;;  %v37_v16 = vsel %vm18_vm1, %v33_v10, 0.0  ;;  %v39_v17 = vsel %vm18_vm1, %v34_v11, 0.0 }
   0x6   :  { %v38_v18 = vadd.f32 %v37_v16, %v36_v14  ;;  %v41_v20 = vsel %vm18_vm1, %v35_v13, 0.0 }
   0x7   :  { %v25_v19 = vadd.f32 %v24_v12, %v23_v15 }
   0x8   :  { %v40_v21 = vadd.f32 %v39_v17, %v38_v18  ;;  %v49_v35 = vld [vmem:[%s103_s1] sm:$0x3] }
   0x9   :  { %v26_v22 = vrot.slane %v25_v19, 4 }
   0xa   :  { %v42_v23 = vadd.f32 %v41_v20, %v40_v21 }
   0xb   :  { %v27_v24 = vadd.f32 %v26_v22, %v25_v19 }
   0xc   :  { %v43_v25 = vrot.slane %v42_v23, 4 }
   0xd   :  { %v28_v26 = vrot.slane %v27_v24, 2 }
   0xe   :  { %v44_v27 = vadd.f32 %v43_v25, %v42_v23 }
   0xf   :  { %v29_v28 = vadd.f32 %v28_v26, %v27_v24 }
  0x10   :  { %v45_v29 = vrot.slane %v44_v27, 2 }
  0x11   :  { %v30_v30 = vrot.slane %v29_v28, 1 }
  0x12   :  { %v46_v31 = vadd.f32 %v45_v29, %v44_v27 }
  0x13   :  { %v31_v32 = vadd.f32 %v30_v30, %v29_v28 }
  0x14   :  { %v47_v33 = vrot.slane %v46_v31, 1 }
  0x16   :  { %v48_v34 = vadd.f32 %v47_v33, %v46_v31 }
  0x18   :  { %v51_v36 = vsel %vm50_vm2, %v31_v32, %v48_v34 }
  0x19   :  { %v52_v37 = vadd.f32 %v51_v36, %v49_v35 }
  0x1b   :  { %54 = vst.msk [vmem:[%s103_s1] sm:$0x3] %vm12_vm0, %v52_v37 }

// kernel: _lambda_.110
= control target key start
LH: loop header
LB: loop body
LE: loop exit
PB: predicated region body
PF: predicated region fallthrough
CT: control target
= control target key end

     0   :  { %v27_v4 = vlaneseq  ;;  %vm49_vm0 = vcmask 64512   ;;  %s113_s1 = inlined_call_operand.vmem [shape: f32[2,8], index: 1, kind: input, shape index: {}]   ;;  %s114_s2 = inlined_call_operand.vmem [shape: f32[32,8], index: 2, kind: input, shape index: {}]   ;;  %s115_s0 = inlined_call_operand.<no memory space> [shape: f32[1], index: 0, kind: input, shape index: {}]   ;;  %s116_s3 = inlined_call_operand.vmem [shape: f32[32,8], index: 3, kind: output, shape index: {}]  }
   0x1   :  { %v15_v0 = vld [vmem:[%s113_s1] sm:$0x1]  ;;  %v17_v1 = vld [vmem:[%s113_s1 + $0x1] sm:$0x1]  ;;  %v24_v12 = vld [vmem:[%s114_s2 + $0x8] sm:$0xff]  ;;  %v44_v21 = vstv %s115_s0 }
   0x2   :  { %v16_v2 = vmul.f32 0.03125, %v15_v0  ;;  %v18_v3 = vmul.f32 0.03125, %v17_v1  ;;  %v28_v7 = vshrl.u32 %v27_v4, 7  ;;  %v23_v10 = vld [vmem:[%s114_s2] sm:$0xff]  ;;  %v25_v13 = vld [vmem:[%s114_s2 + $0x10] sm:$0xff]  ;;  %v26_v14 = vld [vmem:[%s114_s2 + $0x18] sm:$0xff] }
   0x4   :  { %v19_v5 = vmul.f32 %v16_v2, %v16_v2  ;;  %v29_v9 = vsub.s32 0, %v28_v7 }
   0x6   :  { %v20_v6 = vsub.f32 %v18_v3, %v19_v5  ;;  %v30_v11 = vrot.slane %v16_v2, %v29_v9 }
   0x8   :  { %v21_v8 = vadd.f32 1e-05, %v20_v6  ;;  %v31_v15 = vsub.f32 %v23_v10, %v30_v11  ;;  %v32_v16 = vsub.f32 %v24_v12, %v30_v11  ;;  %v33_v17 = vsub.f32 %v25_v13, %v30_v11 }
   0x9   :  { %v34_v18 = vsub.f32 %v26_v14, %v30_v11 }
   0xa   :  { %58 = vrsqrt.f32 %v21_v8 }
  0x14   :  { %v59_v19 = vpop.eup %58 }
  0x15   :  { %v38_v20 = vrot.slane %v59_v19, %v29_v9 }
  0x17   :  { %v39_v22 = vmul.f32 %v38_v20, %v31_v15  ;;  %v40_v23 = vmul.f32 %v38_v20, %v32_v16  ;;  %v41_v24 = vmul.f32 %v38_v20, %v33_v17  ;;  %v42_v25 = vmul.f32 %v38_v20, %v34_v18 }
  0x19   :  { %v45_v26 = vmul.f32 %v44_v21, %v39_v22  ;;  %v46_v27 = vmul.f32 %v44_v21, %v40_v23  ;;  %v47_v28 = vmul.f32 %v44_v21, %v41_v24  ;;  %v48_v29 = vmul.f32 %v44_v21, %v42_v25 }
  0x1b   :  { %50 = vst.msk [vmem:[%s116_s3] sm:$0xff] %vm49_vm0, %v45_v26  ;;  %51 = vst.msk [vmem:[%s116_s3 + $0x8] sm:$0xff] %vm49_vm0, %v46_v27 }
  0x1c   :  { %52 = vst.msk [vmem:[%s116_s3 + $0x10] sm:$0xff] %vm49_vm0, %v47_v28  ;;  %53 = vst.msk [vmem:[%s116_s3 + $0x18] sm:$0xff] %vm49_vm0, %v48_v29 }

// kernel: _lambda_.106
= control target key start
LH: loop header
LB: loop body
LE: loop exit
PB: predicated region body
PF: predicated region fallthrough
CT: control target
= control target key end

     0   :  { %vm19_vm0 = vcmask 64512   ;;  %v216_v2 = vmov 0.0   ;;  %v217_v6 = vmov 0   ;;  %vm82_vm1 = vcmask 588800   ;;  %s294_s1 = inlined_call_operand.vmem [shape: bf16[72,8], index: 1, kind: input, shape index: {}]   ;;  %s295_s0 = inlined_call_operand.vmem [shape: bf16[32,72], index: 0, kind: input, shape index: {}]   ;;  %s296_s2 = inlined_call_operand.vmem [shape: f32[1,8], index: 2, kind: input, shape index: {}]   ;;  %s297_s3 = inlined_call_operand.vmem [shape: f32[32,8], index: 3, kind: output, shape index: {}]  }
   0x1   :  { %v211_v0 = vld [vmem:[%s294_s1] sm:$0xff]   ;;  %v212_v1 = vld [vmem:[%s294_s1 + $0x8] sm:$0xff]   ;;  %22 = vst.msk [vmem:[#allocation2 + $0x10] sm:$0xff] %vm19_vm0, %v216_v2  ;;  %20 = vst.msk [vmem:[#allocation2] sm:$0xff] %vm19_vm0, %v216_v2  ;;  %vm89_vm2 = vcmask 1043456  }
   0x2   :  { %21 = vst.msk [vmem:[#allocation2 + $0x8] sm:$0xff] %vm19_vm0, %v216_v2  ;;  %23 = vst.msk [vmem:[#allocation2 + $0x18] sm:$0xff] %vm19_vm0, %v216_v2  ;;  %194 = vmatprep.subr.bf16.mxu0 %v211_v0  ;;  %v213_v3 = vld [vmem:[%s294_s1 + $0x10] sm:$0xff]   ;;  %v24_v4 = vld [vmem:[%s295_s0] sm:$0xf] }
   0x3   :  { %195 = vmatpush3.bf16.msra.mxu0 %v211_v0  ;;  %v25_v5 = vld [vmem:[%s295_s0 + $0x4] sm:$0xf]  ;;  %v28_v7 = vmax.bf16 %v217_v6, %v24_v4  ;;  %v214_v9 = vld [vmem:[%s294_s1 + $0x18] sm:$0xff]   ;;  %v26_v11 = vld [vmem:[%s295_s0 + $0x8] sm:$0xf] }
   0x4   :  { %196 = vmatprep.subr.bf16.mxu0 %v212_v1  ;;  %v29_v8 = vmax.bf16 %v217_v6, %v25_v5  ;;  %v27_v12 = vld [vmem:[%s295_s0 + $0xc] sm:$0xf]  ;;  %v215_v13 = vld [vmem:[%s294_s1 + $0x20] ss:$0 sps:$4 sm:$0xff]   ;;  %v30_v14 = vmax.bf16 %v217_v6, %v26_v11 }
   0x5   :  { %v31_v15 = vmax.bf16 %v217_v6, %v27_v12  ;;  %v91_v16 = vsel %vm89_vm2, %v215_v13, 0  ;;  %v186_v30 = vld [vmem:[%s296_s2] ss:$0 sm:$0xff] }
   0x6   :  { %v177_v10 = vcombine.low %v28_v7, %v29_v8 }
   0x7   :  { %197 = vmatpush3.bf16.msra.mxu0 %v212_v1  ;;  %v178_v17 = vcombine.low %v30_v14, %v31_v15 }
   0x8   :  { %198 = vmatprep.subr.bf16.mxu0 %v213_v3  ;;  %204 = vmatprep.mubr.msk.bf16.mxu0 %vm82_vm1, %v177_v10  ;;  %v34_v18 = vld [vmem:[#allocation2 + $0x10] sm:$0xff]  ;;  %v32_v19 = vld [vmem:[#allocation2] sm:$0xff] }
   0x9   :  { %v35_v21 = vld [vmem:[#allocation2 + $0x18] sm:$0xff]  ;;  %v33_v24 = vld [vmem:[#allocation2 + $0x8] sm:$0xff] }
   0xb   :  { %199 = vmatpush3.bf16.msra.mxu0 %v213_v3 }
   0xc   :  { %200 = vmatprep.subr.bf16.mxu0 %v214_v9 }
   0xf   :  { %201 = vmatpush3.bf16.msra.mxu0 %v214_v9 }
  0x10   :  { %208 = vmatprep.subr.msk.bf16.mxu0 %vm89_vm2, %v215_v13 }
  0x13   :  { %203 = vmatpush3.bf16.msra.mxu0 %v91_v16 }
  0x16   :  { %205 = vmatmul.mubr.msk.bf16.vlgmr.msra.gmra.mrb[0].mxu0 %vm82_vm1, %v178_v17 }
  0xe9   :  { %v206_v20 = vpop.f32.mrb[0].mxu0 }
  0xea   :  { %v144_v22 = vadd.f32 %v206_v20, %v34_v18  ;;  %v127_v23 = vpop.f32.mrb[1].mxu0 }
  0xeb   :  { %v142_v25 = vadd.f32 %v127_v23, %v32_v19  ;;  %v207_v26 = vpop.f32.mrb[2].mxu0 }
  0xec   :  { %149 = vst.msk [vmem:[#allocation2 + $0x10] sm:$0xff] %vm19_vm0, %v144_v22  ;;  %v145_v27 = vadd.f32 %v207_v26, %v35_v21  ;;  %v130_v28 = vpop.f32.mrb[3].mxu0 }
  0xed   :  { %147 = vst.msk [vmem:[#allocation2] sm:$0xff] %vm19_vm0, %v142_v25  ;;  %v143_v29 = vadd.f32 %v130_v28, %v33_v24 }
  0xee   :  { %150 = vst.msk [vmem:[#allocation2 + $0x18] sm:$0xff] %vm19_vm0, %v145_v27 }
  0xef   :  { %148 = vst.msk [vmem:[#allocation2 + $0x8] sm:$0xff] %vm19_vm0, %v143_v29 }
  0xf3   :  { %v156_v31 = vld [vmem:[#allocation2 + $0x10] sm:$0xff] }
  0xf4   :  { %v167_v32 = vadd.f32 %v186_v30, %v156_v31  ;;  %v154_v33 = vld [vmem:[#allocation2] sm:$0xff] }
  0xf5   :  { %v165_v34 = vadd.f32 %v186_v30, %v154_v33  ;;  %v157_v35 = vld [vmem:[#allocation2 + $0x18] sm:$0xff] }
  0xf6   :  { %171 = vst.msk [vmem:[%s297_s3 + $0x10] sm:$0xff] %vm19_vm0, %v167_v32  ;;  %v168_v36 = vadd.f32 %v186_v30, %v157_v35  ;;  %v155_v37 = vld [vmem:[#allocation2 + $0x8] sm:$0xff] }
  0xf7   :  { %169 = vst.msk [vmem:[%s297_s3] sm:$0xff] %vm19_vm0, %v165_v34  ;;  %v166_v38 = vadd.f32 %v186_v30, %v155_v37 }
  0xf8   :  { %172 = vst.msk [vmem:[%s297_s3 + $0x18] sm:$0xff] %vm19_vm0, %v168_v36 }
  0xf9   :  { %170 = vst.msk [vmem:[%s297_s3 + $0x8] sm:$0xff] %vm19_vm0, %v166_v38 }

// kernel: _lambda_.111
= control target key start
LH: loop header
LB: loop body
LE: loop exit
PB: predicated region body
PF: predicated region fallthrough
CT: control target
= control target key end

     0   :  { %10 = vsyncpa [#allocation3], 0  ;;  %s212_s0 = inlined_call_operand.vmem [shape: f32[3], index: 0, kind: input, shape index: {}]   ;;  %s213_s1 = inlined_call_operand.vmem [shape: f32[2,8], index: 1, kind: input, shape index: {}]   ;;  %s214_s2 = inlined_call_operand.vmem [shape: f32[32,8], index: 2, kind: input, shape index: {}]   ;;  %s215_s3 = inlined_call_operand.vmem [shape: f32[32,8], index: 3, kind: input, shape index: {}]   ;;  %s216_s4 = inlined_call_operand.vmem [shape: f32[32,8], index: 4, kind: input, shape index: {}]   ;;  %s217_s5 = inlined_call_operand.vmem [shape: f32[32,8], index: 5, kind: output, shape index: {}]  }
   0x1   :  { %s17_s20 = sshll.u32 %s212_s0, 4  ;;  %s18_s20 = int_to_ptr.vmem [resolvable:$true] %s17_s20 }
   0x2   :  { %s110_s21 = scalar_lea.vmem %s18_s20, 16  ;;  %p115_p1 = scmp.lt.s32.totalorder %s18_s20, %s18_s20 }
   0x3   :  { %p111_p0 = scmp.ne.s32.totalorder %s18_s20, %s110_s21  ;;  %p116_p2 = scmp.lt.s32.totalorder %s110_s21, %s110_s21 }
   0x5   :  { %p117_p3 = por %p116_p2, %p115_p1 }
   0x7   :  { %p118_p4 = pnand %p117_p3, %p111_p0 }
   0x9   :  { %121 = shalt.err (!%p118_p4)
}
   0xa   :  { %s124_s22 = smov [#allocation2]  }
   0xb   :  { %20 = dma.vmem_to_smem %s18_s20, 16, %s124_s22, [#allocation3]  }
   0xc   :  { %122 = dma.done.wait [#allocation3], 16  }
   0xd   :  { %123 = vsyncadd [#allocation3], 4294967280 }
   0xe   :  { %32 = sfence }
   0xf   :  { %v33_v0 = vld [vmem:[%s213_s1] sm:$0x1]  ;;  %v35_v1 = vld [vmem:[%s213_s1 + $0x1] sm:$0x1]  ;;  %v45_v4 = vlaneseq  ;;  %s105_s0 = sld [smem:[#allocation2 + $0x1]]  ;;  %s61_s27 = sld [smem:[#allocation2]] }
  0x10   :  { %v34_v2 = vmul.f32 0.03125, %v33_v0  ;;  %v36_v3 = vmul.f32 0.03125, %v35_v1  ;;  %s106_s28 = sld [smem:[#allocation2 + $0x2]]  ;;  %v41_v11 = vld [vmem:[%s214_s2] sm:$0xff]  ;;  %v42_v12 = vld [vmem:[%s214_s2 + $0x8] sm:$0xff]  ;;  %v43_v13 = vld [vmem:[%s214_s2 + $0x10] sm:$0xff] }
  0x11   :  { %v46_v7 = vshrl.u32 %v45_v4, 7  ;;  %v44_v14 = vld [vmem:[%s214_s2 + $0x18] sm:$0xff]  ;;  %v67_v16 = vld [vmem:[%s215_s3] sm:$0xff]  ;;  %v68_v19 = vld [vmem:[%s215_s3 + $0x8] sm:$0xff]  ;;  %vm95_vm0 = vcmask 64512  }
  0x12   :  { %v37_v5 = vmul.f32 %v34_v2, %v34_v2  ;;  %v69_v21 = vld [vmem:[%s215_s3 + $0x10] sm:$0xff]  ;;  %v70_v23 = vld [vmem:[%s215_s3 + $0x18] sm:$0xff]  ;;  %v81_v25 = vld [vmem:[%s216_s4] sm:$0xff] }
  0x13   :  { %v47_v9 = vsub.s32 0, %v46_v7  ;;  %v82_v26 = vld [vmem:[%s216_s4 + $0x8] sm:$0xff]  ;;  %v83_v30 = vld [vmem:[%s216_s4 + $0x10] sm:$0xff]  ;;  %v84_v31 = vld [vmem:[%s216_s4 + $0x18] sm:$0xff] }
  0x14   :  { %v38_v6 = vsub.f32 %v36_v3, %v37_v5 }
  0x15   :  { %v48_v10 = vrot.slane %v34_v2, %v47_v9  ;;  %v72_v17 = vstv %s105_s0  ;;  %v62_v28 = vstv %s61_s27 }
  0x16   :  { %v39_v8 = vadd.f32 1e-05, %v38_v6  ;;  %v86_v29 = vstv %s106_s28  ;;  %v73_v32 = vmul.f32 %v72_v17, %v67_v16  ;;  %v74_v33 = vmul.f32 %v72_v17, %v68_v19 }
  0x17   :  { %v49_v15 = vsub.f32 %v41_v11, %v48_v10  ;;  %v50_v18 = vsub.f32 %v42_v12, %v48_v10  ;;  %v51_v20 = vsub.f32 %v43_v13, %v48_v10  ;;  %v52_v22 = vsub.f32 %v44_v14, %v48_v10 }
  0x18   :  { %108 = vrsqrt.f32 %v39_v8  ;;  %v75_v34 = vmul.f32 %v72_v17, %v69_v21  ;;  %v76_v35 = vmul.f32 %v72_v17, %v70_v23  ;;  %v87_v40 = vmul.f32 %v86_v29, %v81_v25 }
  0x19   :  { %v88_v41 = vmul.f32 %v86_v29, %v82_v26  ;;  %v89_v42 = vmul.f32 %v86_v29, %v83_v30  ;;  %v90_v43 = vmul.f32 %v86_v29, %v84_v31 }
  0x22   :  { %v109_v24 = vpop.eup %108 }
  0x23   :  { %v56_v27 = vrot.slane %v109_v24, %v47_v9 }
  0x25   :  { %v57_v36 = vmul.f32 %v56_v27, %v49_v15  ;;  %v58_v37 = vmul.f32 %v56_v27, %v50_v18  ;;  %v59_v38 = vmul.f32 %v56_v27, %v51_v20  ;;  %v60_v39 = vmul.f32 %v56_v27, %v52_v22 }
  0x27   :  { %v63_v44 = vmul.f32 %v62_v28, %v57_v36  ;;  %v64_v45 = vmul.f32 %v62_v28, %v58_v37  ;;  %v65_v46 = vmul.f32 %v62_v28, %v59_v38  ;;  %v66_v47 = vmul.f32 %v62_v28, %v60_v39 }
  0x29   :  { %v77_v48 = vadd.f32 %v73_v32, %v63_v44  ;;  %v78_v49 = vadd.f32 %v74_v33, %v64_v45  ;;  %v79_v50 = vadd.f32 %v75_v34, %v65_v46  ;;  %v80_v51 = vadd.f32 %v76_v35, %v66_v47 }
  0x2b   :  { %v91_v52 = vadd.f32 %v87_v40, %v77_v48  ;;  %v92_v53 = vadd.f32 %v88_v41, %v78_v49  ;;  %v93_v54 = vadd.f32 %v89_v42, %v79_v50  ;;  %v94_v55 = vadd.f32 %v90_v43, %v80_v51 }
  0x2d   :  { %96 = vst.msk [vmem:[%s217_s5] sm:$0xff] %vm95_vm0, %v91_v52  ;;  %97 = vst.msk [vmem:[%s217_s5 + $0x8] sm:$0xff] %vm95_vm0, %v92_v53 }
  0x2e   :  { %98 = vst.msk [vmem:[%s217_s5 + $0x10] sm:$0xff] %vm95_vm0, %v93_v54  ;;  %99 = vst.msk [vmem:[%s217_s5 + $0x18] sm:$0xff] %vm95_vm0, %v94_v55 }
  0x2f   :  { %104 = vsyncpa [#allocation3], 1 }

// kernel: _lambda_.94
= control target key start
LH: loop header
LB: loop body
LE: loop exit
PB: predicated region body
PF: predicated region fallthrough
CT: control target
= control target key end

     0   :  { %vm156_vm0 = vcmask 1045504   ;;  %vm131_vm1 = vcmask 97280   ;;  %v404_v5 = vmov 0   ;;  %vm19_vm2 = vcmask 64512   ;;  %s602_s1 = inlined_call_operand.vmem [shape: bf16[12,8], index: 1, kind: input, shape index: {}]   ;;  %s603_s0 = inlined_call_operand.vmem [shape: bf16[128,12], index: 0, kind: input, shape index: {}]   ;;  %s604_s2 = inlined_call_operand.vmem [shape: f32[1,8], index: 2, kind: input, shape index: {}]   ;;  %s605_s3 = inlined_call_operand.vmem [shape: f32[128,8], index: 3, kind: output, shape index: {}]  }
   0x1   :  { %v403_v0 = vld [vmem:[%s602_s1] sm:$0x3f]   ;;  %v38_v10 = vld [vmem:[%s603_s0 + $0x8] sm:$0xf]  ;;  %v39_v12 = vld [vmem:[%s603_s0 + $0xc] sm:$0xf] }
   0x2   :  { %v36_v1 = vld [vmem:[%s603_s0] sm:$0xf]  ;;  %v37_v2 = vld [vmem:[%s603_s0 + $0x4] sm:$0xf]  ;;  %399 = vmatprep.subr.msk.bf16.mxu0 %vm156_vm0, %v403_v0  ;;  %400 = vmatprep.subr.msk.bf16.mxu1 %vm156_vm0, %v403_v0  ;;  %v158_v4 = vsel %vm156_vm0, %v403_v0, 0  ;;  %v54_v13 = vmax.bf16 %v404_v5, %v38_v10  ;;  %v55_v17 = vmax.bf16 %v404_v5, %v39_v12  ;;  %v405_v41 = vmov 0.0  }
   0x3   :  { %v44_v3 = vld [vmem:[%s603_s0 + $0x20] sm:$0xf]  ;;  %v52_v6 = vmax.bf16 %v404_v5, %v36_v1  ;;  %v53_v7 = vmax.bf16 %v404_v5, %v37_v2  ;;  %v45_v8 = vld [vmem:[%s603_s0 + $0x24] sm:$0xf]  ;;  %380 = vmatpush3.bf16.msra.mxu0 %v158_v4  ;;  %398 = vmatpush3.bf16.msra.mxu1 %v158_v4  ;;  %v46_v14 = vld [vmem:[%s603_s0 + $0x28] sm:$0xf] }
   0x4   :  { %v60_v9 = vmax.bf16 %v404_v5, %v44_v3  ;;  %v61_v11 = vmax.bf16 %v404_v5, %v45_v8  ;;  %v47_v15 = vld [vmem:[%s603_s0 + $0x2c] sm:$0xf]  ;;  %v62_v18 = vmax.bf16 %v404_v5, %v46_v14  ;;  %v40_v20 = vld [vmem:[%s603_s0 + $0x10] sm:$0xf]  ;;  %v41_v21 = vld [vmem:[%s603_s0 + $0x14] sm:$0xf]  ;;  %v353_v30 = vcombine.low %v54_v13, %v55_v17 }
   0x5   :  { %v352_v16 = vcombine.low %v52_v6, %v53_v7  ;;  %v63_v19 = vmax.bf16 %v404_v5, %v47_v15  ;;  %v48_v22 = vld [vmem:[%s603_s0 + $0x30] sm:$0xf]  ;;  %v56_v24 = vmax.bf16 %v404_v5, %v40_v20  ;;  %v57_v25 = vmax.bf16 %v404_v5, %v41_v21  ;;  %v49_v26 = vld [vmem:[%s603_s0 + $0x34] sm:$0xf]  ;;  %v42_v28 = vld [vmem:[%s603_s0 + $0x18] sm:$0xf] }
   0x6   :  { %v356_v23 = vcombine.low %v60_v9, %v61_v11  ;;  %v64_v27 = vmax.bf16 %v404_v5, %v48_v22  ;;  %v43_v29 = vld [vmem:[%s603_s0 + $0x1c] sm:$0xf]  ;;  %v65_v32 = vmax.bf16 %v404_v5, %v49_v26  ;;  %v50_v33 = vld [vmem:[%s603_s0 + $0x38] sm:$0xf]  ;;  %v58_v36 = vmax.bf16 %v404_v5, %v42_v28  ;;  %22 = vst.msk [vmem:[#allocation2 + $0x10] sm:$0xff] %vm19_vm2, %v405_v41 }
   0x7   :  { %381 = vmatprep.mubr.msk.bf16.mxu0 %vm131_vm1, %v352_v16  ;;  %v357_v31 = vcombine.low %v62_v18, %v63_v19  ;;  %v51_v34 = vld [vmem:[%s603_s0 + $0x3c] sm:$0xf]  ;;  %v354_v35 = vcombine.low %v56_v24, %v57_v25  ;;  %v59_v37 = vmax.bf16 %v404_v5, %v43_v29  ;;  %v66_v39 = vmax.bf16 %v404_v5, %v50_v33  ;;  %v512_v8 = vld [vmem:[%s604_s2] ss:$0 sm:$0xff] }
   0x8   :  { %389 = vmatprep.mubr.msk.bf16.mxu1 %vm131_vm1, %v356_v23  ;;  %382 = vmatmul.mubr.msk.bf16.vlgmr.msra.gmra.mrb[0].mxu0 %vm131_vm1, %v353_v30  ;;  %v358_v38 = vcombine.low %v64_v27, %v65_v32  ;;  %v67_v40 = vmax.bf16 %v404_v5, %v51_v34  ;;  %20 = vst.msk [vmem:[#allocation2] sm:$0xff] %vm19_vm2, %v405_v41  ;;  %21 = vst.msk [vmem:[#allocation2 + $0x8] sm:$0xff] %vm19_vm2, %v405_v41 }
   0x9   :  { %390 = vmatmul.mubr.msk.bf16.vlgmr.msra.gmra.mrb[0].mxu1 %vm131_vm1, %v357_v31  ;;  %385 = vmatprep.mubr.msk.bf16.mxu0 %vm131_vm1, %v354_v35  ;;  %23 = vst.msk [vmem:[#allocation2 + $0x18] sm:$0xff] %vm19_vm2, %v405_v41  ;;  %24 = vst.msk [vmem:[#allocation2 + $0x20] sm:$0xff] %vm19_vm2, %v405_v41  ;;  %v355_v42 = vcombine.low %v58_v36, %v59_v37 }
   0xa   :  { %25 = vst.msk [vmem:[#allocation2 + $0x28] sm:$0xff] %vm19_vm2, %v405_v41  ;;  %26 = vst.msk [vmem:[#allocation2 + $0x30] sm:$0xff] %vm19_vm2, %v405_v41  ;;  %393 = vmatprep.mubr.msk.bf16.mxu1 %vm131_vm1, %v358_v38  ;;  %v359_v43 = vcombine.low %v66_v39, %v67_v40 }
   0xb   :  { %27 = vst.msk [vmem:[#allocation2 + $0x38] sm:$0xff] %vm19_vm2, %v405_v41  ;;  %28 = vst.msk [vmem:[#allocation2 + $0x40] sm:$0xff] %vm19_vm2, %v405_v41 }
   0xc   :  { %29 = vst.msk [vmem:[#allocation2 + $0x48] sm:$0xff] %vm19_vm2, %v405_v41  ;;  %30 = vst.msk [vmem:[#allocation2 + $0x50] sm:$0xff] %vm19_vm2, %v405_v41 }
   0xd   :  { %31 = vst.msk [vmem:[#allocation2 + $0x58] sm:$0xff] %vm19_vm2, %v405_v41  ;;  %32 = vst.msk [vmem:[#allocation2 + $0x60] sm:$0xff] %vm19_vm2, %v405_v41  ;;  %v70_v44 = vld [vmem:[#allocation2 + $0x10] sm:$0xff] }
   0xe   :  { %33 = vst.msk [vmem:[#allocation2 + $0x68] sm:$0xff] %vm19_vm2, %v405_v41  ;;  %34 = vst.msk [vmem:[#allocation2 + $0x70] sm:$0xff] %vm19_vm2, %v405_v41 }
   0xf   :  { %35 = vst.msk [vmem:[#allocation2 + $0x78] sm:$0xff] %vm19_vm2, %v405_v41  ;;  %v68_v46 = vld [vmem:[#allocation2] sm:$0xff]  ;;  %v69_v56 = vld [vmem:[#allocation2 + $0x8] sm:$0xff] }
  0x10   :  { %386 = vmatmul.mubr.msk.bf16.gmra.mrb[4].mxu0 %vm131_vm1, %v355_v42  ;;  %v71_v50 = vld [vmem:[#allocation2 + $0x18] sm:$0xff]  ;;  %v72_v6 = vld [vmem:[#allocation2 + $0x20] sm:$0xff] }
  0x11   :  { %394 = vmatmul.mubr.msk.bf16.gmra.mrb[4].mxu1 %vm131_vm1, %v359_v43  ;;  %v74_v4 = vld [vmem:[#allocation2 + $0x30] sm:$0xff]  ;;  %v73_v17 = vld [vmem:[#allocation2 + $0x28] sm:$0xff] }
  0x12   :  { %v76_v47 = vld [vmem:[#allocation2 + $0x40] sm:$0xff]  ;;  %v75_v11 = vld [vmem:[#allocation2 + $0x38] sm:$0xff] }
  0x13   :  { %v78_v45 = vld [vmem:[#allocation2 + $0x50] sm:$0xff]  ;;  %v77_v57 = vld [vmem:[#allocation2 + $0x48] sm:$0xff] }
  0x14   :  { %v79_v51 = vld [vmem:[#allocation2 + $0x58] sm:$0xff]  ;;  %v80_v7 = vld [vmem:[#allocation2 + $0x60] sm:$0xff] }
  0x15   :  { %v82_v5 = vld [vmem:[#allocation2 + $0x70] sm:$0xff]  ;;  %v81_v18 = vld [vmem:[#allocation2 + $0x68] sm:$0xff] }
  0x16   :  { %v83_v12 = vld [vmem:[#allocation2 + $0x78] sm:$0xff] }
  0xdb   :  { %v383_v48 = vpop.f32.mrb[0].mxu0 }
  0xdc   :  { %v391_v49 = vpop.f32.mrb[0].mxu1  ;;  %v259_v52 = vadd.f32 %v383_v48, %v70_v44  ;;  %v194_v54 = vpop.f32.mrb[1].mxu0 }
  0xdd   :  { %v267_v53 = vadd.f32 %v391_v49, %v78_v45  ;;  %v226_v55 = vpop.f32.mrb[1].mxu1  ;;  %v257_v58 = vadd.f32 %v194_v54, %v68_v46  ;;  %v384_v60 = vpop.f32.mrb[2].mxu0 }
  0xde   :  { %v265_v59 = vadd.f32 %v226_v55, %v76_v47  ;;  %v392_v61 = vpop.f32.mrb[2].mxu1  ;;  %276 = vst.msk [vmem:[#allocation2 + $0x10] sm:$0xff] %vm19_vm2, %v259_v52  ;;  %v260_v62 = vadd.f32 %v384_v60, %v71_v50  ;;  %v197_v0 = vpop.f32.mrb[3].mxu0 }
  0xdf   :  { %284 = vst.msk [vmem:[#allocation2 + $0x50] sm:$0xff] %vm19_vm2, %v267_v53  ;;  %v268_v63 = vadd.f32 %v392_v61, %v79_v51  ;;  %v229_v1 = vpop.f32.mrb[3].mxu1  ;;  %274 = vst.msk [vmem:[#allocation2] sm:$0xff] %vm19_vm2, %v257_v58  ;;  %v258_v2 = vadd.f32 %v197_v0, %v69_v56 }
  0xe0   :  { %282 = vst.msk [vmem:[#allocation2 + $0x40] sm:$0xff] %vm19_vm2, %v265_v59  ;;  %v266_v3 = vadd.f32 %v229_v1, %v77_v57  ;;  %277 = vst.msk [vmem:[#allocation2 + $0x18] sm:$0xff] %vm19_vm2, %v260_v62 }
  0xe1   :  { %285 = vst.msk [vmem:[#allocation2 + $0x58] sm:$0xff] %vm19_vm2, %v268_v63  ;;  %275 = vst.msk [vmem:[#allocation2 + $0x8] sm:$0xff] %vm19_vm2, %v258_v2 }
  0xe2   :  { %283 = vst.msk [vmem:[#allocation2 + $0x48] sm:$0xff] %vm19_vm2, %v266_v3 }
  0xe3   :  { %v387_v9 = vpop.f32.mrb[4].mxu0 }
  0xe4   :  { %v395_v10 = vpop.f32.mrb[4].mxu1  ;;  %v263_v13 = vadd.f32 %v387_v9, %v74_v4  ;;  %v210_v15 = vpop.f32.mrb[5].mxu0 }
  0xe5   :  { %v271_v14 = vadd.f32 %v395_v10, %v82_v5  ;;  %v242_v16 = vpop.f32.mrb[5].mxu1  ;;  %v295_v19 = vld [vmem:[#allocation2 + $0x10] sm:$0xff]  ;;  %v261_v21 = vadd.f32 %v210_v15, %v72_v6  ;;  %v388_v23 = vpop.f32.mrb[6].mxu0 }
  0xe6   :  { %v303_v20 = vld [vmem:[#allocation2 + $0x50] sm:$0xff]  ;;  %v269_v22 = vadd.f32 %v242_v16, %v80_v7  ;;  %v396_v24 = vpop.f32.mrb[6].mxu1  ;;  %v318_v25 = vadd.f32 %v512_v8, %v295_v19  ;;  %v293_v27 = vld [vmem:[#allocation2] sm:$0xff]  ;;  %280 = vst.msk [vmem:[#allocation2 + $0x30] sm:$0xff] %vm19_vm2, %v263_v13  ;;  %v264_v29 = vadd.f32 %v388_v23, %v75_v11  ;;  %v213_v31 = vpop.f32.mrb[7].mxu0 }
  0xe7   :  { %v326_v26 = vadd.f32 %v512_v8, %v303_v20  ;;  %v301_v28 = vld [vmem:[#allocation2 + $0x40] sm:$0xff]  ;;  %288 = vst.msk [vmem:[#allocation2 + $0x70] sm:$0xff] %vm19_vm2, %v271_v14  ;;  %v272_v30 = vadd.f32 %v396_v24, %v83_v12  ;;  %v245_v32 = vpop.f32.mrb[7].mxu1  ;;  %v316_v33 = vadd.f32 %v512_v8, %v293_v27  ;;  %v296_v35 = vld [vmem:[#allocation2 + $0x18] sm:$0xff]  ;;  %278 = vst.msk [vmem:[#allocation2 + $0x20] sm:$0xff] %vm19_vm2, %v261_v21 }
  0xe8   :  { %v324_v34 = vadd.f32 %v512_v8, %v301_v28  ;;  %v304_v36 = vld [vmem:[#allocation2 + $0x58] sm:$0xff]  ;;  %286 = vst.msk [vmem:[#allocation2 + $0x60] sm:$0xff] %vm19_vm2, %v269_v22  ;;  %v262_v37 = vadd.f32 %v213_v31, %v73_v17  ;;  %v270_v38 = vadd.f32 %v245_v32, %v81_v18  ;;  %334 = vst.msk [vmem:[%s605_s3 + $0x10] sm:$0xff] %vm19_vm2, %v318_v25  ;;  %v294_v41 = vld [vmem:[#allocation2 + $0x8] sm:$0xff] }
  0xe9   :  { %342 = vst.msk [vmem:[%s605_s3 + $0x50] sm:$0xff] %vm19_vm2, %v326_v26  ;;  %v319_v39 = vadd.f32 %v512_v8, %v296_v35  ;;  %v327_v40 = vadd.f32 %v512_v8, %v304_v36  ;;  %v302_v42 = vld [vmem:[#allocation2 + $0x48] sm:$0xff]  ;;  %281 = vst.msk [vmem:[#allocation2 + $0x38] sm:$0xff] %vm19_vm2, %v264_v29  ;;  %v317_v43 = vadd.f32 %v512_v8, %v294_v41 }
  0xea   :  { %289 = vst.msk [vmem:[#allocation2 + $0x78] sm:$0xff] %vm19_vm2, %v272_v30  ;;  %332 = vst.msk [vmem:[%s605_s3] sm:$0xff] %vm19_vm2, %v316_v33  ;;  %v325_v44 = vadd.f32 %v512_v8, %v302_v42 }
  0xeb   :  { %340 = vst.msk [vmem:[%s605_s3 + $0x40] sm:$0xff] %vm19_vm2, %v324_v34  ;;  %279 = vst.msk [vmem:[#allocation2 + $0x28] sm:$0xff] %vm19_vm2, %v262_v37 }
  0xec   :  { %287 = vst.msk [vmem:[#allocation2 + $0x68] sm:$0xff] %vm19_vm2, %v270_v38  ;;  %335 = vst.msk [vmem:[%s605_s3 + $0x18] sm:$0xff] %vm19_vm2, %v319_v39 }
  0xed   :  { %343 = vst.msk [vmem:[%s605_s3 + $0x58] sm:$0xff] %vm19_vm2, %v327_v40  ;;  %333 = vst.msk [vmem:[%s605_s3 + $0x8] sm:$0xff] %vm19_vm2, %v317_v43  ;;  %v299_v45 = vld [vmem:[#allocation2 + $0x30] sm:$0xff] }
  0xee   :  { %341 = vst.msk [vmem:[%s605_s3 + $0x48] sm:$0xff] %vm19_vm2, %v325_v44  ;;  %v307_v46 = vld [vmem:[#allocation2 + $0x70] sm:$0xff]  ;;  %v322_v47 = vadd.f32 %v512_v8, %v299_v45  ;;  %v297_v49 = vld [vmem:[#allocation2 + $0x20] sm:$0xff] }
  0xef   :  { %v330_v48 = vadd.f32 %v512_v8, %v307_v46  ;;  %v305_v50 = vld [vmem:[#allocation2 + $0x60] sm:$0xff]  ;;  %v320_v51 = vadd.f32 %v512_v8, %v297_v49 }
  0xf0   :  { %v328_v52 = vadd.f32 %v512_v8, %v305_v50  ;;  %v300_v53 = vld [vmem:[#allocation2 + $0x38] sm:$0xff]  ;;  %338 = vst.msk [vmem:[%s605_s3 + $0x30] sm:$0xff] %vm19_vm2, %v322_v47 }
  0xf1   :  { %v308_v54 = vld [vmem:[#allocation2 + $0x78] sm:$0xff]  ;;  %346 = vst.msk [vmem:[%s605_s3 + $0x70] sm:$0xff] %vm19_vm2, %v330_v48  ;;  %v323_v55 = vadd.f32 %v512_v8, %v300_v53  ;;  %336 = vst.msk [vmem:[%s605_s3 + $0x20] sm:$0xff] %vm19_vm2, %v320_v51 }
  0xf2   :  { %v331_v56 = vadd.f32 %v512_v8, %v308_v54  ;;  %v298_v57 = vld [vmem:[#allocation2 + $0x28] sm:$0xff]  ;;  %344 = vst.msk [vmem:[%s605_s3 + $0x60] sm:$0xff] %vm19_vm2, %v328_v52 }
  0xf3   :  { %v306_v58 = vld [vmem:[#allocation2 + $0x68] sm:$0xff]  ;;  %v321_v59 = vadd.f32 %v512_v8, %v298_v57  ;;  %339 = vst.msk [vmem:[%s605_s3 + $0x38] sm:$0xff] %vm19_vm2, %v323_v55 }
  0xf4   :  { %v329_v60 = vadd.f32 %v512_v8, %v306_v58  ;;  %347 = vst.msk [vmem:[%s605_s3 + $0x78] sm:$0xff] %vm19_vm2, %v331_v56 }
  0xf5   :  { %337 = vst.msk [vmem:[%s605_s3 + $0x28] sm:$0xff] %vm19_vm2, %v321_v59 }
  0xf6   :  { %345 = vst.msk [vmem:[%s605_s3 + $0x68] sm:$0xff] %vm19_vm2, %v329_v60 }

// kernel: _lambda_.115
= control target key start
LH: loop header
LB: loop body
LE: loop exit
PB: predicated region body
PF: predicated region fallthrough
CT: control target
= control target key end

     0   :  { %vm54_vm0 = vcmask 1043456   ;;  %vm19_vm1 = vcmask 64512   ;;  %v158_v3 = vmov 0.0   ;;  %v159_v5 = vmov 0   ;;  %s224_s1 = inlined_call_operand.vmem [shape: bf16[8,8], index: 1, kind: input, shape index: {}]   ;;  %s225_s0 = inlined_call_operand.vmem [shape: bf16[32,8], index: 0, kind: input, shape index: {}]   ;;  %s226_s2 = inlined_call_operand.vmem [shape: f32[1,8], index: 2, kind: input, shape index: {}]   ;;  %s227_s3 = inlined_call_operand.vmem [shape: f32[32,8], index: 3, kind: output, shape index: {}]  }
   0x1   :  { %v36_v0 = vld [vmem:[%s224_s1] sm:$0xf]  ;;  %v25_v2 = vld [vmem:[%s225_s0 + $0x4] sm:$0xf]  ;;  %22 = vst.msk [vmem:[#allocation2 + $0x10] sm:$0xff] %vm19_vm1, %v158_v3  ;;  %20 = vst.msk [vmem:[#allocation2] sm:$0xff] %vm19_vm1, %v158_v3 }
   0x2   :  { %v24_v1 = vld [vmem:[%s225_s0] sm:$0xf]  ;;  %21 = vst.msk [vmem:[#allocation2 + $0x8] sm:$0xff] %vm19_vm1, %v158_v3  ;;  %23 = vst.msk [vmem:[#allocation2 + $0x18] sm:$0xff] %vm19_vm1, %v158_v3  ;;  %155 = vmatprep.subr.msk.bf16.mxu0 %vm54_vm0, %v36_v0  ;;  %v56_v4 = vsel %vm54_vm0, %v36_v0, 0  ;;  %v29_v7 = vmax.bf16 %v159_v5, %v25_v2 }
   0x3   :  { %v28_v6 = vmax.bf16 %v159_v5, %v24_v1  ;;  %v26_v8 = vld [vmem:[%s225_s0 + $0x8] sm:$0xf]  ;;  %v27_v9 = vld [vmem:[%s225_s0 + $0xc] sm:$0xf]  ;;  %150 = vmatpush3.bf16.msra.mxu0 %v56_v4  ;;  %v145_v26 = vld [vmem:[%s226_s2] ss:$0 sm:$0xff] }
   0x4   :  { %v30_v10 = vmax.bf16 %v159_v5, %v26_v8  ;;  %v31_v11 = vmax.bf16 %v159_v5, %v27_v9 }
   0x5   :  { %v141_v12 = vcombine.low %v28_v6, %v29_v7 }
   0x6   :  { %v142_v13 = vcombine.low %v30_v10, %v31_v11 }
   0x7   :  { %151 = vmatprep.mubr.msk.bf16.mxu0 %vm19_vm1, %v141_v12 }
   0x8   :  { %152 = vmatmul.mubr.msk.bf16.vlgmr.msra.gmra.mrb[0].mxu0 %vm19_vm1, %v142_v13  ;;  %v34_v14 = vld [vmem:[#allocation2 + $0x10] sm:$0xff]  ;;  %v32_v15 = vld [vmem:[#allocation2] sm:$0xff] }
   0x9   :  { %v35_v17 = vld [vmem:[#allocation2 + $0x18] sm:$0xff]  ;;  %v33_v20 = vld [vmem:[#allocation2 + $0x8] sm:$0xff] }
  0xdb   :  { %v153_v16 = vpop.f32.mrb[0].mxu0 }
  0xdc   :  { %v109_v18 = vadd.f32 %v153_v16, %v34_v14  ;;  %v92_v19 = vpop.f32.mrb[1].mxu0 }
  0xdd   :  { %v107_v21 = vadd.f32 %v92_v19, %v32_v15  ;;  %v154_v22 = vpop.f32.mrb[2].mxu0 }
  0xde   :  { %113 = vst.msk [vmem:[#allocation2 + $0x10] sm:$0xff] %vm19_vm1, %v109_v18  ;;  %v110_v23 = vadd.f32 %v154_v22, %v35_v17  ;;  %v95_v24 = vpop.f32.mrb[3].mxu0 }
  0xdf   :  { %111 = vst.msk [vmem:[#allocation2] sm:$0xff] %vm19_vm1, %v107_v21  ;;  %v108_v25 = vadd.f32 %v95_v24, %v33_v20 }
  0xe0   :  { %114 = vst.msk [vmem:[#allocation2 + $0x18] sm:$0xff] %vm19_vm1, %v110_v23 }
  0xe1   :  { %112 = vst.msk [vmem:[#allocation2 + $0x8] sm:$0xff] %vm19_vm1, %v108_v25 }
  0xe5   :  { %v120_v27 = vld [vmem:[#allocation2 + $0x10] sm:$0xff] }
  0xe6   :  { %v131_v28 = vadd.f32 %v145_v26, %v120_v27  ;;  %v118_v29 = vld [vmem:[#allocation2] sm:$0xff] }
  0xe7   :  { %v129_v30 = vadd.f32 %v145_v26, %v118_v29  ;;  %v121_v31 = vld [vmem:[#allocation2 + $0x18] sm:$0xff] }
  0xe8   :  { %135 = vst.msk [vmem:[%s227_s3 + $0x10] sm:$0xff] %vm19_vm1, %v131_v28  ;;  %v132_v32 = vadd.f32 %v145_v26, %v121_v31  ;;  %v119_v33 = vld [vmem:[#allocation2 + $0x8] sm:$0xff] }
  0xe9   :  { %133 = vst.msk [vmem:[%s227_s3] sm:$0xff] %vm19_vm1, %v129_v30  ;;  %v130_v34 = vadd.f32 %v145_v26, %v119_v33 }
  0xea   :  { %136 = vst.msk [vmem:[%s227_s3 + $0x18] sm:$0xff] %vm19_vm1, %v132_v32 }
  0xeb   :  { %134 = vst.msk [vmem:[%s227_s3 + $0x8] sm:$0xff] %vm19_vm1, %v130_v34 }

// kernel: _lambda_.127
= control target key start
LH: loop header
LB: loop body
LE: loop exit
PB: predicated region body
PF: predicated region fallthrough
CT: control target
= control target key end

     0   :  { %vm54_vm0 = vcmask 1043456   ;;  %vm19_vm1 = vcmask 130048   ;;  %v159_v4 = vmov 0   ;;  %vm47_vm2 = vcmask 64512   ;;  %s223_s1 = inlined_call_operand.vmem [shape: bf16[8,16], index: 1, kind: input, shape index: {}]   ;;  %s224_s0 = inlined_call_operand.vmem [shape: bf16[32,8], index: 0, kind: input, shape index: {}]   ;;  %s225_s2 = inlined_call_operand.vmem [shape: f32[1,16], index: 2, kind: input, shape index: {}]   ;;  %s226_s3 = inlined_call_operand.vmem [shape: f32[32,16], index: 3, kind: output, shape index: {}]  }
   0x1   :  { %v36_v0 = vld [vmem:[%s223_s1] sm:$0xf]  ;;  %v25_v2 = vld [vmem:[%s224_s0 + $0x4] sm:$0xf]  ;;  %v26_v7 = vld [vmem:[%s224_s0 + $0x8] sm:$0xf] }
   0x2   :  { %v24_v1 = vld [vmem:[%s224_s0] sm:$0xf]  ;;  %156 = vmatprep.subr.msk.bf16.mxu0 %vm54_vm0, %v36_v0  ;;  %v56_v3 = vsel %vm54_vm0, %v36_v0, 0  ;;  %v29_v6 = vmax.bf16 %v159_v4, %v25_v2  ;;  %v27_v8 = vld [vmem:[%s224_s0 + $0xc] sm:$0xf]  ;;  %v30_v9 = vmax.bf16 %v159_v4, %v26_v7  ;;  %v160_v11 = vmov 0.0  }
   0x3   :  { %v28_v5 = vmax.bf16 %v159_v4, %v24_v1  ;;  %151 = vmatpush3.bf16.msra.mxu0 %v56_v3  ;;  %v31_v10 = vmax.bf16 %v159_v4, %v27_v8  ;;  %22 = vst.msk [vmem:[#allocation2 + $0x10] sm:$0xff] %vm19_vm1, %v160_v11  ;;  %20 = vst.msk [vmem:[#allocation2] sm:$0xff] %vm19_vm1, %v160_v11  ;;  %v146_v26 = vld [vmem:[%s225_s2] ss:$0 sm:$0xff] }
   0x4   :  { %21 = vst.msk [vmem:[#allocation2 + $0x8] sm:$0xff] %vm19_vm1, %v160_v11  ;;  %23 = vst.msk [vmem:[#allocation2 + $0x18] sm:$0xff] %vm19_vm1, %v160_v11 }
   0x5   :  { %v142_v12 = vcombine.low %v28_v5, %v29_v6  ;;  %v143_v13 = vcombine.low %v30_v9, %v31_v10 }
   0x7   :  { %152 = vmatprep.mubr.msk.bf16.mxu0 %vm47_vm2, %v142_v12 }
   0x8   :  { %153 = vmatmul.mubr.msk.bf16.vlgmr.msra.gmra.mrb[0].mxu0 %vm47_vm2, %v143_v13 }
   0xa   :  { %v34_v14 = vld [vmem:[#allocation2 + $0x10] sm:$0xff]  ;;  %v32_v15 = vld [vmem:[#allocation2] sm:$0xff] }
   0xb   :  { %v35_v17 = vld [vmem:[#allocation2 + $0x18] sm:$0xff]  ;;  %v33_v20 = vld [vmem:[#allocation2 + $0x8] sm:$0xff] }
  0xdb   :  { %v154_v16 = vpop.f32.mrb[0].mxu0 }
  0xdc   :  { %v109_v18 = vadd.f32 %v154_v16, %v34_v14  ;;  %v92_v19 = vpop.f32.mrb[1].mxu0 }
  0xdd   :  { %v107_v21 = vadd.f32 %v92_v19, %v32_v15  ;;  %v155_v22 = vpop.f32.mrb[2].mxu0 }
  0xde   :  { %114 = vst.msk [vmem:[#allocation2 + $0x10] sm:$0xff] %vm19_vm1, %v109_v18  ;;  %v110_v23 = vadd.f32 %v155_v22, %v35_v17  ;;  %v95_v24 = vpop.f32.mrb[3].mxu0 }
  0xdf   :  { %112 = vst.msk [vmem:[#allocation2] sm:$0xff] %vm19_vm1, %v107_v21  ;;  %v108_v25 = vadd.f32 %v95_v24, %v33_v20 }
  0xe0   :  { %115 = vst.msk [vmem:[#allocation2 + $0x18] sm:$0xff] %vm19_vm1, %v110_v23 }
  0xe1   :  { %113 = vst.msk [vmem:[#allocation2 + $0x8] sm:$0xff] %vm19_vm1, %v108_v25 }
  0xe5   :  { %v121_v27 = vld [vmem:[#allocation2 + $0x10] sm:$0xff] }
  0xe6   :  { %v132_v28 = vadd.f32 %v146_v26, %v121_v27  ;;  %v119_v29 = vld [vmem:[#allocation2] sm:$0xff] }
  0xe7   :  { %v130_v30 = vadd.f32 %v146_v26, %v119_v29  ;;  %v122_v31 = vld [vmem:[#allocation2 + $0x18] sm:$0xff] }
  0xe8   :  { %136 = vst.msk [vmem:[%s226_s3 + $0x10] sm:$0xff] %vm19_vm1, %v132_v28  ;;  %v133_v32 = vadd.f32 %v146_v26, %v122_v31  ;;  %v120_v33 = vld [vmem:[#allocation2 + $0x8] sm:$0xff] }
  0xe9   :  { %134 = vst.msk [vmem:[%s226_s3] sm:$0xff] %vm19_vm1, %v130_v30  ;;  %v131_v34 = vadd.f32 %v146_v26, %v120_v33 }
  0xea   :  { %137 = vst.msk [vmem:[%s226_s3 + $0x18] sm:$0xff] %vm19_vm1, %v133_v32 }
  0xeb   :  { %135 = vst.msk [vmem:[%s226_s3 + $0x8] sm:$0xff] %vm19_vm1, %v131_v34 }

// kernel: _lambda_.128
= control target key start
LH: loop header
LB: loop body
LE: loop exit
PB: predicated region body
PF: predicated region fallthrough
CT: control target
= control target key end

     0   :  { %vm12_vm0 = vcmask 123904   ;;  %vm18_vm1 = vcmask 130048   ;;  %v60_v0 = vmov 0.0   ;;  %vm50_vm2 = vcmask 1040384   ;;  %s102_s0 = inlined_call_operand.vmem [shape: f32[32,16], index: 0, kind: input, shape index: {}]   ;;  %s103_s1 = inlined_call_operand.vmem [shape: f32[2,16], index: 1, kind: output, shape index: {}]  }
   0x1   :  { %13 = vst.msk [vmem:[%s103_s1] sm:$0x3] %vm12_vm0, %v60_v0  ;;  %v14_v1 = vld [vmem:[%s102_s0] sm:$0xff]  ;;  %v15_v2 = vld [vmem:[%s102_s0 + $0x8] sm:$0xff]  ;;  %v16_v3 = vld [vmem:[%s102_s0 + $0x10] sm:$0xff] }
   0x2   :  { %v17_v4 = vld [vmem:[%s102_s0 + $0x18] sm:$0xff]  ;;  %v19_v5 = vsel %vm18_vm1, %v14_v1, 0.0  ;;  %v20_v6 = vsel %vm18_vm1, %v15_v2, 0.0  ;;  %v22_v7 = vsel %vm18_vm1, %v16_v3, 0.0  ;;  %v32_v8 = vmul.f32 %v14_v1, %v14_v1 }
   0x3   :  { %v21_v9 = vadd.f32 %v20_v6, %v19_v5  ;;  %v33_v10 = vmul.f32 %v15_v2, %v15_v2  ;;  %v34_v11 = vmul.f32 %v16_v3, %v16_v3  ;;  %v24_v12 = vsel %vm18_vm1, %v17_v4, 0.0 }
   0x4   :  { %v35_v13 = vmul.f32 %v17_v4, %v17_v4  ;;  %v36_v14 = vsel %vm18_vm1, %v32_v8, 0.0 }
   0x5   :  { %v23_v15 = vadd.f32 %v22_v7, %v21_v9  ;;  %v37_v16 = vsel %vm18_vm1, %v33_v10, 0.0  ;;  %v39_v17 = vsel %vm18_vm1, %v34_v11, 0.0 }
   0x6   :  { %v38_v18 = vadd.f32 %v37_v16, %v36_v14  ;;  %v41_v20 = vsel %vm18_vm1, %v35_v13, 0.0 }
   0x7   :  { %v25_v19 = vadd.f32 %v24_v12, %v23_v15 }
   0x8   :  { %v40_v21 = vadd.f32 %v39_v17, %v38_v18  ;;  %v49_v35 = vld [vmem:[%s103_s1] sm:$0x3] }
   0x9   :  { %v26_v22 = vrot.slane %v25_v19, 4 }
   0xa   :  { %v42_v23 = vadd.f32 %v41_v20, %v40_v21 }
   0xb   :  { %v27_v24 = vadd.f32 %v26_v22, %v25_v19 }
   0xc   :  { %v43_v25 = vrot.slane %v42_v23, 4 }
   0xd   :  { %v28_v26 = vrot.slane %v27_v24, 2 }
   0xe   :  { %v44_v27 = vadd.f32 %v43_v25, %v42_v23 }
   0xf   :  { %v29_v28 = vadd.f32 %v28_v26, %v27_v24 }
  0x10   :  { %v45_v29 = vrot.slane %v44_v27, 2 }
  0x11   :  { %v30_v30 = vrot.slane %v29_v28, 1 }
  0x12   :  { %v46_v31 = vadd.f32 %v45_v29, %v44_v27 }
  0x13   :  { %v31_v32 = vadd.f32 %v30_v30, %v29_v28 }
  0x14   :  { %v47_v33 = vrot.slane %v46_v31, 1 }
  0x16   :  { %v48_v34 = vadd.f32 %v47_v33, %v46_v31 }
  0x18   :  { %v51_v36 = vsel %vm50_vm2, %v31_v32, %v48_v34 }
  0x19   :  { %v52_v37 = vadd.f32 %v51_v36, %v49_v35 }
  0x1b   :  { %54 = vst.msk [vmem:[%s103_s1] sm:$0x3] %vm12_vm0, %v52_v37 }

// kernel: _lambda_.129
= control target key start
LH: loop header
LB: loop body
LE: loop exit
PB: predicated region body
PF: predicated region fallthrough
CT: control target
= control target key end

     0   :  { %v27_v4 = vlaneseq  ;;  %vm49_vm0 = vcmask 130048   ;;  %s113_s1 = inlined_call_operand.vmem [shape: f32[2,16], index: 1, kind: input, shape index: {}]   ;;  %s114_s2 = inlined_call_operand.vmem [shape: f32[32,16], index: 2, kind: input, shape index: {}]   ;;  %s115_s0 = inlined_call_operand.<no memory space> [shape: f32[1], index: 0, kind: input, shape index: {}]   ;;  %s116_s3 = inlined_call_operand.vmem [shape: f32[32,16], index: 3, kind: output, shape index: {}]  }
   0x1   :  { %v15_v0 = vld [vmem:[%s113_s1] sm:$0x1]  ;;  %v17_v1 = vld [vmem:[%s113_s1 + $0x1] sm:$0x1]  ;;  %v24_v12 = vld [vmem:[%s114_s2 + $0x8] sm:$0xff]  ;;  %v44_v21 = vstv %s115_s0 }
   0x2   :  { %v16_v2 = vmul.f32 0.03125, %v15_v0  ;;  %v18_v3 = vmul.f32 0.03125, %v17_v1  ;;  %v28_v7 = vshrl.u32 %v27_v4, 7  ;;  %v23_v10 = vld [vmem:[%s114_s2] sm:$0xff]  ;;  %v25_v13 = vld [vmem:[%s114_s2 + $0x10] sm:$0xff]  ;;  %v26_v14 = vld [vmem:[%s114_s2 + $0x18] sm:$0xff] }
   0x4   :  { %v19_v5 = vmul.f32 %v16_v2, %v16_v2  ;;  %v29_v9 = vsub.s32 0, %v28_v7 }
   0x6   :  { %v20_v6 = vsub.f32 %v18_v3, %v19_v5  ;;  %v30_v11 = vrot.slane %v16_v2, %v29_v9 }
   0x8   :  { %v21_v8 = vadd.f32 1e-05, %v20_v6  ;;  %v31_v15 = vsub.f32 %v23_v10, %v30_v11  ;;  %v32_v16 = vsub.f32 %v24_v12, %v30_v11  ;;  %v33_v17 = vsub.f32 %v25_v13, %v30_v11 }
   0x9   :  { %v34_v18 = vsub.f32 %v26_v14, %v30_v11 }
   0xa   :  { %58 = vrsqrt.f32 %v21_v8 }
  0x14   :  { %v59_v19 = vpop.eup %58 }
  0x15   :  { %v38_v20 = vrot.slane %v59_v19, %v29_v9 }
  0x17   :  { %v39_v22 = vmul.f32 %v38_v20, %v31_v15  ;;  %v40_v23 = vmul.f32 %v38_v20, %v32_v16  ;;  %v41_v24 = vmul.f32 %v38_v20, %v33_v17  ;;  %v42_v25 = vmul.f32 %v38_v20, %v34_v18 }
  0x19   :  { %v45_v26 = vmul.f32 %v44_v21, %v39_v22  ;;  %v46_v27 = vmul.f32 %v44_v21, %v40_v23  ;;  %v47_v28 = vmul.f32 %v44_v21, %v41_v24  ;;  %v48_v29 = vmul.f32 %v44_v21, %v42_v25 }
  0x1b   :  { %50 = vst.msk [vmem:[%s116_s3] sm:$0xff] %vm49_vm0, %v45_v26  ;;  %51 = vst.msk [vmem:[%s116_s3 + $0x8] sm:$0xff] %vm49_vm0, %v46_v27 }
  0x1c   :  { %52 = vst.msk [vmem:[%s116_s3 + $0x10] sm:$0xff] %vm49_vm0, %v47_v28  ;;  %53 = vst.msk [vmem:[%s116_s3 + $0x18] sm:$0xff] %vm49_vm0, %v48_v29 }

// kernel: _lambda_.138
= control target key start
LH: loop header
LB: loop body
LE: loop exit
PB: predicated region body
PF: predicated region fallthrough
CT: control target
= control target key end

     0   :  { %vm19_vm0 = vcmask 130048   ;;  %v124_v0 = vmov 0.0   ;;  %vm125_vm1 = vmmov 0   ;;  %v126_v4 = vmov 0   ;;  %s165_s1 = inlined_call_operand.vmem [shape: bf16[32,16], index: 1, kind: input, shape index: {}]   ;;  %s166_s0 = inlined_call_operand.vmem [shape: bf16[8,32], index: 0, kind: input, shape index: {}]   ;;  %s167_s2 = inlined_call_operand.vmem [shape: f32[1,16], index: 2, kind: input, shape index: {}]   ;;  %s168_s3 = inlined_call_operand.vmem [shape: f32[8,16], index: 3, kind: output, shape index: {}]  }
   0x1   :  { %20 = vst.msk [vmem:[#allocation2] sm:$0xff] %vm19_vm0, %v124_v0  ;;  %111 = vmatprep.subr.bf16.mxu0 %v124_v0  ;;  %v122_v1 = vld [vmem:[%s165_s1] sm:$0xff]   ;;  %115 = vmatprep.mubr.msk.bf16.mxu0 %vm125_vm1, %v124_v0  ;;  %v123_v2 = vld [vmem:[%s165_s1 + $0x8] sm:$0xff]   ;;  %vm40_vm2 = vcmask 261120  }
   0x2   :  { %112 = vmatpush3.bf16.msra.mxu0 %v122_v1  ;;  %v21_v3 = vld [vmem:[%s166_s0] sm:$0xf] }
   0x3   :  { %113 = vmatprep.subr.bf16.mxu0 %v124_v0  ;;  %v22_v5 = vmax.bf16 %v126_v4, %v21_v3  ;;  %v107_v12 = vld [vmem:[%s167_s2] ss:$0 sm:$0xff] }
   0x6   :  { %114 = vmatpush3.bf16.msra.mxu0 %v123_v2 }
   0x8   :  { %v23_v6 = vld [vmem:[#allocation2] sm:$0xff] }
   0x9   :  { %116 = vmatmul.mubr.msk.bf16.vlgmr.msra.gmra.mrb[0].mxu0 %vm40_vm2, %v22_v5 }
  0xdc   :  { %v78_v7 = vpop.f32.mrb[0].mxu0 }
  0xdd   :  { %v84_v8 = vadd.f32 %v78_v7, %v23_v6  ;;  %v117_v9 = vpop.f32.mrb[1].mxu0 }
  0xde   :  { %v81_v10 = vpop.f32.mrb[2].mxu0 }
  0xdf   :  { %86 = vst.msk [vmem:[#allocation2] sm:$0xff] %vm19_vm0, %v84_v8  ;;  %v118_v11 = vpop.f32.mrb[3].mxu0 }
  0xe6   :  { %v90_v13 = vld [vmem:[#allocation2] sm:$0xff] }
  0xe7   :  { %v98_v14 = vadd.f32 %v107_v12, %v90_v13 }
  0xe9   :  { %99 = vst.msk [vmem:[%s168_s3] sm:$0xff] %vm19_vm0, %v98_v14 }

// kernel: _lambda_.140
= control target key start
LH: loop header
LB: loop body
LE: loop exit
PB: predicated region body
PF: predicated region fallthrough
CT: control target
= control target key end

     0   :  { %v24_v4 = vlaneseq  ;;  %vm37_vm0 = vcmask 130048   ;;  %s80_s1 = inlined_call_operand.vmem [shape: f32[2,16], index: 1, kind: input, shape index: {}]   ;;  %s81_s2 = inlined_call_operand.vmem [shape: f32[8,16], index: 2, kind: input, shape index: {}]   ;;  %s82_s0 = inlined_call_operand.<no memory space> [shape: f32[1], index: 0, kind: input, shape index: {}]   ;;  %s83_s3 = inlined_call_operand.vmem [shape: f32[8,16], index: 3, kind: output, shape index: {}]  }
   0x1   :  { %v15_v0 = vld [vmem:[%s80_s1] sm:$0x1]  ;;  %v17_v1 = vld [vmem:[%s80_s1 + $0x1] sm:$0x1]  ;;  %v35_v15 = vstv %s82_s0 }
   0x2   :  { %v16_v2 = vmul.f32 0.125, %v15_v0  ;;  %v18_v3 = vmul.f32 0.125, %v17_v1  ;;  %v25_v7 = vshrl.u32 %v24_v4, 7  ;;  %v23_v11 = vld [vmem:[%s81_s2] sm:$0xff] }
   0x4   :  { %v19_v5 = vmul.f32 %v16_v2, %v16_v2  ;;  %v26_v9 = vsub.s32 0, %v25_v7 }
   0x6   :  { %v20_v6 = vsub.f32 %v18_v3, %v19_v5  ;;  %v27_v10 = vrot.slane %v16_v2, %v26_v9 }
   0x8   :  { %v21_v8 = vadd.f32 1e-05, %v20_v6  ;;  %v28_v12 = vsub.f32 %v23_v11, %v27_v10 }
   0xa   :  { %43 = vrsqrt.f32 %v21_v8 }
  0x14   :  { %v44_v13 = vpop.eup %43 }
  0x15   :  { %v32_v14 = vrot.slane %v44_v13, %v26_v9 }
  0x17   :  { %v33_v16 = vmul.f32 %v32_v14, %v28_v12 }
  0x19   :  { %v36_v17 = vmul.f32 %v35_v15, %v33_v16 }
  0x1b   :  { %38 = vst.msk [vmem:[%s83_s3] sm:$0xff] %vm37_vm0, %v36_v17 }

// kernel: _lambda_.139
= control target key start
LH: loop header
LB: loop body
LE: loop exit
PB: predicated region body
PF: predicated region fallthrough
CT: control target
= control target key end

     0   :  { %vm12_vm0 = vcmask 123904   ;;  %vm15_vm1 = vcmask 130048   ;;  %v42_v0 = vmov 0.0   ;;  %vm32_vm2 = vcmask 1040384   ;;  %s67_s0 = inlined_call_operand.vmem [shape: f32[8,16], index: 0, kind: input, shape index: {}]   ;;  %s68_s1 = inlined_call_operand.vmem [shape: f32[2,16], index: 1, kind: output, shape index: {}]  }
   0x1   :  { %13 = vst.msk [vmem:[%s68_s1] sm:$0x3] %vm12_vm0, %v42_v0  ;;  %v14_v1 = vld [vmem:[%s67_s0] sm:$0xff] }
   0x2   :  { %v16_v2 = vsel %vm15_vm1, %v14_v1, 0.0  ;;  %v23_v3 = vmul.f32 %v14_v1, %v14_v1 }
   0x3   :  { %v17_v4 = vrot.slane %v16_v2, 4 }
   0x4   :  { %v24_v5 = vsel %vm15_vm1, %v23_v3, 0.0 }
   0x5   :  { %v18_v6 = vadd.f32 %v17_v4, %v16_v2  ;;  %v25_v7 = vrot.slane %v24_v5, 4 }
   0x7   :  { %v19_v8 = vrot.slane %v18_v6, 2  ;;  %v26_v9 = vadd.f32 %v25_v7, %v24_v5 }
   0x8   :  { %v31_v17 = vld [vmem:[%s68_s1] sm:$0x3] }
   0x9   :  { %v20_v10 = vadd.f32 %v19_v8, %v18_v6  ;;  %v27_v11 = vrot.slane %v26_v9, 2 }
   0xb   :  { %v21_v12 = vrot.slane %v20_v10, 1  ;;  %v28_v13 = vadd.f32 %v27_v11, %v26_v9 }
   0xd   :  { %v22_v14 = vadd.f32 %v21_v12, %v20_v10  ;;  %v29_v15 = vrot.slane %v28_v13, 1 }
   0xf   :  { %v30_v16 = vadd.f32 %v29_v15, %v28_v13 }
  0x11   :  { %v33_v18 = vsel %vm32_vm2, %v22_v14, %v30_v16 }
  0x12   :  { %v34_v19 = vadd.f32 %v33_v18, %v31_v17 }
  0x14   :  { %36 = vst.msk [vmem:[%s68_s1] sm:$0x3] %vm12_vm0, %v34_v19 }

// kernel: _lambda_.136
= control target key start
LH: loop header
LB: loop body
LE: loop exit
PB: predicated region body
PF: predicated region fallthrough
CT: control target
= control target key end

     0   :  { %vm19_vm0 = vcmask 130048   ;;  %v189_v0 = vmov 0   ;;  %v190_v2 = vmov 0.0   ;;  %s251_s1 = inlined_call_operand.vmem [shape: bf16[144,16], index: 1, kind: input, shape index: {}]   ;;  %s252_s0 = inlined_call_operand.vmem [shape: bf16[8,144], index: 0, kind: input, shape index: {}]   ;;  %s253_s2 = inlined_call_operand.vmem [shape: f32[1,16], index: 2, kind: input, shape index: {}]   ;;  %s254_s3 = inlined_call_operand.vmem [shape: f32[8,16], index: 3, kind: output, shape index: {}]  }
   0x1   :  { %106 = vmatprep.subr.bf16.mxu0 %v189_v0  ;;  %v180_v1 = vld [vmem:[%s251_s1] sm:$0xff]   ;;  %20 = vst.msk [vmem:[#allocation2] sm:$0xff] %vm19_vm0, %v190_v2  ;;  %v181_v3 = vld [vmem:[%s251_s1 + $0x8] sm:$0xff]   ;;  %v182_v4 = vld [vmem:[%s251_s1 + $0x10] sm:$0xff]  }
   0x2   :  { %107 = vmatpush1.bf16.msra.mxu0 %v180_v1  ;;  %v21_v5 = vld [vmem:[%s252_s0] sm:$0xff]  ;;  %v183_v6 = vld [vmem:[%s251_s1 + $0x18] sm:$0xff]   ;;  %v185_v10 = vld [vmem:[%s251_s1 + $0x28] sm:$0xff]  }
   0x3   :  { %108 = vmatprep.subr.bf16.mxu0 %v189_v0  ;;  %v22_v7 = vmax.bf16 %v189_v0, %v21_v5  ;;  %v184_v9 = vld [vmem:[%s251_s1 + $0x20] sm:$0xff]   ;;  %v186_v11 = vld [vmem:[%s251_s1 + $0x30] sm:$0xff]   ;;  %v187_v12 = vld [vmem:[%s251_s1 + $0x38] sm:$0xff]  }
   0x4   :  { %v188_v13 = vld [vmem:[%s251_s1 + $0x40] sm:$0xff]  }
   0x5   :  { %v166_v8 = vcombine.high %v22_v7, %v22_v7  ;;  %v165_v14 = vcombine.low %v22_v7, %v22_v7  ;;  %v177_v21 = vld [vmem:[%s253_s2] ss:$0 sm:$0xff] }
   0x6   :  { %109 = vmatpush1.bf16.msra.mxu0 %v181_v3 }
   0x7   :  { %110 = vmatprep.subr.bf16.mxu0 %v189_v0  ;;  %176 = vmatprep.mubr.msk.bf16.mxu0 %vm19_vm0, %v166_v8 }
   0x8   :  { %v23_v15 = vld [vmem:[#allocation2] sm:$0xff] }
   0xa   :  { %111 = vmatpush1.bf16.msra.mxu0 %v182_v4 }
   0xb   :  { %112 = vmatprep.subr.bf16.mxu0 %v189_v0 }
   0xe   :  { %113 = vmatpush1.bf16.msra.mxu0 %v183_v6 }
   0xf   :  { %114 = vmatprep.subr.bf16.mxu0 %v189_v0 }
  0x12   :  { %115 = vmatpush1.bf16.msra.mxu0 %v184_v9 }
  0x13   :  { %116 = vmatprep.subr.bf16.mxu0 %v189_v0 }
  0x16   :  { %117 = vmatpush1.bf16.msra.mxu0 %v185_v10 }
  0x17   :  { %118 = vmatprep.subr.bf16.mxu0 %v189_v0 }
  0x1a   :  { %119 = vmatpush1.bf16.msra.mxu0 %v186_v11 }
  0x1b   :  { %120 = vmatprep.subr.bf16.mxu0 %v189_v0 }
  0x1e   :  { %121 = vmatpush1.bf16.msra.mxu0 %v187_v12 }
  0x1f   :  { %122 = vmatprep.subr.bf16.mxu0 %v189_v0 }
  0x22   :  { %123 = vmatpush1.bf16.msra.mxu0 %v188_v13 }
  0x25   :  { %139 = vmatmul.mubr.bf16.vlgmr.msra.gmra.mrb[0].mxu0 %v165_v14 }
  0xf8   :  { %v140_v16 = vpop.f32.mrb[0].mxu0 }
  0xf9   :  { %v146_v17 = vadd.f32 %v140_v16, %v23_v15  ;;  %v142_v18 = vpop.f32.mrb[1].mxu0 }
  0xfa   :  { %v143_v19 = vpop.f32.mrb[2].mxu0 }
  0xfb   :  { %147 = vst.msk [vmem:[#allocation2] sm:$0xff] %vm19_vm0, %v146_v17  ;;  %v144_v20 = vpop.f32.mrb[3].mxu0 }
 0x102   :  { %v151_v22 = vld [vmem:[#allocation2] sm:$0xff] }
 0x103   :  { %v159_v23 = vadd.f32 %v177_v21, %v151_v22 }
 0x105   :  { %160 = vst.msk [vmem:[%s254_s3] sm:$0xff] %vm19_vm0, %v159_v23 }

// kernel: _lambda_.141
= control target key start
LH: loop header
LB: loop body
LE: loop exit
PB: predicated region body
PF: predicated region fallthrough
CT: control target
= control target key end

     0   :  { %10 = vsyncpa [#allocation3], 0  ;;  %s143_s0 = inlined_call_operand.vmem [shape: f32[3], index: 0, kind: input, shape index: {}]   ;;  %s144_s1 = inlined_call_operand.vmem [shape: f32[2,16], index: 1, kind: input, shape index: {}]   ;;  %s145_s2 = inlined_call_operand.vmem [shape: f32[8,16], index: 2, kind: input, shape index: {}]   ;;  %s146_s3 = inlined_call_operand.vmem [shape: f32[8,16], index: 3, kind: input, shape index: {}]   ;;  %s147_s4 = inlined_call_operand.vmem [shape: f32[8,16], index: 4, kind: input, shape index: {}]   ;;  %s148_s5 = inlined_call_operand.vmem [shape: f32[8,16], index: 5, kind: output, shape index: {}]  }
   0x1   :  { %s17_s20 = sshll.u32 %s143_s0, 4  ;;  %s18_s20 = int_to_ptr.vmem [resolvable:$true] %s17_s20 }
   0x2   :  { %s77_s21 = scalar_lea.vmem %s18_s20, 16  ;;  %p82_p1 = scmp.lt.s32.totalorder %s18_s20, %s18_s20 }
   0x3   :  { %p78_p0 = scmp.ne.s32.totalorder %s18_s20, %s77_s21  ;;  %p83_p2 = scmp.lt.s32.totalorder %s77_s21, %s77_s21 }
   0x5   :  { %p84_p3 = por %p83_p2, %p82_p1 }
   0x7   :  { %p85_p4 = pnand %p84_p3, %p78_p0 }
   0x9   :  { %88 = shalt.err (!%p85_p4)
}
   0xa   :  { %s91_s22 = smov [#allocation2]  }
   0xb   :  { %20 = dma.vmem_to_smem %s18_s20, 16, %s91_s22, [#allocation3]  }
   0xc   :  { %89 = dma.done.wait [#allocation3], 16  }
   0xd   :  { %90 = vsyncadd [#allocation3], 4294967280 }
   0xe   :  { %32 = sfence }
   0xf   :  { %v33_v0 = vld [vmem:[%s144_s1] sm:$0x1]  ;;  %v35_v1 = vld [vmem:[%s144_s1 + $0x1] sm:$0x1]  ;;  %v42_v4 = vlaneseq  ;;  %s72_s0 = sld [smem:[#allocation2 + $0x1]]  ;;  %s52_s27 = sld [smem:[#allocation2]] }
  0x10   :  { %v34_v2 = vmul.f32 0.125, %v33_v0  ;;  %v36_v3 = vmul.f32 0.125, %v35_v1  ;;  %s73_s28 = sld [smem:[#allocation2 + $0x2]]  ;;  %v41_v11 = vld [vmem:[%s145_s2] sm:$0xff]  ;;  %vm65_vm0 = vcmask 130048  }
  0x11   :  { %v43_v7 = vshrl.u32 %v42_v4, 7  ;;  %v55_v14 = vld [vmem:[%s146_s3] sm:$0xff] }
  0x12   :  { %v37_v5 = vmul.f32 %v34_v2, %v34_v2  ;;  %v60_v18 = vld [vmem:[%s147_s4] sm:$0xff] }
  0x13   :  { %v44_v9 = vsub.s32 0, %v43_v7 }
  0x14   :  { %v38_v6 = vsub.f32 %v36_v3, %v37_v5 }
  0x15   :  { %v45_v10 = vrot.slane %v34_v2, %v44_v9  ;;  %v57_v15 = vstv %s72_s0  ;;  %v53_v17 = vstv %s52_s27 }
  0x16   :  { %v39_v8 = vadd.f32 1e-05, %v38_v6  ;;  %v62_v19 = vstv %s73_s28  ;;  %v58_v21 = vmul.f32 %v57_v15, %v55_v14 }
  0x17   :  { %v46_v12 = vsub.f32 %v41_v11, %v45_v10  ;;  %v63_v23 = vmul.f32 %v62_v19, %v60_v18 }
  0x18   :  { %75 = vrsqrt.f32 %v39_v8 }
  0x22   :  { %v76_v13 = vpop.eup %75 }
  0x23   :  { %v50_v16 = vrot.slane %v76_v13, %v44_v9 }
  0x25   :  { %v51_v20 = vmul.f32 %v50_v16, %v46_v12 }
  0x27   :  { %v54_v22 = vmul.f32 %v53_v17, %v51_v20 }
  0x29   :  { %v59_v24 = vadd.f32 %v58_v21, %v54_v22 }
  0x2b   :  { %v64_v25 = vadd.f32 %v63_v23, %v59_v24 }
  0x2d   :  { %66 = vst.msk [vmem:[%s148_s5] sm:$0xff] %vm65_vm0, %v64_v25 }
  0x2e   :  { %71 = vsyncpa [#allocation3], 1 }

// kernel: _lambda_.145
= control target key start
LH: loop header
LB: loop body
LE: loop exit
PB: predicated region body
PF: predicated region fallthrough
CT: control target
= control target key end

     0   :  { %vm19_vm0 = vcmask 130048   ;;  %v110_v0 = vmov 0.0   ;;  %vm111_vm1 = vmmov 0   ;;  %v112_v3 = vmov 0   ;;  %s149_s1 = inlined_call_operand.vmem [shape: bf16[16,16], index: 1, kind: input, shape index: {}]   ;;  %s150_s0 = inlined_call_operand.vmem [shape: bf16[8,16], index: 0, kind: input, shape index: {}]   ;;  %s151_s2 = inlined_call_operand.vmem [shape: f32[1,16], index: 2, kind: input, shape index: {}]   ;;  %s152_s3 = inlined_call_operand.vmem [shape: f32[8,16], index: 3, kind: output, shape index: {}]  }
   0x1   :  { %100 = vmatprep.subr.bf16.mxu0 %v110_v0  ;;  %v109_v1 = vld [vmem:[%s149_s1] sm:$0xff]   ;;  %102 = vmatprep.mubr.msk.bf16.mxu0 %vm111_vm1, %v110_v0  ;;  %20 = vst.msk [vmem:[#allocation2] sm:$0xff] %vm19_vm0, %v110_v0 }
   0x2   :  { %v21_v2 = vld [vmem:[%s150_s0] sm:$0xf]  ;;  %101 = vmatpush3.bf16.msra.mxu0 %v109_v1 }
   0x3   :  { %v22_v4 = vmax.bf16 %v112_v3, %v21_v2  ;;  %v97_v11 = vld [vmem:[%s151_s2] ss:$0 sm:$0xff] }
   0x5   :  { %103 = vmatmul.mubr.msk.bf16.vlgmr.msra.gmra.mrb[0].mxu0 %vm19_vm0, %v22_v4 }
   0x8   :  { %v23_v5 = vld [vmem:[#allocation2] sm:$0xff] }
  0xd8   :  { %v70_v6 = vpop.f32.mrb[0].mxu0 }
  0xd9   :  { %v76_v7 = vadd.f32 %v70_v6, %v23_v5  ;;  %v104_v8 = vpop.f32.mrb[1].mxu0 }
  0xda   :  { %v73_v9 = vpop.f32.mrb[2].mxu0 }
  0xdb   :  { %77 = vst.msk [vmem:[#allocation2] sm:$0xff] %vm19_vm0, %v76_v7  ;;  %v105_v10 = vpop.f32.mrb[3].mxu0 }
  0xe2   :  { %v81_v12 = vld [vmem:[#allocation2] sm:$0xff] }
  0xe3   :  { %v89_v13 = vadd.f32 %v97_v11, %v81_v12 }
  0xe5   :  { %90 = vst.msk [vmem:[%s152_s3] sm:$0xff] %vm19_vm0, %v89_v13 }

// kernel: _lambda_.155
= control target key start
LH: loop header
LB: loop body
LE: loop exit
PB: predicated region body
PF: predicated region fallthrough
CT: control target
= control target key end

     0   :  { %v24_v4 = vlaneseq  ;;  %vm38_vm0 = vcmask 130048   ;;  %s81_s1 = inlined_call_operand.vmem [shape: f32[2,16], index: 1, kind: input, shape index: {}]   ;;  %s82_s2 = inlined_call_operand.vmem [shape: f32[8,16], index: 2, kind: input, shape index: {}]   ;;  %s83_s0 = inlined_call_operand.<no memory space> [shape: f32[1], index: 0, kind: input, shape index: {}]   ;;  %s84_s3 = inlined_call_operand.vmem [shape: f32[8,16], index: 3, kind: output, shape index: {}]  }
   0x1   :  { %v15_v0 = vld [vmem:[%s81_s1] sm:$0x1]  ;;  %v17_v1 = vld [vmem:[%s81_s1 + $0x1] sm:$0x1]  ;;  %v36_v16 = vstv %s83_s0 }
   0x2   :  { %v16_v2 = vmul.f32 0.125, %v15_v0  ;;  %v18_v3 = vmul.f32 0.125, %v17_v1  ;;  %v25_v7 = vshrl.u32 %v24_v4, 7  ;;  %v23_v11 = vld [vmem:[%s82_s2] sm:$0xff] }
   0x4   :  { %v19_v5 = vmul.f32 %v16_v2, %v16_v2  ;;  %v26_v9 = vsub.s32 0, %v25_v7 }
   0x6   :  { %v20_v6 = vsub.f32 %v18_v3, %v19_v5  ;;  %v27_v10 = vrot.slane %v16_v2, %v26_v9 }
   0x8   :  { %v21_v8 = vadd.f32 1e-05, %v20_v6  ;;  %v28_v12 = vsub.f32 %v23_v11, %v27_v10 }
   0xa   :  { %44 = vrsqrt.f32 %v21_v8 }
  0x14   :  { %v45_v13 = vpop.eup %44 }
  0x15   :  { %v32_v14 = vrot.slane %v45_v13, %v26_v9 }
  0x17   :  { %v33_v15 = vmul.f32 %v32_v14, %v28_v12 }
  0x19   :  { %v34_v17 = vmax.f32 %v33_v15, 0.0 }
  0x1b   :  { %v37_v18 = vmul.f32 %v36_v16, %v34_v17 }
  0x1d   :  { %39 = vst.msk [vmem:[%s84_s3] sm:$0xff] %vm38_vm0, %v37_v18 }

// kernel: _lambda_.156
= control target key start
LH: loop header
LB: loop body
LE: loop exit
PB: predicated region body
PF: predicated region fallthrough
CT: control target
= control target key end

     0   :  { %vm12_vm0 = vcmask 123904   ;;  %vm17_vm1 = vcmask 130048   ;;  %v47_v0 = vmov 0.0   ;;  %vm36_vm2 = vcmask 1041409   ;;  %s75_s0 = inlined_call_operand.vmem [shape: f32[2,8,16], index: 0, kind: input, shape index: {}]   ;;  %s76_s1 = inlined_call_operand.vmem [shape: f32[2,16], index: 1, kind: output, shape index: {}]  }
   0x1   :  { %13 = vst.msk [vmem:[%s76_s1] sm:$0x3] %vm12_vm0, %v47_v0  ;;  %v15_v1 = vld [vmem:[%s75_s0] sm:$0xff]  ;;  %v16_v2 = vld [vmem:[%s75_s0 + $0x8] sm:$0xff] }
   0x2   :  { %v18_v3 = vsel %vm17_vm1, %v15_v1, 0.0  ;;  %v25_v4 = vsel %vm17_vm1, %v16_v2, 0.0 }
   0x3   :  { %v19_v5 = vrot.slane %v18_v3, 4  ;;  %v26_v6 = vrot.slane %v25_v4, 4 }
   0x5   :  { %v20_v7 = vadd.f32 %v19_v5, %v18_v3  ;;  %v27_v8 = vadd.f32 %v26_v6, %v25_v4 }
   0x7   :  { %v21_v9 = vrot.slane %v20_v7, 2  ;;  %v28_v10 = vrot.slane %v27_v8, 2 }
   0x8   :  { %v14_v17 = vld [vmem:[%s76_s1] sm:$0x3] }
   0x9   :  { %v22_v11 = vadd.f32 %v21_v9, %v20_v7  ;;  %v29_v12 = vadd.f32 %v28_v10, %v27_v8 }
   0xb   :  { %v23_v13 = vrot.slane %v22_v11, 1  ;;  %v30_v14 = vrot.slane %v29_v12, 1 }
   0xd   :  { %v24_v15 = vadd.f32 %v23_v13, %v22_v11  ;;  %v31_v16 = vadd.f32 %v30_v14, %v29_v12 }
   0xf   :  { %v32_v18 = vmul.f32 0.25, %v24_v15  ;;  %v33_v19 = vmul.f32 0.25, %v31_v16 }
  0x11   :  { %v37_v20 = vsel %vm36_vm2, %v33_v19, %v32_v18 }
  0x12   :  { %v39_v21 = vadd.f32 %v37_v20, %v14_v17 }
  0x14   :  { %41 = vst.msk [vmem:[%s76_s1] sm:$0x3] %vm12_vm0, %v39_v21 }

// kernel: _lambda_.157
= control target key start
LH: loop header
LB: loop body
LE: loop exit
PB: predicated region body
PF: predicated region fallthrough
CT: control target
= control target key end

     0   :  { %vm19_vm0 = vcmask 80896   ;;  %v109_v0 = vmov 0.0   ;;  %vm110_vm1 = vmmov 0   ;;  %vm31_vm2 = vcmask 130048   ;;  %s146_s1 = inlined_call_operand.vmem [shape: bf16[16,10], index: 1, kind: input, shape index: {}]   ;;  %s147_s0 = inlined_call_operand.vmem [shape: bf16[8,16], index: 0, kind: input, shape index: {}]   ;;  %s148_s2 = inlined_call_operand.vmem [shape: f32[1,10], index: 2, kind: input, shape index: {}]   ;;  %s149_s3 = inlined_call_operand.vmem [shape: f32[8,10], index: 3, kind: output, shape index: {}]  }
   0x1   :  { %20 = vst.msk [vmem:[#allocation2] sm:$0xff] %vm19_vm0, %v109_v0  ;;  %100 = vmatprep.subr.bf16.mxu0 %v109_v0  ;;  %v108_v1 = vld [vmem:[%s146_s1] sm:$0xff]   ;;  %102 = vmatprep.mubr.msk.bf16.mxu0 %vm110_vm1, %v109_v0 }
   0x2   :  { %101 = vmatpush3.bf16.msra.mxu0 %v108_v1  ;;  %v21_v2 = vld [vmem:[%s147_s0] sm:$0xf] }
   0x3   :  { %v97_v9 = vld [vmem:[%s148_s2] ss:$0 sm:$0xff] }
   0x5   :  { %103 = vmatmul.mubr.msk.bf16.vlgmr.msra.gmra.mrb[0].mxu0 %vm31_vm2, %v21_v2 }
   0x8   :  { %v22_v3 = vld [vmem:[#allocation2] sm:$0xff] }
  0xd8   :  { %v69_v4 = vpop.f32.mrb[0].mxu0 }
  0xd9   :  { %v75_v5 = vadd.f32 %v69_v4, %v22_v3  ;;  %v104_v6 = vpop.f32.mrb[1].mxu0 }
  0xda   :  { %v72_v7 = vpop.f32.mrb[2].mxu0 }
  0xdb   :  { %77 = vst.msk [vmem:[#allocation2] sm:$0xff] %vm19_vm0, %v75_v5  ;;  %v105_v8 = vpop.f32.mrb[3].mxu0 }
  0xe2   :  { %v81_v10 = vld [vmem:[#allocation2] sm:$0xff] }
  0xe3   :  { %v89_v11 = vadd.f32 %v97_v9, %v81_v10 }
  0xe5   :  { %90 = vst.msk [vmem:[%s149_s3] sm:$0xff] %vm19_vm0, %v89_v11 }

</bundles_post_ra>
